<compile_context>
chip_gen: v7x
topology: tpu7x:2x2x1
jax: 0.10.0
libtpu: 0.0.40
codegen_flags: <defaults>
</compile_context>

<pallas_src>
import functools
import math

import jax
import jax.numpy as jnp
import numpy as np
from jax.experimental import pallas as pl
from jax.experimental.pallas import tpu as pltpu

F32 = jnp.float32
BF16 = jnp.bfloat16
NEG_BIG = -1e30  # finite "minus infinity" for causal masking
SQRT_2_OVER_PI = math.sqrt(2.0 / math.pi)

VMEM_LIMIT_BYTES = 32 * 1024 * 1024  # explicit scoped-VMEM limit (v5e default is 16 MiB)


# ----------------------------- shared math helpers ----------------------------

def _layernorm(x, w, b, eps=1e-5):
    mu = jnp.mean(x, axis=-1, keepdims=True)
    var = jnp.mean((x - mu) ** 2, axis=-1, keepdims=True)
    return (x - mu) * jax.lax.rsqrt(var + eps) * w + b


def _gelu_tanh(x):
    # tanh-approximate GELU: one EUP tanh + a few VPU ops per element instead
    # of a ~10-op erf polynomial.  |delta| vs torch's exact erf-GELU < ~1e-3.
    return 0.5 * x * (1.0 + jnp.tanh(SQRT_2_OVER_PI * (x + 0.044715 * x * x * x)))


# ------------------------------ Pallas kernels -------------------------------

def gpt_block_kernel(x_ref,
                     ln1w_ref, ln1b_ref, caw_ref, cab_ref, cpw_ref, cpb_ref,
                     ln2w_ref, ln2b_ref, fcw_ref, fcb_ref, pjw_ref, pjb_ref,
                     out_ref, *, n_head):
    """One GPTBlock for `bb` batch elements.  x_ref/out_ref: (bb, T, C) f32.

    Matmul weights (caw/cpw/fcw/pjw) are bf16; all dots run with bf16 inputs
    and f32 accumulation.  LayerNorm / softmax / GELU stay in f32.
    """
    bb, T, C = x_ref.shape
    hd = C // n_head
    scale = 1.0 / math.sqrt(hd)

    # Flatten (bb, T, C) -> (bb*T, C) with a cheap sublane concat so the shared
    # GEMMs see M = bb*T rows (fills the 256-row MXU on v6e/v7x when bb=2).
    if bb == 1:
        x = x_ref[0]
    else:
        x = jnp.concatenate([x_ref[i] for i in range(bb)], axis=0)   # (M, C)

    # ---- attention branch ----
    h1 = _layernorm(x, ln1w_ref[...], ln1b_ref[...])
    qkv = jnp.dot(h1.astype(BF16), caw_ref[...],
                  preferred_element_type=F32) + cab_ref[...]          # (M, 3C) f32
    qkv16 = qkv.astype(BF16)                                          # single cast

    # One 2-D causal mask, shared across every (batch, head) pair.
    row = jax.lax.broadcasted_iota(jnp.int32, (T, T), 0)
    col = jax.lax.broadcasted_iota(jnp.int32, (T, T), 1)
    causal = row >= col

    y_parts = []
    for b in range(bb):
        r0 = b * T
        head_outs = []
        for h in range(n_head):
            c0 = h * hd
            q = qkv16[r0:r0 + T, c0:c0 + hd]                      # (T, hd) bf16
            k = qkv16[r0:r0 + T, C + c0:C + c0 + hd]
            v = qkv16[r0:r0 + T, 2 * C + c0:2 * C + c0 + hd]
            s = jnp.einsum("qd,kd->qk", q, k,
                           preferred_element_type=F32) * scale     # (T, T) f32
            s = jnp.where(causal, s, NEG_BIG)                      # finite mask
            s = s - jnp.max(s, axis=-1, keepdims=True)
            p = jnp.exp(s)                                         # EUP
            p = p * pl.reciprocal(jnp.sum(p, axis=-1, keepdims=True),
                                  approx=True)                     # EUP recip
            yh = jnp.dot(p.astype(BF16), v, preferred_element_type=F32)
            head_outs.append(yh.astype(BF16))                      # (T, hd)
        y_parts.append(jnp.concatenate(head_outs, axis=-1))        # (T, C) bf16
    y = y_parts[0] if bb == 1 else jnp.concatenate(y_parts, axis=0)  # (M, C)
    y = jnp.dot(y, cpw_ref[...], preferred_element_type=F32) + cpb_ref[...]
    x = x + y                                      # residual (resid_dropout = id)

    # ---- MLP branch ----
    h2 = _layernorm(x, ln2w_ref[...], ln2b_ref[...])
    hh = jnp.dot(h2.astype(BF16), fcw_ref[...],
                 preferred_element_type=F32) + fcb_ref[...]
    hh = _gelu_tanh(hh)                            # f32 elementwise, tanh on EUP
    hh = jnp.dot(hh.astype(BF16), pjw_ref[...],
                 preferred_element_type=F32) + pjb_ref[...]
    res = x + hh                                   # residual (dropout = id)

    for b in range(bb):
        out_ref[b] = res[b * T:(b + 1) * T, :]


def lm_head_kernel(xn_ref, wt_ref, out_ref):
    """Tied lm_head on the (already ln_f-normalized) last token.

    xn_ref: (B, C) bf16, wt_ref: (C, V_TILE) bf16, out_ref: (B, V_TILE) f32.
    ln_f is hoisted out of this per-vocab-tile loop (computed once outside).
    """
    out_ref[...] = jnp.dot(xn_ref[...], wt_ref[...], preferred_element_type=F32)


# ------------------------------- host wrappers --------------------------------

def run_block(x, p, n_head):
    B, T, C = x.shape
    bb = 2 if B % 2 == 0 else 1         # 2 batch elems / step -> M = 2T GEMM rows
    kernel = functools.partial(gpt_block_kernel, n_head=n_head)

    def full(arr):  # full-array BlockSpec for a 2-D weight / bias
        return pl.BlockSpec(arr.shape, lambda b: (0, 0))

    return pl.pallas_call(
        kernel,
        out_shape=jax.ShapeDtypeStruct((B, T, C), F32),
        grid=(B // bb,),
        in_specs=[
            pl.BlockSpec((bb, T, C), lambda b: (b, 0, 0)),
            full(p["ln1_w"]), full(p["ln1_b"]),
            full(p["c_attn_w"]), full(p["c_attn_b"]),
            full(p["c_proj_w"]), full(p["c_proj_b"]),
            full(p["ln2_w"]), full(p["ln2_b"]),
            full(p["fc_w"]), full(p["fc_b"]),
            full(p["proj_w"]), full(p["proj_b"]),
        ],
        out_specs=pl.BlockSpec((bb, T, C), lambda b: (b, 0, 0)),
        # Alias the residual stream in place: no fresh HBM allocation per layer.
        input_output_aliases={0: 0},
        # Batch axis is truly parallel -> lets v7x shard it across its 2 TCs.
        compiler_params=pltpu.CompilerParams(
            dimension_semantics=("parallel",),
            vmem_limit_bytes=VMEM_LIMIT_BYTES),
    )(x,
      p["ln1_w"], p["ln1_b"], p["c_attn_w"], p["c_attn_b"],
      p["c_proj_w"], p["c_proj_b"],
      p["ln2_w"], p["ln2_b"], p["fc_w"], p["fc_b"], p["proj_w"], p["proj_b"])


def _pick_v_tile(vp, max_tile=2048):
    """Largest lane-dense (multiple-of-128) vocab tile <= max_tile dividing vp."""
    if vp <= max_tile:
        return vp
    for cand in range(max_tile, 127, -128):
        if vp % cand == 0:
            return cand
    return 128


def run_lm_head(xn16, lm_head_wt):
    B, C = xn16.shape
    Vp = lm_head_wt.shape[1]
    v_tile = _pick_v_tile(Vp)
    assert Vp % v_tile == 0
    return pl.pallas_call(
        lm_head_kernel,
        out_shape=jax.ShapeDtypeStruct((B, Vp), F32),
        grid=(Vp // v_tile,),
        in_specs=[
            pl.BlockSpec((B, C), lambda j: (0, 0)),
            pl.BlockSpec((C, v_tile), lambda j: (0, j)),   # stream vocab tiles
        ],
        out_specs=pl.BlockSpec((B, v_tile), lambda j: (0, j)),
        compiler_params=pltpu.CompilerParams(
            dimension_semantics=("parallel",),
            vmem_limit_bytes=VMEM_LIMIT_BYTES),
    )(xn16, lm_head_wt)


def gpt_forward(idx, params, n_head):
    """Inference path of GPT.forward (targets=None): returns (logits[B,1,V], None)."""
    B, T = idx.shape
    block_size = params["wpe"].shape[0]
    assert T <= block_size
    tok_emb = params["wte"][idx]                   # (B, T, C) gather (glue)
    pos_emb = params["wpe"][:T]                    # (T, C)
    x = (tok_emb + pos_emb).astype(F32)            # drop = identity (eval)
    for p in params["blocks"]:
        x = run_block(x, p, n_head)
    x_last = x[:, -1, :]                           # (B, C)  -- x[:, [-1], :] in torch
    # ln_f hoisted out of the vocab-tile loop: tiny (B, C) LayerNorm as glue.
    xn16 = _layernorm(x_last, params["ln_f_w"], params["ln_f_b"]).astype(BF16)
    logits = run_lm_head(xn16, params["lm_head_wt"])   # (B, V_pad)
    V = params["wte"].shape[0]
    return logits[:, :V][:, None, :], None         # (B, 1, V)


# ------------------------------ parameter setup --------------------------------

def init_params(key, *, block_size, vocab_size, n_layer, n_embd):
    C = n_embd
    keys = jax.random.split(key, 2 + 6 * n_layer)
    ki = iter(keys)

    def nrm(k, shape, std=0.02):
        return (std * jax.random.normal(k, shape)).astype(F32)

    wte = nrm(next(ki), (vocab_size, C))                      # f32 for embedding add
    vpad = ((vocab_size + 127) // 128) * 128                  # lane-align the vocab
    lm_head_wt = (jnp.zeros((C, vpad), F32)
                  .at[:, :vocab_size].set(wte.T)).astype(BF16)  # tied, precomputed

    params = {
        "wte": wte,
        "wpe": nrm(next(ki), (block_size, C)),
        "ln_f_w": jnp.ones((1, C), F32),
        "ln_f_b": jnp.zeros((1, C), F32),
        "lm_head_wt": lm_head_wt,
        "blocks": [],
    }
    for _ in range(n_layer):
        blk = {
            "ln1_w": jnp.ones((1, C), F32),
            "ln1_b": jnp.zeros((1, C), F32),
            "c_attn_w": nrm(next(ki), (C, 3 * C)).astype(BF16),
            "c_attn_b": nrm(next(ki), (1, 3 * C)),
            "c_proj_w": nrm(next(ki), (C, C)).astype(BF16),
            "c_proj_b": jnp.zeros((1, C), F32),
            "ln2_w": jnp.ones((1, C), F32),
            "ln2_b": jnp.zeros((1, C), F32),
            "fc_w": nrm(next(ki), (C, 4 * C)).astype(BF16),
            "fc_b": nrm(next(ki), (1, 4 * C)),
            "proj_w": nrm(next(ki), (4 * C, C)).astype(BF16),
            "proj_b": jnp.zeros((1, C), F32),
        }
        params["blocks"].append(blk)
    return params


# ------------------------------ pure-JAX reference ------------------------------

def ref_forward(idx, params, n_head):
    """Pure-JAX reference mirroring the kernel's mixed precision (bf16 matmul
    inputs, f32 accumulation, tanh-GELU) so the comparison is tight."""
    hi = jax.lax.Precision.HIGHEST

    def mmb(a, w):  # bf16-rounded operands, f32 accumulation (like the MXU path)
        return jnp.dot(a.astype(BF16).astype(F32), w.astype(F32), precision=hi)

    B, T = idx.shape
    C = params["wte"].shape[1]
    hd = C // n_head
    scale = 1.0 / math.sqrt(hd)
    x = params["wte"][idx] + params["wpe"][:T]
    mask = jnp.tril(jnp.ones((T, T), bool))
    for p in params["blocks"]:
        h = _layernorm(x, p["ln1_w"], p["ln1_b"])
        qkv = mmb(h, p["c_attn_w"]) + p["c_attn_b"]
        q, k, v = qkv[..., :C], qkv[..., C:2 * C], qkv[..., 2 * C:]
        q = q.reshape(B, T, n_head, hd).transpose(0, 2, 1, 3)
        k = k.reshape(B, T, n_head, hd).transpose(0, 2, 1, 3)
        v = v.reshape(B, T, n_head, hd).transpose(0, 2, 1, 3)
        s = jnp.einsum("bhqd,bhkd->bhqk",
                       q.astype(BF16).astype(F32), k.astype(BF16).astype(F32),
                       precision=hi) * scale
        s = jnp.where(mask, s, NEG_BIG)
        s = s - jnp.max(s, axis=-1, keepdims=True)
        pr = jnp.exp(s)
        pr = pr / jnp.sum(pr, axis=-1, keepdims=True)
        y = jnp.einsum("bhqk,bhkd->bhqd",
                       pr.astype(BF16).astype(F32), v.astype(BF16).astype(F32),
                       precision=hi)
        y = y.transpose(0, 2, 1, 3).reshape(B, T, C)
        y = mmb(y, p["c_proj_w"]) + p["c_proj_b"]
        x = x + y
        h = _layernorm(x, p["ln2_w"], p["ln2_b"])
        hh = mmb(h, p["fc_w"]) + p["fc_b"]
        hh = jax.nn.gelu(hh, approximate=True)     # matches kernel's tanh-GELU
        hh = mmb(hh, p["proj_w"]) + p["proj_b"]
        x = x + hh
    xl = _layernorm(x[:, -1, :], params["ln_f_w"], params["ln_f_b"])
    V = params["wte"].shape[0]
    logits = mmb(xl, params["lm_head_wt"].astype(F32)[:, :V])
    return logits[:, None, :]


# ------------------------------------ main --------------------------------------

if __name__ == "__main__":
    # Small, (8,128)-friendly deterministic config.
    BLOCK_SIZE = 128
    VOCAB_SIZE = 200      # padded to 256 (multiple of 128) for the lm_head kernel
    N_LAYER = 2
    N_HEAD = 4
    N_EMBD = 128
    B, T = 2, 128

    key = jax.random.PRNGKey(0)
    pkey, ikey = jax.random.split(key)
    params = init_params(pkey, block_size=BLOCK_SIZE, vocab_size=VOCAB_SIZE,
                         n_layer=N_LAYER, n_embd=N_EMBD)
    idx = jax.random.randint(ikey, (B, T), 0, VOCAB_SIZE, dtype=jnp.int32)

    fwd = jax.jit(gpt_forward, static_argnames=("n_head",))
    logits, loss = fwd(idx, params, n_head=N_HEAD)
    logits = jax.block_until_ready(logits)

    assert logits.shape == (B, 1, VOCAB_SIZE)
    assert loss is None
    assert bool(jnp.all(jnp.isfinite(logits)))

    # Sanity-check against the precision-matched pure-JAX reference.
    ref = jax.block_until_ready(ref_forward(idx, params, N_HEAD))
    np.testing.assert_allclose(np.asarray(logits), np.asarray(ref),
                               rtol=1e-2, atol=1e-2)

    print("KERNEL_OK")
</pallas_src>

<mosaic_0001>
module attributes {stable_mosaic.version = 11 : i64} {
  func.func @gpt_block_kernel(%arg0: i32, %arg1: memref<2x128x128xf32, #tpu.memory_space<vmem>>, %arg2: memref<1x128xf32, #tpu.memory_space<vmem>>, %arg3: memref<1x128xf32, #tpu.memory_space<vmem>>, %arg4: memref<128x384xbf16, #tpu.memory_space<vmem>>, %arg5: memref<1x384xf32, #tpu.memory_space<vmem>>, %arg6: memref<128x128xbf16, #tpu.memory_space<vmem>>, %arg7: memref<1x128xf32, #tpu.memory_space<vmem>>, %arg8: memref<1x128xf32, #tpu.memory_space<vmem>>, %arg9: memref<1x128xf32, #tpu.memory_space<vmem>>, %arg10: memref<128x512xbf16, #tpu.memory_space<vmem>>, %arg11: memref<1x512xf32, #tpu.memory_space<vmem>>, %arg12: memref<512x128xbf16, #tpu.memory_space<vmem>>, %arg13: memref<1x128xf32, #tpu.memory_space<vmem>>, %arg14: memref<2x128x128xf32, #tpu.memory_space<vmem>>) attributes {dimension_semantics = [#tpu.dimension_semantics<parallel>], iteration_bounds = array<i64: 1>, scalar_prefetch = 0 : i64, scratch_operands = 0 : i64, tpu.core_type = #tpu.core_type<tc>, window_params = [{transform_indices = @transform_0, window_bounds = array<i64: 2, 128, 128>}, {pipeline_mode = #tpu.pipeline_mode<synchronous>, transform_indices = @transform_1, window_bounds = array<i64: 1, 128>}, {pipeline_mode = #tpu.pipeline_mode<synchronous>, transform_indices = @transform_2, window_bounds = array<i64: 1, 128>}, {pipeline_mode = #tpu.pipeline_mode<synchronous>, transform_indices = @transform_3, window_bounds = array<i64: 128, 384>}, {pipeline_mode = #tpu.pipeline_mode<synchronous>, transform_indices = @transform_4, window_bounds = array<i64: 1, 384>}, {pipeline_mode = #tpu.pipeline_mode<synchronous>, transform_indices = @transform_5, window_bounds = array<i64: 128, 128>}, {pipeline_mode = #tpu.pipeline_mode<synchronous>, transform_indices = @transform_6, window_bounds = array<i64: 1, 128>}, {pipeline_mode = #tpu.pipeline_mode<synchronous>, transform_indices = @transform_7, window_bounds = array<i64: 1, 128>}, {pipeline_mode = #tpu.pipeline_mode<synchronous>, transform_indices = @transform_8, window_bounds = array<i64: 1, 128>}, {pipeline_mode = #tpu.pipeline_mode<synchronous>, transform_indices = @transform_9, window_bounds = array<i64: 128, 512>}, {pipeline_mode = #tpu.pipeline_mode<synchronous>, transform_indices = @transform_10, window_bounds = array<i64: 1, 512>}, {pipeline_mode = #tpu.pipeline_mode<synchronous>, transform_indices = @transform_11, window_bounds = array<i64: 512, 128>}, {pipeline_mode = #tpu.pipeline_mode<synchronous>, transform_indices = @transform_12, window_bounds = array<i64: 1, 128>}, {transform_indices = @transform_13, window_bounds = array<i64: 2, 128, 128>}]} {
    %c0 = arith.constant 0 : index
    %c0_0 = arith.constant 0 : index
    %c0_1 = arith.constant 0 : index
    %0 = vector.load %arg1[%c0, %c0_0, %c0_1] : memref<2x128x128xf32, #tpu.memory_space<vmem>>, vector<1x128x128xf32>
    %1 = vector.shape_cast %0 : vector<1x128x128xf32> to vector<128x128xf32>
    %c1 = arith.constant 1 : index
    %c0_2 = arith.constant 0 : index
    %c0_3 = arith.constant 0 : index
    %2 = vector.load %arg1[%c1, %c0_2, %c0_3] : memref<2x128x128xf32, #tpu.memory_space<vmem>>, vector<1x128x128xf32>
    %3 = vector.shape_cast %2 : vector<1x128x128xf32> to vector<128x128xf32>
    %4 = tpu.concatenate %1, %3 in 0 : vector<128x128xf32>, vector<128x128xf32> -> vector<256x128xf32>
    %c0_4 = arith.constant 0 : index
    %c0_5 = arith.constant 0 : index
    %5 = vector.load %arg2[%c0_4, %c0_5] : memref<1x128xf32, #tpu.memory_space<vmem>>, vector<1x128xf32>
    %c0_6 = arith.constant 0 : index
    %c0_7 = arith.constant 0 : index
    %6 = vector.load %arg3[%c0_6, %c0_7] : memref<1x128xf32, #tpu.memory_space<vmem>>, vector<1x128xf32>
    %cst = arith.constant dense<0.000000e+00> : vector<256xf32>
    %7 = vector.multi_reduction <add>, %4, %cst [1] : vector<256x128xf32> to vector<256xf32>
    %8 = vector.shape_cast %7 : vector<256xf32> to vector<256x1xf32>
    %cst_8 = arith.constant 1.280000e+02 : f32
    %9 = vector.broadcast %cst_8 : f32 to vector<256x1xf32>
    %10 = arith.divf %8, %9 : vector<256x1xf32>
    %11 = vector.broadcast %10 : vector<256x1xf32> to vector<256x128xf32>
    %12 = arith.subf %4, %11 : vector<256x128xf32>
    %13 = arith.mulf %12, %12 : vector<256x128xf32>
    %cst_9 = arith.constant dense<0.000000e+00> : vector<256xf32>
    %14 = vector.multi_reduction <add>, %13, %cst_9 [1] : vector<256x128xf32> to vector<256xf32>
    %15 = vector.shape_cast %14 : vector<256xf32> to vector<256x1xf32>
    %cst_10 = arith.constant 1.280000e+02 : f32
    %16 = vector.broadcast %cst_10 : f32 to vector<256x1xf32>
    %17 = arith.divf %15, %16 : vector<256x1xf32>
    %18 = vector.broadcast %10 : vector<256x1xf32> to vector<256x128xf32>
    %19 = arith.subf %4, %18 : vector<256x128xf32>
    %cst_11 = arith.constant 9.99999974E-6 : f32
    %20 = vector.broadcast %cst_11 : f32 to vector<256x1xf32>
    %21 = arith.addf %17, %20 : vector<256x1xf32>
    %22 = math.rsqrt %21 : vector<256x1xf32>
    %23 = vector.broadcast %22 : vector<256x1xf32> to vector<256x128xf32>
    %24 = arith.mulf %19, %23 : vector<256x128xf32>
    %25 = vector.broadcast %5 : vector<1x128xf32> to vector<256x128xf32>
    %26 = arith.mulf %24, %25 : vector<256x128xf32>
    %27 = vector.broadcast %6 : vector<1x128xf32> to vector<256x128xf32>
    %28 = arith.addf %26, %27 : vector<256x128xf32>
    %29 = arith.truncf %28 : vector<256x128xf32> to vector<256x128xbf16>
    %c0_12 = arith.constant 0 : index
    %c0_13 = arith.constant 0 : index
    %30 = vector.load %arg4[%c0_12, %c0_13] : memref<128x384xbf16, #tpu.memory_space<vmem>>, vector<128x384xbf16>
    %cst_14 = arith.constant dense<0.000000e+00> : vector<256x384xf32>
    %31 = tpu.matmul %29, %30, %cst_14 {dimension_numbers = #tpu.dot_dimension_numbers<[1], [0], [0], [1], [0, 0, 1, 1], [], []>} : vector<256x128xbf16>, vector<128x384xbf16>, vector<256x384xf32> -> vector<256x384xf32>
    %c0_15 = arith.constant 0 : index
    %c0_16 = arith.constant 0 : index
    %32 = vector.load %arg5[%c0_15, %c0_16] : memref<1x384xf32, #tpu.memory_space<vmem>>, vector<1x384xf32>
    %33 = vector.broadcast %32 : vector<1x384xf32> to vector<256x384xf32>
    %34 = arith.addf %31, %33 : vector<256x384xf32>
    %35 = arith.truncf %34 : vector<256x384xf32> to vector<256x384xbf16>
    %36 = tpu.iota {dimensions = array<i32: 0>} : vector<128x128xi32>
    %37 = tpu.iota {dimensions = array<i32: 1>} : vector<128x128xi32>
    %38 = arith.cmpi sge, %36, %37 : vector<128x128xi32>
    %39 = vector.extract_strided_slice %35 {offsets = [0, 0], sizes = [128, 32], strides = [1, 1]} : vector<256x384xbf16> to vector<128x32xbf16>
    %40 = vector.extract_strided_slice %35 {offsets = [0, 128], sizes = [128, 32], strides = [1, 1]} : vector<256x384xbf16> to vector<128x32xbf16>
    %41 = vector.extract_strided_slice %35 {offsets = [0, 256], sizes = [128, 32], strides = [1, 1]} : vector<256x384xbf16> to vector<128x32xbf16>
    "tpu.trace_start"() <{level = 10 : i32, message = "qd,kd->qk"}> : () -> ()
    %cst_17 = arith.constant dense<0.000000e+00> : vector<128x128xf32>
    %42 = tpu.matmul %39, %40, %cst_17 {dimension_numbers = #tpu.dot_dimension_numbers<[1], [1], [0], [0], [0, 0, 1, 0], [], []>} : vector<128x32xbf16>, vector<128x32xbf16>, vector<128x128xf32> -> vector<128x128xf32>
    "tpu.trace_stop"() : () -> ()
    %cst_18 = arith.constant 0.176776692 : f32
    %43 = vector.broadcast %cst_18 : f32 to vector<128x128xf32>
    %44 = arith.mulf %42, %43 : vector<128x128xf32>
    %cst_19 = arith.constant -1.000000e+30 : f32
    %45 = vector.broadcast %cst_19 : f32 to vector<128x128xf32>
    %46 = arith.select %38, %44, %45 : vector<128x128xi1>, vector<128x128xf32>
    %cst_20 = arith.constant dense<0xFF800000> : vector<128xf32>
    %47 = vector.multi_reduction <maximumf>, %46, %cst_20 [1] : vector<128x128xf32> to vector<128xf32>
    %48 = vector.shape_cast %47 : vector<128xf32> to vector<128x1xf32>
    %49 = vector.broadcast %48 : vector<128x1xf32> to vector<128x128xf32>
    %50 = arith.subf %46, %49 : vector<128x128xf32>
    %51 = math.exp %50 : vector<128x128xf32>
    %cst_21 = arith.constant dense<0.000000e+00> : vector<128xf32>
    %52 = vector.multi_reduction <add>, %51, %cst_21 [1] : vector<128x128xf32> to vector<128xf32>
    %53 = vector.shape_cast %52 : vector<128xf32> to vector<128x1xf32>
    %54 = tpu.reciprocal %53 {approx = true} : vector<128x1xf32> -> vector<128x1xf32>
    %55 = vector.broadcast %54 : vector<128x1xf32> to vector<128x128xf32>
    %56 = arith.mulf %51, %55 : vector<128x128xf32>
    %57 = arith.truncf %56 : vector<128x128xf32> to vector<128x128xbf16>
    %cst_22 = arith.constant dense<0.000000e+00> : vector<128x32xf32>
    %58 = tpu.matmul %57, %41, %cst_22 {dimension_numbers = #tpu.dot_dimension_numbers<[1], [0], [0], [1], [0, 0, 1, 1], [], []>} : vector<128x128xbf16>, vector<128x32xbf16>, vector<128x32xf32> -> vector<128x32xf32>
    %59 = arith.truncf %58 : vector<128x32xf32> to vector<128x32xbf16>
    %60 = vector.extract_strided_slice %35 {offsets = [0, 32], sizes = [128, 32], strides = [1, 1]} : vector<256x384xbf16> to vector<128x32xbf16>
    %61 = vector.extract_strided_slice %35 {offsets = [0, 160], sizes = [128, 32], strides = [1, 1]} : vector<256x384xbf16> to vector<128x32xbf16>
    %62 = vector.extract_strided_slice %35 {offsets = [0, 288], sizes = [128, 32], strides = [1, 1]} : vector<256x384xbf16> to vector<128x32xbf16>
    "tpu.trace_start"() <{level = 10 : i32, message = "qd,kd->qk"}> : () -> ()
    %cst_23 = arith.constant dense<0.000000e+00> : vector<128x128xf32>
    %63 = tpu.matmul %60, %61, %cst_23 {dimension_numbers = #tpu.dot_dimension_numbers<[1], [1], [0], [0], [0, 0, 1, 0], [], []>} : vector<128x32xbf16>, vector<128x32xbf16>, vector<128x128xf32> -> vector<128x128xf32>
    "tpu.trace_stop"() : () -> ()
    %cst_24 = arith.constant 0.176776692 : f32
    %64 = vector.broadcast %cst_24 : f32 to vector<128x128xf32>
    %65 = arith.mulf %63, %64 : vector<128x128xf32>
    %cst_25 = arith.constant -1.000000e+30 : f32
    %66 = vector.broadcast %cst_25 : f32 to vector<128x128xf32>
    %67 = arith.select %38, %65, %66 : vector<128x128xi1>, vector<128x128xf32>
    %cst_26 = arith.constant dense<0xFF800000> : vector<128xf32>
    %68 = vector.multi_reduction <maximumf>, %67, %cst_26 [1] : vector<128x128xf32> to vector<128xf32>
    %69 = vector.shape_cast %68 : vector<128xf32> to vector<128x1xf32>
    %70 = vector.broadcast %69 : vector<128x1xf32> to vector<128x128xf32>
    %71 = arith.subf %67, %70 : vector<128x128xf32>
    %72 = math.exp %71 : vector<128x128xf32>
    %cst_27 = arith.constant dense<0.000000e+00> : vector<128xf32>
    %73 = vector.multi_reduction <add>, %72, %cst_27 [1] : vector<128x128xf32> to vector<128xf32>
    %74 = vector.shape_cast %73 : vector<128xf32> to vector<128x1xf32>
    %75 = tpu.reciprocal %74 {approx = true} : vector<128x1xf32> -> vector<128x1xf32>
    %76 = vector.broadcast %75 : vector<128x1xf32> to vector<128x128xf32>
    %77 = arith.mulf %72, %76 : vector<128x128xf32>
    %78 = arith.truncf %77 : vector<128x128xf32> to vector<128x128xbf16>
    %cst_28 = arith.constant dense<0.000000e+00> : vector<128x32xf32>
    %79 = tpu.matmul %78, %62, %cst_28 {dimension_numbers = #tpu.dot_dimension_numbers<[1], [0], [0], [1], [0, 0, 1, 1], [], []>} : vector<128x128xbf16>, vector<128x32xbf16>, vector<128x32xf32> -> vector<128x32xf32>
    %80 = arith.truncf %79 : vector<128x32xf32> to vector<128x32xbf16>
    %81 = vector.extract_strided_slice %35 {offsets = [0, 64], sizes = [128, 32], strides = [1, 1]} : vector<256x384xbf16> to vector<128x32xbf16>
    %82 = vector.extract_strided_slice %35 {offsets = [0, 192], sizes = [128, 32], strides = [1, 1]} : vector<256x384xbf16> to vector<128x32xbf16>
    %83 = vector.extract_strided_slice %35 {offsets = [0, 320], sizes = [128, 32], strides = [1, 1]} : vector<256x384xbf16> to vector<128x32xbf16>
    "tpu.trace_start"() <{level = 10 : i32, message = "qd,kd->qk"}> : () -> ()
    %cst_29 = arith.constant dense<0.000000e+00> : vector<128x128xf32>
    %84 = tpu.matmul %81, %82, %cst_29 {dimension_numbers = #tpu.dot_dimension_numbers<[1], [1], [0], [0], [0, 0, 1, 0], [], []>} : vector<128x32xbf16>, vector<128x32xbf16>, vector<128x128xf32> -> vector<128x128xf32>
    "tpu.trace_stop"() : () -> ()
    %cst_30 = arith.constant 0.176776692 : f32
    %85 = vector.broadcast %cst_30 : f32 to vector<128x128xf32>
    %86 = arith.mulf %84, %85 : vector<128x128xf32>
    %cst_31 = arith.constant -1.000000e+30 : f32
    %87 = vector.broadcast %cst_31 : f32 to vector<128x128xf32>
    %88 = arith.select %38, %86, %87 : vector<128x128xi1>, vector<128x128xf32>
    %cst_32 = arith.constant dense<0xFF800000> : vector<128xf32>
    %89 = vector.multi_reduction <maximumf>, %88, %cst_32 [1] : vector<128x128xf32> to vector<128xf32>
    %90 = vector.shape_cast %89 : vector<128xf32> to vector<128x1xf32>
    %91 = vector.broadcast %90 : vector<128x1xf32> to vector<128x128xf32>
    %92 = arith.subf %88, %91 : vector<128x128xf32>
    %93 = math.exp %92 : vector<128x128xf32>
    %cst_33 = arith.constant dense<0.000000e+00> : vector<128xf32>
    %94 = vector.multi_reduction <add>, %93, %cst_33 [1] : vector<128x128xf32> to vector<128xf32>
    %95 = vector.shape_cast %94 : vector<128xf32> to vector<128x1xf32>
    %96 = tpu.reciprocal %95 {approx = true} : vector<128x1xf32> -> vector<128x1xf32>
    %97 = vector.broadcast %96 : vector<128x1xf32> to vector<128x128xf32>
    %98 = arith.mulf %93, %97 : vector<128x128xf32>
    %99 = arith.truncf %98 : vector<128x128xf32> to vector<128x128xbf16>
    %cst_34 = arith.constant dense<0.000000e+00> : vector<128x32xf32>
    %100 = tpu.matmul %99, %83, %cst_34 {dimension_numbers = #tpu.dot_dimension_numbers<[1], [0], [0], [1], [0, 0, 1, 1], [], []>} : vector<128x128xbf16>, vector<128x32xbf16>, vector<128x32xf32> -> vector<128x32xf32>
    %101 = arith.truncf %100 : vector<128x32xf32> to vector<128x32xbf16>
    %102 = vector.extract_strided_slice %35 {offsets = [0, 96], sizes = [128, 32], strides = [1, 1]} : vector<256x384xbf16> to vector<128x32xbf16>
    %103 = vector.extract_strided_slice %35 {offsets = [0, 224], sizes = [128, 32], strides = [1, 1]} : vector<256x384xbf16> to vector<128x32xbf16>
    %104 = vector.extract_strided_slice %35 {offsets = [0, 352], sizes = [128, 32], strides = [1, 1]} : vector<256x384xbf16> to vector<128x32xbf16>
    "tpu.trace_start"() <{level = 10 : i32, message = "qd,kd->qk"}> : () -> ()
    %cst_35 = arith.constant dense<0.000000e+00> : vector<128x128xf32>
    %105 = tpu.matmul %102, %103, %cst_35 {dimension_numbers = #tpu.dot_dimension_numbers<[1], [1], [0], [0], [0, 0, 1, 0], [], []>} : vector<128x32xbf16>, vector<128x32xbf16>, vector<128x128xf32> -> vector<128x128xf32>
    "tpu.trace_stop"() : () -> ()
    %cst_36 = arith.constant 0.176776692 : f32
    %106 = vector.broadcast %cst_36 : f32 to vector<128x128xf32>
    %107 = arith.mulf %105, %106 : vector<128x128xf32>
    %cst_37 = arith.constant -1.000000e+30 : f32
    %108 = vector.broadcast %cst_37 : f32 to vector<128x128xf32>
    %109 = arith.select %38, %107, %108 : vector<128x128xi1>, vector<128x128xf32>
    %cst_38 = arith.constant dense<0xFF800000> : vector<128xf32>
    %110 = vector.multi_reduction <maximumf>, %109, %cst_38 [1] : vector<128x128xf32> to vector<128xf32>
    %111 = vector.shape_cast %110 : vector<128xf32> to vector<128x1xf32>
    %112 = vector.broadcast %111 : vector<128x1xf32> to vector<128x128xf32>
    %113 = arith.subf %109, %112 : vector<128x128xf32>
    %114 = math.exp %113 : vector<128x128xf32>
    %cst_39 = arith.constant dense<0.000000e+00> : vector<128xf32>
    %115 = vector.multi_reduction <add>, %114, %cst_39 [1] : vector<128x128xf32> to vector<128xf32>
    %116 = vector.shape_cast %115 : vector<128xf32> to vector<128x1xf32>
    %117 = tpu.reciprocal %116 {approx = true} : vector<128x1xf32> -> vector<128x1xf32>
    %118 = vector.broadcast %117 : vector<128x1xf32> to vector<128x128xf32>
    %119 = arith.mulf %114, %118 : vector<128x128xf32>
    %120 = arith.truncf %119 : vector<128x128xf32> to vector<128x128xbf16>
    %cst_40 = arith.constant dense<0.000000e+00> : vector<128x32xf32>
    %121 = tpu.matmul %120, %104, %cst_40 {dimension_numbers = #tpu.dot_dimension_numbers<[1], [0], [0], [1], [0, 0, 1, 1], [], []>} : vector<128x128xbf16>, vector<128x32xbf16>, vector<128x32xf32> -> vector<128x32xf32>
    %122 = arith.truncf %121 : vector<128x32xf32> to vector<128x32xbf16>
    %123 = tpu.concatenate %59, %80, %101, %122 in 1 : vector<128x32xbf16>, vector<128x32xbf16>, vector<128x32xbf16>, vector<128x32xbf16> -> vector<128x128xbf16>
    %124 = vector.extract_strided_slice %35 {offsets = [128, 0], sizes = [128, 32], strides = [1, 1]} : vector<256x384xbf16> to vector<128x32xbf16>
    %125 = vector.extract_strided_slice %35 {offsets = [128, 128], sizes = [128, 32], strides = [1, 1]} : vector<256x384xbf16> to vector<128x32xbf16>
    %126 = vector.extract_strided_slice %35 {offsets = [128, 256], sizes = [128, 32], strides = [1, 1]} : vector<256x384xbf16> to vector<128x32xbf16>
    "tpu.trace_start"() <{level = 10 : i32, message = "qd,kd->qk"}> : () -> ()
    %cst_41 = arith.constant dense<0.000000e+00> : vector<128x128xf32>
    %127 = tpu.matmul %124, %125, %cst_41 {dimension_numbers = #tpu.dot_dimension_numbers<[1], [1], [0], [0], [0, 0, 1, 0], [], []>} : vector<128x32xbf16>, vector<128x32xbf16>, vector<128x128xf32> -> vector<128x128xf32>
    "tpu.trace_stop"() : () -> ()
    %cst_42 = arith.constant 0.176776692 : f32
    %128 = vector.broadcast %cst_42 : f32 to vector<128x128xf32>
    %129 = arith.mulf %127, %128 : vector<128x128xf32>
    %cst_43 = arith.constant -1.000000e+30 : f32
    %130 = vector.broadcast %cst_43 : f32 to vector<128x128xf32>
    %131 = arith.select %38, %129, %130 : vector<128x128xi1>, vector<128x128xf32>
    %cst_44 = arith.constant dense<0xFF800000> : vector<128xf32>
    %132 = vector.multi_reduction <maximumf>, %131, %cst_44 [1] : vector<128x128xf32> to vector<128xf32>
    %133 = vector.shape_cast %132 : vector<128xf32> to vector<128x1xf32>
    %134 = vector.broadcast %133 : vector<128x1xf32> to vector<128x128xf32>
    %135 = arith.subf %131, %134 : vector<128x128xf32>
    %136 = math.exp %135 : vector<128x128xf32>
    %cst_45 = arith.constant dense<0.000000e+00> : vector<128xf32>
    %137 = vector.multi_reduction <add>, %136, %cst_45 [1] : vector<128x128xf32> to vector<128xf32>
    %138 = vector.shape_cast %137 : vector<128xf32> to vector<128x1xf32>
    %139 = tpu.reciprocal %138 {approx = true} : vector<128x1xf32> -> vector<128x1xf32>
    %140 = vector.broadcast %139 : vector<128x1xf32> to vector<128x128xf32>
    %141 = arith.mulf %136, %140 : vector<128x128xf32>
    %142 = arith.truncf %141 : vector<128x128xf32> to vector<128x128xbf16>
    %cst_46 = arith.constant dense<0.000000e+00> : vector<128x32xf32>
    %143 = tpu.matmul %142, %126, %cst_46 {dimension_numbers = #tpu.dot_dimension_numbers<[1], [0], [0], [1], [0, 0, 1, 1], [], []>} : vector<128x128xbf16>, vector<128x32xbf16>, vector<128x32xf32> -> vector<128x32xf32>
    %144 = arith.truncf %143 : vector<128x32xf32> to vector<128x32xbf16>
    %145 = vector.extract_strided_slice %35 {offsets = [128, 32], sizes = [128, 32], strides = [1, 1]} : vector<256x384xbf16> to vector<128x32xbf16>
    %146 = vector.extract_strided_slice %35 {offsets = [128, 160], sizes = [128, 32], strides = [1, 1]} : vector<256x384xbf16> to vector<128x32xbf16>
    %147 = vector.extract_strided_slice %35 {offsets = [128, 288], sizes = [128, 32], strides = [1, 1]} : vector<256x384xbf16> to vector<128x32xbf16>
    "tpu.trace_start"() <{level = 10 : i32, message = "qd,kd->qk"}> : () -> ()
    %cst_47 = arith.constant dense<0.000000e+00> : vector<128x128xf32>
    %148 = tpu.matmul %145, %146, %cst_47 {dimension_numbers = #tpu.dot_dimension_numbers<[1], [1], [0], [0], [0, 0, 1, 0], [], []>} : vector<128x32xbf16>, vector<128x32xbf16>, vector<128x128xf32> -> vector<128x128xf32>
    "tpu.trace_stop"() : () -> ()
    %cst_48 = arith.constant 0.176776692 : f32
    %149 = vector.broadcast %cst_48 : f32 to vector<128x128xf32>
    %150 = arith.mulf %148, %149 : vector<128x128xf32>
    %cst_49 = arith.constant -1.000000e+30 : f32
    %151 = vector.broadcast %cst_49 : f32 to vector<128x128xf32>
    %152 = arith.select %38, %150, %151 : vector<128x128xi1>, vector<128x128xf32>
    %cst_50 = arith.constant dense<0xFF800000> : vector<128xf32>
    %153 = vector.multi_reduction <maximumf>, %152, %cst_50 [1] : vector<128x128xf32> to vector<128xf32>
    %154 = vector.shape_cast %153 : vector<128xf32> to vector<128x1xf32>
    %155 = vector.broadcast %154 : vector<128x1xf32> to vector<128x128xf32>
    %156 = arith.subf %152, %155 : vector<128x128xf32>
    %157 = math.exp %156 : vector<128x128xf32>
    %cst_51 = arith.constant dense<0.000000e+00> : vector<128xf32>
    %158 = vector.multi_reduction <add>, %157, %cst_51 [1] : vector<128x128xf32> to vector<128xf32>
    %159 = vector.shape_cast %158 : vector<128xf32> to vector<128x1xf32>
    %160 = tpu.reciprocal %159 {approx = true} : vector<128x1xf32> -> vector<128x1xf32>
    %161 = vector.broadcast %160 : vector<128x1xf32> to vector<128x128xf32>
    %162 = arith.mulf %157, %161 : vector<128x128xf32>
    %163 = arith.truncf %162 : vector<128x128xf32> to vector<128x128xbf16>
    %cst_52 = arith.constant dense<0.000000e+00> : vector<128x32xf32>
    %164 = tpu.matmul %163, %147, %cst_52 {dimension_numbers = #tpu.dot_dimension_numbers<[1], [0], [0], [1], [0, 0, 1, 1], [], []>} : vector<128x128xbf16>, vector<128x32xbf16>, vector<128x32xf32> -> vector<128x32xf32>
    %165 = arith.truncf %164 : vector<128x32xf32> to vector<128x32xbf16>
    %166 = vector.extract_strided_slice %35 {offsets = [128, 64], sizes = [128, 32], strides = [1, 1]} : vector<256x384xbf16> to vector<128x32xbf16>
    %167 = vector.extract_strided_slice %35 {offsets = [128, 192], sizes = [128, 32], strides = [1, 1]} : vector<256x384xbf16> to vector<128x32xbf16>
    %168 = vector.extract_strided_slice %35 {offsets = [128, 320], sizes = [128, 32], strides = [1, 1]} : vector<256x384xbf16> to vector<128x32xbf16>
    "tpu.trace_start"() <{level = 10 : i32, message = "qd,kd->qk"}> : () -> ()
    %cst_53 = arith.constant dense<0.000000e+00> : vector<128x128xf32>
    %169 = tpu.matmul %166, %167, %cst_53 {dimension_numbers = #tpu.dot_dimension_numbers<[1], [1], [0], [0], [0, 0, 1, 0], [], []>} : vector<128x32xbf16>, vector<128x32xbf16>, vector<128x128xf32> -> vector<128x128xf32>
    "tpu.trace_stop"() : () -> ()
    %cst_54 = arith.constant 0.176776692 : f32
    %170 = vector.broadcast %cst_54 : f32 to vector<128x128xf32>
    %171 = arith.mulf %169, %170 : vector<128x128xf32>
    %cst_55 = arith.constant -1.000000e+30 : f32
    %172 = vector.broadcast %cst_55 : f32 to vector<128x128xf32>
    %173 = arith.select %38, %171, %172 : vector<128x128xi1>, vector<128x128xf32>
    %cst_56 = arith.constant dense<0xFF800000> : vector<128xf32>
    %174 = vector.multi_reduction <maximumf>, %173, %cst_56 [1] : vector<128x128xf32> to vector<128xf32>
    %175 = vector.shape_cast %174 : vector<128xf32> to vector<128x1xf32>
    %176 = vector.broadcast %175 : vector<128x1xf32> to vector<128x128xf32>
    %177 = arith.subf %173, %176 : vector<128x128xf32>
    %178 = math.exp %177 : vector<128x128xf32>
    %cst_57 = arith.constant dense<0.000000e+00> : vector<128xf32>
    %179 = vector.multi_reduction <add>, %178, %cst_57 [1] : vector<128x128xf32> to vector<128xf32>
    %180 = vector.shape_cast %179 : vector<128xf32> to vector<128x1xf32>
    %181 = tpu.reciprocal %180 {approx = true} : vector<128x1xf32> -> vector<128x1xf32>
    %182 = vector.broadcast %181 : vector<128x1xf32> to vector<128x128xf32>
    %183 = arith.mulf %178, %182 : vector<128x128xf32>
    %184 = arith.truncf %183 : vector<128x128xf32> to vector<128x128xbf16>
    %cst_58 = arith.constant dense<0.000000e+00> : vector<128x32xf32>
    %185 = tpu.matmul %184, %168, %cst_58 {dimension_numbers = #tpu.dot_dimension_numbers<[1], [0], [0], [1], [0, 0, 1, 1], [], []>} : vector<128x128xbf16>, vector<128x32xbf16>, vector<128x32xf32> -> vector<128x32xf32>
    %186 = arith.truncf %185 : vector<128x32xf32> to vector<128x32xbf16>
    %187 = vector.extract_strided_slice %35 {offsets = [128, 96], sizes = [128, 32], strides = [1, 1]} : vector<256x384xbf16> to vector<128x32xbf16>
    %188 = vector.extract_strided_slice %35 {offsets = [128, 224], sizes = [128, 32], strides = [1, 1]} : vector<256x384xbf16> to vector<128x32xbf16>
    %189 = vector.extract_strided_slice %35 {offsets = [128, 352], sizes = [128, 32], strides = [1, 1]} : vector<256x384xbf16> to vector<128x32xbf16>
    "tpu.trace_start"() <{level = 10 : i32, message = "qd,kd->qk"}> : () -> ()
    %cst_59 = arith.constant dense<0.000000e+00> : vector<128x128xf32>
    %190 = tpu.matmul %187, %188, %cst_59 {dimension_numbers = #tpu.dot_dimension_numbers<[1], [1], [0], [0], [0, 0, 1, 0], [], []>} : vector<128x32xbf16>, vector<128x32xbf16>, vector<128x128xf32> -> vector<128x128xf32>
    "tpu.trace_stop"() : () -> ()
    %cst_60 = arith.constant 0.176776692 : f32
    %191 = vector.broadcast %cst_60 : f32 to vector<128x128xf32>
    %192 = arith.mulf %190, %191 : vector<128x128xf32>
    %cst_61 = arith.constant -1.000000e+30 : f32
    %193 = vector.broadcast %cst_61 : f32 to vector<128x128xf32>
    %194 = arith.select %38, %192, %193 : vector<128x128xi1>, vector<128x128xf32>
    %cst_62 = arith.constant dense<0xFF800000> : vector<128xf32>
    %195 = vector.multi_reduction <maximumf>, %194, %cst_62 [1] : vector<128x128xf32> to vector<128xf32>
    %196 = vector.shape_cast %195 : vector<128xf32> to vector<128x1xf32>
    %197 = vector.broadcast %196 : vector<128x1xf32> to vector<128x128xf32>
    %198 = arith.subf %194, %197 : vector<128x128xf32>
    %199 = math.exp %198 : vector<128x128xf32>
    %cst_63 = arith.constant dense<0.000000e+00> : vector<128xf32>
    %200 = vector.multi_reduction <add>, %199, %cst_63 [1] : vector<128x128xf32> to vector<128xf32>
    %201 = vector.shape_cast %200 : vector<128xf32> to vector<128x1xf32>
    %202 = tpu.reciprocal %201 {approx = true} : vector<128x1xf32> -> vector<128x1xf32>
    %203 = vector.broadcast %202 : vector<128x1xf32> to vector<128x128xf32>
    %204 = arith.mulf %199, %203 : vector<128x128xf32>
    %205 = arith.truncf %204 : vector<128x128xf32> to vector<128x128xbf16>
    %cst_64 = arith.constant dense<0.000000e+00> : vector<128x32xf32>
    %206 = tpu.matmul %205, %189, %cst_64 {dimension_numbers = #tpu.dot_dimension_numbers<[1], [0], [0], [1], [0, 0, 1, 1], [], []>} : vector<128x128xbf16>, vector<128x32xbf16>, vector<128x32xf32> -> vector<128x32xf32>
    %207 = arith.truncf %206 : vector<128x32xf32> to vector<128x32xbf16>
    %208 = tpu.concatenate %144, %165, %186, %207 in 1 : vector<128x32xbf16>, vector<128x32xbf16>, vector<128x32xbf16>, vector<128x32xbf16> -> vector<128x128xbf16>
    %209 = tpu.concatenate %123, %208 in 0 : vector<128x128xbf16>, vector<128x128xbf16> -> vector<256x128xbf16>
    %c0_65 = arith.constant 0 : index
    %c0_66 = arith.constant 0 : index
    %210 = vector.load %arg6[%c0_65, %c0_66] : memref<128x128xbf16, #tpu.memory_space<vmem>>, vector<128x128xbf16>
    %cst_67 = arith.constant dense<0.000000e+00> : vector<256x128xf32>
    %211 = tpu.matmul %209, %210, %cst_67 {dimension_numbers = #tpu.dot_dimension_numbers<[1], [0], [0], [1], [0, 0, 1, 1], [], []>} : vector<256x128xbf16>, vector<128x128xbf16>, vector<256x128xf32> -> vector<256x128xf32>
    %c0_68 = arith.constant 0 : index
    %c0_69 = arith.constant 0 : index
    %212 = vector.load %arg7[%c0_68, %c0_69] : memref<1x128xf32, #tpu.memory_space<vmem>>, vector<1x128xf32>
    %213 = vector.broadcast %212 : vector<1x128xf32> to vector<256x128xf32>
    %214 = arith.addf %211, %213 : vector<256x128xf32>
    %215 = arith.addf %4, %214 : vector<256x128xf32>
    %c0_70 = arith.constant 0 : index
    %c0_71 = arith.constant 0 : index
    %216 = vector.load %arg8[%c0_70, %c0_71] : memref<1x128xf32, #tpu.memory_space<vmem>>, vector<1x128xf32>
    %c0_72 = arith.constant 0 : index
    %c0_73 = arith.constant 0 : index
    %217 = vector.load %arg9[%c0_72, %c0_73] : memref<1x128xf32, #tpu.memory_space<vmem>>, vector<1x128xf32>
    %cst_74 = arith.constant dense<0.000000e+00> : vector<256xf32>
    %218 = vector.multi_reduction <add>, %215, %cst_74 [1] : vector<256x128xf32> to vector<256xf32>
    %219 = vector.shape_cast %218 : vector<256xf32> to vector<256x1xf32>
    %cst_75 = arith.constant 1.280000e+02 : f32
    %220 = vector.broadcast %cst_75 : f32 to vector<256x1xf32>
    %221 = arith.divf %219, %220 : vector<256x1xf32>
    %222 = vector.broadcast %221 : vector<256x1xf32> to vector<256x128xf32>
    %223 = arith.subf %215, %222 : vector<256x128xf32>
    %224 = arith.mulf %223, %223 : vector<256x128xf32>
    %cst_76 = arith.constant dense<0.000000e+00> : vector<256xf32>
    %225 = vector.multi_reduction <add>, %224, %cst_76 [1] : vector<256x128xf32> to vector<256xf32>
    %226 = vector.shape_cast %225 : vector<256xf32> to vector<256x1xf32>
    %cst_77 = arith.constant 1.280000e+02 : f32
    %227 = vector.broadcast %cst_77 : f32 to vector<256x1xf32>
    %228 = arith.divf %226, %227 : vector<256x1xf32>
    %229 = vector.broadcast %221 : vector<256x1xf32> to vector<256x128xf32>
    %230 = arith.subf %215, %229 : vector<256x128xf32>
    %cst_78 = arith.constant 9.99999974E-6 : f32
    %231 = vector.broadcast %cst_78 : f32 to vector<256x1xf32>
    %232 = arith.addf %228, %231 : vector<256x1xf32>
    %233 = math.rsqrt %232 : vector<256x1xf32>
    %234 = vector.broadcast %233 : vector<256x1xf32> to vector<256x128xf32>
    %235 = arith.mulf %230, %234 : vector<256x128xf32>
    %236 = vector.broadcast %216 : vector<1x128xf32> to vector<256x128xf32>
    %237 = arith.mulf %235, %236 : vector<256x128xf32>
    %238 = vector.broadcast %217 : vector<1x128xf32> to vector<256x128xf32>
    %239 = arith.addf %237, %238 : vector<256x128xf32>
    %240 = arith.truncf %239 : vector<256x128xf32> to vector<256x128xbf16>
    %c0_79 = arith.constant 0 : index
    %c0_80 = arith.constant 0 : index
    %241 = vector.load %arg10[%c0_79, %c0_80] : memref<128x512xbf16, #tpu.memory_space<vmem>>, vector<128x512xbf16>
    %cst_81 = arith.constant dense<0.000000e+00> : vector<256x512xf32>
    %242 = tpu.matmul %240, %241, %cst_81 {dimension_numbers = #tpu.dot_dimension_numbers<[1], [0], [0], [1], [0, 0, 1, 1], [], []>} : vector<256x128xbf16>, vector<128x512xbf16>, vector<256x512xf32> -> vector<256x512xf32>
    %c0_82 = arith.constant 0 : index
    %c0_83 = arith.constant 0 : index
    %243 = vector.load %arg11[%c0_82, %c0_83] : memref<1x512xf32, #tpu.memory_space<vmem>>, vector<1x512xf32>
    %244 = vector.broadcast %243 : vector<1x512xf32> to vector<256x512xf32>
    %245 = arith.addf %242, %244 : vector<256x512xf32>
    %cst_84 = arith.constant 5.000000e-01 : f32
    %246 = vector.broadcast %cst_84 : f32 to vector<256x512xf32>
    %247 = arith.mulf %246, %245 : vector<256x512xf32>
    %cst_85 = arith.constant 4.471500e-02 : f32
    %248 = vector.broadcast %cst_85 : f32 to vector<256x512xf32>
    %249 = arith.mulf %248, %245 : vector<256x512xf32>
    %250 = arith.mulf %249, %245 : vector<256x512xf32>
    %251 = arith.mulf %250, %245 : vector<256x512xf32>
    %252 = arith.addf %245, %251 : vector<256x512xf32>
    %cst_86 = arith.constant 0.797884583 : f32
    %253 = vector.broadcast %cst_86 : f32 to vector<256x512xf32>
    %254 = arith.mulf %253, %252 : vector<256x512xf32>
    %255 = math.tanh %254 : vector<256x512xf32>
    %cst_87 = arith.constant 1.000000e+00 : f32
    %256 = vector.broadcast %cst_87 : f32 to vector<256x512xf32>
    %257 = arith.addf %256, %255 : vector<256x512xf32>
    %258 = arith.mulf %247, %257 : vector<256x512xf32>
    %259 = arith.truncf %258 : vector<256x512xf32> to vector<256x512xbf16>
    %c0_88 = arith.constant 0 : index
    %c0_89 = arith.constant 0 : index
    %260 = vector.load %arg12[%c0_88, %c0_89] : memref<512x128xbf16, #tpu.memory_space<vmem>>, vector<512x128xbf16>
    %cst_90 = arith.constant dense<0.000000e+00> : vector<256x128xf32>
    %261 = tpu.matmul %259, %260, %cst_90 {dimension_numbers = #tpu.dot_dimension_numbers<[1], [0], [0], [1], [0, 0, 1, 1], [], []>} : vector<256x512xbf16>, vector<512x128xbf16>, vector<256x128xf32> -> vector<256x128xf32>
    %c0_91 = arith.constant 0 : index
    %c0_92 = arith.constant 0 : index
    %262 = vector.load %arg13[%c0_91, %c0_92] : memref<1x128xf32, #tpu.memory_space<vmem>>, vector<1x128xf32>
    %263 = vector.broadcast %262 : vector<1x128xf32> to vector<256x128xf32>
    %264 = arith.addf %261, %263 : vector<256x128xf32>
    %265 = arith.addf %215, %264 : vector<256x128xf32>
    %266 = vector.extract_strided_slice %265 {offsets = [0, 0], sizes = [128, 128], strides = [1, 1]} : vector<256x128xf32> to vector<128x128xf32>
    %c0_93 = arith.constant 0 : index
    %c0_94 = arith.constant 0 : index
    %c0_95 = arith.constant 0 : index
    %267 = vector.load %arg14[%c0_93, %c0_94, %c0_95] : memref<2x128x128xf32, #tpu.memory_space<vmem>>, vector<1x128x128xf32>
    %268 = vector.shape_cast %267 : vector<1x128x128xf32> to vector<128x128xf32>
    %269 = vector.shape_cast %266 : vector<128x128xf32> to vector<1x128x128xf32>
    tpu.vector_store %arg14[%c0_93, %c0_94, %c0_95], %269 {strides = array<i32>} : memref<2x128x128xf32, #tpu.memory_space<vmem>>, vector<1x128x128xf32>,
    %270 = vector.extract_strided_slice %265 {offsets = [128, 0], sizes = [128, 128], strides = [1, 1]} : vector<256x128xf32> to vector<128x128xf32>
    %c1_96 = arith.constant 1 : index
    %c0_97 = arith.constant 0 : index
    %c0_98 = arith.constant 0 : index
    %271 = vector.load %arg14[%c1_96, %c0_97, %c0_98] : memref<2x128x128xf32, #tpu.memory_space<vmem>>, vector<1x128x128xf32>
    %272 = vector.shape_cast %271 : vector<1x128x128xf32> to vector<128x128xf32>
    %273 = vector.shape_cast %270 : vector<128x128xf32> to vector<1x128x128xf32>
    tpu.vector_store %arg14[%c1_96, %c0_97, %c0_98], %273 {strides = array<i32>} : memref<2x128x128xf32, #tpu.memory_space<vmem>>, vector<1x128x128xf32>,
    return
  }
  func.func @transform_0(%arg0: i32) -> (i32, i32, i32) {
    %c0_i32 = arith.constant 0 : i32
    %c0_i32_0 = arith.constant 0 : i32
    %c0_i32_1 = arith.constant 0 : i32
    return %arg0, %c0_i32, %c0_i32_0 : i32, i32, i32
  }
  func.func @transform_1(%arg0: i32) -> (i32, i32) {
    %c0_i32 = arith.constant 0 : i32
    %c0_i32_0 = arith.constant 0 : i32
    %c0_i32_1 = arith.constant 0 : i32
    return %c0_i32, %c0_i32_0 : i32, i32
  }
  func.func @transform_2(%arg0: i32) -> (i32, i32) {
    %c0_i32 = arith.constant 0 : i32
    %c0_i32_0 = arith.constant 0 : i32
    %c0_i32_1 = arith.constant 0 : i32
    return %c0_i32, %c0_i32_0 : i32, i32
  }
  func.func @transform_3(%arg0: i32) -> (i32, i32) {
    %c0_i32 = arith.constant 0 : i32
    %c0_i32_0 = arith.constant 0 : i32
    %c0_i32_1 = arith.constant 0 : i32
    return %c0_i32, %c0_i32_0 : i32, i32
  }
  func.func @transform_4(%arg0: i32) -> (i32, i32) {
    %c0_i32 = arith.constant 0 : i32
    %c0_i32_0 = arith.constant 0 : i32
    %c0_i32_1 = arith.constant 0 : i32
    return %c0_i32, %c0_i32_0 : i32, i32
  }
  func.func @transform_5(%arg0: i32) -> (i32, i32) {
    %c0_i32 = arith.constant 0 : i32
    %c0_i32_0 = arith.constant 0 : i32
    %c0_i32_1 = arith.constant 0 : i32
    return %c0_i32, %c0_i32_0 : i32, i32
  }
  func.func @transform_6(%arg0: i32) -> (i32, i32) {
    %c0_i32 = arith.constant 0 : i32
    %c0_i32_0 = arith.constant 0 : i32
    %c0_i32_1 = arith.constant 0 : i32
    return %c0_i32, %c0_i32_0 : i32, i32
  }
  func.func @transform_7(%arg0: i32) -> (i32, i32) {
    %c0_i32 = arith.constant 0 : i32
    %c0_i32_0 = arith.constant 0 : i32
    %c0_i32_1 = arith.constant 0 : i32
    return %c0_i32, %c0_i32_0 : i32, i32
  }
  func.func @transform_8(%arg0: i32) -> (i32, i32) {
    %c0_i32 = arith.constant 0 : i32
    %c0_i32_0 = arith.constant 0 : i32
    %c0_i32_1 = arith.constant 0 : i32
    return %c0_i32, %c0_i32_0 : i32, i32
  }
  func.func @transform_9(%arg0: i32) -> (i32, i32) {
    %c0_i32 = arith.constant 0 : i32
    %c0_i32_0 = arith.constant 0 : i32
    %c0_i32_1 = arith.constant 0 : i32
    return %c0_i32, %c0_i32_0 : i32, i32
  }
  func.func @transform_10(%arg0: i32) -> (i32, i32) {
    %c0_i32 = arith.constant 0 : i32
    %c0_i32_0 = arith.constant 0 : i32
    %c0_i32_1 = arith.constant 0 : i32
    return %c0_i32, %c0_i32_0 : i32, i32
  }
  func.func @transform_11(%arg0: i32) -> (i32, i32) {
    %c0_i32 = arith.constant 0 : i32
    %c0_i32_0 = arith.constant 0 : i32
    %c0_i32_1 = arith.constant 0 : i32
    return %c0_i32, %c0_i32_0 : i32, i32
  }
  func.func @transform_12(%arg0: i32) -> (i32, i32) {
    %c0_i32 = arith.constant 0 : i32
    %c0_i32_0 = arith.constant 0 : i32
    %c0_i32_1 = arith.constant 0 : i32
    return %c0_i32, %c0_i32_0 : i32, i32
  }
  func.func @transform_13(%arg0: i32) -> (i32, i32, i32) {
    %c0_i32 = arith.constant 0 : i32
    %c0_i32_0 = arith.constant 0 : i32
    %c0_i32_1 = arith.constant 0 : i32
    return %arg0, %c0_i32, %c0_i32_0 : i32, i32, i32
  }
}

module attributes {stable_mosaic.version = 11 : i64} {
  func.func @lm_head_kernel(%arg0: i32, %arg1: memref<2x128xbf16, #tpu.memory_space<vmem>>, %arg2: memref<128x256xbf16, #tpu.memory_space<vmem>>, %arg3: memref<2x256xf32, #tpu.memory_space<vmem>>) attributes {dimension_semantics = [#tpu.dimension_semantics<parallel>], iteration_bounds = array<i64: 1>, scalar_prefetch = 0 : i64, scratch_operands = 0 : i64, tpu.core_type = #tpu.core_type<tc>, window_params = [{pipeline_mode = #tpu.pipeline_mode<synchronous>, transform_indices = @transform_0, window_bounds = array<i64: 2, 128>}, {transform_indices = @transform_1, window_bounds = array<i64: 128, 256>}, {transform_indices = @transform_2, window_bounds = array<i64: 2, 256>}]} {
    %c0 = arith.constant 0 : index
    %c0_0 = arith.constant 0 : index
    %0 = vector.load %arg1[%c0, %c0_0] : memref<2x128xbf16, #tpu.memory_space<vmem>>, vector<2x128xbf16>
    %c0_1 = arith.constant 0 : index
    %c0_2 = arith.constant 0 : index
    %1 = vector.load %arg2[%c0_1, %c0_2] : memref<128x256xbf16, #tpu.memory_space<vmem>>, vector<128x256xbf16>
    %cst = arith.constant dense<0.000000e+00> : vector<2x256xf32>
    %2 = tpu.matmul %0, %1, %cst {dimension_numbers = #tpu.dot_dimension_numbers<[1], [0], [0], [1], [0, 0, 1, 1], [], []>} : vector<2x128xbf16>, vector<128x256xbf16>, vector<2x256xf32> -> vector<2x256xf32>
    %c0_3 = arith.constant 0 : index
    %c0_4 = arith.constant 0 : index
    %3 = vector.load %arg3[%c0_3, %c0_4] : memref<2x256xf32, #tpu.memory_space<vmem>>, vector<2x256xf32>
    tpu.vector_store %arg3[%c0_3, %c0_4], %2 {strides = array<i32>} : memref<2x256xf32, #tpu.memory_space<vmem>>, vector<2x256xf32>,
    return
  }
  func.func @transform_0(%arg0: i32) -> (i32, i32) {
    %c0_i32 = arith.constant 0 : i32
    %c0_i32_0 = arith.constant 0 : i32
    %c0_i32_1 = arith.constant 0 : i32
    return %c0_i32, %c0_i32_0 : i32, i32
  }
  func.func @transform_1(%arg0: i32) -> (i32, i32) {
    %c0_i32 = arith.constant 0 : i32
    %c0_i32_0 = arith.constant 0 : i32
    return %c0_i32, %arg0 : i32, i32
  }
  func.func @transform_2(%arg0: i32) -> (i32, i32) {
    %c0_i32 = arith.constant 0 : i32
    %c0_i32_0 = arith.constant 0 : i32
    return %c0_i32, %arg0 : i32, i32
  }
}

</mosaic_0001>

<bundles_post_ra>
// kernel: gpt_forward.5
= control target key start
LH: loop header
LB: loop body
LE: loop exit
PB: predicated region body
PF: predicated region fallthrough
CT: control target
= control target key end

     0   :  { %v208_v1 = vmov 0   ;;  %s278_s1 = inlined_call_operand.vmem [shape: bf16[128,256], index: 1, kind: input, shape index: {}]   ;;  %s279_s0 = inlined_call_operand.vmem [shape: bf16[2,128], index: 0, kind: input, shape index: {}]   ;;  %s280_s2 = inlined_call_operand.vmem [shape: f32[2,256], index: 2, kind: output, shape index: {}]  }
   0x1   :  { %v184_v0 = vld [vmem:[%s278_s1 + $0x4] ss:$8 sps:$4 sm:$0xff]   ;;  %141 = vmatprep.mubr.bf16.mxu0 %v208_v1  ;;  %v186_v2 = vld [vmem:[%s278_s1] ss:$8 sps:$4 sm:$0xff]   ;;  %v187_v3 = vld [vmem:[%s278_s1 + $0x14] ss:$8 sps:$4 sm:$0xff]  }
   0x2   :  { %109 = vmatprep.subr.bf16.mxu0 %v184_v0  ;;  %v189_v4 = vld [vmem:[%s278_s1 + $0x10] ss:$8 sps:$4 sm:$0xff]   ;;  %v190_v5 = vld [vmem:[%s278_s1 + $0x24] ss:$8 sps:$4 sm:$0xff]   ;;  %v192_v6 = vld [vmem:[%s278_s1 + $0x20] ss:$8 sps:$4 sm:$0xff]  }
   0x3   :  { %110 = vmatpush1.bf16.msra.mxu0 %v186_v2  ;;  %v193_v7 = vld [vmem:[%s278_s1 + $0x34] ss:$8 sps:$4 sm:$0xff]   ;;  %v195_v8 = vld [vmem:[%s278_s1 + $0x30] ss:$8 sps:$4 sm:$0xff]   ;;  %v196_v9 = vld [vmem:[%s278_s1 + $0x44] ss:$8 sps:$4 sm:$0xff]  }
   0x4   :  { %111 = vmatprep.subr.bf16.mxu0 %v187_v3  ;;  %v198_v10 = vld [vmem:[%s278_s1 + $0x40] ss:$8 sps:$4 sm:$0xff]   ;;  %v199_v11 = vld [vmem:[%s278_s1 + $0x54] ss:$8 sps:$4 sm:$0xff]   ;;  %v201_v12 = vld [vmem:[%s278_s1 + $0x50] ss:$8 sps:$4 sm:$0xff]  }
   0x5   :  { %v202_v13 = vld [vmem:[%s278_s1 + $0x64] ss:$8 sps:$4 sm:$0xff]   ;;  %v204_v14 = vld [vmem:[%s278_s1 + $0x60] ss:$8 sps:$4 sm:$0xff]   ;;  %v205_v15 = vld [vmem:[%s278_s1 + $0x74] ss:$8 sps:$4 sm:$0xff]  }
   0x6   :  { %v207_v16 = vld [vmem:[%s278_s1 + $0x70] ss:$8 sps:$4 sm:$0xff]   ;;  %v12_v17 = vld [vmem:[%s279_s0] sm:$0x1] }
   0x7   :  { %112 = vmatpush1.bf16.msra.mxu0 %v189_v4 }
   0x8   :  { %113 = vmatprep.subr.bf16.mxu0 %v190_v5 }
   0xb   :  { %114 = vmatpush1.bf16.msra.mxu0 %v192_v6 }
   0xc   :  { %115 = vmatprep.subr.bf16.mxu0 %v193_v7 }
   0xf   :  { %116 = vmatpush1.bf16.msra.mxu0 %v195_v8 }
  0x10   :  { %117 = vmatprep.subr.bf16.mxu0 %v196_v9 }
  0x13   :  { %118 = vmatpush1.bf16.msra.mxu0 %v198_v10 }
  0x14   :  { %119 = vmatprep.subr.bf16.mxu0 %v199_v11 }
  0x17   :  { %120 = vmatpush1.bf16.msra.mxu0 %v201_v12 }
  0x18   :  { %121 = vmatprep.subr.bf16.mxu0 %v202_v13 }
  0x1b   :  { %122 = vmatpush1.bf16.msra.mxu0 %v204_v14 }
  0x1c   :  { %123 = vmatprep.subr.bf16.mxu0 %v205_v15 }
  0x1f   :  { %124 = vmatpush1.bf16.msra.mxu0 %v207_v16 }
  0x22   :  { %142 = vmatmul.mubr.bf16.vlgmr.msra.gmra.mrb[0].mxu0 %v12_v17 }
  0xf5   :  { %v143_v18 = vpop.f32.mrb[0].mxu0 }
  0xf6   :  { %v145_v19 = vpop.f32.mrb[1].mxu0 }
  0xf7   :  { %v152_v20 = vcombine.low %v143_v18, %v145_v19  ;;  %v147_v21 = vpop.f32.mrb[2].mxu0 }
  0xf8   :  { %v148_v22 = vpop.f32.mrb[3].mxu0 }
  0xf9   :  { %182 = vst.sshfl [vmem:[%s280_s2] sm:$0x33 pattern:$0x76325410] %v152_v20 }

// kernel: gpt_forward.3
= control target key start
LH: loop header
LB: loop body
LE: loop exit
PB: predicated region body
PF: predicated region fallthrough
CT: control target
= control target key end

     0   :  { %vm17181_vm0 = vcmask 261120   ;;  %s10920_s21 = smov 64   ;;  %s10921_s22 = smov 32   ;;  %s17143_s0 = inlined_call_operand.vmem [shape: f32[2,128,128], index: 0, kind: input, shape index: {}, may-alias: {0,13}]   ;;  %s17144_s3 = inlined_call_operand.vmem [shape: bf16[128,384], index: 3, kind: input, shape index: {}]   ;;  %s17145_s1 = inlined_call_operand.vmem [shape: f32[1,128], index: 1, kind: input, shape index: {}]   ;;  %s17146_s2 = inlined_call_operand.vmem [shape: f32[1,128], index: 2, kind: input, shape index: {}]   ;;  %s17147_s4 = inlined_call_operand.vmem [shape: f32[1,384], index: 4, kind: input, shape index: {}]   ;;  %s17148_s5 = inlined_call_operand.vmem [shape: bf16[128,128], index: 5, kind: input, shape index: {}]   ;;  %s17149_s6 = inlined_call_operand.vmem [shape: f32[1,128], index: 6, kind: input, shape index: {}]   ;;  %s17150_s9 = inlined_call_operand.vmem [shape: bf16[128,512], index: 9, kind: input, shape index: {}]   ;;  %s17151_s7 = inlined_call_operand.vmem [shape: f32[1,128], index: 7, kind: input, shape index: {}]   ;;  %s17152_s8 = inlined_call_operand.vmem [shape: f32[1,128], index: 8, kind: input, shape index: {}]   ;;  %s17153_s11 = inlined_call_operand.vmem [shape: bf16[512,128], index: 11, kind: input, shape index: {}]   ;;  %s17154_s10 = inlined_call_operand.vmem [shape: f32[1,512], index: 10, kind: input, shape index: {}]   ;;  %s17155_s12 = inlined_call_operand.vmem [shape: f32[1,128], index: 12, kind: input, shape index: {}]   ;;  %s17156_s13 = inlined_call_operand.vmem [shape: f32[2,128,128], index: 13, kind: output, shape index: {}, may-alias: {0,13}]  }
   0x1   :  { %v45_v0 = vld [vmem:[%s17143_s0] sm:$0xff]  ;;  %v47_v1 = vld [vmem:[%s17143_s0 + $0x10] sm:$0xff]  ;;  %v46_v2 = vld [vmem:[%s17143_s0 + $0x8] sm:$0xff] }
   0x2   :  { %80 = vadd.xlane.f32.xlu0 %v45_v0  ;;  %84 = vadd.xlane.f32.xlu1 %v47_v1  ;;  %v48_v3 = vld [vmem:[%s17143_s0 + $0x18] sm:$0xff]  ;;  %v49_v4 = vld [vmem:[%s17143_s0 + $0x20] sm:$0xff]  ;;  %v50_v5 = vld [vmem:[%s17143_s0 + $0x28] sm:$0xff] }
   0x3   :  { %v11013_v6 = vld [vmem:[%s17143_s0 + $0x30] sm:$0xff]  ;;  %v11018_v7 = vld [vmem:[%s17143_s0 + $0x38] sm:$0xff]  ;;  %v11025_v8 = vld [vmem:[%s17143_s0 + $0x40] sm:$0xff] }
   0x4   :  { %v11030_v9 = vld [vmem:[%s17143_s0 + $0x48] sm:$0xff]  ;;  %v11037_v10 = vld [vmem:[%s17143_s0 + $0x50] sm:$0xff]  ;;  %v11042_v11 = vld [vmem:[%s17143_s0 + $0x58] sm:$0xff] }
   0x5   :  { %v11049_v12 = vld [vmem:[%s17143_s0 + $0x60] sm:$0xff]  ;;  %v11054_v13 = vld [vmem:[%s17143_s0 + $0x68] sm:$0xff]  ;;  %v11061_v14 = vld [vmem:[%s17143_s0 + $0x70] sm:$0xff] }
   0x6   :  { %82 = vadd.xlane.f32.xlu0 %v46_v2  ;;  %86 = vadd.xlane.f32.xlu1 %v48_v3  ;;  %v11066_v15 = vld [vmem:[%s17143_s0 + $0x78] sm:$0xff]  ;;  %v9868_v16 = vld [vmem:[%s17144_s3 + $0x4] ss:$12 sps:$4 sm:$0xff]   ;;  %v9870_v17 = vld [vmem:[%s17144_s3] ss:$12 sps:$4 sm:$0xff]  }
   0x7   :  { %702 = vmatprep.subr.bf16.mxu0 %v9868_v16  ;;  %v9871_v18 = vld [vmem:[%s17144_s3 + $0x1c] ss:$12 sps:$4 sm:$0xff]   ;;  %9784 = vmatprep.subr.bf16.mxu1 %v9868_v16  ;;  %v9873_v57 = vld [vmem:[%s17144_s3 + $0x18] ss:$12 sps:$4 sm:$0xff]   ;;  %v9874_v63 = vld [vmem:[%s17144_s3 + $0x34] ss:$12 sps:$4 sm:$0xff]  }
   0x8   :  { %703 = vmatpush1.bf16.msra.mxu0 %v9870_v17  ;;  %9792 = vmatpush1.bf16.msra.mxu1 %v9870_v17  ;;  %v9877_v16 = vld [vmem:[%s17144_s3 + $0x4c] ss:$12 sps:$4 sm:$0xff]  }
   0x9   :  { %704 = vmatprep.subr.bf16.mxu0 %v9871_v18  ;;  %9785 = vmatprep.subr.bf16.mxu1 %v9871_v18 }
   0xa   :  { %88 = vadd.xlane.f32.xlu0 %v49_v4  ;;  %90 = vadd.xlane.f32.xlu1 %v50_v5 }
   0xc   :  { %705 = vmatpush1.bf16.msra.mxu0 %v9873_v57  ;;  %9793 = vmatpush1.bf16.msra.mxu1 %v9873_v57  ;;  %v11280_v57 = vld [vmem:[%s17143_s0 + $0xb0] sm:$0xff] }
   0xd   :  { %706 = vmatprep.subr.bf16.mxu0 %v9874_v63  ;;  %9786 = vmatprep.subr.bf16.mxu1 %v9874_v63 }
   0xe   :  { %92 = vadd.xlane.f32.xlu0 %v11013_v6  ;;  %94 = vadd.xlane.f32.xlu1 %v11018_v7 }
  0x12   :  { %96 = vadd.xlane.f32.xlu0 %v11025_v8  ;;  %98 = vadd.xlane.f32.xlu1 %v11030_v9 }
  0x16   :  { %100 = vadd.xlane.f32.xlu0 %v11037_v10  ;;  %102 = vadd.xlane.f32.xlu1 %v11042_v11 }
  0x1a   :  { %104 = vadd.xlane.f32.xlu0 %v11049_v12  ;;  %106 = vadd.xlane.f32.xlu1 %v11054_v13 }
  0x1e   :  { %108 = vadd.xlane.f32.xlu0 %v11061_v14  ;;  %110 = vadd.xlane.f32.xlu1 %v11066_v15 }
  0x8f   :  { %v81_v19 = vpop.xlane.xlu0 %80  ;;  %v85_v20 = vpop.xlane.xlu1 %84 }
  0x90   :  { %v145_v21 = vmul.f32 0.0078125, %v81_v19  ;;  %v147_v22 = vmul.f32 0.0078125, %v85_v20  ;;  %v9879_v19 = vld [vmem:[%s17144_s3 + $0x48] ss:$12 sps:$4 sm:$0xff]  }
  0x92   :  { %v11079_v23 = vsub.f32 %v45_v0, %v145_v21  ;;  %v11081_v24 = vsub.f32 %v47_v1, %v147_v22 }
  0x93   :  { %v83_v25 = vpop.xlane.xlu0 %82  ;;  %v87_v26 = vpop.xlane.xlu1 %86 }
  0x94   :  { %v146_v27 = vmul.f32 0.0078125, %v83_v25  ;;  %v209_v28 = vmul.f32 %v11079_v23, %v11079_v23  ;;  %v148_v29 = vmul.f32 0.0078125, %v87_v26  ;;  %v211_v30 = vmul.f32 %v11081_v24, %v11081_v24  ;;  %v9880_v26 = vld [vmem:[%s17144_s3 + $0x64] ss:$12 sps:$4 sm:$0xff]  }
  0x96   :  { %241 = vadd.xlane.f32.xlu0 %v209_v28  ;;  %v11087_v31 = vsub.f32 %v46_v2, %v146_v27  ;;  %v11089_v32 = vsub.f32 %v48_v3, %v148_v29  ;;  %v9882_v27 = vld [vmem:[%s17144_s3 + $0x60] ss:$12 sps:$4 sm:$0xff]  }
  0x97   :  { %v89_v33 = vpop.xlane.xlu0 %88  ;;  %v91_v34 = vpop.xlane.xlu1 %90  ;;  %v11180_v29 = vld [vmem:[%s17143_s0 + $0xc0] sm:$0xff] }
  0x98   :  { %v149_v35 = vmul.f32 0.0078125, %v89_v33  ;;  %v210_v36 = vmul.f32 %v11087_v31, %v11087_v31  ;;  %v150_v37 = vmul.f32 0.0078125, %v91_v34  ;;  %v212_v38 = vmul.f32 %v11089_v32, %v11089_v32  ;;  %v9886_v33 = vld [vmem:[%s17144_s3 + $0x94] ss:$12 sps:$4 sm:$0xff]   ;;  %v11192_v34 = vld [vmem:[%s17143_s0 + $0xc8] sm:$0xff] }
  0x9a   :  { %245 = vadd.xlane.f32.xlu0 %v211_v30  ;;  %243 = vadd.xlane.f32.xlu1 %v210_v36  ;;  %v11095_v39 = vsub.f32 %v49_v4, %v149_v35  ;;  %v11097_v40 = vsub.f32 %v50_v5, %v150_v37  ;;  %v9876_v5 = vld [vmem:[%s17144_s3 + $0x30] ss:$12 sps:$4 sm:$0xff]   ;;  %v9885_v30 = vld [vmem:[%s17144_s3 + $0x78] ss:$12 sps:$4 sm:$0xff]  }
  0x9b   :  { %v93_v41 = vpop.xlane.xlu0 %92  ;;  %v95_v42 = vpop.xlane.xlu1 %94  ;;  %707 = vmatpush1.bf16.msra.mxu0 %v9876_v5  ;;  %9794 = vmatpush1.bf16.msra.mxu1 %v9876_v5  ;;  %v11197_v35 = vld [vmem:[%s17143_s0 + $0xd0] sm:$0xff]  ;;  %v9889_v37 = vld [vmem:[%s17144_s3 + $0xac] ss:$12 sps:$4 sm:$0xff]  }
  0x9c   :  { %v151_v43 = vmul.f32 0.0078125, %v93_v41  ;;  %v213_v44 = vmul.f32 %v11095_v39, %v11095_v39  ;;  %v152_v45 = vmul.f32 0.0078125, %v95_v42  ;;  %v214_v46 = vmul.f32 %v11097_v40, %v11097_v40  ;;  %708 = vmatprep.subr.bf16.mxu0 %v9877_v16  ;;  %9787 = vmatprep.subr.bf16.mxu1 %v9877_v16  ;;  %v9888_v36 = vld [vmem:[%s17144_s3 + $0x90] ss:$12 sps:$4 sm:$0xff]   ;;  %v11215_v41 = vld [vmem:[%s17143_s0 + $0xe0] sm:$0xff] }
  0x9d   :  { %v9891_v42 = vld [vmem:[%s17144_s3 + $0xa8] ss:$12 sps:$4 sm:$0xff]  }
  0x9e   :  { %247 = vadd.xlane.f32.xlu1 %v212_v38  ;;  %249 = vadd.xlane.f32.xlu0 %v213_v44  ;;  %v11104_v47 = vsub.f32 %v11013_v6, %v151_v43  ;;  %v11107_v48 = vsub.f32 %v11018_v7, %v152_v45  ;;  %v11210_v38 = vld [vmem:[%s17143_s0 + $0xd8] sm:$0xff]  ;;  %v11225_v43 = vld [vmem:[%s17143_s0 + $0xe8] sm:$0xff]  ;;  %v11230_v44 = vld [vmem:[%s17143_s0 + $0xf0] sm:$0xff]  ;;  %v17160_v45 = vmov 0  }
  0x9f   :  { %v97_v49 = vpop.xlane.xlu0 %96  ;;  %v99_v50 = vpop.xlane.xlu1 %98  ;;  %709 = vmatpush1.bf16.msra.mxu0 %v9879_v19  ;;  %9795 = vmatpush1.bf16.msra.mxu1 %v9879_v19 }
  0xa0   :  { %v153_v51 = vmul.f32 0.0078125, %v97_v49  ;;  %v215_v52 = vmul.f32 %v11104_v47, %v11104_v47  ;;  %v154_v53 = vmul.f32 0.0078125, %v99_v50  ;;  %v216_v54 = vmul.f32 %v11107_v48, %v11107_v48  ;;  %710 = vmatprep.subr.bf16.mxu0 %v9880_v26  ;;  %9788 = vmatprep.subr.bf16.mxu1 %v9880_v26  ;;  %v11244_v49 = vld [vmem:[%s17143_s0 + $0x80] sm:$0xff]  ;;  %v11251_v50 = vld [vmem:[%s17143_s0 + $0x88] sm:$0xff] }
  0xa1   :  { %734 = vmatprep.mubr.bf16.mxu0 %v17160_v45  ;;  %854 = vmatprep.mubr.bf16.mxu1 %v17160_v45 }
  0xa2   :  { %251 = vadd.xlane.f32.xlu1 %v214_v46  ;;  %253 = vadd.xlane.f32.xlu0 %v215_v52  ;;  %v11114_v55 = vsub.f32 %v11025_v8, %v153_v51  ;;  %v11117_v56 = vsub.f32 %v11030_v9, %v154_v53  ;;  %v11239_v46 = vld [vmem:[%s17143_s0 + $0xf8] sm:$0xff]  ;;  %v11256_v51 = vld [vmem:[%s17143_s0 + $0x90] sm:$0xff]  ;;  %v11268_v53 = vld [vmem:[%s17143_s0 + $0xa0] sm:$0xff] }
  0xa3   :  { %v101_v58 = vpop.xlane.xlu0 %100  ;;  %v103_v59 = vpop.xlane.xlu1 %102  ;;  %711 = vmatpush1.bf16.msra.mxu0 %v9882_v27  ;;  %9796 = vmatpush1.bf16.msra.mxu1 %v9882_v27  ;;  %v11263_v52 = vld [vmem:[%s17143_s0 + $0x98] sm:$0xff] }
  0xa4   :  { %v155_v60 = vmul.f32 0.0078125, %v101_v58  ;;  %v217_v61 = vmul.f32 %v11114_v55, %v11114_v55  ;;  %v156_v62 = vmul.f32 0.0078125, %v103_v59  ;;  %v218_v0 = vmul.f32 %v11117_v56, %v11117_v56  ;;  %v11287_v58 = vld [vmem:[%s17143_s0 + $0xb8] sm:$0xff] }
  0xa6   :  { %255 = vadd.xlane.f32.xlu1 %v216_v54  ;;  %257 = vadd.xlane.f32.xlu0 %v217_v61  ;;  %v11130_v1 = vsub.f32 %v11037_v10, %v155_v60  ;;  %v11133_v2 = vsub.f32 %v11042_v11, %v156_v62  ;;  %v11275_v54 = vld [vmem:[%s17143_s0 + $0xa8] sm:$0xff] }
  0xa7   :  { %v105_v3 = vpop.xlane.xlu0 %104  ;;  %v107_v4 = vpop.xlane.xlu1 %106 }
  0xa8   :  { %v157_v6 = vmul.f32 0.0078125, %v105_v3  ;;  %v219_v7 = vmul.f32 %v11130_v1, %v11130_v1  ;;  %v158_v8 = vmul.f32 0.0078125, %v107_v4  ;;  %v220_v9 = vmul.f32 %v11133_v2, %v11133_v2 }
  0xaa   :  { %259 = vadd.xlane.f32.xlu1 %v218_v0  ;;  %261 = vadd.xlane.f32.xlu0 %v219_v7  ;;  %v11143_v10 = vsub.f32 %v11049_v12, %v157_v6  ;;  %v11146_v11 = vsub.f32 %v11054_v13, %v158_v8 }
  0xab   :  { %v109_v17 = vpop.xlane.xlu0 %108  ;;  %v111_v18 = vpop.xlane.xlu1 %110 }
  0xac   :  { %v159_v20 = vmul.f32 0.0078125, %v109_v17  ;;  %v221_v21 = vmul.f32 %v11143_v10, %v11143_v10  ;;  %v160_v22 = vmul.f32 0.0078125, %v111_v18  ;;  %v222_v12 = vmul.f32 %v11146_v11, %v11146_v11 }
  0xae   :  { %263 = vadd.xlane.f32.xlu1 %v220_v9  ;;  %265 = vadd.xlane.f32.xlu0 %v221_v21  ;;  %v11159_v13 = vsub.f32 %v11061_v14, %v159_v20  ;;  %v11162_v25 = vsub.f32 %v11066_v15, %v160_v22  ;;  %v9883_v15 = vld [vmem:[%s17144_s3 + $0x7c] ss:$12 sps:$4 sm:$0xff]  }
  0xaf   :  { %712 = vmatprep.subr.bf16.mxu0 %v9883_v15  ;;  %9789 = vmatprep.subr.bf16.mxu1 %v9883_v15 }
  0xb0   :  { %v223_v28 = vmul.f32 %v11159_v13, %v11159_v13  ;;  %v224_v14 = vmul.f32 %v11162_v25, %v11162_v25  ;;  %713 = vmatpush1.bf16.msra.mxu0 %v9885_v30  ;;  %9797 = vmatpush1.bf16.msra.mxu1 %v9885_v30 }
  0xb1   :  { %714 = vmatprep.subr.bf16.mxu0 %v9886_v33  ;;  %9790 = vmatprep.subr.bf16.mxu1 %v9886_v33 }
  0xb2   :  { %267 = vadd.xlane.f32.xlu1 %v222_v12  ;;  %269 = vadd.xlane.f32.xlu0 %v223_v28 }
  0xb4   :  { %715 = vmatpush1.bf16.msra.mxu0 %v9888_v36  ;;  %9798 = vmatpush1.bf16.msra.mxu1 %v9888_v36 }
  0xb5   :  { %716 = vmatprep.subr.bf16.mxu0 %v9889_v37  ;;  %9791 = vmatprep.subr.bf16.mxu1 %v9889_v37 }
  0xb6   :  { %271 = vadd.xlane.f32.xlu1 %v224_v14  ;;  %128 = vadd.xlane.f32.xlu0 %v11180_v29  ;;  %v11294_v14 = vld [vmem:[%s17145_s1] ss:$0 sm:$0xff] }
  0xb8   :  { %717 = vmatpush1.bf16.msra.mxu0 %v9891_v42  ;;  %9799 = vmatpush1.bf16.msra.mxu1 %v9891_v42 }
  0xba   :  { %130 = vadd.xlane.f32.xlu1 %v11192_v34  ;;  %132 = vadd.xlane.f32.xlu0 %v11197_v35 }
  0xbe   :  { %134 = vadd.xlane.f32.xlu1 %v11210_v38  ;;  %136 = vadd.xlane.f32.xlu0 %v11215_v41 }
  0xc2   :  { %138 = vadd.xlane.f32.xlu1 %v11225_v43  ;;  %140 = vadd.xlane.f32.xlu0 %v11230_v44 }
  0xc6   :  { %142 = vadd.xlane.f32.xlu1 %v11239_v46  ;;  %112 = vadd.xlane.f32.xlu0 %v11244_v49 }
  0xca   :  { %114 = vadd.xlane.f32.xlu1 %v11251_v50  ;;  %116 = vadd.xlane.f32.xlu0 %v11256_v51 }
  0xce   :  { %118 = vadd.xlane.f32.xlu1 %v11263_v52  ;;  %120 = vadd.xlane.f32.xlu0 %v11268_v53 }
  0xd2   :  { %122 = vadd.xlane.f32.xlu1 %v11275_v54  ;;  %124 = vadd.xlane.f32.xlu0 %v11280_v57 }
  0xd6   :  { %126 = vadd.xlane.f32.xlu1 %v11287_v58 }
 0x123   :  { %v242_v59 = vpop.xlane.xlu0 %241 }
 0x124   :  { %v305_v60 = vmul.f32 0.0078125, %v242_v59 }
 0x126   :  { %v337_v61 = vadd.f32 1e-05, %v305_v60 }
 0x127   :  { %v244_v62 = vpop.xlane.xlu1 %243  ;;  %v246_v63 = vpop.xlane.xlu0 %245 }
 0x128   :  { %9988 = vrsqrt.f32 %v337_v61  ;;  %v306_v0 = vmul.f32 0.0078125, %v244_v62  ;;  %v307_v3 = vmul.f32 0.0078125, %v246_v63 }
 0x12a   :  { %v338_v4 = vadd.f32 1e-05, %v306_v0  ;;  %v339_v5 = vadd.f32 1e-05, %v307_v3 }
 0x12b   :  { %v248_v6 = vpop.xlane.xlu1 %247  ;;  %v250_v7 = vpop.xlane.xlu0 %249 }
 0x12c   :  { %9990 = vrsqrt.f32 %v338_v4  ;;  %v308_v8 = vmul.f32 0.0078125, %v248_v6  ;;  %v309_v16 = vmul.f32 0.0078125, %v250_v7 }
 0x12d   :  { %9992 = vrsqrt.f32 %v339_v5 }
 0x12e   :  { %v340_v9 = vadd.f32 1e-05, %v308_v8  ;;  %v341_v21 = vadd.f32 1e-05, %v309_v16 }
 0x12f   :  { %v252_v17 = vpop.xlane.xlu1 %251  ;;  %v254_v18 = vpop.xlane.xlu0 %253 }
 0x130   :  { %9994 = vrsqrt.f32 %v340_v9  ;;  %v310_v19 = vmul.f32 0.0078125, %v252_v17  ;;  %v311_v30 = vmul.f32 0.0078125, %v254_v18 }
 0x132   :  { %v9989_v20 = vpop.eup %9988  ;;  %v342_v22 = vadd.f32 1e-05, %v310_v19  ;;  %v343_v63 = vadd.f32 1e-05, %v311_v30 }
 0x133   :  { %v256_v12 = vpop.xlane.xlu1 %255  ;;  %v258_v26 = vpop.xlane.xlu0 %257  ;;  %v401_v27 = vmul.f32 %v9989_v20, %v11079_v23  ;;  %v11301_v23 = vld [vmem:[%s17146_s2] ss:$0 sm:$0xff] }
 0x134   :  { %9996 = vrsqrt.f32 %v342_v22  ;;  %v312_v28 = vmul.f32 0.0078125, %v256_v12  ;;  %v313_v17 = vmul.f32 0.0078125, %v258_v26 }
 0x135   :  { %9998 = vrsqrt.f32 %v341_v21  ;;  %v439_v42 = vmul.f32 %v11294_v14, %v401_v27 }
 0x136   :  { %v9991_v15 = vpop.eup %9990  ;;  %v344_v60 = vadd.f32 1e-05, %v312_v28  ;;  %v345_v12 = vadd.f32 1e-05, %v313_v17 }
 0x137   :  { %v260_v33 = vpop.xlane.xlu1 %259  ;;  %v262_v36 = vpop.xlane.xlu0 %261  ;;  %v402_v37 = vmul.f32 %v9991_v15, %v11087_v31  ;;  %v477_v4 = vadd.f32 %v11301_v23, %v439_v42 }
 0x138   :  { %v9993_v59 = vpop.eup %9992  ;;  %10000 = vrsqrt.f32 %v344_v60  ;;  %v314_v7 = vmul.f32 0.0078125, %v260_v33  ;;  %v315_v60 = vmul.f32 0.0078125, %v262_v36 }
 0x139   :  { %v440_v61 = vmul.f32 %v11294_v14, %v402_v37  ;;  %v403_v5 = vmul.f32 %v9993_v59, %v11081_v24  ;;  %10002 = vrsqrt.f32 %v343_v63 }
 0x13a   :  { %v9995_v62 = vpop.eup %9994  ;;  %v346_v24 = vadd.f32 1e-05, %v314_v7 }
 0x13b   :  { %v264_v0 = vpop.xlane.xlu1 %263  ;;  %v11304_v3 = vpop.xlane.xlu0 %265  ;;  %v478_v31 = vadd.f32 %v11301_v23, %v440_v61  ;;  %v404_v6 = vmul.f32 %v9995_v62, %v11089_v32  ;;  %v441_v20 = vmul.f32 %v11294_v14, %v403_v5 }
 0x13c   :  { %v316_v27 = vmul.f32 0.0078125, %v264_v0  ;;  %10004 = vrsqrt.f32 %v346_v24 }
 0x13d   :  { %v11310_v8 = vpack.c.bf16 %v478_v31, %v477_v4  ;;  %v442_v9 = vmul.f32 %v11294_v14, %v404_v6  ;;  %v479_v15 = vadd.f32 %v11301_v23, %v441_v20  ;;  %10006 = vrsqrt.f32 %v345_v12 }
 0x13e   :  { %v9997_v16 = vpop.eup %9996  ;;  %v348_v61 = vadd.f32 1e-05, %v316_v27  ;;  %v347_v6 = vadd.f32 1e-05, %v315_v60 }
 0x13f   :  { %v268_v18 = vpop.xlane.xlu1 %267  ;;  %735 = vmatmul.mubr.bf16.vlgmr.msra.gmra.mrb[0].mxu0 %v11310_v8  ;;  %v11314_v19 = vpop.xlane.xlu0 %269  ;;  %v480_v32 = vadd.f32 %v11301_v23, %v442_v9  ;;  %v406_v22 = vmul.f32 %v9997_v16, %v11097_v40 }
 0x140   :  { %v9999_v21 = vpop.eup %9998  ;;  %744 = vmatprep.mubr.bf16.mxu0 %v17160_v45  ;;  %10008 = vrsqrt.f32 %v348_v61  ;;  %v318_v16 = vmul.f32 0.0078125, %v268_v18  ;;  %v317_v18 = vmul.f32 0.0078125, %v11304_v3 }
 0x141   :  { %v405_v30 = vmul.f32 %v9999_v21, %v11095_v39  ;;  %v11324_v37 = vpack.c.bf16 %v480_v32, %v479_v15  ;;  %v444_v42 = vmul.f32 %v11294_v14, %v406_v22  ;;  %10010 = vrsqrt.f32 %v347_v6 }
 0x142   :  { %v10001_v59 = vpop.eup %10000  ;;  %v350_v15 = vadd.f32 1e-05, %v318_v16 }
 0x143   :  { %v11320_v28 = vpop.xlane.xlu1 %271  ;;  %v129_v26 = vpop.xlane.xlu0 %128  ;;  %v443_v0 = vmul.f32 %v11294_v14, %v405_v30  ;;  %v482_v36 = vadd.f32 %v11301_v23, %v444_v42 }
 0x144   :  { %v169_v33 = vmul.f32 0.0078125, %v129_v26  ;;  %v10003_v39 = vpop.eup %10002  ;;  %10012 = vrsqrt.f32 %v350_v15 }
 0x145   :  { %v481_v21 = vadd.f32 %v11301_v23, %v443_v0  ;;  %v407_v24 = vmul.f32 %v10003_v39, %v11104_v47 }
 0x146   :  { %v11328_v40 = vsub.f32 %v11180_v29, %v169_v33  ;;  %v408_v29 = vmul.f32 %v10001_v59, %v11107_v48  ;;  %v10005_v27 = vpop.eup %10004 }
 0x147   :  { %v131_v62 = vpop.xlane.xlu1 %130  ;;  %745 = vmatmul.mubr.bf16.gmra.mrb[4].mxu0 %v11324_v37  ;;  %v133_v63 = vpop.xlane.xlu0 %132  ;;  %v11349_v12 = vpack.c.bf16 %v482_v36, %v481_v21  ;;  %v445_v42 = vmul.f32 %v11294_v14, %v407_v24 }
 0x148   :  { %v170_v4 = vmul.f32 0.0078125, %v131_v62  ;;  %v171_v31 = vmul.f32 0.0078125, %v133_v63  ;;  %v233_v5 = vmul.f32 %v11328_v40, %v11328_v40  ;;  %754 = vmatprep.mubr.bf16.mxu0 %v17160_v45  ;;  %v10007_v59 = vpop.eup %10006  ;;  %v410_v62 = vmul.f32 %v10005_v27, %v11117_v56 }
 0x149   :  { %v349_v63 = vadd.f32 1e-05, %v317_v18  ;;  %v483_v36 = vadd.f32 %v11301_v23, %v445_v42 }
 0x14a   :  { %289 = vadd.xlane.f32.xlu0 %v233_v5  ;;  %v11338_v7 = vsub.f32 %v11192_v34, %v170_v4  ;;  %v11341_v9 = vsub.f32 %v11197_v35, %v171_v31  ;;  %v446_v35 = vmul.f32 %v11294_v14, %v408_v29  ;;  %v320_v4 = vmul.f32 0.0078125, %v11320_v28 }
 0x14b   :  { %v135_v17 = vpop.xlane.xlu1 %134  ;;  %v137_v20 = vpop.xlane.xlu0 %136  ;;  %v409_v29 = vmul.f32 %v10007_v59, %v11114_v55  ;;  %10014 = vrsqrt.f32 %v349_v63  ;;  %v319_v28 = vmul.f32 0.0078125, %v11314_v19 }
 0x14c   :  { %v172_v32 = vmul.f32 0.0078125, %v135_v17  ;;  %v173_v22 = vmul.f32 0.0078125, %v137_v20  ;;  %v234_v48 = vmul.f32 %v11338_v7, %v11338_v7  ;;  %v235_v34 = vmul.f32 %v11341_v9, %v11341_v9  ;;  %v10009_v17 = vpop.eup %10008 }
 0x14d   :  { %v448_v20 = vmul.f32 %v11294_v14, %v410_v62  ;;  %v352_v24 = vadd.f32 1e-05, %v320_v4  ;;  %v412_v18 = vmul.f32 %v10009_v17, %v11133_v2  ;;  %v351_v15 = vadd.f32 1e-05, %v319_v28 }
 0x14e   :  { %291 = vadd.xlane.f32.xlu1 %v234_v48  ;;  %293 = vadd.xlane.f32.xlu0 %v235_v34  ;;  %v11354_v47 = vsub.f32 %v11210_v38, %v172_v32  ;;  %v11357_v26 = vsub.f32 %v11215_v41, %v173_v22  ;;  %v484_v41 = vadd.f32 %v11301_v23, %v446_v35  ;;  %v10011_v34 = vpop.eup %10010 }
 0x14f   :  { %v139_v30 = vpop.xlane.xlu1 %138  ;;  %755 = vmatmul.mubr.bf16.gmra.mrb[8].mxu0 %v11349_v12  ;;  %v141_v33 = vpop.xlane.xlu0 %140  ;;  %v447_v48 = vmul.f32 %v11294_v14, %v409_v29  ;;  %10016 = vrsqrt.f32 %v352_v24 }
 0x150   :  { %v174_v60 = vmul.f32 0.0078125, %v139_v30  ;;  %v175_v61 = vmul.f32 0.0078125, %v141_v33  ;;  %v236_v3 = vmul.f32 %v11354_v47, %v11354_v47  ;;  %v237_v38 = vmul.f32 %v11357_v26, %v11357_v26  ;;  %764 = vmatprep.mubr.bf16.mxu0 %v17160_v45 }
 0x151   :  { %10018 = vrsqrt.f32 %v351_v15 }
 0x152   :  { %295 = vadd.xlane.f32.xlu1 %v236_v3  ;;  %297 = vadd.xlane.f32.xlu0 %v237_v38  ;;  %v11369_v0 = vsub.f32 %v11225_v43, %v174_v60  ;;  %v11372_v39 = vsub.f32 %v11230_v44, %v175_v61  ;;  %v11381_v44 = vpack.c.bf16 %v484_v41, %v483_v36 }
 0x153   :  { %v143_v31 = vpop.xlane.xlu1 %142  ;;  %v113_v5 = vpop.xlane.xlu0 %112  ;;  %v485_v60 = vadd.f32 %v11301_v23, %v447_v48  ;;  %v411_v61 = vmul.f32 %v10011_v34, %v11130_v1 }
 0x154   :  { %v176_v6 = vmul.f32 0.0078125, %v143_v31  ;;  %v161_v56 = vmul.f32 0.0078125, %v113_v5  ;;  %v238_v16 = vmul.f32 %v11369_v0, %v11369_v0  ;;  %v239_v43 = vmul.f32 %v11372_v39, %v11372_v39 }
 0x155   :  { %v449_v5 = vmul.f32 %v11294_v14, %v411_v61 }
 0x156   :  { %299 = vadd.xlane.f32.xlu1 %v238_v16  ;;  %301 = vadd.xlane.f32.xlu0 %v239_v43  ;;  %v11386_v55 = vsub.f32 %v11239_v46, %v176_v6  ;;  %v11389_v21 = vsub.f32 %v11244_v49, %v161_v56  ;;  %v486_v49 = vadd.f32 %v11301_v23, %v448_v20 }
 0x157   :  { %v115_v32 = vpop.xlane.xlu1 %114  ;;  %765 = vmatmul.mubr.bf16.gmra.mrb[12].mxu0 %v11381_v44  ;;  %v117_v22 = vpop.xlane.xlu0 %116  ;;  %v487_v28 = vadd.f32 %v11301_v23, %v449_v5 }
 0x158   :  { %v162_v35 = vmul.f32 0.0078125, %v115_v32  ;;  %v163_v27 = vmul.f32 0.0078125, %v117_v22  ;;  %v240_v19 = vmul.f32 %v11386_v55, %v11386_v55  ;;  %v225_v46 = vmul.f32 %v11389_v21, %v11389_v21  ;;  %774 = vmatprep.mubr.bf16.mxu0 %v17160_v45 }
 0x159   :  { %v11412_v62 = vpack.c.bf16 %v486_v49, %v485_v60 }
 0x15a   :  { %303 = vadd.xlane.f32.xlu1 %v240_v19  ;;  %273 = vadd.xlane.f32.xlu0 %v225_v46  ;;  %v11401_v30 = vsub.f32 %v11251_v50, %v162_v35  ;;  %v11404_v33 = vsub.f32 %v11256_v51, %v163_v27  ;;  %v10013_v50 = vpop.eup %10012  ;;  %v450_v51 = vmul.f32 %v11294_v14, %v412_v18 }
 0x15b   :  { %v119_v42 = vpop.xlane.xlu1 %118  ;;  %v121_v59 = vpop.xlane.xlu0 %120 }
 0x15c   :  { %v164_v3 = vmul.f32 0.0078125, %v119_v42  ;;  %v165_v38 = vmul.f32 0.0078125, %v121_v59  ;;  %v226_v2 = vmul.f32 %v11401_v30, %v11401_v30  ;;  %v227_v41 = vmul.f32 %v11404_v33, %v11404_v33  ;;  %v10015_v36 = vpop.eup %10014 }
 0x15d   :  { %v413_v24 = vmul.f32 %v10015_v36, %v11143_v10  ;;  %v10017_v48 = vpop.eup %10016 }
 0x15e   :  { %275 = vadd.xlane.f32.xlu1 %v226_v2  ;;  %277 = vadd.xlane.f32.xlu0 %v227_v41  ;;  %v11416_v63 = vsub.f32 %v11263_v52, %v164_v3  ;;  %v11419_v1 = vsub.f32 %v11268_v53, %v165_v38  ;;  %v488_v52 = vadd.f32 %v11301_v23, %v450_v51  ;;  %v10019_v35 = vpop.eup %10018 }
 0x15f   :  { %v123_v4 = vpop.xlane.xlu1 %122  ;;  %775 = vmatmul.mubr.bf16.gmra.mrb[16].mxu0 %v11412_v62  ;;  %v125_v31 = vpop.xlane.xlu0 %124  ;;  %v414_v53 = vmul.f32 %v10013_v50, %v11146_v11  ;;  %v451_v10 = vmul.f32 %v11294_v14, %v413_v24  ;;  %v416_v46 = vmul.f32 %v10017_v48, %v11162_v25  ;;  %v11468_v25 = vld [vmem:[%s17144_s3 + $0x8] ss:$12 sps:$4 sm:$0xff]  }
 0x160   :  { %v166_v29 = vmul.f32 0.0078125, %v123_v4  ;;  %v167_v6 = vmul.f32 0.0078125, %v125_v31  ;;  %v228_v56 = vmul.f32 %v11416_v63, %v11416_v63  ;;  %v229_v16 = vmul.f32 %v11419_v1, %v11419_v1  ;;  %784 = vmatprep.mubr.bf16.mxu0 %v17160_v45  ;;  %9176 = vmatprep.subr.bf16.mxu1 %v11468_v25 }
 0x161   :  { %v11442_v34 = vpack.c.bf16 %v488_v52, %v487_v28  ;;  %v489_v49 = vadd.f32 %v11301_v23, %v451_v10  ;;  %v454_v15 = vmul.f32 %v11294_v14, %v416_v46 }
 0x162   :  { %279 = vadd.xlane.f32.xlu1 %v228_v56  ;;  %281 = vadd.xlane.f32.xlu0 %v229_v16  ;;  %v11431_v43 = vsub.f32 %v11275_v54, %v166_v29  ;;  %v11434_v17 = vsub.f32 %v11280_v57, %v167_v6  ;;  %v452_v54 = vmul.f32 %v11294_v14, %v414_v53 }
 0x163   :  { %v127_v20 = vpop.xlane.xlu1 %126  ;;  %v492_v59 = vadd.f32 %v11301_v23, %v454_v15 }
 0x164   :  { %v168_v32 = vmul.f32 0.0078125, %v127_v20  ;;  %v230_v22 = vmul.f32 %v11431_v43, %v11431_v43  ;;  %v231_v11 = vmul.f32 %v11434_v17, %v11434_v17  ;;  %v490_v19 = vadd.f32 %v11301_v23, %v452_v54 }
 0x166   :  { %283 = vadd.xlane.f32.xlu1 %v230_v22  ;;  %285 = vadd.xlane.f32.xlu0 %v231_v11  ;;  %v11446_v57 = vsub.f32 %v11287_v58, %v168_v32  ;;  %v415_v58 = vmul.f32 %v10019_v35, %v11159_v13  ;;  %v11457_v18 = vpack.c.bf16 %v490_v19, %v489_v49 }
 0x167   :  { %785 = vmatmul.mubr.bf16.gmra.mrb[20].mxu0 %v11442_v34 }
 0x168   :  { %v232_v27 = vmul.f32 %v11446_v57, %v11446_v57  ;;  %794 = vmatprep.mubr.bf16.mxu0 %v17160_v45  ;;  %v453_v42 = vmul.f32 %v11294_v14, %v415_v58 }
 0x16a   :  { %287 = vadd.xlane.f32.xlu1 %v232_v27  ;;  %v491_v60 = vadd.f32 %v11301_v23, %v453_v42 }
 0x16c   :  { %v11470_v13 = vpack.c.bf16 %v492_v59, %v491_v60 }
 0x16f   :  { %795 = vmatmul.mubr.bf16.gmra.mrb[24].mxu0 %v11457_v18 }
 0x170   :  { %804 = vmatprep.mubr.bf16.mxu0 %v17160_v45 }
 0x177   :  { %805 = vmatmul.mubr.bf16.gmra.mrb[28].mxu0 %v11470_v13 }
 0x178   :  { %814 = vmatprep.mubr.bf16.mxu0 %v17160_v45 }
 0x1d7   :  { %v290_v61 = vpop.xlane.xlu0 %289 }
 0x1d8   :  { %v329_v3 = vmul.f32 0.0078125, %v290_v61 }
 0x1da   :  { %v361_v38 = vadd.f32 1e-05, %v329_v3 }
 0x1db   :  { %v292_v2 = vpop.xlane.xlu1 %291  ;;  %v294_v41 = vpop.xlane.xlu0 %293 }
 0x1dc   :  { %10020 = vrsqrt.f32 %v361_v38  ;;  %v330_v50 = vmul.f32 0.0078125, %v292_v2  ;;  %v331_v51 = vmul.f32 0.0078125, %v294_v41 }
 0x1de   :  { %v362_v4 = vadd.f32 1e-05, %v330_v50  ;;  %v363_v31 = vadd.f32 1e-05, %v331_v51 }
 0x1df   :  { %v296_v5 = vpop.xlane.xlu1 %295  ;;  %v298_v36 = vpop.xlane.xlu0 %297 }
 0x1e0   :  { %10022 = vrsqrt.f32 %v362_v4  ;;  %v332_v29 = vmul.f32 0.0078125, %v296_v5  ;;  %v333_v6 = vmul.f32 0.0078125, %v298_v36 }
 0x1e1   :  { %10024 = vrsqrt.f32 %v363_v31 }
 0x1e2   :  { %v364_v56 = vadd.f32 1e-05, %v332_v29  ;;  %v365_v20 = vadd.f32 1e-05, %v333_v6  ;;  %v9893_v29 = vld [vmem:[%s17144_s3 + $0x20] ss:$12 sps:$4 sm:$0xff]  }
 0x1e3   :  { %v300_v16 = vpop.xlane.xlu1 %299  ;;  %v302_v52 = vpop.xlane.xlu0 %301 }
 0x1e4   :  { %10026 = vrsqrt.f32 %v364_v56  ;;  %v334_v53 = vmul.f32 0.0078125, %v300_v16  ;;  %v335_v10 = vmul.f32 0.0078125, %v302_v52 }
 0x1e6   :  { %v10021_v28 = vpop.eup %10020  ;;  %v366_v24 = vadd.f32 1e-05, %v334_v53  ;;  %v367_v61 = vadd.f32 1e-05, %v335_v10 }
 0x1e7   :  { %v304_v32 = vpop.xlane.xlu1 %303  ;;  %v274_v22 = vpop.xlane.xlu0 %273  ;;  %v425_v11 = vmul.f32 %v10021_v28, %v11328_v40 }
 0x1e8   :  { %10028 = vrsqrt.f32 %v366_v24  ;;  %v336_v48 = vmul.f32 0.0078125, %v304_v32  ;;  %v321_v54 = vmul.f32 0.0078125, %v274_v22  ;;  %v9894_v24 = vld [vmem:[%s17144_s3 + $0x38] ss:$12 sps:$4 sm:$0xff]  }
 0x1e9   :  { %10030 = vrsqrt.f32 %v365_v20  ;;  %v463_v19 = vmul.f32 %v11294_v14, %v425_v11 }
 0x1ea   :  { %v10023_v35 = vpop.eup %10022  ;;  %v353_v27 = vadd.f32 1e-05, %v321_v54  ;;  %v368_v46 = vadd.f32 1e-05, %v336_v48 }
 0x1eb   :  { %v276_v49 = vpop.xlane.xlu1 %275  ;;  %v278_v58 = vpop.xlane.xlu0 %277  ;;  %v426_v15 = vmul.f32 %v10023_v35, %v11338_v7  ;;  %v501_v41 = vadd.f32 %v11301_v23, %v463_v19 }
 0x1ec   :  { %v10025_v42 = vpop.eup %10024  ;;  %v322_v59 = vmul.f32 0.0078125, %v276_v49  ;;  %v323_v60 = vmul.f32 0.0078125, %v278_v58  ;;  %10032 = vrsqrt.f32 %v353_v27 }
 0x1ed   :  { %v464_v40 = vmul.f32 %v11294_v14, %v426_v15  ;;  %10034 = vrsqrt.f32 %v368_v46  ;;  %v427_v31 = vmul.f32 %v10025_v42, %v11341_v9 }
 0x1ee   :  { %v10027_v3 = vpop.eup %10026  ;;  %v354_v38 = vadd.f32 1e-05, %v322_v59  ;;  %v355_v2 = vadd.f32 1e-05, %v323_v60 }
 0x1ef   :  { %v280_v50 = vpop.xlane.xlu1 %279  ;;  %v282_v51 = vpop.xlane.xlu0 %281  ;;  %v502_v4 = vadd.f32 %v11301_v23, %v464_v40  ;;  %v428_v7 = vmul.f32 %v10027_v3, %v11354_v47  ;;  %v465_v9 = vmul.f32 %v11294_v14, %v427_v31 }
 0x1f0   :  { %10036 = vrsqrt.f32 %v354_v38  ;;  %v324_v5 = vmul.f32 0.0078125, %v280_v50  ;;  %v325_v52 = vmul.f32 0.0078125, %v282_v51 }
 0x1f1   :  { %10038 = vrsqrt.f32 %v367_v61  ;;  %v11483_v36 = vpack.c.bf16 %v502_v4, %v501_v41  ;;  %v466_v6 = vmul.f32 %v11294_v14, %v428_v7 }
 0x1f2   :  { %v10029_v56 = vpop.eup %10028  ;;  %10040 = vrsqrt.f32 %v355_v2  ;;  %v356_v16 = vadd.f32 1e-05, %v324_v5  ;;  %v357_v22 = vadd.f32 1e-05, %v325_v52  ;;  %v9896_v2 = vld [vmem:[%s17144_s3 + $0x68] ss:$12 sps:$4 sm:$0xff]  }
 0x1f3   :  { %v10031_v53 = vpop.eup %10030  ;;  %v284_v20 = vpop.xlane.xlu1 %283  ;;  %855 = vmatmul.mubr.bf16.vlgmr.msra.gmra.mrb[0].mxu1 %v11483_v36  ;;  %v504_v28 = vadd.f32 %v11301_v23, %v466_v6  ;;  %v430_v32 = vmul.f32 %v10029_v56, %v11369_v0  ;;  %v9895_v0 = vld [vmem:[%s17144_s3 + $0x50] ss:$12 sps:$4 sm:$0xff]  }
 0x1f4   :  { %10042 = vrsqrt.f32 %v356_v16  ;;  %v326_v47 = vmul.f32 0.0078125, %v284_v20  ;;  %9177 = vmatpush3.bf16.msra.mxu1 %v11468_v25  ;;  %864 = vmatprep.mubr.bf16.mxu1 %v17160_v45  ;;  %v429_v48 = vmul.f32 %v10031_v53, %v11357_v26  ;;  %v286_v10 = vpop.xlane.xlu0 %285  ;;  %v503_v25 = vadd.f32 %v11301_v23, %v465_v9 }
 0x1f5   :  { %9178 = vmatprep.subr.bf16.mxu1 %v9893_v29  ;;  %v468_v26 = vmul.f32 %v11294_v14, %v430_v32  ;;  %v327_v15 = vmul.f32 0.0078125, %v286_v10  ;;  %v9899_v10 = vld [vmem:[%s17144_s3 + $0xb0] ss:$12 sps:$4 sm:$0xff]  }
 0x1f6   :  { %v358_v11 = vadd.f32 1e-05, %v326_v47  ;;  %v10033_v54 = vpop.eup %10032  ;;  %v11501_v49 = vpack.c.bf16 %v504_v28, %v503_v25  ;;  %v467_v42 = vmul.f32 %v11294_v14, %v429_v48  ;;  %v9898_v47 = vld [vmem:[%s17144_s3 + $0x98] ss:$12 sps:$4 sm:$0xff]   ;;  %v559_v28 = vlaneseq }
 0x1f7   :  { %v288_v35 = vpop.xlane.xlu1 %287  ;;  %v417_v19 = vmul.f32 %v10033_v54, %v11389_v21  ;;  %v10035_v46 = vpop.eup %10034  ;;  %v506_v38 = vadd.f32 %v11301_v23, %v468_v26  ;;  %v11570_v26 = vld [vmem:[%s17147_s4] sm:$0x7]  ;;  %s10919_s4 = smov 96  }
 0x1f8   :  { %10044 = vrsqrt.f32 %v358_v11  ;;  %v328_v27 = vmul.f32 0.0078125, %v288_v35  ;;  %9179 = vmatpush3.bf16.msra.mxu1 %v9893_v29  ;;  %v432_v41 = vmul.f32 %v10035_v46, %v11386_v55  ;;  %v505_v51 = vadd.f32 %v11301_v23, %v467_v42  ;;  %v9897_v55 = vld [vmem:[%s17144_s3 + $0x80] ss:$12 sps:$4 sm:$0xff]  }
 0x1f9   :  { %9180 = vmatprep.subr.bf16.mxu1 %v9894_v24  ;;  %10046 = vrsqrt.f32 %v357_v22  ;;  %v455_v60 = vmul.f32 %v11294_v14, %v417_v19  ;;  %v11556_v35 = vshrl.u32 %v559_v28, 7 }
 0x1fa   :  { %v10037_v58 = vpop.eup %10036  ;;  %v360_v40 = vadd.f32 1e-05, %v328_v27  ;;  %v11526_v56 = vpack.c.bf16 %v506_v38, %v505_v51  ;;  %v470_v16 = vmul.f32 %v11294_v14, %v432_v41 }
 0x1fb   :  { %v10039_v59 = vpop.eup %10038  ;;  %865 = vmatmul.mubr.bf16.gmra.mrb[4].mxu1 %v11501_v49  ;;  %v418_v21 = vmul.f32 %v10037_v58, %v11401_v30  ;;  %v359_v30 = vadd.f32 1e-05, %v327_v15  ;;  %v493_v31 = vadd.f32 %v11301_v23, %v455_v60  ;;  %17457 = vst [vmem:[#allocation2_spill] sm:$0xff] %v11556_v35  ;;  %v17159_v19 = vsub.s32 0, %v11556_v35 }
 0x1fc   :  { %v10041_v61 = vpop.eup %10040  ;;  %9181 = vmatpush3.bf16.msra.mxu1 %v9894_v24  ;;  %874 = vmatprep.mubr.bf16.mxu1 %v17160_v45  ;;  %v431_v4 = vmul.f32 %v10039_v59, %v11372_v39  ;;  %10048 = vrsqrt.f32 %v360_v40  ;;  %v508_v9 = vadd.f32 %v11301_v23, %v470_v16  ;;  %v17157_v58 = vsub.s32 1, %v11556_v35 }
 0x1fd   :  { %9182 = vmatprep.subr.bf16.mxu1 %v9895_v0  ;;  %v456_v3 = vmul.f32 %v11294_v14, %v418_v21  ;;  %v419_v5 = vmul.f32 %v10041_v61, %v11404_v33  ;;  %10050 = vrsqrt.f32 %v359_v30  ;;  %v11578_v42 = vrot.slane %v11570_v26, %v17159_v19 }
 0x1fe   :  { %v10043_v50 = vpop.eup %10042  ;;  %v11586_v60 = vrot.slane %v11570_v26, %v17157_v58 }
 0x1ff   :  { %v494_v7 = vadd.f32 %v11301_v23, %v456_v3  ;;  %v420_v29 = vmul.f32 %v10043_v50, %v11416_v63  ;;  %v457_v33 = vmul.f32 %v11294_v14, %v419_v5  ;;  %v469_v63 = vmul.f32 %v11294_v14, %v431_v4 }
 0x200   :  { %9183 = vmatpush3.bf16.msra.mxu1 %v9895_v0 }
 0x201   :  { %v11524_v6 = vpack.c.bf16 %v494_v7, %v493_v31  ;;  %9184 = vmatprep.subr.bf16.mxu1 %v9896_v2  ;;  %v458_v39 = vmul.f32 %v11294_v14, %v420_v29  ;;  %v495_v32 = vadd.f32 %v11301_v23, %v457_v33  ;;  %v507_v22 = vadd.f32 %v11301_v23, %v469_v63 }
 0x202   :  { %v10045_v52 = vpop.eup %10044 }
 0x203   :  { %815 = vmatmul.mubr.bf16.gmra.mrb[32].mxu0 %v11524_v6  ;;  %875 = vmatmul.mubr.bf16.gmra.mrb[8].mxu1 %v11526_v56  ;;  %v10047_v53 = vpop.eup %10046  ;;  %v496_v20 = vadd.f32 %v11301_v23, %v458_v39  ;;  %v422_v24 = vmul.f32 %v10045_v52, %v11431_v43  ;;  %v11550_v54 = vpack.c.bf16 %v508_v9, %v507_v22 }
 0x204   :  { %9185 = vmatpush3.bf16.msra.mxu1 %v9896_v2  ;;  %824 = vmatprep.mubr.bf16.mxu0 %v17160_v45  ;;  %v421_v11 = vmul.f32 %v10047_v53, %v11419_v1 }
 0x205   :  { %9186 = vmatprep.subr.bf16.mxu1 %v9897_v55  ;;  %884 = vmatprep.mubr.bf16.mxu1 %v17160_v45  ;;  %v11548_v48 = vpack.c.bf16 %v496_v20, %v495_v32  ;;  %v460_v43 = vmul.f32 %v11294_v14, %v422_v24 }
 0x206   :  { %v10049_v25 = vpop.eup %10048  ;;  %v459_v1 = vmul.f32 %v11294_v14, %v421_v11 }
 0x207   :  { %v10051_v27 = vpop.eup %10050  ;;  %v498_v46 = vadd.f32 %v11301_v23, %v460_v43  ;;  %v424_v0 = vmul.f32 %v10049_v25, %v11446_v57 }
 0x208   :  { %9187 = vmatpush3.bf16.msra.mxu1 %v9897_v55  ;;  %v497_v15 = vadd.f32 %v11301_v23, %v459_v1 }
 0x209   :  { %9188 = vmatprep.subr.bf16.mxu1 %v9898_v47  ;;  %v462_v57 = vmul.f32 %v11294_v14, %v424_v0 }
 0x20a   :  { %v11580_v59 = vpack.c.bf16 %v498_v46, %v497_v15 }
 0x20b   :  { %825 = vmatmul.mubr.bf16.gmra.mrb[36].mxu0 %v11548_v48  ;;  %885 = vmatmul.mubr.bf16.gmra.mrb[12].mxu1 %v11550_v54  ;;  %v500_v41 = vadd.f32 %v11301_v23, %v462_v57 }
 0x20c   :  { %9189 = vmatpush3.bf16.msra.mxu1 %v9898_v47  ;;  %9192 = vmatprep.mubr.bf16.mxu1 %v11310_v8  ;;  %v423_v8 = vmul.f32 %v10051_v27, %v11434_v17 }
 0x20d   :  { %9190 = vmatprep.subr.bf16.mxu1 %v9899_v10  ;;  %834 = vmatprep.mubr.bf16.mxu0 %v17160_v45 }
 0x20e   :  { %v461_v17 = vmul.f32 %v11294_v14, %v423_v8 }
 0x210   :  { %9191 = vmatpush3.bf16.msra.mxu1 %v9899_v10  ;;  %v499_v14 = vadd.f32 %v11301_v23, %v461_v17 }
 0x212   :  { %v736_v21 = vpop.f32.mrb[0].mxu0 }
 0x213   :  { %v738_v61 = vpop.f32.mrb[1].mxu0  ;;  %835 = vmatmul.mubr.bf16.gmra.mrb[40].mxu0 %v11580_v59  ;;  %9193 = vmatmul.mubr.bf16.vlgmr.msra.gmra.mrb[16].mxu1 %v11324_v37  ;;  %v737_v3 = vadd.f32 %v736_v21, %v11578_v42 }
 0x214   :  { %v740_v40 = vpop.f32.mrb[2].mxu0  ;;  %9196 = vmatprep.mubr.bf16.mxu1 %v11349_v12  ;;  %844 = vmatprep.mubr.bf16.mxu0 %v17160_v45  ;;  %v739_v50 = vadd.f32 %v738_v61, %v11586_v60  ;;  %v11603_v12 = vpack.c.bf16 %v500_v41, %v499_v14 }
 0x215   :  { %v741_v38 = vadd.f32 %v740_v40, %v11578_v42  ;;  %v742_v2 = vpop.f32.mrb[3].mxu0 }
 0x216   :  { %v743_v30 = vadd.f32 %v742_v2, %v11586_v60 }
 0x217   :  { %v11598_v51 = vpack.c.bf16 %v741_v38, %v737_v3 }
 0x218   :  { %v11601_v37 = vpack.c.bf16 %v743_v30, %v739_v50 }
 0x219   :  { %17458 = vst [vmem:[#allocation3_spill] sm:$0xff] %v11598_v51 }
 0x21a   :  { %v746_v4 = vpop.f32.mrb[4].mxu0  ;;  %1606 = vrot.lane.b32.xlu0 %v11601_v37, %s10919_s4  ;;  %9800 = vmatprep.subr.msk.bf16.mxu1 %vm17181_vm0, %v11601_v37  ;;  %v1165_v31 = vsel %vm17181_vm0, %v11601_v37, 0 }
 0x21b   :  { %v748_v7 = vpop.f32.mrb[5].mxu0  ;;  %845 = vmatmul.mubr.bf16.gmra.mrb[44].mxu0 %v11603_v12  ;;  %9197 = vmatmul.mubr.bf16.gmra.mrb[20].mxu1 %v11381_v44  ;;  %v747_v5 = vadd.f32 %v746_v4, %v11578_v42 }
 0x21c   :  { %9225 = vmatpush3.bf16.xpose.msra.mxu1 %v1165_v31  ;;  %v750_v23 = vpop.f32.mrb[6].mxu0  ;;  %9200 = vmatprep.mubr.bf16.mxu1 %v11412_v62  ;;  %v749_v39 = vadd.f32 %v748_v7, %v11586_v60 }
 0x21d   :  { %v751_v29 = vadd.f32 %v750_v23, %v11578_v42  ;;  %v752_v55 = vpop.f32.mrb[7].mxu0 }
 0x21e   :  { %v753_v16 = vadd.f32 %v752_v55, %v11586_v60 }
 0x21f   :  { %v11618_v52 = vpack.c.bf16 %v751_v29, %v747_v5 }
 0x220   :  { %v11620_v33 = vpack.c.bf16 %v753_v16, %v749_v39 }
 0x221   :  { %17459 = vst [vmem:[#allocation4_spill] sm:$0xff] %v11618_v52 }
 0x222   :  { %1608 = vrot.lane.b32.xlu1 %v11620_v33, %s10919_s4  ;;  %v756_v44 = vpop.f32.mrb[8].mxu0  ;;  %9801 = vmatprep.subr.msk.bf16.mxu1 %vm17181_vm0, %v11620_v33  ;;  %v1168_v62 = vsel %vm17181_vm0, %v11620_v33, 0 }
 0x223   :  { %v758_v63 = vpop.f32.mrb[9].mxu0  ;;  %9201 = vmatmul.mubr.bf16.gmra.mrb[24].mxu1 %v11442_v34  ;;  %v757_v20 = vadd.f32 %v756_v44, %v11578_v42 }
 0x224   :  { %9227 = vmatpush3.bf16.xpose.msra.mxu1 %v1168_v62  ;;  %v760_v53 = vpop.f32.mrb[10].mxu0  ;;  %9204 = vmatprep.mubr.bf16.mxu1 %v11457_v18  ;;  %v759_v24 = vadd.f32 %v758_v63, %v11586_v60 }
 0x225   :  { %v761_v9 = vadd.f32 %v760_v53, %v11578_v42  ;;  %v762_v47 = vpop.f32.mrb[11].mxu0 }
 0x226   :  { %v763_v32 = vadd.f32 %v762_v47, %v11586_v60 }
 0x227   :  { %v11634_v22 = vpack.c.bf16 %v761_v9, %v757_v20 }
 0x228   :  { %v11636_v11 = vpack.c.bf16 %v763_v32, %v759_v24 }
 0x229   :  { %17460 = vst [vmem:[#allocation5_spill] sm:$0xff] %v11634_v22 }
 0x22a   :  { %1610 = vrot.lane.b32.xlu1 %v11636_v11, %s10919_s4  ;;  %v766_v34 = vpop.f32.mrb[12].mxu0  ;;  %9802 = vmatprep.subr.msk.bf16.mxu1 %vm17181_vm0, %v11636_v11  ;;  %v1171_v18 = vsel %vm17181_vm0, %v11636_v11, 0 }
 0x22b   :  { %v768_v10 = vpop.f32.mrb[13].mxu0  ;;  %9205 = vmatmul.mubr.bf16.gmra.mrb[28].mxu1 %v11470_v13  ;;  %v767_v25 = vadd.f32 %v766_v34, %v11578_v42 }
 0x22c   :  { %9229 = vmatpush3.bf16.xpose.msra.mxu1 %v1171_v18  ;;  %v770_v43 = vpop.f32.mrb[14].mxu0  ;;  %9208 = vmatprep.mubr.bf16.mxu1 %v11524_v6  ;;  %v769_v46 = vadd.f32 %v768_v10, %v11586_v60 }
 0x22d   :  { %v771_v1 = vadd.f32 %v770_v43, %v11578_v42  ;;  %v772_v27 = vpop.f32.mrb[15].mxu0 }
 0x22e   :  { %v773_v0 = vadd.f32 %v772_v27, %v11586_v60 }
 0x22f   :  { %v11650_v15 = vpack.c.bf16 %v771_v1, %v767_v25 }
 0x230   :  { %v11652_v8 = vpack.c.bf16 %v773_v0, %v769_v46 }
 0x231   :  { %17461 = vst [vmem:[#allocation6_spill] sm:$0xff] %v11650_v15 }
 0x232   :  { %1612 = vrot.lane.b32.xlu1 %v11652_v8, %s10919_s4  ;;  %v776_v13 = vpop.f32.mrb[16].mxu0  ;;  %9803 = vmatprep.subr.msk.bf16.mxu1 %vm17181_vm0, %v11652_v8  ;;  %v1174_v6 = vsel %vm17181_vm0, %v11652_v8, 0 }
 0x233   :  { %v778_v57 = vpop.f32.mrb[17].mxu0  ;;  %9209 = vmatmul.mubr.bf16.gmra.mrb[32].mxu1 %v11548_v48  ;;  %v777_v61 = vadd.f32 %v776_v13, %v11578_v42 }
 0x234   :  { %9231 = vmatpush3.bf16.xpose.msra.mxu1 %v1174_v6  ;;  %v780_v21 = vpop.f32.mrb[18].mxu0  ;;  %9212 = vmatprep.mubr.bf16.mxu1 %v11580_v59  ;;  %v779_v3 = vadd.f32 %v778_v57, %v11586_v60 }
 0x235   :  { %v781_v17 = vadd.f32 %v780_v21, %v11578_v42  ;;  %v782_v40 = vpop.f32.mrb[19].mxu0 }
 0x236   :  { %v783_v38 = vadd.f32 %v782_v40, %v11586_v60 }
 0x237   :  { %v11666_v2 = vpack.c.bf16 %v781_v17, %v777_v61 }
 0x238   :  { %v11668_v41 = vpack.c.bf16 %v783_v38, %v779_v3 }
 0x239   :  { %17462 = vst [vmem:[#allocation7_spill] sm:$0xff] %v11666_v2 }
 0x23a   :  { %17463 = vst [vmem:[#allocation8_spill] sm:$0xff] %v11668_v41  ;;  %v786_v50 = vpop.f32.mrb[20].mxu0  ;;  %1614 = vrot.lane.b32.xlu0 %v11668_v41, %s10919_s4  ;;  %9804 = vmatprep.subr.msk.bf16.mxu1 %vm17181_vm0, %v11668_v41  ;;  %v1177_v48 = vsel %vm17181_vm0, %v11668_v41, 0 }
 0x23b   :  { %v788_v59 = vpop.f32.mrb[21].mxu0  ;;  %9213 = vmatmul.mubr.bf16.gmra.mrb[36].mxu1 %v11603_v12  ;;  %v787_v14 = vadd.f32 %v786_v50, %v11578_v42 }
 0x23c   :  { %9233 = vmatpush3.bf16.xpose.msra.mxu1 %v1177_v48  ;;  %v790_v30 = vpop.f32.mrb[22].mxu0  ;;  %9216 = vmatprep.mubr.bf16.mxu1 %v11483_v36  ;;  %v789_v7 = vadd.f32 %v788_v59, %v11586_v60 }
 0x23d   :  { %v791_v4 = vadd.f32 %v790_v30, %v11578_v42  ;;  %v792_v31 = vpop.f32.mrb[23].mxu0 }
 0x23e   :  { %v793_v23 = vadd.f32 %v792_v31, %v11586_v60 }
 0x23f   :  { %v11682_v5 = vpack.c.bf16 %v791_v4, %v787_v14 }
 0x240   :  { %v11684_v29 = vpack.c.bf16 %v793_v23, %v789_v7 }
 0x241   :  { %17464 = vst [vmem:[#allocation9_spill] sm:$0xff] %v11682_v5 }
 0x242   :  { %17465 = vst [vmem:[#allocation10_spill] sm:$0xff] %v11684_v29  ;;  %1616 = vrot.lane.b32.xlu1 %v11684_v29, %s10919_s4  ;;  %v796_v12 = vpop.f32.mrb[24].mxu0  ;;  %9805 = vmatprep.subr.msk.bf16.mxu1 %vm17181_vm0, %v11684_v29  ;;  %v1180_v36 = vsel %vm17181_vm0, %v11684_v29, 0 }
 0x243   :  { %v798_v55 = vpop.f32.mrb[25].mxu0  ;;  %9217 = vmatmul.mubr.bf16.gmra.mrb[40].mxu1 %v11501_v49  ;;  %v797_v16 = vadd.f32 %v796_v12, %v11578_v42 }
 0x244   :  { %9235 = vmatpush3.bf16.xpose.msra.mxu1 %v1180_v36  ;;  %v800_v39 = vpop.f32.mrb[26].mxu0  ;;  %9220 = vmatprep.mubr.bf16.mxu1 %v11526_v56  ;;  %v799_v63 = vadd.f32 %v798_v55, %v11586_v60 }
 0x245   :  { %v801_v44 = vadd.f32 %v800_v39, %v11578_v42  ;;  %v802_v62 = vpop.f32.mrb[27].mxu0 }
 0x246   :  { %v803_v53 = vadd.f32 %v802_v62, %v11586_v60 }
 0x247   :  { %v11698_v20 = vpack.c.bf16 %v801_v44, %v797_v16 }
 0x248   :  { %v11700_v9 = vpack.c.bf16 %v803_v53, %v799_v63 }
 0x249   :  { %17466 = vst [vmem:[#allocation11_spill] sm:$0xff] %v11698_v20 }
 0x24a   :  { %17467 = vst [vmem:[#allocation12_spill] sm:$0xff] %v11700_v9  ;;  %v806_v47 = vpop.f32.mrb[28].mxu0  ;;  %1618 = vrot.lane.b32.xlu0 %v11700_v9, %s10919_s4  ;;  %9806 = vmatprep.subr.msk.bf16.mxu1 %vm17181_vm0, %v11700_v9  ;;  %v1183_v49 = vsel %vm17181_vm0, %v11700_v9, 0 }
 0x24b   :  { %v808_v56 = vpop.f32.mrb[29].mxu0  ;;  %9221 = vmatmul.mubr.bf16.gmra.mrb[44].mxu1 %v11550_v54  ;;  %v807_v32 = vadd.f32 %v806_v47, %v11578_v42 }
 0x24c   :  { %9237 = vmatpush3.bf16.xpose.msra.mxu1 %v1183_v49  ;;  %v810_v24 = vpop.f32.mrb[30].mxu0  ;;  %9240 = vmatprep.mubr.msk.bf16.mxu1 %vm17181_vm0, %v11598_v51  ;;  %v809_v10 = vadd.f32 %v808_v56, %v11586_v60 }
 0x24d   :  { %v811_v34 = vadd.f32 %v810_v24, %v11578_v42  ;;  %v812_v18 = vpop.f32.mrb[31].mxu0 }
 0x24e   :  { %v813_v43 = vadd.f32 %v812_v18, %v11586_v60  ;;  %1582 = vrot.lane.b32.xlu0 %v11598_v51, %s10919_s4 }
 0x24f   :  { %v11717_v25 = vpack.c.bf16 %v811_v34, %v807_v32 }
 0x250   :  { %v11719_v54 = vpack.c.bf16 %v813_v43, %v809_v10 }
 0x251   :  { %17468 = vst [vmem:[#allocation13_spill] sm:$0xff] %v11717_v25 }
 0x252   :  { %17469 = vst [vmem:[#allocation14_spill] sm:$0xff] %v11719_v54  ;;  %1620 = vrot.lane.b32.xlu1 %v11719_v54, %s10919_s4  ;;  %1584 = vrot.lane.b32.xlu0 %v11618_v52, %s10919_s4  ;;  %v1186_v1 = vsel %vm17181_vm0, %v11719_v54, 0 }
 0x253   :  { %9807 = vmatprep.subr.msk.bf16.mxu1 %vm17181_vm0, %v11719_v54 }
 0x254   :  { %9239 = vmatpush3.bf16.xpose.msra.mxu1 %v1186_v1 }
 0x256   :  { %2104 = vrot.lane.b32.xlu1 %v11601_v37, %s10920_s21  ;;  %2108 = vrot.lane.b32.xlu0 %v11636_v11, %s10920_s21 }
 0x25a   :  { %2106 = vrot.lane.b32.xlu1 %v11620_v33, %s10920_s21  ;;  %2112 = vrot.lane.b32.xlu0 %v11668_v41, %s10920_s21 }
 0x25b   :  { %9241 = vmatmul.mubr.msk.bf16.vlgmr.msra.gmra.mrb[48].mxu1 %vm17181_vm0, %v11618_v52 }
 0x25c   :  { %9244 = vmatprep.mubr.msk.bf16.mxu1 %vm17181_vm0, %v11634_v22 }
 0x25e   :  { %2110 = vrot.lane.b32.xlu1 %v11652_v8, %s10920_s21  ;;  %1588 = vrot.lane.b32.xlu0 %v11650_v15, %s10919_s4 }
 0x262   :  { %1586 = vrot.lane.b32.xlu1 %v11634_v22, %s10919_s4  ;;  %1590 = vrot.lane.b32.xlu0 %v11666_v2, %s10919_s4 }
 0x263   :  { %9245 = vmatmul.mubr.msk.bf16.gmra.mrb[52].mxu1 %vm17181_vm0, %v11650_v15 }
 0x264   :  { %9248 = vmatprep.mubr.msk.bf16.mxu1 %vm17181_vm0, %v11666_v2 }
 0x266   :  { %2114 = vrot.lane.b32.xlu1 %v11684_v29, %s10920_s21  ;;  %2116 = vrot.lane.b32.xlu0 %v11700_v9, %s10920_s21 }
 0x26a   :  { %1592 = vrot.lane.b32.xlu1 %v11682_v5, %s10919_s4  ;;  %1596 = vrot.lane.b32.xlu0 %v11717_v25, %s10919_s4 }
 0x26b   :  { %9249 = vmatmul.mubr.msk.bf16.gmra.mrb[56].mxu1 %vm17181_vm0, %v11682_v5 }
 0x26c   :  { %9252 = vmatprep.mubr.msk.bf16.mxu1 %vm17181_vm0, %v11698_v20 }
 0x26e   :  { %1594 = vrot.lane.b32.xlu1 %v11698_v20, %s10919_s4  ;;  %2088 = vrot.lane.b32.xlu0 %v11598_v51, %s10920_s21 }
 0x272   :  { %2118 = vrot.lane.b32.xlu1 %v11719_v54, %s10920_s21  ;;  %2092 = vrot.lane.b32.xlu0 %v11634_v22, %s10920_s21 }
 0x273   :  { %9253 = vmatmul.mubr.msk.bf16.gmra.mrb[60].mxu1 %vm17181_vm0, %v11717_v25 }
 0x276   :  { %2090 = vrot.lane.b32.xlu1 %v11618_v52, %s10920_s21  ;;  %2096 = vrot.lane.b32.xlu0 %v11666_v2, %s10920_s21 }
 0x27a   :  { %2094 = vrot.lane.b32.xlu1 %v11650_v15, %s10920_s21  ;;  %2100 = vrot.lane.b32.xlu0 %v11698_v20, %s10920_s21 }
 0x27e   :  { %2098 = vrot.lane.b32.xlu1 %v11682_v5, %s10920_s21 }
 0x282   :  { %2102 = vrot.lane.b32.xlu1 %v11717_v25, %s10920_s21 }
 0x28c   :  { %v1607_v27 = vpop.permute.xlu0 %1606 }
 0x28d   :  { %9808 = vmatprep.subr.msk.bf16.mxu0 %vm17181_vm0, %v1607_v27  ;;  %v1647_v46 = vsel %vm17181_vm0, %v1607_v27, 0 }
 0x28e   :  { %9289 = vmatpush3.bf16.xpose.msra.mxu0 %v1647_v46 }
 0x294   :  { %v1609_v0 = vpop.permute.xlu1 %1608 }
 0x295   :  { %9809 = vmatprep.subr.msk.bf16.mxu0 %vm17181_vm0, %v1609_v0  ;;  %v1650_v13 = vsel %vm17181_vm0, %v1609_v0, 0 }
 0x296   :  { %9291 = vmatpush3.bf16.xpose.msra.mxu0 %v1650_v13 }
 0x29c   :  { %v1611_v6 = vpop.permute.xlu1 %1610 }
 0x29d   :  { %9810 = vmatprep.subr.msk.bf16.mxu0 %vm17181_vm0, %v1611_v6  ;;  %v1653_v57 = vsel %vm17181_vm0, %v1611_v6, 0 }
 0x29e   :  { %9293 = vmatpush3.bf16.xpose.msra.mxu0 %v1653_v57 }
 0x2a4   :  { %v1613_v21 = vpop.permute.xlu1 %1612 }
 0x2a5   :  { %9811 = vmatprep.subr.msk.bf16.mxu0 %vm17181_vm0, %v1613_v21  ;;  %v1656_v61 = vsel %vm17181_vm0, %v1613_v21, 0 }
 0x2a6   :  { %9295 = vmatpush3.bf16.xpose.msra.mxu0 %v1656_v61 }
 0x2ac   :  { %v1615_v17 = vpop.permute.xlu0 %1614 }
 0x2ad   :  { %9812 = vmatprep.subr.msk.bf16.mxu0 %vm17181_vm0, %v1615_v17  ;;  %v1659_v40 = vsel %vm17181_vm0, %v1615_v17, 0 }
 0x2ae   :  { %9297 = vmatpush3.bf16.xpose.msra.mxu0 %v1659_v40 }
 0x2b4   :  { %v1617_v3 = vpop.permute.xlu1 %1616 }
 0x2b5   :  { %9813 = vmatprep.subr.msk.bf16.mxu0 %vm17181_vm0, %v1617_v3  ;;  %v1662_v38 = vsel %vm17181_vm0, %v1617_v3, 0 }
 0x2b6   :  { %9299 = vmatpush3.bf16.xpose.msra.mxu0 %v1662_v38 }
 0x2bc   :  { %v1619_v50 = vpop.permute.xlu0 %1618 }
 0x2bd   :  { %9814 = vmatprep.subr.msk.bf16.mxu0 %vm17181_vm0, %v1619_v50  ;;  %v1665_v48 = vsel %vm17181_vm0, %v1619_v50, 0 }
 0x2be   :  { %9301 = vmatpush3.bf16.xpose.msra.mxu0 %v1665_v48 }
 0x2c0   :  { %v1583_v59 = vpop.permute.xlu0 %1582 }
 0x2c1   :  { %9304 = vmatprep.mubr.msk.bf16.mxu0 %vm17181_vm0, %v1583_v59 }
 0x2c4   :  { %v1621_v30 = vpop.permute.xlu1 %1620  ;;  %v1585_v14 = vpop.permute.xlu0 %1584 }
 0x2c5   :  { %9815 = vmatprep.subr.msk.bf16.mxu0 %vm17181_vm0, %v1621_v30  ;;  %v1668_v4 = vsel %vm17181_vm0, %v1621_v30, 0 }
 0x2c6   :  { %v856_v31 = vpop.f32.mrb[0].mxu1  ;;  %9303 = vmatpush3.bf16.xpose.msra.mxu0 %v1668_v4 }
 0x2c7   :  { %v858_v7 = vpop.f32.mrb[1].mxu1  ;;  %v857_v36 = vadd.f32 %v856_v31, %v11578_v42 }
 0x2c8   :  { %v2105_v23 = vpop.permute.xlu1 %2104  ;;  %v860_v12 = vpop.f32.mrb[2].mxu1  ;;  %v859_v44 = vadd.f32 %v858_v7, %v11586_v60 }
 0x2c9   :  { %v861_v55 = vadd.f32 %v860_v12, %v11578_v42  ;;  %v2109_v39 = vpop.permute.xlu0 %2108  ;;  %v862_v16 = vpop.f32.mrb[3].mxu1  ;;  %9816 = vmatprep.subr.msk.bf16.mxu0 %vm17181_vm0, %v2105_v23  ;;  %v2145_v56 = vsel %vm17181_vm0, %v2105_v23, 0 }
 0x2ca   :  { %v863_v62 = vadd.f32 %v862_v16, %v11586_v60 }
 0x2cb   :  { %v11809_v63 = vpack.c.bf16 %v861_v55, %v857_v36 }
 0x2cc   :  { %v11811_v53 = vpack.c.bf16 %v863_v62, %v859_v44  ;;  %v2107_v47 = vpop.permute.xlu1 %2106 }
 0x2cd   :  { %17470 = vst [vmem:[#allocation15_spill] sm:$0xff] %v11809_v63  ;;  %v11813_v49 = vpop.permute.xlu0 %2112  ;;  %9305 = vmatmul.mubr.msk.bf16.vlgmr.msra.gmra.mrb[48].mxu0 %vm17181_vm0, %v1585_v14  ;;  %v2148_v40 = vsel %vm17181_vm0, %v2107_v47, 0 }
 0x2ce   :  { %17471 = vst [vmem:[#allocation16_spill] sm:$0xff] %v11811_v53  ;;  %v866_v24 = vpop.f32.mrb[4].mxu1  ;;  %9353 = vmatpush3.bf16.xpose.msra.mxu0 %v2145_v56 }
 0x2cf   :  { %v868_v32 = vpop.f32.mrb[5].mxu1  ;;  %9817 = vmatprep.subr.msk.bf16.mxu0 %vm17181_vm0, %v2107_v47  ;;  %v867_v10 = vadd.f32 %v866_v24, %v11578_v42 }
 0x2d0   :  { %v11818_v34 = vpop.permute.xlu1 %2110  ;;  %v870_v18 = vpop.f32.mrb[6].mxu1  ;;  %v869_v46 = vadd.f32 %v868_v32, %v11586_v60 }
 0x2d1   :  { %v871_v43 = vadd.f32 %v870_v18, %v11578_v42  ;;  %v1589_v1 = vpop.permute.xlu0 %1588  ;;  %v872_v27 = vpop.f32.mrb[7].mxu1 }
 0x2d2   :  { %v873_v0 = vadd.f32 %v872_v27, %v11586_v60 }
 0x2d3   :  { %v11824_v13 = vpack.c.bf16 %v871_v43, %v867_v10 }
 0x2d4   :  { %v11826_v6 = vpack.c.bf16 %v873_v0, %v869_v46  ;;  %v1587_v57 = vpop.permute.xlu1 %1586 }
 0x2d5   :  { %17472 = vst [vmem:[#allocation17_spill] sm:$0xff] %v11824_v13  ;;  %v1591_v21 = vpop.permute.xlu0 %1590  ;;  %9308 = vmatprep.mubr.msk.bf16.mxu0 %vm17181_vm0, %v1587_v57 }
 0x2d6   :  { %17473 = vst [vmem:[#allocation18_spill] sm:$0xff] %v11826_v6  ;;  %v816_v61 = vpop.f32.mrb[32].mxu0  ;;  %v876_v17 = vpop.f32.mrb[8].mxu1  ;;  %9309 = vmatmul.mubr.msk.bf16.gmra.mrb[52].mxu0 %vm17181_vm0, %v1589_v1  ;;  %v2151_v1 = vsel %vm17181_vm0, %v2109_v39, 0 }
 0x2d7   :  { %9355 = vmatpush3.bf16.xpose.msra.mxu0 %v2148_v40  ;;  %v818_v3 = vpop.f32.mrb[33].mxu0  ;;  %v878_v38 = vpop.f32.mrb[9].mxu1  ;;  %9312 = vmatprep.mubr.msk.bf16.mxu0 %vm17181_vm0, %v1591_v21  ;;  %v817_v59 = vadd.f32 %v816_v61, %v11578_v42  ;;  %v877_v31 = vadd.f32 %v876_v17, %v11578_v42 }
 0x2d8   :  { %9818 = vmatprep.subr.msk.bf16.mxu0 %vm17181_vm0, %v2109_v39  ;;  %v11833_v50 = vpop.permute.xlu1 %2114  ;;  %v820_v48 = vpop.f32.mrb[34].mxu0  ;;  %v819_v7 = vadd.f32 %v818_v3, %v11586_v60  ;;  %v879_v55 = vadd.f32 %v878_v38, %v11586_v60 }
 0x2d9   :  { %v821_v30 = vadd.f32 %v820_v48, %v11578_v42  ;;  %v880_v14 = vpop.f32.mrb[10].mxu1  ;;  %v11837_v4 = vpop.permute.xlu0 %2116 }
 0x2da   :  { %v881_v23 = vadd.f32 %v880_v14, %v11578_v42  ;;  %v822_v12 = vpop.f32.mrb[35].mxu0  ;;  %v882_v36 = vpop.f32.mrb[11].mxu1 }
 0x2db   :  { %v11843_v16 = vpack.c.bf16 %v821_v30, %v817_v59  ;;  %v823_v44 = vadd.f32 %v822_v12, %v11586_v60  ;;  %v883_v62 = vadd.f32 %v882_v36, %v11586_v60  ;;  %v17158_v59 = vsub.s32 2, %v11556_v35 }
 0x2dc   :  { %v11847_v47 = vpack.c.bf16 %v881_v23, %v877_v31  ;;  %v1593_v56 = vpop.permute.xlu1 %1592 }
 0x2dd   :  { %17474 = vst [vmem:[#allocation19_spill] sm:$0xff] %v11843_v16  ;;  %v11849_v24 = vpack.c.bf16 %v823_v44, %v819_v7  ;;  %v11851_v32 = vpack.c.bf16 %v883_v62, %v879_v55  ;;  %v1597_v18 = vpop.permute.xlu0 %1596  ;;  %v11878_v62 = vrot.slane %v11570_v26, %v17158_v59 }
 0x2de   :  { %17475 = vst [vmem:[#allocation20_spill] sm:$0xff] %v11847_v47  ;;  %v826_v10 = vpop.f32.mrb[36].mxu0  ;;  %v886_v43 = vpop.f32.mrb[12].mxu1  ;;  %9313 = vmatmul.mubr.msk.bf16.gmra.mrb[56].mxu0 %vm17181_vm0, %v1593_v56 }
 0x2df   :  { %17476 = vst [vmem:[#allocation21_spill] sm:$0xff] %v11849_v24  ;;  %17477 = vst [vmem:[#allocation22_spill] sm:$0xff] %v11851_v32  ;;  %9357 = vmatpush3.bf16.xpose.msra.mxu0 %v2151_v1  ;;  %v828_v27 = vpop.f32.mrb[37].mxu0  ;;  %v888_v46 = vpop.f32.mrb[13].mxu1  ;;  %v827_v21 = vadd.f32 %v826_v10, %v11578_v42  ;;  %v887_v40 = vadd.f32 %v886_v43, %v11578_v42  ;;  %v2154_v10 = vsel %vm17181_vm0, %v11818_v34, 0 }
 0x2e0   :  { %9819 = vmatprep.subr.msk.bf16.mxu0 %vm17181_vm0, %v11818_v34  ;;  %v1595_v0 = vpop.permute.xlu1 %1594  ;;  %v830_v57 = vpop.f32.mrb[38].mxu0  ;;  %v829_v3 = vadd.f32 %v828_v27, %v11586_v60  ;;  %v889_v30 = vadd.f32 %v888_v46, %v11586_v60 }
 0x2e1   :  { %v831_v61 = vadd.f32 %v830_v57, %v11578_v42  ;;  %v890_v17 = vpop.f32.mrb[14].mxu1  ;;  %9316 = vmatprep.mubr.msk.bf16.mxu0 %vm17181_vm0, %v1595_v0  ;;  %v832_v38 = vpop.f32.mrb[39].mxu0 }
 0x2e2   :  { %v891_v39 = vadd.f32 %v890_v17, %v11578_v42  ;;  %v892_v48 = vpop.f32.mrb[15].mxu1  ;;  %v833_v31 = vadd.f32 %v832_v38, %v11586_v60  ;;  %v2089_v12 = vpop.permute.xlu0 %2088 }
 0x2e3   :  { %v11865_v14 = vpack.c.bf16 %v831_v61, %v827_v21  ;;  %v893_v7 = vadd.f32 %v892_v48, %v11586_v60 }
 0x2e4   :  { %v11869_v23 = vpack.c.bf16 %v891_v39, %v887_v40  ;;  %v11871_v36 = vpack.c.bf16 %v833_v31, %v829_v3 }
 0x2e5   :  { %17478 = vst [vmem:[#allocation23_spill] sm:$0xff] %v11865_v14  ;;  %v11873_v55 = vpack.c.bf16 %v893_v7, %v889_v30 }
 0x2e6   :  { %17479 = vst [vmem:[#allocation24_spill] sm:$0xff] %v11869_v23  ;;  %17480 = vst [vmem:[#allocation25_spill] sm:$0xff] %v11871_v36  ;;  %v836_v44 = vpop.f32.mrb[40].mxu0  ;;  %v9194_v56 = vpop.f32.mrb[16].mxu1  ;;  %9317 = vmatmul.mubr.msk.bf16.gmra.mrb[60].mxu0 %vm17181_vm0, %v1597_v18 }
 0x2e7   :  { %17481 = vst [vmem:[#allocation26_spill] sm:$0xff] %v11873_v55  ;;  %9359 = vmatpush3.bf16.xpose.msra.mxu0 %v2154_v10  ;;  %v838_v43 = vpop.f32.mrb[41].mxu0  ;;  %v929_v1 = vpop.f32.mrb[17].mxu1  ;;  %9368 = vmatprep.mubr.msk.bf16.mxu0 %vm17181_vm0, %v2089_v12  ;;  %v837_v46 = vadd.f32 %v836_v44, %v11578_v42  ;;  %v938_v57 = vadd.f32 %v9194_v56, %v11878_v62  ;;  %v2157_v12 = vsel %vm17181_vm0, %v11813_v49, 0 }
 0x2e8   :  { %9820 = vmatprep.subr.msk.bf16.mxu0 %vm17181_vm0, %v11813_v49  ;;  %v840_v27 = vpop.f32.mrb[42].mxu0  ;;  %v9195_v0 = vpop.f32.mrb[18].mxu1  ;;  %v839_v18 = vadd.f32 %v838_v43, %v11586_v60  ;;  %v930_v17 = vadd.f32 %v929_v1, %v11878_v62 }
 0x2e9   :  { %v841_v26 = vadd.f32 %v840_v27, %v11578_v42  ;;  %v941_v34 = vadd.f32 %v9195_v0, %v11878_v62  ;;  %v842_v21 = vpop.f32.mrb[43].mxu0  ;;  %v932_v61 = vpop.f32.mrb[19].mxu1 }
 0x2ea   :  { %v843_v3 = vadd.f32 %v842_v21, %v11586_v60  ;;  %v933_v39 = vadd.f32 %v932_v61, %v11878_v62 }
 0x2eb   :  { %v11892_v40 = vpack.c.bf16 %v841_v26, %v837_v46  ;;  %v11896_v38 = vpack.c.bf16 %v941_v34, %v938_v57 }
 0x2ec   :  { %v11898_v48 = vpack.c.bf16 %v843_v3, %v839_v18  ;;  %v11900_v30 = vpack.c.bf16 %v933_v39, %v930_v17 }
 0x2ed   :  { %17482 = vst [vmem:[#allocation27_spill] sm:$0xff] %v11892_v40  ;;  %17483 = vst [vmem:[#allocation28_spill] sm:$0xff] %v11896_v38  ;;  %1961 = vrot.lane.b32.xlu1 %v11896_v38, %s10919_s4 }
 0x2ee   :  { %17484 = vst [vmem:[#allocation29_spill] sm:$0xff] %v11898_v48  ;;  %17485 = vst [vmem:[#allocation30_spill] sm:$0xff] %v11900_v30  ;;  %v9198_v31 = vpop.f32.mrb[20].mxu1  ;;  %v846_v7 = vpop.f32.mrb[44].mxu0  ;;  %1959 = vrot.lane.b32.xlu0 %v11900_v30, %s10919_s4  ;;  %9256 = vmatprep.subr.bf16.mxu1 %v11900_v30 }
 0x2ef   :  { %v848_v44 = vpop.f32.mrb[45].mxu0  ;;  %v945_v56 = vpop.f32.mrb[21].mxu1  ;;  %9361 = vmatpush3.bf16.xpose.msra.mxu0 %v2157_v12  ;;  %9257 = vmatpush3.bf16.msra.mxu1 %v11900_v30  ;;  %v847_v43 = vadd.f32 %v846_v7, %v11578_v42  ;;  %v954_v26 = vadd.f32 %v9198_v31, %v11878_v62 }
 0x2f0   :  { %v850_v10 = vpop.f32.mrb[46].mxu0  ;;  %9821 = vmatprep.subr.msk.bf16.mxu0 %vm17181_vm0, %v11833_v50  ;;  %v9199_v27 = vpop.f32.mrb[22].mxu1  ;;  %9258 = vmatprep.subr.bf16.mxu1 %v11896_v38  ;;  %v849_v49 = vadd.f32 %v848_v44, %v11586_v60  ;;  %v946_v34 = vadd.f32 %v945_v56, %v11878_v62 }
 0x2f1   :  { %v851_v1 = vadd.f32 %v850_v10, %v11578_v42  ;;  %v852_v46 = vpop.f32.mrb[47].mxu0  ;;  %v957_v0 = vadd.f32 %v9199_v27, %v11878_v62  ;;  %v948_v18 = vpop.f32.mrb[23].mxu1 }
 0x2f2   :  { %v853_v57 = vadd.f32 %v852_v46, %v11586_v60  ;;  %v949_v61 = vadd.f32 %v948_v18, %v11878_v62  ;;  %v2160_v60 = vsel %vm17181_vm0, %v11833_v50, 0  ;;  %v2163_v46 = vsel %vm17181_vm0, %v11837_v4, 0 }
 0x2f3   :  { %v11920_v21 = vpack.c.bf16 %v851_v1, %v847_v43  ;;  %v11923_v42 = vpack.c.bf16 %v957_v0, %v954_v26  ;;  %9259 = vmatpush3.bf16.msra.mxu1 %v11896_v38 }
 0x2f4   :  { %v11925_v17 = vpack.c.bf16 %v853_v57, %v849_v49  ;;  %v11928_v3 = vpack.c.bf16 %v949_v61, %v946_v34  ;;  %v2119_v49 = vpop.permute.xlu1 %2118 }
 0x2f5   :  { %17486 = vst [vmem:[#allocation31_spill] sm:$0xff] %v11920_v21  ;;  %17487 = vst [vmem:[#allocation32_spill] sm:$0xff] %v11923_v42  ;;  %1965 = vrot.lane.b32.xlu0 %v11923_v42, %s10919_s4  ;;  %v1114_v21 = vadd.s32 72, %v11556_v35 }
 0x2f6   :  { %17488 = vst [vmem:[#allocation33_spill] sm:$0xff] %v11925_v17  ;;  %17489 = vst [vmem:[#allocation34_spill] sm:$0xff] %v11928_v3  ;;  %v9202_v39 = vpop.f32.mrb[24].mxu1  ;;  %1963 = vrot.lane.b32.xlu1 %v11928_v3, %s10919_s4  ;;  %9260 = vmatprep.subr.bf16.mxu1 %v11928_v3 }
 0x2f7   :  { %v961_v31 = vpop.f32.mrb[25].mxu1  ;;  %9363 = vmatpush3.bf16.xpose.msra.mxu0 %v2160_v60  ;;  %9261 = vmatpush3.bf16.msra.mxu1 %v11928_v3  ;;  %v970_v12 = vadd.f32 %v9202_v39, %v11878_v62 }
 0x2f8   :  { %v9203_v7 = vpop.f32.mrb[26].mxu1  ;;  %9822 = vmatprep.subr.msk.bf16.mxu0 %vm17181_vm0, %v11837_v4  ;;  %9262 = vmatprep.subr.bf16.mxu1 %v11923_v42  ;;  %v962_v10 = vadd.f32 %v961_v31, %v11878_v62 }
 0x2f9   :  { %v973_v44 = vadd.f32 %v9203_v7, %v11878_v62  ;;  %v964_v56 = vpop.f32.mrb[27].mxu1 }
 0x2fa   :  { %v965_v43 = vadd.f32 %v964_v56, %v11878_v62 }
 0x2fb   :  { %v11945_v50 = vpack.c.bf16 %v973_v44, %v970_v12  ;;  %9263 = vmatpush3.bf16.msra.mxu1 %v11923_v42  ;;  %v2166_v12 = vsel %vm17181_vm0, %v2119_v49, 0 }
 0x2fc   :  { %v11947_v1 = vpack.c.bf16 %v965_v43, %v962_v10 }
 0x2fd   :  { %17490 = vst [vmem:[#allocation35_spill] sm:$0xff] %v11945_v50  ;;  %1969 = vrot.lane.b32.xlu0 %v11945_v50, %s10919_s4 }
 0x2fe   :  { %17491 = vst [vmem:[#allocation36_spill] sm:$0xff] %v11947_v1  ;;  %v9206_v27 = vpop.f32.mrb[28].mxu1  ;;  %1967 = vrot.lane.b32.xlu1 %v11947_v1, %s10919_s4  ;;  %9264 = vmatprep.subr.bf16.mxu1 %v11947_v1 }
 0x2ff   :  { %v977_v26 = vpop.f32.mrb[29].mxu1  ;;  %9365 = vmatpush3.bf16.xpose.msra.mxu0 %v2163_v46  ;;  %9265 = vmatpush3.bf16.msra.mxu1 %v11947_v1  ;;  %v986_v57 = vadd.f32 %v9206_v27, %v11878_v62 }
 0x300   :  { %v9207_v0 = vpop.f32.mrb[30].mxu1  ;;  %9823 = vmatprep.subr.msk.bf16.mxu0 %vm17181_vm0, %v2119_v49  ;;  %9266 = vmatprep.subr.bf16.mxu1 %v11945_v50  ;;  %v978_v61 = vadd.f32 %v977_v26, %v11878_v62 }
 0x301   :  { %v989_v18 = vadd.f32 %v9207_v0, %v11878_v62  ;;  %v980_v34 = vpop.f32.mrb[31].mxu1  ;;  %v2091_v0 = vpop.permute.xlu1 %2090 }
 0x302   :  { %v981_v39 = vadd.f32 %v980_v34, %v11878_v62  ;;  %2449 = vrot.lane.b32.xlu1 %v11900_v30, %s10920_s21 }
 0x303   :  { %v11966_v4 = vpack.c.bf16 %v989_v18, %v986_v57  ;;  %9267 = vmatpush3.bf16.msra.mxu1 %v11945_v50  ;;  %v2093_v18 = vpop.permute.xlu0 %2092 }
 0x304   :  { %v11968_v60 = vpack.c.bf16 %v981_v39, %v978_v61 }
 0x305   :  { %17492 = vst [vmem:[#allocation37_spill] sm:$0xff] %v11966_v4  ;;  %1973 = vrot.lane.b32.xlu0 %v11966_v4, %s10919_s4 }
 0x306   :  { %17493 = vst [vmem:[#allocation38_spill] sm:$0xff] %v11968_v60  ;;  %2453 = vrot.lane.b32.xlu1 %v11928_v3, %s10920_s21  ;;  %v9210_v31 = vpop.f32.mrb[32].mxu1  ;;  %9268 = vmatprep.subr.bf16.mxu1 %v11968_v60 }
 0x307   :  { %v1002_v7 = vadd.f32 %v9210_v31, %v11878_v62  ;;  %v993_v44 = vpop.f32.mrb[33].mxu1  ;;  %9367 = vmatpush3.bf16.xpose.msra.mxu0 %v2166_v12  ;;  %9269 = vmatpush3.bf16.msra.mxu1 %v11968_v60 }
 0x308   :  { %v994_v56 = vadd.f32 %v993_v44, %v11878_v62  ;;  %v9211_v10 = vpop.f32.mrb[34].mxu1  ;;  %9270 = vmatprep.subr.bf16.mxu1 %v11966_v4 }
 0x309   :  { %v1005_v43 = vadd.f32 %v9211_v10, %v11878_v62  ;;  %2451 = vrot.lane.b32.xlu0 %v11896_v38, %s10920_s21  ;;  %v996_v27 = vpop.f32.mrb[35].mxu1  ;;  %v2095_v10 = vpop.permute.xlu1 %2094 }
 0x30a   :  { %v997_v46 = vadd.f32 %v996_v27, %v11878_v62  ;;  %2457 = vrot.lane.b32.xlu1 %v11947_v1, %s10920_s21  ;;  %v2097_v27 = vpop.permute.xlu0 %2096 }
 0x30b   :  { %v11987_v26 = vpack.c.bf16 %v1005_v43, %v1002_v7  ;;  %9271 = vmatpush3.bf16.msra.mxu1 %v11966_v4 }
 0x30c   :  { %v11989_v49 = vpack.c.bf16 %v997_v46, %v994_v56 }
 0x30d   :  { %17494 = vst [vmem:[#allocation39_spill] sm:$0xff] %v11987_v26  ;;  %2455 = vrot.lane.b32.xlu0 %v11923_v42, %s10920_s21 }
 0x30e   :  { %17495 = vst [vmem:[#allocation40_spill] sm:$0xff] %v11989_v49  ;;  %2596 = vrot.lane.b32.xlu1 %v11620_v33, %s10921_s22  ;;  %v9214_v57 = vpop.f32.mrb[36].mxu1  ;;  %9369 = vmatmul.mubr.msk.bf16.vlgmr.msra.gmra.mrb[64].mxu0 %vm17181_vm0, %v2091_v0 }
 0x30f   :  { %v1018_v34 = vadd.f32 %v9214_v57, %v11878_v62  ;;  %v1009_v61 = vpop.f32.mrb[37].mxu1  ;;  %9372 = vmatprep.mubr.msk.bf16.mxu0 %vm17181_vm0, %v2093_v18 }
 0x310   :  { %v1010_v39 = vadd.f32 %v1009_v61, %v11878_v62  ;;  %v9215_v31 = vpop.f32.mrb[38].mxu1 }
 0x311   :  { %v1021_v7 = vadd.f32 %v9215_v31, %v11878_v62  ;;  %2459 = vrot.lane.b32.xlu0 %v11945_v50, %s10920_s21  ;;  %v1012_v12 = vpop.f32.mrb[39].mxu1 }
 0x312   :  { %v1013_v33 = vadd.f32 %v1012_v12, %v11878_v62  ;;  %2600 = vrot.lane.b32.xlu1 %v11652_v8, %s10921_s22 }
 0x313   :  { %v12006_v44 = vpack.c.bf16 %v1021_v7, %v1018_v34  ;;  %v2099_v7 = vpop.permute.xlu1 %2098 }
 0x314   :  { %v12008_v56 = vpack.c.bf16 %v1013_v33, %v1010_v39  ;;  %v2101_v33 = vpop.permute.xlu0 %2100 }
 0x315   :  { %17496 = vst [vmem:[#allocation41_spill] sm:$0xff] %v12006_v44  ;;  %2463 = vrot.lane.b32.xlu0 %v11966_v4, %s10920_s21  ;;  %v1119_v4 = vadd.s32 112, %v11556_v35 }
 0x316   :  { %17497 = vst [vmem:[#allocation42_spill] sm:$0xff] %v12008_v56  ;;  %1971 = vrot.lane.b32.xlu1 %v11968_v60, %s10919_s4  ;;  %v9218_v43 = vpop.f32.mrb[40].mxu1  ;;  %9373 = vmatmul.mubr.msk.bf16.gmra.mrb[68].mxu0 %vm17181_vm0, %v2095_v10 }
 0x317   :  { %v1034_v46 = vadd.f32 %v9218_v43, %v11878_v62  ;;  %v1025_v0 = vpop.f32.mrb[41].mxu1  ;;  %9376 = vmatprep.mubr.msk.bf16.mxu0 %vm17181_vm0, %v2097_v27 }
 0x318   :  { %v1026_v8 = vadd.f32 %v1025_v0, %v11878_v62  ;;  %v9219_v57 = vpop.f32.mrb[42].mxu1 }
 0x319   :  { %v1037_v18 = vadd.f32 %v9219_v57, %v11878_v62  ;;  %2594 = vrot.lane.b32.xlu0 %v11601_v37, %s10921_s22  ;;  %v1028_v34 = vpop.f32.mrb[43].mxu1 }
 0x31a   :  { %v1029_v61 = vadd.f32 %v1028_v34, %v11878_v62 }
 0x31b   :  { %v12022_v39 = vpack.c.bf16 %v1037_v18, %v1034_v46  ;;  %v2103_v18 = vpop.permute.xlu1 %2102 }
 0x31c   :  { %v12024_v31 = vpack.c.bf16 %v1029_v61, %v1026_v8 }
 0x31d   :  { %17498 = vst [vmem:[#allocation43_spill] sm:$0xff] %v12022_v39  ;;  %2598 = vrot.lane.b32.xlu0 %v11636_v11, %s10921_s22 }
 0x31e   :  { %17499 = vst [vmem:[#allocation44_spill] sm:$0xff] %v12024_v31  ;;  %v9222_v12 = vpop.f32.mrb[44].mxu1  ;;  %9377 = vmatmul.mubr.msk.bf16.gmra.mrb[72].mxu0 %vm17181_vm0, %v2099_v7 }
 0x31f   :  { %v1050_v10 = vadd.f32 %v9222_v12, %v11878_v62  ;;  %v1041_v43 = vpop.f32.mrb[45].mxu1  ;;  %9380 = vmatprep.mubr.msk.bf16.mxu0 %vm17181_vm0, %v2101_v33  ;;  %v1106_v33 = vadd.s32 8, %v11556_v35 }
 0x320   :  { %v1042_v37 = vadd.f32 %v1041_v43, %v11878_v62  ;;  %v9223_v27 = vpop.f32.mrb[46].mxu1  ;;  %v12043_v43 = vand.u32 127, %v559_v28 }
 0x321   :  { %v1053_v46 = vadd.f32 %v9223_v27, %v11878_v62  ;;  %2461 = vrot.lane.b32.xlu0 %v11968_v60, %s10920_s21  ;;  %v1044_v0 = vpop.f32.mrb[47].mxu1 }
 0x322   :  { %v1045_v11 = vadd.f32 %v1044_v0, %v11878_v62  ;;  %vm12046_vm1 = vcmp.ge.s32.totalorder %v1106_v33, %v12043_v43  ;;  %v1107_v0 = vadd.s32 16, %v11556_v35  ;;  %vm12086_vm5 = vcmp.ge.s32.totalorder %v11556_v35, %v12043_v43 }
 0x323   :  { %v12036_v8 = vpack.c.bf16 %v1053_v46, %v1050_v10  ;;  %v1112_v10 = vadd.s32 56, %v11556_v35  ;;  %vm12119_vm8 = vcmp.ge.s32.totalorder %v1114_v21, %v12043_v43  ;;  %v1109_v21 = vadd.s32 32, %v11556_v35 }
 0x324   :  { %v12038_v57 = vpack.c.bf16 %v1045_v11, %v1042_v37  ;;  %vm12064_vm3 = vcmp.ge.s32.totalorder %v1107_v0, %v12043_v43  ;;  %vm12200_vm15 = vcmp.ge.s32.totalorder %v1119_v4, %v12043_v43 }
 0x325   :  { %17500 = vst [vmem:[#allocation45_spill] sm:$0xff] %v12036_v8  ;;  %vm12058_vm2 = vcmp.ge.s32.totalorder %v1112_v10, %v12043_v43  ;;  %v17508_v10 = vmov 0  ;;  %vm12152_vm11 = vcmp.ge.s32.totalorder %v1109_v21, %v12043_v43 }
 0x326   :  { %17501 = vst [vmem:[#allocation46_spill] sm:$0xff] %v12038_v57  ;;  %9381 = vmatmul.mubr.msk.bf16.gmra.mrb[76].mxu0 %vm17181_vm0, %v2103_v18 }
 0x32e   :  { %v9242_v34 = vpop.f32.mrb[48].mxu1 }
 0x32f   :  { %v1222_v61 = vpop.f32.mrb[49].mxu1  ;;  %v1287_v33 = vmul.f32 0.17677669, %v9242_v34  ;;  %v1116_v34 = vadd.s32 88, %v11556_v35 }
 0x330   :  { %v9243_v7 = vpop.f32.mrb[50].mxu1  ;;  %v1285_v23 = vmul.f32 0.17677669, %v1222_v61 }
 0x331   :  { %v1225_v12 = vpop.f32.mrb[51].mxu1  ;;  %v12081_v47 = vsel %vm12064_vm3, %v1287_v33, -1e+30  ;;  %vm12097_vm6 = vcmp.ge.s32.totalorder %v1116_v34, %v12043_v43  ;;  %v17514_v33 = vmov 0  ;;  %v1288_v40 = vmul.f32 0.17677669, %v9243_v7 }
 0x332   :  { %v1286_v27 = vmul.f32 0.17677669, %v1225_v12  ;;  %v1110_v12 = vadd.s32 40, %v11556_v35  ;;  %v17515_v33 = vsel %vm12097_vm6, 4294967295, %v17514_v33  ;;  %v12104_v14 = vsel %vm12086_vm5, %v1285_v23, -1e+30 }
 0x333   :  { %17516 = vst [vmem:[#allocation49_spill] sm:$0xff] %v17515_v33  ;;  %v17520_v23 = vmov 0  ;;  %v1120_v7 = vadd.s32 120, %v11556_v35 }
 0x334   :  { %v12054_v59 = vsel %vm12046_vm1, %v1286_v27, -1e+30  ;;  %vm12074_vm4 = vcmp.ge.s32.totalorder %v1110_v12, %v12043_v43  ;;  %v1108_v12 = vadd.s32 24, %v11556_v35  ;;  %v17521_v23 = vsel %vm12119_vm8, 4294967295, %v17520_v23 }
 0x335   :  { %v17509_v10 = vsel %vm12074_vm4, 4294967295, %v17508_v10  ;;  %17522 = vst [vmem:[#allocation51_spill] sm:$0xff] %v17521_v23  ;;  %vm12141_vm10 = vcmp.ge.s32.totalorder %v1120_v7, %v12043_v43 }
 0x336   :  { %v9246_v58 = vpop.f32.mrb[52].mxu1  ;;  %17510 = vst [vmem:[#allocation47_spill] sm:$0xff] %v17509_v10  ;;  %vm12108_vm7 = vcmp.ge.s32.totalorder %v1108_v12, %v12043_v43 }
 0x337   :  { %v1238_v37 = vpop.f32.mrb[53].mxu1  ;;  %v1291_v12 = vmul.f32 0.17677669, %v9246_v58  ;;  %v12126_v6 = vsel %vm12108_vm7, %v1288_v40, -1e+30  ;;  %v17525_v40 = vmov 0 }
 0x338   :  { %v9247_v46 = vpop.f32.mrb[54].mxu1  ;;  %v17526_v40 = vsel %vm12141_vm10, 4294967295, %v17525_v40  ;;  %v1289_v48 = vmul.f32 0.17677669, %v1238_v37  ;;  %v17531_v37 = vmov 0 }
 0x339   :  { %v1292_v11 = vmul.f32 0.17677669, %v9247_v46  ;;  %v1241_v18 = vpop.f32.mrb[55].mxu1  ;;  %17527 = vst [vmem:[#allocation52_spill] sm:$0xff] %v17526_v40 }
 0x33a   :  { %1319 = vmax.xlane.f32.xlu1 %v12054_v59  ;;  %v1290_v46 = vmul.f32 0.17677669, %v1241_v18  ;;  %v12169_v21 = vsel %vm12152_vm11, %v1289_v48, -1e+30 }
 0x33b   :  { %v12070_v27 = vsel %vm12058_vm2, %v1292_v11, -1e+30  ;;  %v17511_v11 = vmov 0 }
 0x33c   :  { %v17512_v11 = vsel %vm12086_vm5, 4294967295, %v17511_v11  ;;  %v12093_v61 = vsel %vm12074_vm4, %v1290_v46, -1e+30  ;;  %v17517_v46 = vmov 0 }
 0x33d   :  { %17513 = vst [vmem:[#allocation48_spill] sm:$0xff] %v17512_v11  ;;  %v17518_v46 = vsel %vm12108_vm7, 4294967295, %v17517_v46 }
 0x33e   :  { %v9250_v45 = vpop.f32.mrb[56].mxu1  ;;  %1331 = vmax.xlane.f32.xlu1 %v12070_v27  ;;  %17519 = vst [vmem:[#allocation50_spill] sm:$0xff] %v17518_v46 }
 0x33f   :  { %v1254_v0 = vpop.f32.mrb[57].mxu1 }
 0x340   :  { %v9251_v18 = vpop.f32.mrb[58].mxu1  ;;  %1321 = vmax.xlane.f32.xlu0 %v12081_v47 }
 0x341   :  { %v1296_v13 = vmul.f32 0.17677669, %v9251_v18  ;;  %v1257_v63 = vpop.f32.mrb[59].mxu1  ;;  %v1111_v18 = vadd.s32 48, %v11556_v35 }
 0x342   :  { %1327 = vmax.xlane.f32.xlu1 %v12093_v61  ;;  %v1294_v34 = vmul.f32 0.17677669, %v1257_v63 }
 0x343   :  { %v12115_v16 = vsel %vm12097_vm6, %v1296_v13, -1e+30  ;;  %vm12130_vm9 = vcmp.ge.s32.totalorder %v1111_v18, %v12043_v43  ;;  %v1118_v18 = vadd.s32 104, %v11556_v35 }
 0x344   :  { %1317 = vmax.xlane.f32.xlu0 %v12104_v14  ;;  %v12137_v58 = vsel %vm12119_vm8, %v1294_v34, -1e+30  ;;  %v12148_v24 = vsel %vm12130_vm9, %v1291_v12, -1e+30  ;;  %v17528_v34 = vmov 0 }
 0x345   :  { %v17529_v34 = vsel %vm12152_vm11, 4294967295, %v17528_v34  ;;  %vm12163_vm12 = vcmp.ge.s32.totalorder %v1118_v18, %v12043_v43  ;;  %v1295_v12 = vmul.f32 0.17677669, %v9250_v45  ;;  %v1293_v45 = vmul.f32 0.17677669, %v1254_v0 }
 0x346   :  { %v9254_v55 = vpop.f32.mrb[60].mxu1  ;;  %1339 = vmax.xlane.f32.xlu1 %v12115_v16  ;;  %17530 = vst [vmem:[#allocation53_spill] sm:$0xff] %v17529_v34  ;;  %v17532_v37 = vsel %vm12163_vm12, 4294967295, %v17531_v37  ;;  %v17540_v0 = vmov 0 }
 0x347   :  { %v1270_v32 = vpop.f32.mrb[61].mxu1  ;;  %17533 = vst [vmem:[#allocation54_spill] sm:$0xff] %v17532_v37  ;;  %v1299_v60 = vmul.f32 0.17677669, %v9254_v55  ;;  %v17541_v0 = vsel %vm12200_vm15, 4294967295, %v17540_v0  ;;  %v17543_v55 = vmov 0 }
 0x348   :  { %v9255_v63 = vpop.f32.mrb[62].mxu1  ;;  %1323 = vmax.xlane.f32.xlu0 %v12126_v6  ;;  %17542 = vst [vmem:[#allocation57_spill] sm:$0xff] %v17541_v0 }
 0x349   :  { %v1300_v53 = vmul.f32 0.17677669, %v9255_v63  ;;  %v1273_v17 = vpop.f32.mrb[63].mxu1  ;;  %v1115_v63 = vadd.s32 80, %v11556_v35  ;;  %v12207_v1 = vsel %vm12200_vm15, %v1299_v60, -1e+30 }
 0x34a   :  { %1335 = vmax.xlane.f32.xlu1 %v12137_v58  ;;  %v1298_v7 = vmul.f32 0.17677669, %v1273_v17  ;;  %v17534_v17 = vmov 0 }
 0x34b   :  { %v12159_v36 = vsel %vm12141_vm10, %v1300_v53, -1e+30  ;;  %vm12173_vm13 = vcmp.ge.s32.totalorder %v1115_v63, %v12043_v43  ;;  %v1113_v53 = vadd.s32 64, %v11556_v35  ;;  %v17537_v63 = vmov 0 }
 0x34c   :  { %1329 = vmax.xlane.f32.xlu0 %v12148_v24  ;;  %v17535_v17 = vsel %vm12173_vm13, 4294967295, %v17534_v17  ;;  %v12180_v18 = vsel %vm12163_vm12, %v1298_v7, -1e+30  ;;  %v12185_v48 = vsel %vm12173_vm13, %v1295_v12, -1e+30  ;;  %v1117_v12 = vadd.s32 96, %v11556_v35 }
 0x34d   :  { %17536 = vst [vmem:[#allocation55_spill] sm:$0xff] %v17535_v17  ;;  %vm12189_vm14 = vcmp.ge.s32.totalorder %v1113_v53, %v12043_v43  ;;  %v1297_v53 = vmul.f32 0.17677669, %v1270_v32 }
 0x34e   :  { %1347 = vmax.xlane.f32.xlu1 %v12159_v36  ;;  %v17538_v63 = vsel %vm12189_vm14, 4294967295, %v17537_v63  ;;  %v12196_v7 = vsel %vm12189_vm14, %v1293_v45, -1e+30  ;;  %vm12211_vm0 = vcmp.ge.s32.totalorder %v1117_v12, %v12043_v43 }
 0x34f   :  { %17539 = vst [vmem:[#allocation56_spill] sm:$0xff] %v17538_v63  ;;  %v17544_v55 = vsel %vm12211_vm0, 4294967295, %v17543_v55  ;;  %v12217_v4 = vsel %vm12211_vm0, %v1297_v53, -1e+30 }
 0x350   :  { %1325 = vmax.xlane.f32.xlu0 %v12169_v21  ;;  %17545 = vst [vmem:[#allocation58_spill] sm:$0xff] %v17544_v55 }
 0x352   :  { %1343 = vmax.xlane.f32.xlu1 %v12180_v18 }
 0x354   :  { %1337 = vmax.xlane.f32.xlu0 %v12185_v48 }
 0x358   :  { %1333 = vmax.xlane.f32.xlu0 %v12196_v7 }
 0x35c   :  { %1345 = vmax.xlane.f32.xlu0 %v12207_v1 }
 0x35f   :  { %v12225_v60 = vpop.permute.xlu1 %1961 }
 0x360   :  { %1341 = vmax.xlane.f32.xlu0 %v12217_v4  ;;  %v12220_v45 = vpop.permute.xlu0 %1959  ;;  %17548 = vst [vmem:[#allocation61_spill] sm:$0xff] %v12225_v60 }
 0x361   :  { %17546 = vst [vmem:[#allocation59_spill] sm:$0xff] %v12220_v45  ;;  %9320 = vmatprep.subr.bf16.mxu1 %v12220_v45 }
 0x367   :  { %v12223_v32 = vpop.permute.xlu0 %1965 }
 0x368   :  { %17547 = vst [vmem:[#allocation60_spill] sm:$0xff] %v12223_v32  ;;  %v12229_v43 = vpop.permute.xlu1 %1963 }
 0x369   :  { %17550 = vst [vmem:[#allocation63_spill] sm:$0xff] %v12229_v43 }
 0x36f   :  { %v12227_v35 = vpop.permute.xlu0 %1969 }
 0x370   :  { %17549 = vst [vmem:[#allocation62_spill] sm:$0xff] %v12227_v35  ;;  %v12233_v31 = vpop.permute.xlu1 %1967 }
 0x371   :  { %17552 = vst [vmem:[#allocation65_spill] sm:$0xff] %v12233_v31 }
 0x377   :  { %v12231_v12 = vpop.permute.xlu0 %1973 }
 0x378   :  { %17551 = vst [vmem:[#allocation64_spill] sm:$0xff] %v12231_v12 }
 0x37b   :  { %v12240_v49 = vpop.permute.xlu0 %2451 }
 0x37c   :  { %17553 = vst [vmem:[#allocation66_spill] sm:$0xff] %v12240_v49 }
 0x37f   :  { %v12259_v20 = vpop.permute.xlu0 %2455 }
 0x380   :  { %17555 = vst [vmem:[#allocation68_spill] sm:$0xff] %v12259_v20 }
 0x3a0   :  { %v9306_v50 = vpop.f32.mrb[48].mxu0 }
 0x3a1   :  { %v1769_v8 = vmul.f32 0.17677669, %v9306_v50  ;;  %v1704_v53 = vpop.f32.mrb[49].mxu0 }
 0x3a2   :  { %v1767_v57 = vmul.f32 0.17677669, %v1704_v53  ;;  %v9307_v39 = vpop.f32.mrb[50].mxu0 }
 0x3a3   :  { %v1770_v44 = vmul.f32 0.17677669, %v9307_v39  ;;  %v1707_v56 = vpop.f32.mrb[51].mxu0  ;;  %v12237_v26 = vsel %vm12064_vm3, %v1769_v8, -1e+30  ;;  %v12252_v39 = vpop.permute.xlu1 %2449 }
 0x3a4   :  { %1803 = vmax.xlane.f32.xlu0 %v12237_v26  ;;  %v1768_v3 = vmul.f32 0.17677669, %v1707_v56  ;;  %v12249_v50 = vsel %vm12086_vm5, %v1767_v57, -1e+30  ;;  %17554 = vst [vmem:[#allocation67_spill] sm:$0xff] %v12252_v39 }
 0x3a5   :  { %v12244_v30 = vsel %vm12108_vm7, %v1770_v44, -1e+30 }
 0x3a6   :  { %1805 = vmax.xlane.f32.xlu1 %v12244_v30  ;;  %v12256_v53 = vsel %vm12046_vm1, %v1768_v3, -1e+30 }
 0x3a8   :  { %1799 = vmax.xlane.f32.xlu0 %v12249_v50 }
 0x3a9   :  { %v9310_v8 = vpop.f32.mrb[52].mxu0 }
 0x3aa   :  { %v1773_v56 = vmul.f32 0.17677669, %v9310_v8  ;;  %1801 = vmax.xlane.f32.xlu1 %v12256_v53  ;;  %v1720_v44 = vpop.f32.mrb[53].mxu0  ;;  %v12270_v8 = vpop.permute.xlu1 %2453 }
 0x3ab   :  { %v1771_v42 = vmul.f32 0.17677669, %v1720_v44  ;;  %v9311_v2 = vpop.f32.mrb[54].mxu0  ;;  %17556 = vst [vmem:[#allocation69_spill] sm:$0xff] %v12270_v8 }
 0x3ac   :  { %v1774_v38 = vmul.f32 0.17677669, %v9311_v2  ;;  %v1723_v57 = vpop.f32.mrb[55].mxu0  ;;  %v12263_v22 = vsel %vm12130_vm9, %v1773_v56, -1e+30  ;;  %v12277_v2 = vpop.permute.xlu0 %2459 }
 0x3ad   :  { %1811 = vmax.xlane.f32.xlu0 %v12263_v22  ;;  %v1772_v25 = vmul.f32 0.17677669, %v1723_v57  ;;  %v12275_v44 = vsel %vm12152_vm11, %v1771_v42, -1e+30  ;;  %17557 = vst [vmem:[#allocation70_spill] sm:$0xff] %v12277_v2 }
 0x3ae   :  { %v12268_v3 = vsel %vm12058_vm2, %v1774_v38, -1e+30  ;;  %v12289_v2 = vpop.permute.xlu1 %2457 }
 0x3af   :  { %1813 = vmax.xlane.f32.xlu1 %v12268_v3  ;;  %v12282_v57 = vsel %vm12074_vm4, %v1772_v25, -1e+30  ;;  %17558 = vst [vmem:[#allocation71_spill] sm:$0xff] %v12289_v2 }
 0x3b0   :  { %v12296_v25 = vpop.permute.xlu0 %2463 }
 0x3b1   :  { %1807 = vmax.xlane.f32.xlu0 %v12275_v44  ;;  %v9314_v56 = vpop.f32.mrb[56].mxu0  ;;  %17559 = vst [vmem:[#allocation72_spill] sm:$0xff] %v12296_v25 }
 0x3b2   :  { %v1777_v51 = vmul.f32 0.17677669, %v9314_v56  ;;  %v1736_v5 = vpop.f32.mrb[57].mxu0  ;;  %v12308_v54 = vpop.permute.xlu1 %2596 }
 0x3b3   :  { %v1775_v38 = vmul.f32 0.17677669, %v1736_v5  ;;  %1809 = vmax.xlane.f32.xlu1 %v12282_v57  ;;  %v9315_v9 = vpop.f32.mrb[58].mxu0  ;;  %17560 = vst [vmem:[#allocation73_spill] sm:$0xff] %v12308_v54 }
 0x3b4   :  { %v1778_v15 = vmul.f32 0.17677669, %v9315_v9  ;;  %v1739_v52 = vpop.f32.mrb[59].mxu0  ;;  %v12287_v42 = vsel %vm12173_vm13, %v1777_v51, -1e+30  ;;  %v12315_v41 = vpop.permute.xlu0 %2594 }
 0x3b5   :  { %1819 = vmax.xlane.f32.xlu0 %v12287_v42  ;;  %v1776_v56 = vmul.f32 0.17677669, %v1739_v52  ;;  %v12301_v5 = vsel %vm12189_vm14, %v1775_v38, -1e+30  ;;  %17561 = vst [vmem:[#allocation74_spill] sm:$0xff] %v12315_v41 }
 0x3b6   :  { %v12294_v20 = vsel %vm12097_vm6, %v1778_v15, -1e+30 }
 0x3b7   :  { %1821 = vmax.xlane.f32.xlu1 %v12294_v20  ;;  %v12306_v52 = vsel %vm12119_vm8, %v1776_v56, -1e+30 }
 0x3b8   :  { %v12334_v54 = vpop.permute.xlu0 %2598 }
 0x3b9   :  { %1815 = vmax.xlane.f32.xlu0 %v12301_v5  ;;  %v9318_v51 = vpop.f32.mrb[60].mxu0  ;;  %17563 = vst [vmem:[#allocation76_spill] sm:$0xff] %v12334_v54 }
 0x3ba   :  { %v1781_v9 = vmul.f32 0.17677669, %v9318_v51  ;;  %v1752_v2 = vpop.f32.mrb[61].mxu0 }
 0x3bb   :  { %v1779_v15 = vmul.f32 0.17677669, %v1752_v2  ;;  %1817 = vmax.xlane.f32.xlu1 %v12306_v52  ;;  %v9319_v25 = vpop.f32.mrb[62].mxu0 }
 0x3bc   :  { %v1782_v8 = vmul.f32 0.17677669, %v9319_v25  ;;  %v1755_v49 = vpop.f32.mrb[63].mxu0  ;;  %v12313_v38 = vsel %vm12200_vm15, %v1781_v9, -1e+30  ;;  %v12327_v25 = vpop.permute.xlu1 %2600 }
 0x3bd   :  { %1827 = vmax.xlane.f32.xlu0 %v12313_v38  ;;  %v1780_v51 = vmul.f32 0.17677669, %v1755_v49  ;;  %v12325_v2 = vsel %vm12211_vm0, %v1779_v15, -1e+30  ;;  %17562 = vst [vmem:[#allocation75_spill] sm:$0xff] %v12327_v25 }
 0x3be   :  { %v12320_v56 = vsel %vm12141_vm10, %v1782_v8, -1e+30  ;;  %v12339_v8 = vpop.permute.xlu0 %2461 }
 0x3bf   :  { %1829 = vmax.xlane.f32.xlu1 %v12320_v56  ;;  %v12332_v9 = vsel %vm12163_vm12, %v1780_v51, -1e+30  ;;  %17565 = vst [vmem:[#allocation78_spill] sm:$0xff] %v12339_v8 }
 0x3c0   :  { %v12337_v49 = vpop.permute.xlu1 %1971 }
 0x3c1   :  { %1823 = vmax.xlane.f32.xlu0 %v12325_v2  ;;  %17564 = vst [vmem:[#allocation77_spill] sm:$0xff] %v12337_v49 }
 0x3c3   :  { %1825 = vmax.xlane.f32.xlu1 %v12332_v9 }
 0x3c7   :  { %v1320_v41 = vpop.xlane.xlu1 %1319 }
 0x3c8   :  { %v1350_v31 = vsub.f32 %v12054_v59, %v1320_v41 }
 0x3ca   :  { %v1367_v8 = vmul.f32 1.442695, %v1350_v31 }
 0x3cb   :  { %v1332_v25 = vpop.xlane.xlu1 %1331 }
 0x3cc   :  { %v1356_v60 = vsub.f32 %v12070_v27, %v1332_v25 }
 0x3cd   :  { %v1322_v29 = vpop.xlane.xlu0 %1321 }
 0x3ce   :  { %v1351_v15 = vsub.f32 %v12081_v47, %v1322_v29 }
 0x3cf   :  { %v1328_v49 = vpop.xlane.xlu1 %1327 }
 0x3d0   :  { %v1369_v39 = vmul.f32 1.442695, %v1351_v15  ;;  %v1354_v41 = vsub.f32 %v12093_v61, %v1328_v49 }
 0x3d1   :  { %v1318_v12 = vpop.xlane.xlu0 %1317 }
 0x3d2   :  { %10052 = vpow2.f32 %v1369_v39  ;;  %v1349_v35 = vsub.f32 %v12104_v14, %v1318_v12  ;;  %v1375_v27 = vmul.f32 1.442695, %v1354_v41 }
 0x3d3   :  { %v1340_v59 = vpop.xlane.xlu1 %1339 }
 0x3d4   :  { %v1365_v51 = vmul.f32 1.442695, %v1349_v35  ;;  %v1379_v35 = vmul.f32 1.442695, %v1356_v60 }
 0x3d5   :  { %v1324_v54 = vpop.xlane.xlu0 %1323 }
 0x3d6   :  { %10054 = vpow2.f32 %v1365_v51  ;;  %v1352_v32 = vsub.f32 %v12126_v6, %v1324_v54 }
 0x3d7   :  { %v1336_v60 = vpop.xlane.xlu1 %1335 }
 0x3d8   :  { %v1371_v43 = vmul.f32 1.442695, %v1352_v32 }
 0x3d9   :  { %v1330_v45 = vpop.xlane.xlu0 %1329 }
 0x3da   :  { %10056 = vpow2.f32 %v1371_v43  ;;  %v1355_v29 = vsub.f32 %v12148_v24, %v1330_v45  ;;  %v1360_v24 = vsub.f32 %v12115_v16, %v1340_v59  ;;  %v1358_v16 = vsub.f32 %v12137_v58, %v1336_v60 }
 0x3db   :  { %10058 = vpow2.f32 %v1367_v8 }
 0x3dc   :  { %v12347_v47 = vpop.eup %10052  ;;  %v1377_v39 = vmul.f32 1.442695, %v1355_v29  ;;  %v1387_v49 = vmul.f32 1.442695, %v1360_v24  ;;  %v1383_v41 = vmul.f32 1.442695, %v1358_v16 }
 0x3dd   :  { %1401 = vadd.xlane.f32.xlu0 %v12347_v47  ;;  %v1326_v54 = vpop.xlane.xlu0 %1325 }
 0x3de   :  { %10060 = vpow2.f32 %v1377_v39  ;;  %v1353_v6 = vsub.f32 %v12169_v21, %v1326_v54 }
 0x3df   :  { %10062 = vpow2.f32 %v1379_v35 }
 0x3e0   :  { %v12352_v14 = vpop.eup %10054  ;;  %v1373_v31 = vmul.f32 1.442695, %v1353_v6 }
 0x3e1   :  { %1397 = vadd.xlane.f32.xlu0 %v12352_v14  ;;  %v1338_v45 = vpop.xlane.xlu0 %1337  ;;  %v9370_v32 = vpop.f32.mrb[64].mxu0 }
 0x3e2   :  { %10064 = vpow2.f32 %v1373_v31  ;;  %v1359_v61 = vsub.f32 %v12185_v48, %v1338_v45  ;;  %v2202_v43 = vpop.f32.mrb[65].mxu0  ;;  %v1348_v31 = vpop.xlane.xlu1 %1347 }
 0x3e3   :  { %v9371_v21 = vpop.f32.mrb[66].mxu0  ;;  %10066 = vpow2.f32 %v1375_v27 }
 0x3e4   :  { %v12357_v12 = vpop.eup %10056  ;;  %v1385_v25 = vmul.f32 1.442695, %v1359_v61  ;;  %v2205_v8 = vpop.f32.mrb[67].mxu0 }
 0x3e5   :  { %1403 = vadd.xlane.f32.xlu1 %v12357_v12  ;;  %v1334_v15 = vpop.xlane.xlu0 %1333  ;;  %v12362_v29 = vpop.eup %10058 }
 0x3e6   :  { %10068 = vpow2.f32 %v1385_v25  ;;  %v1357_v51 = vsub.f32 %v12196_v7, %v1334_v15  ;;  %v1364_v25 = vsub.f32 %v12159_v36, %v1348_v31 }
 0x3e7   :  { %10070 = vpow2.f32 %v1387_v49 }
 0x3e8   :  { %v12364_v48 = vpop.eup %10060  ;;  %v1381_v39 = vmul.f32 1.442695, %v1357_v51 }
 0x3e9   :  { %17566 = vst [vmem:[#allocation79_spill] sm:$0xff] %v12364_v48  ;;  %1399 = vadd.xlane.f32.xlu1 %v12362_v29  ;;  %1409 = vadd.xlane.f32.xlu0 %v12364_v48  ;;  %v1346_v35 = vpop.xlane.xlu0 %1345  ;;  %v9374_v59 = vpop.f32.mrb[68].mxu0 }
 0x3ea   :  { %10072 = vpow2.f32 %v1381_v39  ;;  %v12368_v54 = vpop.eup %10062  ;;  %v2218_v58 = vpop.f32.mrb[69].mxu0  ;;  %v1363_v24 = vsub.f32 %v12207_v1, %v1346_v35  ;;  %v2267_v35 = vmul.f32 0.17677669, %v9370_v32 }
 0x3eb   :  { %17567 = vst [vmem:[#allocation80_spill] sm:$0xff] %v12368_v54  ;;  %v9375_v7 = vpop.f32.mrb[70].mxu0  ;;  %10074 = vpow2.f32 %v1383_v41  ;;  %v1344_v39 = vpop.xlane.xlu1 %1343 }
 0x3ec   :  { %v12370_v6 = vpop.eup %10064  ;;  %v2221_v27 = vpop.f32.mrb[71].mxu0  ;;  %v1393_v49 = vmul.f32 1.442695, %v1363_v24  ;;  %v1362_v36 = vsub.f32 %v12180_v18, %v1344_v39  ;;  %v2265_v24 = vmul.f32 0.17677669, %v2202_v43 }
 0x3ed   :  { %17568 = vst [vmem:[#allocation81_spill] sm:$0xff] %v12370_v6  ;;  %1411 = vadd.xlane.f32.xlu1 %v12368_v54  ;;  %1405 = vadd.xlane.f32.xlu0 %v12370_v6  ;;  %v12375_v45 = vpop.eup %10066  ;;  %v1342_v61 = vpop.xlane.xlu0 %1341  ;;  %v1395_v6 = vmul.f32 1.442695, %v1364_v25 }
 0x3ee   :  { %v1361_v15 = vsub.f32 %v12217_v4, %v1342_v61  ;;  %10076 = vpow2.f32 %v1393_v49  ;;  %v2268_v61 = vmul.f32 0.17677669, %v9371_v21  ;;  %v1391_v32 = vmul.f32 1.442695, %v1362_v36 }
 0x3ef   :  { %10078 = vpow2.f32 %v1395_v6  ;;  %v12404_v43 = vsel %vm12086_vm5, %v2265_v24, -1e+30  ;;  %v2271_v36 = vmul.f32 0.17677669, %v9374_v59  ;;  %v2269_v24 = vmul.f32 0.17677669, %v2218_v58 }
 0x3f0   :  { %v12377_v60 = vpop.eup %10068  ;;  %v1389_v31 = vmul.f32 1.442695, %v1361_v15  ;;  %v12400_v15 = vsel %vm12108_vm7, %v2268_v61, -1e+30  ;;  %v2272_v61 = vmul.f32 0.17677669, %v9375_v7 }
 0x3f1   :  { %17569 = vst [vmem:[#allocation82_spill] sm:$0xff] %v12377_v60  ;;  %1407 = vadd.xlane.f32.xlu1 %v12375_v45  ;;  %1417 = vadd.xlane.f32.xlu0 %v12377_v60  ;;  %v9378_v16 = vpop.f32.mrb[72].mxu0  ;;  %v12383_v51 = vpop.eup %10070  ;;  %v12394_v60 = vsel %vm12064_vm3, %v2267_v35, -1e+30  ;;  %v12436_v11 = vsel %vm12152_vm11, %v2269_v24, -1e+30 }
 0x3f2   :  { %v2234_v41 = vpop.f32.mrb[73].mxu0  ;;  %10080 = vpow2.f32 %v1389_v31  ;;  %v12432_v59 = vsel %vm12058_vm2, %v2272_v61, -1e+30  ;;  %v2275_v7 = vmul.f32 0.17677669, %v9378_v16 }
 0x3f3   :  { %v9379_v48 = vpop.f32.mrb[74].mxu0  ;;  %10082 = vpow2.f32 %v1391_v32  ;;  %v2270_v32 = vmul.f32 0.17677669, %v2221_v27 }
 0x3f4   :  { %v12385_v1 = vpop.eup %10072  ;;  %v2237_v54 = vpop.f32.mrb[75].mxu0  ;;  %v12452_v61 = vsel %vm12173_vm13, %v2275_v7, -1e+30 }
 0x3f5   :  { %17570 = vst [vmem:[#allocation83_spill] sm:$0xff] %v12385_v1  ;;  %1419 = vadd.xlane.f32.xlu1 %v12383_v51  ;;  %1413 = vadd.xlane.f32.xlu0 %v12385_v1  ;;  %v12390_v4 = vpop.eup %10074  ;;  %v2266_v1 = vmul.f32 0.17677669, %v2205_v8  ;;  %v12442_v58 = vsel %vm12074_vm4, %v2270_v32, -1e+30 }
 0x3f7   :  { %v12412_v8 = vsel %vm12046_vm1, %v2266_v1, -1e+30  ;;  %v12426_v1 = vsel %vm12130_vm9, %v2271_v36, -1e+30 }
 0x3f8   :  { %v12408_v6 = vpop.eup %10076 }
 0x3f9   :  { %1415 = vadd.xlane.f32.xlu1 %v12390_v4  ;;  %2301 = vmax.xlane.f32.xlu0 %v12394_v60  ;;  %v9382_v25 = vpop.f32.mrb[76].mxu0  ;;  %v12416_v39 = vpop.eup %10078 }
 0x3fa   :  { %v2250_v18 = vpop.f32.mrb[77].mxu0  ;;  %v2279_v46 = vmul.f32 0.17677669, %v9382_v25  ;;  %v2273_v25 = vmul.f32 0.17677669, %v2234_v41 }
 0x3fb   :  { %v9383_v49 = vpop.f32.mrb[78].mxu0 }
 0x3fc   :  { %v2253_v21 = vpop.f32.mrb[79].mxu0  ;;  %v12418_v35 = vpop.eup %10080  ;;  %v2280_v36 = vmul.f32 0.17677669, %v9383_v49  ;;  %v12446_v27 = vsel %vm12200_vm15, %v2279_v46, -1e+30 }
 0x3fd   :  { %2303 = vmax.xlane.f32.xlu1 %v12400_v15  ;;  %2297 = vmax.xlane.f32.xlu0 %v12404_v43  ;;  %v12422_v31 = vpop.eup %10082  ;;  %v2278_v24 = vmul.f32 0.17677669, %v2253_v21  ;;  %v2276_v46 = vmul.f32 0.17677669, %v9379_v48  ;;  %v12462_v16 = vsel %vm12189_vm14, %v2273_v25, -1e+30 }
 0x3fe   :  { %v12456_v32 = vsel %vm12141_vm10, %v2280_v36, -1e+30  ;;  %v2274_v49 = vmul.f32 0.17677669, %v2237_v54  ;;  %v2277_v48 = vmul.f32 0.17677669, %v2250_v18 }
 0x3ff   :  { %v12466_v41 = vsel %vm12163_vm12, %v2278_v24, -1e+30  ;;  %v12472_v21 = vsel %vm12097_vm6, %v2276_v46, -1e+30 }
 0x400   :  { %v12477_v7 = vsel %vm12119_vm8, %v2274_v49, -1e+30  ;;  %v12482_v36 = vsel %vm12211_vm0, %v2277_v48, -1e+30  ;;  %vm17604_vm0 = vcmask 261120  }
 0x401   :  { %2299 = vmax.xlane.f32.xlu1 %v12412_v8  ;;  %1425 = vadd.xlane.f32.xlu0 %v12408_v6  ;;  %vm17611_vm12 = vmmov %vm17604_vm0 }
 0x402   :  { %vm17612_vm15 = vmmov %vm17604_vm0 }
 0x403   :  { %vm17614_vm10 = vmmov %vm17604_vm0 }
 0x404   :  { %vm17615_vm14 = vmmov %vm17604_vm0 }
 0x405   :  { %1427 = vadd.xlane.f32.xlu1 %v12416_v39  ;;  %1421 = vadd.xlane.f32.xlu0 %v12418_v35  ;;  %vm17617_vm8 = vmmov %vm17604_vm0 }
 0x409   :  { %1423 = vadd.xlane.f32.xlu1 %v12422_v31  ;;  %2309 = vmax.xlane.f32.xlu0 %v12426_v1 }
 0x40d   :  { %2311 = vmax.xlane.f32.xlu1 %v12432_v59  ;;  %2305 = vmax.xlane.f32.xlu0 %v12436_v11 }
 0x411   :  { %2307 = vmax.xlane.f32.xlu1 %v12442_v58  ;;  %2325 = vmax.xlane.f32.xlu0 %v12446_v27 }
 0x415   :  { %2317 = vmax.xlane.f32.xlu1 %v12452_v61  ;;  %2327 = vmax.xlane.f32.xlu0 %v12456_v32 }
 0x419   :  { %2313 = vmax.xlane.f32.xlu1 %v12462_v16  ;;  %2323 = vmax.xlane.f32.xlu0 %v12466_v41 }
 0x41d   :  { %2319 = vmax.xlane.f32.xlu1 %v12472_v21 }
 0x421   :  { %2315 = vmax.xlane.f32.xlu1 %v12477_v7 }
 0x425   :  { %2321 = vmax.xlane.f32.xlu1 %v12482_v36 }
 0x431   :  { %v1804_v54 = vpop.xlane.xlu0 %1803 }
 0x432   :  { %v1833_v25 = vsub.f32 %v12237_v26, %v1804_v54 }
 0x433   :  { %v1806_v24 = vpop.xlane.xlu1 %1805 }
 0x434   :  { %v1851_v46 = vmul.f32 1.442695, %v1833_v25  ;;  %v1834_v18 = vsub.f32 %v12244_v30, %v1806_v24 }
 0x435   :  { %v1800_v37 = vpop.xlane.xlu0 %1799 }
 0x436   :  { %10084 = vpow2.f32 %v1851_v46  ;;  %v1831_v49 = vsub.f32 %v12249_v50, %v1800_v37  ;;  %v1853_v63 = vmul.f32 1.442695, %v1834_v18 }
 0x437   :  { %v1802_v0 = vpop.xlane.xlu1 %1801 }
 0x438   :  { %v1847_v40 = vmul.f32 1.442695, %v1831_v49  ;;  %v1832_v48 = vsub.f32 %v12256_v53, %v1802_v0 }
 0x43a   :  { %10086 = vpow2.f32 %v1847_v40  ;;  %v1812_v55 = vpop.xlane.xlu0 %1811  ;;  %v1849_v26 = vmul.f32 1.442695, %v1832_v48 }
 0x43b   :  { %10088 = vpow2.f32 %v1853_v63  ;;  %v1837_v54 = vsub.f32 %v12263_v22, %v1812_v55 }
 0x43c   :  { %v1814_v23 = vpop.xlane.xlu1 %1813 }
 0x43d   :  { %v1838_v17 = vsub.f32 %v12268_v3, %v1814_v23  ;;  %v1859_v40 = vmul.f32 1.442695, %v1837_v54 }
 0x43e   :  { %v1808_v25 = vpop.xlane.xlu0 %1807 }
 0x43f   :  { %v1861_v46 = vmul.f32 1.442695, %v1838_v17  ;;  %v1835_v0 = vsub.f32 %v12275_v44, %v1808_v25 }
 0x440   :  { %v12491_v33 = vpop.eup %10084  ;;  %v1810_v30 = vpop.xlane.xlu1 %1809 }
 0x441   :  { %10090 = vpow2.f32 %v1861_v46  ;;  %v1836_v37 = vsub.f32 %v12282_v57, %v1810_v30  ;;  %1883 = vadd.xlane.f32.xlu0 %v12491_v33  ;;  %v1855_v17 = vmul.f32 1.442695, %v1835_v0 }
 0x442   :  { %10092 = vpow2.f32 %v1849_v26  ;;  %v1820_v50 = vpop.xlane.xlu0 %1819 }
 0x443   :  { %v1857_v23 = vmul.f32 1.442695, %v1836_v37  ;;  %v1841_v55 = vsub.f32 %v12287_v42, %v1820_v50 }
 0x444   :  { %v12496_v63 = vpop.eup %10086  ;;  %v1822_v53 = vpop.xlane.xlu1 %1821 }
 0x445   :  { %10094 = vpow2.f32 %v1857_v23  ;;  %v1842_v22 = vsub.f32 %v12294_v20, %v1822_v53  ;;  %1879 = vadd.xlane.f32.xlu1 %v12496_v63  ;;  %v12501_v24 = vpop.eup %10088  ;;  %v1867_v49 = vmul.f32 1.442695, %v1841_v55 }
 0x446   :  { %10096 = vpow2.f32 %v1859_v40  ;;  %v1816_v3 = vpop.xlane.xlu0 %1815 }
 0x447   :  { %v1869_v57 = vmul.f32 1.442695, %v1842_v22  ;;  %v1839_v20 = vsub.f32 %v12301_v5, %v1816_v3 }
 0x448   :  { %v1818_v18 = vpop.xlane.xlu1 %1817 }
 0x449   :  { %10098 = vpow2.f32 %v1869_v57  ;;  %v1840_v44 = vsub.f32 %v12306_v52, %v1818_v18  ;;  %1885 = vadd.xlane.f32.xlu1 %v12501_v24  ;;  %v1863_v52 = vmul.f32 1.442695, %v1839_v20 }
 0x44a   :  { %10100 = vpow2.f32 %v1855_v17  ;;  %v1828_v48 = vpop.xlane.xlu0 %1827 }
 0x44b   :  { %v12506_v26 = vpop.eup %10090  ;;  %v1865_v54 = vmul.f32 1.442695, %v1840_v44  ;;  %v1845_v30 = vsub.f32 %v12313_v38, %v1828_v48 }
 0x44c   :  { %v12508_v25 = vpop.eup %10092  ;;  %v1830_v42 = vpop.xlane.xlu1 %1829  ;;  %1893 = vadd.xlane.f32.xlu0 %v12506_v26 }
 0x44d   :  { %10102 = vpow2.f32 %v1865_v54  ;;  %v1846_v46 = vsub.f32 %v12320_v56, %v1830_v42  ;;  %1881 = vadd.xlane.f32.xlu1 %v12508_v25  ;;  %v1875_v56 = vmul.f32 1.442695, %v1845_v30 }
 0x44e   :  { %10104 = vpow2.f32 %v1867_v49  ;;  %v1824_v40 = vpop.xlane.xlu0 %1823 }
 0x44f   :  { %v12514_v37 = vpop.eup %10094  ;;  %v1877_v5 = vmul.f32 1.442695, %v1846_v46  ;;  %v1843_v53 = vsub.f32 %v12325_v2, %v1824_v40 }
 0x450   :  { %v12516_v0 = vpop.eup %10096  ;;  %v1826_v50 = vpop.xlane.xlu1 %1825  ;;  %1889 = vadd.xlane.f32.xlu0 %v12514_v37 }
 0x451   :  { %10106 = vpow2.f32 %v1877_v5  ;;  %v1844_v23 = vsub.f32 %v12332_v9, %v1826_v50  ;;  %1891 = vadd.xlane.f32.xlu1 %v12516_v0  ;;  %v1871_v55 = vmul.f32 1.442695, %v1843_v53 }
 0x452   :  { %10108 = vpow2.f32 %v1863_v52 }
 0x453   :  { %v12522_v22 = vpop.eup %10098  ;;  %v1873_v38 = vmul.f32 1.442695, %v1844_v23 }
 0x454   :  { %v12524_v17 = vpop.eup %10100  ;;  %1901 = vadd.xlane.f32.xlu0 %v12522_v22 }
 0x455   :  { %10110 = vpow2.f32 %v1873_v38  ;;  %1887 = vadd.xlane.f32.xlu1 %v12524_v17 }
 0x456   :  { %10112 = vpow2.f32 %v1875_v56 }
 0x457   :  { %v12528_v3 = vpop.eup %10102  ;;  %10114 = vpow2.f32 %v1871_v55 }
 0x458   :  { %v12530_v9 = vpop.eup %10104  ;;  %1897 = vadd.xlane.f32.xlu0 %v12528_v3 }
 0x459   :  { %1899 = vadd.xlane.f32.xlu1 %v12530_v9 }
 0x45b   :  { %v12534_v2 = vpop.eup %10106 }
 0x45c   :  { %v12536_v57 = vpop.eup %10108  ;;  %1909 = vadd.xlane.f32.xlu0 %v12534_v2 }
 0x45d   :  { %1895 = vadd.xlane.f32.xlu1 %v12536_v57 }
 0x45f   :  { %v12540_v18 = vpop.eup %10110 }
 0x460   :  { %v12542_v44 = vpop.eup %10112  ;;  %1905 = vadd.xlane.f32.xlu0 %v12540_v18 }
 0x461   :  { %1907 = vadd.xlane.f32.xlu1 %v12542_v44  ;;  %v12546_v49 = vpop.eup %10114 }
 0x465   :  { %1903 = vadd.xlane.f32.xlu1 %v12546_v49 }
 0x46a   :  { %v1402_v20 = vpop.xlane.xlu0 %1401 }
 0x46e   :  { %v1398_v48 = vpop.xlane.xlu0 %1397 }
 0x472   :  { %v1404_v54 = vpop.xlane.xlu1 %1403 }
 0x473   :  { %10116 = vrcp.f32 %v1404_v54 }
 0x474   :  { %10118 = vrcp.f32 %v1398_v48 }
 0x475   :  { %10120 = vrcp.f32 %v1402_v20 }
 0x476   :  { %v1400_v42 = vpop.xlane.xlu1 %1399  ;;  %v1410_v46 = vpop.xlane.xlu0 %1409 }
 0x477   :  { %10122 = vrcp.f32 %v1400_v42 }
 0x47a   :  { %v1412_v52 = vpop.xlane.xlu1 %1411  ;;  %v1406_v30 = vpop.xlane.xlu0 %1405 }
 0x47b   :  { %10124 = vrcp.f32 %v1412_v52 }
 0x47c   :  { %10126 = vrcp.f32 %v1406_v30 }
 0x47d   :  { %v10117_v5 = vpop.eup %10116  ;;  %10128 = vrcp.f32 %v1410_v46 }
 0x47e   :  { %v1408_v40 = vpop.xlane.xlu1 %1407  ;;  %v1418_v50 = vpop.xlane.xlu0 %1417  ;;  %v1448_v38 = vmul.f32 %v10117_v5, %v12357_v12 }
 0x47f   :  { %v10119_v23 = vpop.eup %10118  ;;  %10130 = vrcp.f32 %v1408_v40 }
 0x480   :  { %v10121_v56 = vpop.eup %10120  ;;  %v1445_v20 = vmul.f32 %v10119_v23, %v12352_v14  ;;  %v17571_v14 = vld [vmem:[#allocation59_spill] sm:$0xff] }
 0x481   :  { %v10123_v53 = vpop.eup %10122  ;;  %v1447_v42 = vmul.f32 %v10121_v56, %v12347_v47  ;;  %v17572_v47 = vld [vmem:[#allocation61_spill] sm:$0xff]  ;;  %v17573_v56 = vld [vmem:[#allocation80_spill] sm:$0xff] }
 0x482   :  { %v1420_v55 = vpop.xlane.xlu1 %1419  ;;  %v1414_v48 = vpop.xlane.xlu0 %1413  ;;  %v1446_v54 = vmul.f32 %v10123_v53, %v12362_v29 }
 0x483   :  { %10132 = vrcp.f32 %v1420_v55  ;;  %v1462_v46 = vpack.c.bf16 %v1448_v38, %v1447_v42 }
 0x484   :  { %v1461_v52 = vpack.c.bf16 %v1446_v54, %v1445_v20  ;;  %10134 = vrcp.f32 %v1414_v48  ;;  %v17575_v54 = vld [vmem:[#allocation79_spill] sm:$0xff] }
 0x485   :  { %v10125_v30 = vpop.eup %10124  ;;  %10136 = vrcp.f32 %v1418_v50  ;;  %v17574_v50 = vld [vmem:[#allocation81_spill] sm:$0xff] }
 0x486   :  { %v1416_v34 = vpop.xlane.xlu1 %1415  ;;  %9272 = vmatprep.mubr.bf16.mxu1 %v1461_v52  ;;  %v2302_v40 = vpop.xlane.xlu0 %2301  ;;  %v1452_v53 = vmul.f32 %v10125_v30, %v17573_v56 }
 0x487   :  { %v10127_v10 = vpop.eup %10126  ;;  %10138 = vrcp.f32 %v1416_v34  ;;  %v2331_v12 = vsub.f32 %v12394_v60, %v2302_v40  ;;  %9273 = vmatmul.mubr.bf16.vlgmr.msra.gmra.mrb[64].mxu1 %v1462_v46 }
 0x488   :  { %v10129_v5 = vpop.eup %10128  ;;  %9321 = vmatpush3.bf16.msra.mxu1 %v17571_v14  ;;  %v1449_v48 = vmul.f32 %v10127_v10, %v17574_v50 }
 0x489   :  { %v10131_v29 = vpop.eup %10130  ;;  %v2349_v23 = vmul.f32 1.442695, %v2331_v12  ;;  %9322 = vmatprep.subr.bf16.mxu1 %v17572_v47  ;;  %v1451_v42 = vmul.f32 %v10129_v5, %v17575_v54  ;;  %v17576_v12 = vld [vmem:[#allocation63_spill] sm:$0xff]  ;;  %v17580_v54 = vld [vmem:[#allocation65_spill] sm:$0xff] }
 0x48a   :  { %v2304_v38 = vpop.xlane.xlu1 %2303  ;;  %v2298_v55 = vpop.xlane.xlu0 %2297  ;;  %v1450_v20 = vmul.f32 %v10131_v29, %v12375_v45 }
 0x48b   :  { %10140 = vpow2.f32 %v2349_v23  ;;  %v2332_v34 = vsub.f32 %v12400_v15, %v2304_v38  ;;  %v2329_v60 = vsub.f32 %v12404_v43, %v2298_v55  ;;  %v1464_v30 = vpack.c.bf16 %v1452_v53, %v1451_v42  ;;  %v17577_v23 = vld [vmem:[#allocation60_spill] sm:$0xff]  ;;  %v17578_v55 = vld [vmem:[#allocation83_spill] sm:$0xff] }
 0x48c   :  { %9323 = vmatpush3.bf16.msra.mxu1 %v17572_v47  ;;  %v1463_v52 = vpack.c.bf16 %v1450_v20, %v1449_v48  ;;  %v17579_v20 = vld [vmem:[#allocation82_spill] sm:$0xff] }
 0x48d   :  { %v2351_v46 = vmul.f32 1.442695, %v2332_v34  ;;  %v2345_v40 = vmul.f32 1.442695, %v2329_v60  ;;  %9324 = vmatprep.subr.bf16.mxu1 %v17576_v12  ;;  %v10133_v14 = vpop.eup %10132 }
 0x48e   :  { %v2300_v56 = vpop.xlane.xlu1 %2299  ;;  %9276 = vmatprep.mubr.bf16.mxu1 %v1463_v52  ;;  %v1426_v10 = vpop.xlane.xlu0 %1425  ;;  %v1456_v47 = vmul.f32 %v10133_v14, %v12383_v51  ;;  %v17581_v52 = vld [vmem:[#allocation62_spill] sm:$0xff] }
 0x48f   :  { %v10135_v45 = vpop.eup %10134  ;;  %10142 = vpow2.f32 %v2351_v46  ;;  %v2330_v15 = vsub.f32 %v12412_v8, %v2300_v56  ;;  %9277 = vmatmul.mubr.bf16.gmra.mrb[68].mxu1 %v1464_v30 }
 0x490   :  { %v10137_v43 = vpop.eup %10136  ;;  %10144 = vpow2.f32 %v2345_v40  ;;  %9325 = vmatpush3.bf16.msra.mxu1 %v17576_v12  ;;  %v1453_v50 = vmul.f32 %v10135_v45, %v17578_v55  ;;  %v17582_v12 = vld [vmem:[#allocation77_spill] sm:$0xff]  ;;  %v17583_v45 = vld [vmem:[#allocation64_spill] sm:$0xff]  ;;  %v17585_v55 = vld [vmem:[#allocation10_spill] sm:$0xff] }
 0x491   :  { %v10139_v5 = vpop.eup %10138  ;;  %v2347_v29 = vmul.f32 1.442695, %v2330_v15  ;;  %9326 = vmatprep.subr.bf16.mxu1 %v17577_v23  ;;  %v1455_v8 = vmul.f32 %v10137_v43, %v17579_v20 }
 0x492   :  { %v1428_v53 = vpop.xlane.xlu1 %1427  ;;  %v1422_v38 = vpop.xlane.xlu0 %1421  ;;  %v1454_v48 = vmul.f32 %v10139_v5, %v12390_v4 }
 0x493   :  { %10146 = vpow2.f32 %v2347_v29  ;;  %v1466_v42 = vpack.c.bf16 %v1456_v47, %v1455_v8  ;;  %v17584_v47 = vld [vmem:[#allocation67_spill] sm:$0xff] }
 0x494   :  { %10148 = vrcp.f32 %v1428_v53  ;;  %9327 = vmatpush3.bf16.msra.mxu1 %v17577_v23  ;;  %v1465_v34 = vpack.c.bf16 %v1454_v48, %v1453_v50 }
 0x495   :  { %v12572_v60 = vpop.eup %10140  ;;  %10150 = vrcp.f32 %v1422_v38  ;;  %9328 = vmatprep.subr.bf16.mxu1 %v17580_v54 }
 0x496   :  { %10152 = vrcp.f32 %v1426_v10  ;;  %v1424_v51 = vpop.xlane.xlu1 %1423  ;;  %9280 = vmatprep.mubr.bf16.mxu1 %v1465_v34  ;;  %2381 = vadd.xlane.f32.xlu1 %v12572_v60 }
 0x497   :  { %10154 = vrcp.f32 %v1424_v51  ;;  %9281 = vmatmul.mubr.bf16.gmra.mrb[72].mxu1 %v1466_v42 }
 0x498   :  { %9329 = vmatpush3.bf16.msra.mxu1 %v17580_v54 }
 0x499   :  { %v12577_v4 = vpop.eup %10142  ;;  %9330 = vmatprep.subr.bf16.mxu1 %v17581_v52 }
 0x49a   :  { %v12580_v46 = vpop.eup %10144  ;;  %2383 = vadd.xlane.f32.xlu0 %v12577_v4  ;;  %v2312_v38 = vpop.xlane.xlu1 %2311 }
 0x49b   :  { %2377 = vadd.xlane.f32.xlu1 %v12580_v46 }
 0x49c   :  { %9331 = vmatpush3.bf16.msra.mxu1 %v17581_v52 }
 0x49d   :  { %v12585_v40 = vpop.eup %10146  ;;  %9332 = vmatprep.subr.bf16.mxu1 %v17582_v12 }
 0x49e   :  { %v10149_v30 = vpop.eup %10148  ;;  %2379 = vadd.xlane.f32.xlu0 %v12585_v40  ;;  %v2308_v50 = vpop.xlane.xlu1 %2307 }
 0x49f   :  { %v10151_v14 = vpop.eup %10150  ;;  %v1460_v15 = vmul.f32 %v10149_v30, %v12416_v39  ;;  %v2310_v39 = vpop.xlane.xlu0 %2309  ;;  %v2334_v20 = vsub.f32 %v12442_v58, %v2308_v50 }
 0x4a0   :  { %v10153_v56 = vpop.eup %10152  ;;  %9333 = vmatpush3.bf16.msra.mxu1 %v17582_v12  ;;  %v1457_v43 = vmul.f32 %v10151_v14, %v12418_v35  ;;  %v17586_v35 = vld [vmem:[#allocation8_spill] sm:$0xff]  ;;  %v2335_v34 = vsub.f32 %v12426_v1, %v2310_v39 }
 0x4a1   :  { %v10155_v10 = vpop.eup %10154  ;;  %9334 = vmatprep.subr.bf16.mxu1 %v17583_v45  ;;  %v1459_v29 = vmul.f32 %v10153_v56, %v12408_v6  ;;  %v2355_v42 = vmul.f32 1.442695, %v2334_v20 }
 0x4a2   :  { %v1458_v5 = vmul.f32 %v10155_v10, %v12422_v31  ;;  %v2318_v48 = vpop.xlane.xlu1 %2317  ;;  %v2357_v52 = vmul.f32 1.442695, %v2335_v34 }
 0x4a3   :  { %v1468_v53 = vpack.c.bf16 %v1460_v15, %v1459_v29  ;;  %v2306_v31 = vpop.xlane.xlu0 %2305  ;;  %v2339_v51 = vsub.f32 %v12452_v61, %v2318_v48  ;;  %10156 = vpow2.f32 %v2355_v42 }
 0x4a4   :  { %9335 = vmatpush3.bf16.msra.mxu1 %v17583_v45  ;;  %v1467_v23 = vpack.c.bf16 %v1458_v5, %v1457_v43  ;;  %v2333_v12 = vsub.f32 %v12436_v11, %v2306_v31  ;;  %10158 = vpow2.f32 %v2357_v52  ;;  %v2336_v45 = vsub.f32 %v12432_v59, %v2312_v38 }
 0x4a5   :  { %9384 = vmatprep.subr.bf16.mxu1 %v17584_v47  ;;  %v2365_v30 = vmul.f32 1.442695, %v2339_v51 }
 0x4a6   :  { %9284 = vmatprep.mubr.bf16.mxu1 %v1467_v23  ;;  %v2314_v6 = vpop.xlane.xlu1 %2313  ;;  %v2353_v58 = vmul.f32 1.442695, %v2333_v12  ;;  %v2359_v5 = vmul.f32 1.442695, %v2336_v45 }
 0x4a7   :  { %9285 = vmatmul.mubr.bf16.gmra.mrb[76].mxu1 %v1468_v53  ;;  %v2326_v8 = vpop.xlane.xlu0 %2325  ;;  %v2337_v56 = vsub.f32 %v12462_v16, %v2314_v6  ;;  %10160 = vpow2.f32 %v2365_v30 }
 0x4a8   :  { %10162 = vpow2.f32 %v2353_v58  ;;  %v2343_v61 = vsub.f32 %v12446_v27, %v2326_v8 }
 0x4a9   :  { %v2361_v15 = vmul.f32 1.442695, %v2337_v56 }
 0x4aa   :  { %v2320_v54 = vpop.xlane.xlu1 %2319  ;;  %v2373_v38 = vmul.f32 1.442695, %v2343_v61 }
 0x4ab   :  { %v2328_v14 = vpop.xlane.xlu0 %2327  ;;  %v2340_v1 = vsub.f32 %v12472_v21, %v2320_v54  ;;  %10164 = vpow2.f32 %v2361_v15 }
 0x4ac   :  { %2604 = vrot.lane.b32.xlu1 %v17585_v55, %s10921_s22  ;;  %10166 = vpow2.f32 %v2359_v5 }
 0x4ad   :  { %v2367_v29 = vmul.f32 1.442695, %v2340_v1  ;;  %v12611_v53 = vpop.eup %10156 }
 0x4ae   :  { %v2316_v10 = vpop.xlane.xlu1 %2315  ;;  %v12615_v55 = vpop.eup %10158 }
 0x4af   :  { %v2324_v43 = vpop.xlane.xlu0 %2323  ;;  %v2338_v23 = vsub.f32 %v12477_v7, %v2316_v10  ;;  %10168 = vpow2.f32 %v2367_v29 }
 0x4b0   :  { %v2342_v16 = vsub.f32 %v12466_v41, %v2324_v43  ;;  %10170 = vpow2.f32 %v2373_v38  ;;  %v2344_v41 = vsub.f32 %v12456_v32, %v2328_v14 }
 0x4b1   :  { %v2363_v21 = vmul.f32 1.442695, %v2338_v23  ;;  %v12617_v39 = vpop.eup %10160 }
 0x4b2   :  { %v2322_v11 = vpop.xlane.xlu1 %2321  ;;  %v2371_v27 = vmul.f32 1.442695, %v2342_v16  ;;  %v2375_v6 = vmul.f32 1.442695, %v2344_v41 }
 0x4b3   :  { %v2341_v59 = vsub.f32 %v12482_v36, %v2322_v11  ;;  %10172 = vpow2.f32 %v2363_v21  ;;  %v12622_v36 = vpop.eup %10162 }
 0x4b4   :  { %2602 = vrot.lane.b32.xlu0 %v17586_v35, %s10921_s22  ;;  %10174 = vpow2.f32 %v2371_v27 }
 0x4b5   :  { %v2369_v48 = vmul.f32 1.442695, %v2341_v59  ;;  %v12624_v31 = vpop.eup %10164 }
 0x4b6   :  { %v12628_v32 = vpop.eup %10166 }
 0x4b7   :  { %10176 = vpow2.f32 %v2369_v48 }
 0x4b9   :  { %v12630_v34 = vpop.eup %10168 }
 0x4ba   :  { %v12634_v42 = vpop.eup %10170 }
 0x4bd   :  { %v12636_v52 = vpop.eup %10172 }
 0x4be   :  { %v12639_v12 = vpop.eup %10174 }
 0x4c1   :  { %v12642_v30 = vpop.eup %10176 }
 0x4ce   :  { %v1884_v7 = vpop.xlane.xlu0 %1883 }
 0x4d0   :  { %2387 = vadd.xlane.f32.xlu1 %v12611_v53 }
 0x4d2   :  { %v1880_v50 = vpop.xlane.xlu1 %1879 }
 0x4d3   :  { %2389 = vadd.xlane.f32.xlu0 %v12615_v55 }
 0x4d4   :  { %2397 = vadd.xlane.f32.xlu1 %v12617_v39 }
 0x4d6   :  { %v1886_v35 = vpop.xlane.xlu1 %1885 }
 0x4d7   :  { %2385 = vadd.xlane.f32.xlu0 %v12622_v36  ;;  %10178 = vrcp.f32 %v1886_v35 }
 0x4d8   :  { %2393 = vadd.xlane.f32.xlu1 %v12624_v31  ;;  %10180 = vrcp.f32 %v1880_v50 }
 0x4d9   :  { %v1894_v20 = vpop.xlane.xlu0 %1893  ;;  %10182 = vrcp.f32 %v1884_v7 }
 0x4da   :  { %v1882_v8 = vpop.xlane.xlu1 %1881 }
 0x4db   :  { %10184 = vrcp.f32 %v1882_v8  ;;  %2391 = vadd.xlane.f32.xlu0 %v12628_v32  ;;  %v17588_v8 = vld [vmem:[#allocation69_spill] sm:$0xff] }
 0x4dc   :  { %10186 = vpow2.f32 %v2375_v6  ;;  %2399 = vadd.xlane.f32.xlu1 %v12630_v34 }
 0x4dd   :  { %v1890_v54 = vpop.xlane.xlu0 %1889 }
 0x4de   :  { %v1892_v51 = vpop.xlane.xlu1 %1891 }
 0x4df   :  { %2405 = vadd.xlane.f32.xlu0 %v12634_v42  ;;  %10188 = vrcp.f32 %v1892_v51 }
 0x4e0   :  { %2395 = vadd.xlane.f32.xlu1 %v12636_v52  ;;  %10190 = vrcp.f32 %v1890_v54 }
 0x4e1   :  { %v1902_v14 = vpop.xlane.xlu0 %1901  ;;  %v10179_v56 = vpop.eup %10178  ;;  %10192 = vrcp.f32 %v1894_v20 }
 0x4e2   :  { %v1888_v10 = vpop.xlane.xlu1 %1887  ;;  %v10181_v45 = vpop.eup %10180  ;;  %v1930_v1 = vmul.f32 %v10179_v56, %v12501_v24 }
 0x4e3   :  { %10194 = vrcp.f32 %v1888_v10  ;;  %2401 = vadd.xlane.f32.xlu0 %v12642_v30  ;;  %v10183_v58 = vpop.eup %10182  ;;  %v1927_v11 = vmul.f32 %v10181_v45, %v12496_v63 }
 0x4e4   :  { %2403 = vadd.xlane.f32.xlu1 %v12639_v12  ;;  %v1929_v23 = vmul.f32 %v10183_v58, %v12491_v33 }
 0x4e5   :  { %v10185_v15 = vpop.eup %10184  ;;  %v1898_v43 = vpop.xlane.xlu0 %1897 }
 0x4e6   :  { %v12647_v5 = vpop.eup %10186  ;;  %v1900_v61 = vpop.xlane.xlu1 %1899  ;;  %v1928_v29 = vmul.f32 %v10185_v15, %v12508_v25  ;;  %v1944_v38 = vpack.c.bf16 %v1930_v1, %v1929_v23  ;;  %v17587_v25 = vld [vmem:[#allocation66_spill] sm:$0xff]  ;;  %v17591_v1 = vld [vmem:[#allocation4_spill] sm:$0xff] }
 0x4e7   :  { %2407 = vadd.xlane.f32.xlu0 %v12647_v5  ;;  %10196 = vrcp.f32 %v1900_v61 }
 0x4e8   :  { %v1943_v16 = vpack.c.bf16 %v1928_v29, %v1927_v11  ;;  %10198 = vrcp.f32 %v1898_v43  ;;  %v17592_v43 = vld [vmem:[#allocation71_spill] sm:$0xff] }
 0x4e9   :  { %v1910_v59 = vpop.xlane.xlu0 %1909  ;;  %v10189_v21 = vpop.eup %10188  ;;  %10200 = vrcp.f32 %v1902_v14  ;;  %v17590_v14 = vld [vmem:[#allocation68_spill] sm:$0xff] }
 0x4ea   :  { %v1896_v24 = vpop.xlane.xlu1 %1895  ;;  %9336 = vmatprep.mubr.bf16.mxu1 %v1943_v16  ;;  %v10191_v27 = vpop.eup %10190  ;;  %v1933_v33 = vmul.f32 %v10189_v21, %v12516_v0  ;;  %v17595_v16 = vld [vmem:[#allocation12_spill] sm:$0xff] }
 0x4eb   :  { %10202 = vrcp.f32 %v1896_v24  ;;  %9337 = vmatmul.mubr.bf16.vlgmr.msra.gmra.mrb[80].mxu1 %v1944_v38  ;;  %v10193_v50 = vpop.eup %10192  ;;  %v1932_v35 = vmul.f32 %v10191_v27, %v12514_v37  ;;  %v17596_v27 = vld [vmem:[#allocation9_spill] sm:$0xff] }
 0x4ec   :  { %9385 = vmatpush3.bf16.msra.mxu1 %v17584_v47  ;;  %v1934_v6 = vmul.f32 %v10193_v50, %v12506_v26  ;;  %v17589_v26 = vld [vmem:[#allocation14_spill] sm:$0xff] }
 0x4ed   :  { %v10195_v63 = vpop.eup %10194  ;;  %9386 = vmatprep.subr.bf16.mxu1 %v17587_v25  ;;  %v1906_v48 = vpop.xlane.xlu0 %1905  ;;  %v17597_v50 = vld [vmem:[#allocation78_spill] sm:$0xff] }
 0x4ee   :  { %v1908_v41 = vpop.xlane.xlu1 %1907  ;;  %v1931_v7 = vmul.f32 %v10195_v63, %v12524_v17  ;;  %v1946_v47 = vpack.c.bf16 %v1934_v6, %v1933_v33  ;;  %v17603_v33 = vld [vmem:[#allocation74_spill] sm:$0xff] }
 0x4ef   :  { %10204 = vrcp.f32 %v1908_v41  ;;  %v17606_v41 = vld [vmem:[#allocation32_spill] sm:$0xff]  ;;  %v17609_v6 = vld [vmem:[#allocation34_spill] sm:$0xff] }
 0x4f0   :  { %9387 = vmatpush3.bf16.msra.mxu1 %v17587_v25  ;;  %v1945_v20 = vpack.c.bf16 %v1932_v35, %v1931_v7  ;;  %10206 = vrcp.f32 %v1906_v48  ;;  %v17602_v25 = vld [vmem:[#allocation28_spill] sm:$0xff]  ;;  %v17605_v48 = vld [vmem:[#allocation7_spill] sm:$0xff]  ;;  %v17608_v35 = vld [vmem:[#allocation30_spill] sm:$0xff] }
 0x4f1   :  { %9388 = vmatprep.subr.bf16.mxu1 %v17588_v8  ;;  %v10197_v54 = vpop.eup %10196  ;;  %10208 = vrcp.f32 %v1910_v59  ;;  %v17607_v7 = vld [vmem:[#allocation11_spill] sm:$0xff] }
 0x4f2   :  { %v1904_v51 = vpop.xlane.xlu1 %1903  ;;  %9340 = vmatprep.mubr.bf16.mxu1 %v1945_v20  ;;  %v10199_v0 = vpop.eup %10198  ;;  %v1937_v56 = vmul.f32 %v10197_v54, %v12530_v9 }
 0x4f3   :  { %10210 = vrcp.f32 %v1904_v51  ;;  %9341 = vmatmul.mubr.bf16.gmra.mrb[84].mxu1 %v1946_v47  ;;  %v10201_v17 = vpop.eup %10200  ;;  %v1936_v45 = vmul.f32 %v10199_v0, %v12528_v3  ;;  %v17593_v3 = vld [vmem:[#allocation6_spill] sm:$0xff] }
 0x4f4   :  { %9389 = vmatpush3.bf16.msra.mxu1 %v17588_v8  ;;  %v1938_v58 = vmul.f32 %v10201_v17, %v12522_v22  ;;  %v17594_v22 = vld [vmem:[#allocation70_spill] sm:$0xff] }
 0x4f5   :  { %v10203_v37 = vpop.eup %10202  ;;  %2608 = vrot.lane.b32.xlu1 %v17589_v26, %s10921_s22  ;;  %9390 = vmatprep.subr.bf16.mxu1 %v17590_v14 }
 0x4f6   :  { %v1935_v10 = vmul.f32 %v10203_v37, %v12536_v57  ;;  %v1948_v61 = vpack.c.bf16 %v1938_v58, %v1937_v56 }
 0x4f8   :  { %9391 = vmatpush3.bf16.msra.mxu1 %v17590_v14  ;;  %v1947_v15 = vpack.c.bf16 %v1936_v45, %v1935_v10 }
 0x4f9   :  { %2580 = vrot.lane.b32.xlu1 %v17591_v1, %s10921_s22  ;;  %9392 = vmatprep.subr.bf16.mxu1 %v17592_v43  ;;  %v10205_v11 = vpop.eup %10204  ;;  %v17610_v1 = vld [vmem:[#allocation73_spill] sm:$0xff] }
 0x4fa   :  { %9344 = vmatprep.mubr.bf16.mxu1 %v1947_v15  ;;  %v10207_v29 = vpop.eup %10206  ;;  %v1941_v23 = vmul.f32 %v10205_v11, %v12542_v44  ;;  %v17598_v44 = vld [vmem:[#allocation3_spill] sm:$0xff]  ;;  %v2635_v15 = vsel %vm17604_vm0, %v17603_v33, 0 }
 0x4fb   :  { %9345 = vmatmul.mubr.bf16.gmra.mrb[88].mxu1 %v1948_v61  ;;  %v10209_v9 = vpop.eup %10208  ;;  %v1940_v38 = vmul.f32 %v10207_v29, %v12540_v18  ;;  %v17599_v18 = vld [vmem:[#allocation13_spill] sm:$0xff] }
 0x4fc   :  { %9393 = vmatpush3.bf16.msra.mxu1 %v17592_v43  ;;  %v1942_v21 = vmul.f32 %v10209_v9, %v12534_v2  ;;  %v17600_v2 = vld [vmem:[#allocation72_spill] sm:$0xff] }
 0x4fd   :  { %v10211_v57 = vpop.eup %10210  ;;  %2584 = vrot.lane.b32.xlu1 %v17593_v3, %s10921_s22  ;;  %9394 = vmatprep.subr.bf16.mxu1 %v17594_v22 }
 0x4fe   :  { %2606 = vrot.lane.b32.xlu0 %v17595_v16, %s10921_s22  ;;  %v1939_v59 = vmul.f32 %v10211_v57, %v12546_v49  ;;  %v1950_v63 = vpack.c.bf16 %v1942_v21, %v1941_v23  ;;  %v17601_v49 = vld [vmem:[#allocation5_spill] sm:$0xff] }
 0x500   :  { %9395 = vmatpush3.bf16.msra.mxu1 %v17594_v22  ;;  %v1949_v24 = vpack.c.bf16 %v1940_v38, %v1939_v59 }
 0x501   :  { %2588 = vrot.lane.b32.xlu1 %v17596_v27, %s10921_s22  ;;  %9396 = vmatprep.subr.bf16.mxu1 %v17597_v50 }
 0x502   :  { %2578 = vrot.lane.b32.xlu0 %v17598_v44, %s10921_s22  ;;  %9348 = vmatprep.mubr.bf16.mxu1 %v1949_v24 }
 0x503   :  { %9349 = vmatmul.mubr.bf16.gmra.mrb[92].mxu1 %v1950_v63 }
 0x504   :  { %9397 = vmatpush3.bf16.msra.mxu1 %v17597_v50 }
 0x505   :  { %2592 = vrot.lane.b32.xlu1 %v17599_v18, %s10921_s22  ;;  %9398 = vmatprep.subr.bf16.mxu1 %v17600_v2 }
 0x506   :  { %2582 = vrot.lane.b32.xlu0 %v17601_v49, %s10921_s22 }
 0x508   :  { %9399 = vmatpush3.bf16.msra.mxu1 %v17600_v2 }
 0x509   :  { %2941 = vrot.lane.b32.xlu1 %v17602_v25, %s10921_s22  ;;  %9824 = vmatprep.subr.msk.bf16.mxu1 %vm17604_vm0, %v17603_v33 }
 0x50a   :  { %2586 = vrot.lane.b32.xlu0 %v17605_v48, %s10921_s22 }
 0x50d   :  { %2945 = vrot.lane.b32.xlu1 %v17606_v41, %s10921_s22 }
 0x50e   :  { %2590 = vrot.lane.b32.xlu0 %v17607_v7, %s10921_s22 }
 0x512   :  { %2939 = vrot.lane.b32.xlu0 %v17608_v35, %s10921_s22 }
 0x516   :  { %2943 = vrot.lane.b32.xlu0 %v17609_v6, %s10921_s22 }
 0x523   :  { %v2382_v20 = vpop.xlane.xlu1 %2381 }
 0x527   :  { %v2384_v8 = vpop.xlane.xlu0 %2383 }
 0x528   :  { %v2378_v47 = vpop.xlane.xlu1 %2377  ;;  %10212 = vrcp.f32 %v2384_v8 }
 0x529   :  { %10214 = vrcp.f32 %v2378_v47 }
 0x52a   :  { %10216 = vrcp.f32 %v2382_v20 }
 0x52b   :  { %v2380_v54 = vpop.xlane.xlu0 %2379 }
 0x52c   :  { %10218 = vrcp.f32 %v2380_v54  ;;  %v2605_v11 = vpop.permute.xlu1 %2604 }
 0x52f   :  { %v2603_v61 = vpop.permute.xlu0 %2602 }
 0x532   :  { %v10213_v51 = vpop.eup %10212 }
 0x533   :  { %v10215_v0 = vpop.eup %10214  ;;  %v2428_v26 = vmul.f32 %v10213_v51, %v12577_v4  ;;  %v2638_v4 = vsel %vm17612_vm15, %v17610_v1, 0  ;;  %vm17634_vm15 = vmmov %vm17604_vm0 }
 0x534   :  { %v10217_v17 = vpop.eup %10216  ;;  %v2425_v14 = vmul.f32 %v10215_v0, %v12580_v46  ;;  %v17613_v46 = vld [vmem:[#allocation76_spill] sm:$0xff] }
 0x535   :  { %v2427_v10 = vmul.f32 %v10217_v17, %v12572_v60  ;;  %v2641_v60 = vsel %vm17615_vm14, %v17613_v46, 0  ;;  %vm17628_vm14 = vmmov %vm17604_vm0 }
 0x536   :  { %v10219_v37 = vpop.eup %10218  ;;  %v2650_v63 = vsel %vm17628_vm14, %v2605_v11, 0  ;;  %vm17643_vm14 = vmmov %vm17604_vm0 }
 0x537   :  { %v2426_v56 = vmul.f32 %v10219_v37, %v12585_v40  ;;  %v2442_v58 = vpack.c.bf16 %v2428_v26, %v2427_v10  ;;  %v17616_v40 = vld [vmem:[#allocation75_spill] sm:$0xff] }
 0x538   :  { %v2644_v43 = vsel %vm17604_vm0, %v17616_v40, 0 }
 0x539   :  { %v2441_v45 = vpack.c.bf16 %v2426_v56, %v2425_v14 }
 0x53b   :  { %9400 = vmatprep.mubr.bf16.mxu1 %v2441_v45 }
 0x53c   :  { %9401 = vmatmul.mubr.bf16.vlgmr.msra.gmra.mrb[96].mxu1 %v2442_v58 }
 0x53d   :  { %9417 = vmatpush3.bf16.xpose.msra.mxu1 %v2635_v15 }
 0x53e   :  { %9825 = vmatprep.subr.msk.bf16.mxu1 %vm17611_vm12, %v17610_v1  ;;  %vm17618_vm12 = vmmov %vm17604_vm0 }
 0x545   :  { %9419 = vmatpush3.bf16.xpose.msra.mxu1 %v2638_v4 }
 0x546   :  { %9826 = vmatprep.subr.msk.bf16.mxu1 %vm17614_vm10, %v17613_v46  ;;  %vm17622_vm10 = vmmov %vm17604_vm0 }
 0x547   :  { %v2647_v3 = vsel %vm17622_vm10, %v2603_v61, 0  ;;  %vm17640_vm10 = vmmov %vm17604_vm0 }
 0x54d   :  { %9421 = vmatpush3.bf16.xpose.msra.mxu1 %v2641_v60 }
 0x54e   :  { %9827 = vmatprep.subr.msk.bf16.mxu1 %vm17617_vm8, %v17616_v40  ;;  %vm17624_vm8 = vmmov %vm17604_vm0 }
 0x555   :  { %9423 = vmatpush3.bf16.xpose.msra.mxu1 %v2644_v43 }
 0x556   :  { %9828 = vmatprep.subr.msk.bf16.mxu1 %vm17618_vm12, %v2603_v61  ;;  %vm17637_vm12 = vmmov %vm17604_vm0 }
 0x55a   :  { %v12729_v29 = vpop.f32.mrb[64].mxu1 }
 0x55b   :  { %17619 = vst [vmem:[#allocation59_spill] sm:$0xff] %v12729_v29  ;;  %v12731_v9 = vpop.f32.mrb[65].mxu1 }
 0x55c   :  { %17620 = vst [vmem:[#allocation61_spill] sm:$0xff] %v12731_v9  ;;  %v12733_v57 = vpop.f32.mrb[66].mxu1 }
 0x55d   :  { %17621 = vst [vmem:[#allocation80_spill] sm:$0xff] %v12733_v57  ;;  %v2388_v23 = vpop.xlane.xlu1 %2387  ;;  %9425 = vmatpush3.bf16.xpose.msra.mxu1 %v2647_v3  ;;  %v12738_v16 = vpop.f32.mrb[67].mxu1 }
 0x55e   :  { %17623 = vst [vmem:[#allocation81_spill] sm:$0xff] %v12738_v16  ;;  %9829 = vmatprep.subr.msk.bf16.mxu1 %vm17624_vm8, %v2605_v11  ;;  %10220 = vrcp.f32 %v2388_v23  ;;  %vm17642_vm8 = vmmov %vm17604_vm0 }
 0x560   :  { %v2390_v38 = vpop.xlane.xlu0 %2389 }
 0x561   :  { %v2398_v21 = vpop.xlane.xlu1 %2397 }
 0x562   :  { %v12743_v24 = vpop.f32.mrb[68].mxu1 }
 0x563   :  { %17625 = vst [vmem:[#allocation79_spill] sm:$0xff] %v12743_v24  ;;  %v12745_v27 = vpop.f32.mrb[69].mxu1 }
 0x564   :  { %17626 = vst [vmem:[#allocation63_spill] sm:$0xff] %v12745_v27  ;;  %v12747_v50 = vpop.f32.mrb[70].mxu1  ;;  %v2386_v44 = vpop.xlane.xlu0 %2385 }
 0x565   :  { %17627 = vst [vmem:[#allocation60_spill] sm:$0xff] %v12747_v50  ;;  %v2394_v2 = vpop.xlane.xlu1 %2393  ;;  %9427 = vmatpush3.bf16.xpose.msra.mxu1 %v2650_v63  ;;  %10222 = vrcp.f32 %v2386_v44  ;;  %v12752_v49 = vpop.f32.mrb[71].mxu1 }
 0x566   :  { %17629 = vst [vmem:[#allocation83_spill] sm:$0xff] %v12752_v49  ;;  %10224 = vrcp.f32 %v2390_v38 }
 0x568   :  { %v2392_v33 = vpop.xlane.xlu0 %2391  ;;  %v10221_v20 = vpop.eup %10220 }
 0x569   :  { %v2400_v48 = vpop.xlane.xlu1 %2399  ;;  %10226 = vrcp.f32 %v2392_v33  ;;  %v2430_v26 = vmul.f32 %v10221_v20, %v12611_v53 }
 0x56a   :  { %v12756_v41 = vpop.f32.mrb[72].mxu1  ;;  %10228 = vrcp.f32 %v2394_v2 }
 0x56b   :  { %17630 = vst [vmem:[#allocation82_spill] sm:$0xff] %v12756_v41  ;;  %v12758_v7 = vpop.f32.mrb[73].mxu1  ;;  %10230 = vrcp.f32 %v2400_v48 }
 0x56c   :  { %17631 = vst [vmem:[#allocation65_spill] sm:$0xff] %v12758_v7  ;;  %v12760_v35 = vpop.f32.mrb[74].mxu1  ;;  %v2406_v6 = vpop.xlane.xlu0 %2405 }
 0x56d   :  { %17632 = vst [vmem:[#allocation62_spill] sm:$0xff] %v12760_v35  ;;  %v2396_v47 = vpop.xlane.xlu1 %2395  ;;  %v12764_v54 = vpop.f32.mrb[75].mxu1 }
 0x56e   :  { %17633 = vst [vmem:[#allocation77_spill] sm:$0xff] %v12764_v54  ;;  %10232 = vrcp.f32 %v2396_v47 }
 0x56f   :  { %v10223_v0 = vpop.eup %10222  ;;  %10234 = vrcp.f32 %v2398_v21 }
 0x570   :  { %v2402_v17 = vpop.xlane.xlu0 %2401  ;;  %v2429_v37 = vmul.f32 %v10223_v0, %v12622_v36  ;;  %v10225_v14 = vpop.eup %10224 }
 0x571   :  { %v2404_v56 = vpop.xlane.xlu1 %2403  ;;  %10236 = vrcp.f32 %v2402_v17  ;;  %v2431_v15 = vmul.f32 %v10225_v14, %v12615_v55 }
 0x572   :  { %10238 = vrcp.f32 %v2404_v56  ;;  %v2443_v10 = vpack.c.bf16 %v2430_v26, %v2429_v37 }
 0x573   :  { %v10227_v45 = vpop.eup %10226 }
 0x574   :  { %9404 = vmatprep.mubr.bf16.mxu1 %v2443_v10  ;;  %v2408_v58 = vpop.xlane.xlu0 %2407  ;;  %v2432_v1 = vmul.f32 %v10227_v45, %v12628_v32  ;;  %v10229_v46 = vpop.eup %10228  ;;  %v17641_v10 = vld [vmem:[#allocation40_spill] sm:$0xff] }
 0x575   :  { %v2609_v4 = vpop.permute.xlu1 %2608  ;;  %10240 = vrcp.f32 %v2408_v58  ;;  %v10231_v40 = vpop.eup %10230  ;;  %v2433_v3 = vmul.f32 %v10229_v46, %v12624_v31 }
 0x576   :  { %v2444_v60 = vpack.c.bf16 %v2432_v1, %v2431_v15  ;;  %10242 = vrcp.f32 %v2406_v6  ;;  %v2436_v23 = vmul.f32 %v10231_v40, %v12630_v34  ;;  %v17646_v40 = vld [vmem:[#allocation42_spill] sm:$0xff] }
 0x578   :  { %v10233_v36 = vpop.eup %10232  ;;  %9405 = vmatmul.mubr.bf16.gmra.mrb[100].mxu1 %v2444_v60  ;;  %v2607_v53 = vpop.permute.xlu0 %2606 }
 0x579   :  { %v10235_v43 = vpop.eup %10234  ;;  %v2581_v61 = vpop.permute.xlu1 %2580  ;;  %9830 = vmatprep.subr.msk.bf16.mxu1 %vm17634_vm15, %v2607_v53  ;;  %v2653_v11 = vsel %vm17604_vm0, %v2607_v53, 0  ;;  %v2434_v55 = vmul.f32 %v10233_v36, %v12636_v52  ;;  %vm17644_vm15 = vmmov %vm17604_vm0  ;;  %v17648_v36 = vld [vmem:[#allocation41_spill] sm:$0xff]  ;;  %v17649_v53 = vld [vmem:[#allocation44_spill] sm:$0xff] }
 0x57a   :  { %v12776_v32 = vpop.f32.mrb[76].mxu1  ;;  %9429 = vmatpush3.bf16.xpose.msra.mxu1 %v2653_v11  ;;  %v2435_v48 = vmul.f32 %v10235_v43, %v12617_v39  ;;  %v17652_v43 = vld [vmem:[#allocation43_spill] sm:$0xff]  ;;  %v17655_v11 = vld [vmem:[#allocation45_spill] sm:$0xff] }
 0x57b   :  { %17635 = vst [vmem:[#allocation64_spill] sm:$0xff] %v12776_v32  ;;  %v10237_v38 = vpop.eup %10236  ;;  %v12779_v21 = vpop.f32.mrb[77].mxu1  ;;  %9831 = vmatprep.subr.msk.bf16.mxu1 %vm17637_vm12, %v2609_v4  ;;  %v2445_v63 = vpack.c.bf16 %v2434_v55, %v2433_v3  ;;  %vm17647_vm12 = vmmov %vm17604_vm0 }
 0x57c   :  { %17636 = vst [vmem:[#allocation67_spill] sm:$0xff] %v12779_v21  ;;  %v10239_v44 = vpop.eup %10238  ;;  %v12782_v2 = vpop.f32.mrb[78].mxu1  ;;  %v2437_v31 = vmul.f32 %v10237_v38, %v12642_v30  ;;  %v2446_v0 = vpack.c.bf16 %v2436_v23, %v2435_v48  ;;  %v2656_v30 = vsel %vm17640_vm10, %v2609_v4, 0  ;;  %v17645_v4 = vld [vmem:[#allocation39_spill] sm:$0xff]  ;;  %vm17650_vm10 = vmmov %vm17604_vm0 }
 0x57d   :  { %17638 = vst [vmem:[#allocation10_spill] sm:$0xff] %v12782_v2  ;;  %v2579_v33 = vpop.permute.xlu0 %2578  ;;  %v2585_v6 = vpop.permute.xlu1 %2584  ;;  %9408 = vmatprep.mubr.bf16.mxu1 %v2445_v63  ;;  %v2438_v20 = vmul.f32 %v10239_v44, %v12639_v12 }
 0x57e   :  { %v12788_v34 = vpop.f32.mrb[79].mxu1 }
 0x57f   :  { %17639 = vst [vmem:[#allocation8_spill] sm:$0xff] %v12788_v34  ;;  %v10241_v17 = vpop.eup %10240  ;;  %v2447_v37 = vpack.c.bf16 %v2438_v20, %v2437_v31 }
 0x580   :  { %9409 = vmatmul.mubr.bf16.gmra.mrb[104].mxu1 %v2446_v0  ;;  %v10243_v39 = vpop.eup %10242  ;;  %v2440_v56 = vmul.f32 %v10241_v17, %v12647_v5 }
 0x581   :  { %v2583_v26 = vpop.permute.xlu0 %2582  ;;  %9412 = vmatprep.mubr.bf16.mxu1 %v2447_v37  ;;  %v2589_v14 = vpop.permute.xlu1 %2588  ;;  %v2439_v12 = vmul.f32 %v10243_v39, %v12634_v42 }
 0x582   :  { %9431 = vmatpush3.bf16.xpose.msra.mxu1 %v2656_v30 }
 0x583   :  { %9512 = vmatprep.subr.bf16.mxu1 %v17641_v10  ;;  %v2448_v58 = vpack.c.bf16 %v2440_v56, %v2439_v12 }
 0x585   :  { %v2587_v45 = vpop.permute.xlu0 %2586  ;;  %v2593_v15 = vpop.permute.xlu1 %2592 }
 0x588   :  { %9413 = vmatmul.mubr.bf16.gmra.mrb[108].mxu1 %v2448_v58 }
 0x589   :  { %v2591_v1 = vpop.permute.xlu0 %2590  ;;  %9432 = vmatprep.mubr.msk.bf16.mxu1 %vm17642_vm8, %v2579_v33  ;;  %v2942_v60 = vpop.permute.xlu1 %2941  ;;  %vm17651_vm8 = vmmov %vm17604_vm0 }
 0x58d   :  { %v2940_v46 = vpop.permute.xlu0 %2939  ;;  %v2946_v42 = vpop.permute.xlu1 %2945 }
 0x58e   :  { %9448 = vmatprep.subr.bf16.mxu0 %v2940_v46 }
 0x58f   :  { %9449 = vmatpush3.bf16.msra.mxu0 %v2940_v46 }
 0x590   :  { %9450 = vmatprep.subr.bf16.mxu0 %v2942_v60  ;;  %9433 = vmatmul.mubr.msk.bf16.vlgmr.msra.gmra.mrb[112].mxu1 %vm17643_vm14, %v2581_v61  ;;  %v17653_v61 = vld [vmem:[#allocation46_spill] sm:$0xff]  ;;  %vm17654_vm14 = vmmov %vm17604_vm0 }
 0x591   :  { %9513 = vmatpush3.bf16.msra.mxu1 %v17641_v10  ;;  %9436 = vmatprep.mubr.msk.bf16.mxu1 %vm17644_vm15, %v2583_v26  ;;  %v2944_v5 = vpop.permute.xlu0 %2943 }
 0x592   :  { %9514 = vmatprep.subr.bf16.mxu1 %v17645_v4 }
 0x593   :  { %9451 = vmatpush3.bf16.msra.mxu0 %v2942_v60 }
 0x594   :  { %9452 = vmatprep.subr.bf16.mxu0 %v2944_v5 }
 0x595   :  { %9515 = vmatpush3.bf16.msra.mxu1 %v17645_v4 }
 0x596   :  { %9516 = vmatprep.subr.bf16.mxu1 %v17646_v40 }
 0x597   :  { %9453 = vmatpush3.bf16.msra.mxu0 %v2944_v5 }
 0x598   :  { %9454 = vmatprep.subr.bf16.mxu0 %v2946_v42  ;;  %9437 = vmatmul.mubr.msk.bf16.gmra.mrb[116].mxu1 %vm17604_vm0, %v2585_v6 }
 0x599   :  { %9517 = vmatpush3.bf16.msra.mxu1 %v17646_v40  ;;  %9440 = vmatprep.mubr.msk.bf16.mxu1 %vm17647_vm12, %v2587_v45 }
 0x59a   :  { %9518 = vmatprep.subr.bf16.mxu1 %v17648_v36 }
 0x59b   :  { %9455 = vmatpush3.bf16.msra.mxu0 %v2946_v42 }
 0x59d   :  { %9519 = vmatpush3.bf16.msra.mxu1 %v17648_v36 }
 0x59e   :  { %9520 = vmatprep.subr.bf16.mxu1 %v17649_v53 }
 0x5a0   :  { %9441 = vmatmul.mubr.msk.bf16.gmra.mrb[120].mxu1 %vm17650_vm10, %v2589_v14 }
 0x5a1   :  { %9521 = vmatpush3.bf16.msra.mxu1 %v17649_v53  ;;  %9444 = vmatprep.mubr.msk.bf16.mxu1 %vm17651_vm8, %v2591_v1 }
 0x5a2   :  { %9522 = vmatprep.subr.bf16.mxu1 %v17652_v43 }
 0x5a5   :  { %9523 = vmatpush3.bf16.msra.mxu1 %v17652_v43 }
 0x5a6   :  { %9524 = vmatprep.subr.bf16.mxu1 %v17653_v61 }
 0x5a8   :  { %9445 = vmatmul.mubr.msk.bf16.gmra.mrb[124].mxu1 %vm17654_vm14, %v2593_v15 }
 0x5a9   :  { %9525 = vmatpush3.bf16.msra.mxu1 %v17653_v61 }
 0x5aa   :  { %9526 = vmatprep.subr.bf16.mxu1 %v17655_v11 }
 0x5ad   :  { %9527 = vmatpush3.bf16.msra.mxu1 %v17655_v11 }
 0x5be   :  { %v12820_v3 = vpop.f32.mrb[80].mxu1 }
 0x5bf   :  { %17656 = vst [vmem:[#allocation66_spill] sm:$0xff] %v12820_v3  ;;  %v12822_v55 = vpop.f32.mrb[81].mxu1 }
 0x5c0   :  { %17657 = vst [vmem:[#allocation69_spill] sm:$0xff] %v12822_v55  ;;  %v12824_v23 = vpop.f32.mrb[82].mxu1 }
 0x5c1   :  { %17658 = vst [vmem:[#allocation14_spill] sm:$0xff] %v12824_v23  ;;  %v12828_v63 = vpop.f32.mrb[83].mxu1 }
 0x5c2   :  { %17659 = vst [vmem:[#allocation68_spill] sm:$0xff] %v12828_v63 }
 0x5c6   :  { %v12832_v33 = vpop.f32.mrb[84].mxu1 }
 0x5c7   :  { %17660 = vst [vmem:[#allocation4_spill] sm:$0xff] %v12832_v33  ;;  %v12834_v48 = vpop.f32.mrb[85].mxu1 }
 0x5c8   :  { %17661 = vst [vmem:[#allocation71_spill] sm:$0xff] %v12834_v48  ;;  %v12836_v31 = vpop.f32.mrb[86].mxu1  ;;  %v17708_v48 = vld [vmem:[#allocation38_spill] sm:$0xff] }
 0x5c9   :  { %17662 = vst [vmem:[#allocation6_spill] sm:$0xff] %v12836_v31  ;;  %v12840_v20 = vpop.f32.mrb[87].mxu1 }
 0x5ca   :  { %17663 = vst [vmem:[#allocation70_spill] sm:$0xff] %v12840_v20  ;;  %v17709_v20 = vld [vmem:[#allocation37_spill] sm:$0xff] }
 0x5ce   :  { %v12844_v17 = vpop.f32.mrb[88].mxu1 }
 0x5cf   :  { %17664 = vst [vmem:[#allocation12_spill] sm:$0xff] %v12844_v17  ;;  %v12846_v37 = vpop.f32.mrb[89].mxu1 }
 0x5d0   :  { %17665 = vst [vmem:[#allocation9_spill] sm:$0xff] %v12846_v37  ;;  %v12848_v26 = vpop.f32.mrb[90].mxu1 }
 0x5d1   :  { %17666 = vst [vmem:[#allocation78_spill] sm:$0xff] %v12848_v26  ;;  %v12852_v30 = vpop.f32.mrb[91].mxu1 }
 0x5d2   :  { %17667 = vst [vmem:[#allocation3_spill] sm:$0xff] %v12852_v30 }
 0x5d6   :  { %v12856_v56 = vpop.f32.mrb[92].mxu1 }
 0x5d7   :  { %17668 = vst [vmem:[#allocation13_spill] sm:$0xff] %v12856_v56  ;;  %v12858_v45 = vpop.f32.mrb[93].mxu1 }
 0x5d8   :  { %17669 = vst [vmem:[#allocation72_spill] sm:$0xff] %v12858_v45  ;;  %v12860_v12 = vpop.f32.mrb[94].mxu1 }
 0x5d9   :  { %17670 = vst [vmem:[#allocation5_spill] sm:$0xff] %v12860_v12  ;;  %v12864_v15 = vpop.f32.mrb[95].mxu1 }
 0x5da   :  { %17671 = vst [vmem:[#allocation28_spill] sm:$0xff] %v12864_v15 }
 0x60f   :  { %v12868_v46 = vpop.f32.mrb[96].mxu1 }
 0x610   :  { %17672 = vst [vmem:[#allocation74_spill] sm:$0xff] %v12868_v46  ;;  %v12870_v60 = vpop.f32.mrb[97].mxu1 }
 0x611   :  { %17673 = vst [vmem:[#allocation7_spill] sm:$0xff] %v12870_v60  ;;  %v12872_v5 = vpop.f32.mrb[98].mxu1 }
 0x612   :  { %17674 = vst [vmem:[#allocation32_spill] sm:$0xff] %v12872_v5  ;;  %v12876_v52 = vpop.f32.mrb[99].mxu1 }
 0x613   :  { %17675 = vst [vmem:[#allocation11_spill] sm:$0xff] %v12876_v52 }
 0x64b   :  { %v12880_v8 = vpop.f32.mrb[100].mxu1 }
 0x64c   :  { %17676 = vst [vmem:[#allocation30_spill] sm:$0xff] %v12880_v8  ;;  %v12882_v51 = vpop.f32.mrb[101].mxu1 }
 0x64d   :  { %17677 = vst [vmem:[#allocation34_spill] sm:$0xff] %v12882_v51  ;;  %v12884_v18 = vpop.f32.mrb[102].mxu1 }
 0x64e   :  { %17678 = vst [vmem:[#allocation73_spill] sm:$0xff] %v12884_v18  ;;  %v12888_v22 = vpop.f32.mrb[103].mxu1 }
 0x64f   :  { %17679 = vst [vmem:[#allocation76_spill] sm:$0xff] %v12888_v22 }
 0x653   :  { %v12892_v58 = vpop.f32.mrb[104].mxu1 }
 0x654   :  { %17680 = vst [vmem:[#allocation75_spill] sm:$0xff] %v12892_v58  ;;  %v12894_v1 = vpop.f32.mrb[105].mxu1 }
 0x655   :  { %17681 = vst [vmem:[#allocation40_spill] sm:$0xff] %v12894_v1  ;;  %v12896_v39 = vpop.f32.mrb[106].mxu1 }
 0x656   :  { %17682 = vst [vmem:[#allocation39_spill] sm:$0xff] %v12896_v39  ;;  %v12900_v6 = vpop.f32.mrb[107].mxu1  ;;  %v17698_v39 = vld [vmem:[#allocation52_spill] sm:$0xff] }
 0x657   :  { %17683 = vst [vmem:[#allocation42_spill] sm:$0xff] %v12900_v6  ;;  %vm17699_vm12 = vnez %v17698_v39  ;;  %v17700_v6 = vld [vmem:[#allocation57_spill] sm:$0xff] }
 0x658   :  { %vm17701_vm10 = vnez %v17700_v6 }
 0x65b   :  { %v12904_v25 = vpop.f32.mrb[108].mxu1 }
 0x65c   :  { %17684 = vst [vmem:[#allocation41_spill] sm:$0xff] %v12904_v25  ;;  %v12906_v42 = vpop.f32.mrb[109].mxu1 }
 0x65d   :  { %17685 = vst [vmem:[#allocation84_spill] sm:$0xff] %v12906_v42  ;;  %v12908_v44 = vpop.f32.mrb[110].mxu1 }
 0x65e   :  { %17686 = vst [vmem:[#allocation85_spill] sm:$0xff] %v12908_v44  ;;  %v12912_v47 = vpop.f32.mrb[111].mxu1  ;;  %v17692_v44 = vld [vmem:[#allocation49_spill] sm:$0xff] }
 0x65f   :  { %17687 = vst [vmem:[#allocation86_spill] sm:$0xff] %v12912_v47 }
 0x663   :  { %v9434_v14 = vpop.f32.mrb[112].mxu1 }
 0x664   :  { %v2757_v32 = vmul.f32 0.17677669, %v9434_v14  ;;  %v2692_v2 = vpop.f32.mrb[113].mxu1 }
 0x665   :  { %v9435_v21 = vpop.f32.mrb[114].mxu1  ;;  %v2755_v34 = vmul.f32 0.17677669, %v2692_v2 }
 0x666   :  { %v2695_v0 = vpop.f32.mrb[115].mxu1  ;;  %v2773_v41 = vsel %vm12064_vm3, %v2757_v32, -1e+30  ;;  %v2758_v7 = vmul.f32 0.17677669, %v9435_v21 }
 0x667   :  { %v2756_v35 = vmul.f32 0.17677669, %v2695_v0  ;;  %2791 = vmax.xlane.f32.xlu0 %v2773_v41  ;;  %v12925_v38 = vsel %vm12086_vm5, %v2755_v34, -1e+30 }
 0x668   :  { %v12930_v32 = vsel %vm12108_vm7, %v2758_v7, -1e+30 }
 0x669   :  { %v12920_v59 = vsel %vm12046_vm1, %v2756_v35, -1e+30 }
 0x66a   :  { %2789 = vmax.xlane.f32.xlu1 %v12920_v59 }
 0x66b   :  { %2787 = vmax.xlane.f32.xlu0 %v12925_v38  ;;  %v9438_v2 = vpop.f32.mrb[116].mxu1 }
 0x66c   :  { %v2708_v14 = vpop.f32.mrb[117].mxu1  ;;  %v2761_v21 = vmul.f32 0.17677669, %v9438_v2 }
 0x66d   :  { %v9439_v24 = vpop.f32.mrb[118].mxu1  ;;  %v2759_v34 = vmul.f32 0.17677669, %v2708_v14 }
 0x66e   :  { %v2762_v0 = vmul.f32 0.17677669, %v9439_v24  ;;  %v2711_v27 = vpop.f32.mrb[119].mxu1  ;;  %v12940_v29 = vsel %vm12130_vm9, %v2761_v21, -1e+30 }
 0x66f   :  { %2793 = vmax.xlane.f32.xlu0 %v12930_v32  ;;  %v2760_v35 = vmul.f32 0.17677669, %v2711_v27  ;;  %v12950_v14 = vsel %vm12152_vm11, %v2759_v34, -1e+30 }
 0x670   :  { %v12935_v49 = vsel %vm12058_vm2, %v2762_v0, -1e+30 }
 0x671   :  { %2801 = vmax.xlane.f32.xlu1 %v12935_v49  ;;  %v12945_v57 = vsel %vm12074_vm4, %v2760_v35, -1e+30 }
 0x673   :  { %2799 = vmax.xlane.f32.xlu0 %v12940_v29  ;;  %v9442_v7 = vpop.f32.mrb[120].mxu1 }
 0x674   :  { %v2724_v2 = vpop.f32.mrb[121].mxu1  ;;  %v2765_v9 = vmul.f32 0.17677669, %v9442_v7 }
 0x675   :  { %2797 = vmax.xlane.f32.xlu1 %v12945_v57  ;;  %v9443_v27 = vpop.f32.mrb[122].mxu1  ;;  %v2763_v47 = vmul.f32 0.17677669, %v2724_v2 }
 0x676   :  { %v2766_v16 = vmul.f32 0.17677669, %v9443_v27  ;;  %v2727_v25 = vpop.f32.mrb[123].mxu1  ;;  %v12960_v56 = vsel %vm12173_vm13, %v2765_v9, -1e+30  ;;  %v17694_v27 = vld [vmem:[#allocation51_spill] sm:$0xff] }
 0x677   :  { %2795 = vmax.xlane.f32.xlu0 %v12950_v14  ;;  %v2764_v21 = vmul.f32 0.17677669, %v2727_v25  ;;  %vm17695_vm15 = vnez %v17694_v27 }
 0x678   :  { %v12955_v42 = vsel %vm12097_vm6, %v2766_v16, -1e+30  ;;  %v17696_v16 = vld [vmem:[#allocation56_spill] sm:$0xff] }
 0x679   :  { %2809 = vmax.xlane.f32.xlu1 %v12955_v42  ;;  %v12965_v12 = vsel %vm17695_vm15, %v2764_v21, -1e+30  ;;  %vm17697_vm0 = vnez %v17696_v16 }
 0x67a   :  { %v12970_v2 = vsel %vm17697_vm0, %v2763_v47, -1e+30  ;;  %v17702_v47 = vld [vmem:[#allocation54_spill] sm:$0xff] }
 0x67b   :  { %2807 = vmax.xlane.f32.xlu0 %v12960_v56  ;;  %v9446_v34 = vpop.f32.mrb[124].mxu1  ;;  %vm17703_vm8 = vnez %v17702_v47 }
 0x67c   :  { %v2740_v7 = vpop.f32.mrb[125].mxu1  ;;  %v2769_v45 = vmul.f32 0.17677669, %v9446_v34 }
 0x67d   :  { %2805 = vmax.xlane.f32.xlu1 %v12965_v12  ;;  %v9447_v25 = vpop.f32.mrb[126].mxu1  ;;  %v2767_v21 = vmul.f32 0.17677669, %v2740_v7 }
 0x67e   :  { %v2770_v15 = vmul.f32 0.17677669, %v9447_v25  ;;  %v2743_v58 = vpop.f32.mrb[127].mxu1  ;;  %v12980_v17 = vsel %vm17701_vm10, %v2769_v45, -1e+30  ;;  %v17707_v45 = vld [vmem:[#allocation36_spill] sm:$0xff] }
 0x67f   :  { %2803 = vmax.xlane.f32.xlu0 %v12970_v2  ;;  %v2768_v9 = vmul.f32 0.17677669, %v2743_v58  ;;  %v17704_v58 = vld [vmem:[#allocation58_spill] sm:$0xff] }
 0x680   :  { %v12975_v1 = vsel %vm17699_vm12, %v2770_v15, -1e+30  ;;  %vm17705_vm14 = vnez %v17704_v58  ;;  %v17706_v15 = vld [vmem:[#allocation35_spill] sm:$0xff] }
 0x681   :  { %2817 = vmax.xlane.f32.xlu1 %v12975_v1  ;;  %v12985_v34 = vsel %vm17703_vm8, %v2768_v9, -1e+30  ;;  %v12990_v25 = vsel %vm17705_vm14, %v2767_v21, -1e+30  ;;  %vm17712_vm8 = vcmask 261120  }
 0x682   :  { %vm17713_vm12 = vmmov %vm17712_vm8 }
 0x683   :  { %2815 = vmax.xlane.f32.xlu0 %v12980_v17  ;;  %vm17714_vm14 = vmmov %vm17712_vm8 }
 0x684   :  { %vm17716_vm10 = vmmov %vm17712_vm8 }
 0x685   :  { %2813 = vmax.xlane.f32.xlu1 %v12985_v34  ;;  %vm17717_vm15 = vmmov %vm17712_vm8 }
 0x686   :  { %vm17719_vm0 = vmmov %vm17712_vm8 }
 0x687   :  { %2811 = vmax.xlane.f32.xlu0 %v12990_v25  ;;  %vm17745_vm6 = vmmov %vm17719_vm0 }
 0x696   :  { %2949 = vrot.lane.b32.xlu1 %v17706_v15, %s10921_s22 }
 0x69d   :  { %2947 = vrot.lane.b32.xlu0 %v17707_v45, %s10921_s22 }
 0x6f4   :  { %v2792_v7 = vpop.xlane.xlu0 %2791 }
 0x6f5   :  { %v2821_v26 = vsub.f32 %v2773_v41, %v2792_v7 }
 0x6f7   :  { %v2839_v37 = vmul.f32 1.442695, %v2821_v26  ;;  %v2790_v30 = vpop.xlane.xlu1 %2789 }
 0x6f8   :  { %v2820_v9 = vsub.f32 %v12920_v59, %v2790_v30  ;;  %v2788_v8 = vpop.xlane.xlu0 %2787 }
 0x6f9   :  { %10244 = vpow2.f32 %v2839_v37  ;;  %v2819_v18 = vsub.f32 %v12925_v38, %v2788_v8 }
 0x6fa   :  { %v2837_v21 = vmul.f32 1.442695, %v2820_v9 }
 0x6fb   :  { %v2835_v51 = vmul.f32 1.442695, %v2819_v18 }
 0x6fc   :  { %10246 = vpow2.f32 %v2837_v21  ;;  %v2794_v22 = vpop.xlane.xlu0 %2793 }
 0x6fd   :  { %10248 = vpow2.f32 %v2835_v51  ;;  %v2822_v15 = vsub.f32 %v12930_v32, %v2794_v22 }
 0x6fe   :  { %v2802_v33 = vpop.xlane.xlu1 %2801 }
 0x6ff   :  { %v2841_v31 = vmul.f32 1.442695, %v2822_v15  ;;  %v2826_v60 = vsub.f32 %v12935_v49, %v2802_v33 }
 0x700   :  { %v2800_v45 = vpop.xlane.xlu0 %2799 }
 0x701   :  { %10250 = vpow2.f32 %v2841_v31  ;;  %v2825_v5 = vsub.f32 %v12940_v29, %v2800_v45  ;;  %v2849_v23 = vmul.f32 1.442695, %v2826_v60 }
 0x702   :  { %v2798_v41 = vpop.xlane.xlu1 %2797 }
 0x703   :  { %v13000_v26 = vpop.eup %10244  ;;  %v2824_v63 = vsub.f32 %v12945_v57, %v2798_v41  ;;  %v2847_v52 = vmul.f32 1.442695, %v2825_v5 }
 0x704   :  { %2871 = vadd.xlane.f32.xlu1 %v13000_v26  ;;  %v2796_v59 = vpop.xlane.xlu0 %2795 }
 0x705   :  { %v2823_v46 = vsub.f32 %v12950_v14, %v2796_v59 }
 0x706   :  { %v13003_v37 = vpop.eup %10246  ;;  %v2810_v8 = vpop.xlane.xlu1 %2809 }
 0x707   :  { %v13005_v38 = vpop.eup %10248  ;;  %2869 = vadd.xlane.f32.xlu0 %v13003_v37  ;;  %v2843_v55 = vmul.f32 1.442695, %v2823_v46 }
 0x708   :  { %2867 = vadd.xlane.f32.xlu1 %v13005_v38  ;;  %v2808_v22 = vpop.xlane.xlu0 %2807 }
 0x709   :  { %10252 = vpow2.f32 %v2843_v55  ;;  %v2829_v29 = vsub.f32 %v12960_v56, %v2808_v22  ;;  %v17710_v22 = vld [vmem:[#allocation25_spill] sm:$0xff] }
 0x70a   :  { %v2806_v18 = vpop.xlane.xlu1 %2805  ;;  %10254 = vpow2.f32 %v2847_v52 }
 0x70b   :  { %v13009_v51 = vpop.eup %10250  ;;  %v2828_v3 = vsub.f32 %v12965_v12, %v2806_v18  ;;  %v17711_v18 = vld [vmem:[#allocation21_spill] sm:$0xff] }
 0x70c   :  { %2873 = vadd.xlane.f32.xlu1 %v13009_v51  ;;  %v2804_v31 = vpop.xlane.xlu0 %2803 }
 0x70d   :  { %v2853_v14 = vmul.f32 1.442695, %v2828_v3 }
 0x70e   :  { %v2818_v30 = vpop.xlane.xlu1 %2817 }
 0x70f   :  { %v2834_v33 = vsub.f32 %v12975_v1, %v2818_v30 }
 0x710   :  { %v2816_v32 = vpop.xlane.xlu0 %2815 }
 0x711   :  { %v2833_v12 = vsub.f32 %v12980_v17, %v2816_v32  ;;  %v2865_v5 = vmul.f32 1.442695, %v2834_v33  ;;  %v3231_v33 = vsel %vm17713_vm12, %v17711_v18, 0  ;;  %vm17720_vm12 = vmmov %vm17719_vm0 }
 0x712   :  { %v2814_v7 = vpop.xlane.xlu1 %2813 }
 0x713   :  { %v2832_v49 = vsub.f32 %v12985_v34, %v2814_v7  ;;  %v13025_v55 = vpop.eup %10252  ;;  %v2863_v1 = vmul.f32 1.442695, %v2833_v12  ;;  %v17721_v12 = vld [vmem:[#allocation16_spill] sm:$0xff] }
 0x714   :  { %v2812_v9 = vpop.xlane.xlu0 %2811 }
 0x715   :  { %v2831_v52 = vsub.f32 %v12990_v25, %v2812_v9  ;;  %v2861_v3 = vmul.f32 1.442695, %v2832_v49 }
 0x716   :  { %v2950_v15 = vpop.permute.xlu1 %2949 }
 0x717   :  { %v2859_v60 = vmul.f32 1.442695, %v2831_v52 }
 0x718   :  { %v2948_v21 = vpop.permute.xlu0 %2947 }
 0x719   :  { %9456 = vmatprep.subr.bf16.mxu0 %v2948_v21 }
 0x71a   :  { %9457 = vmatpush3.bf16.msra.mxu0 %v2948_v21  ;;  %v2845_v21 = vmul.f32 1.442695, %v2824_v63  ;;  %v2855_v63 = vmul.f32 1.442695, %v2829_v29 }
 0x71b   :  { %9458 = vmatprep.subr.bf16.mxu0 %v2950_v15 }
 0x71c   :  { %10256 = vpow2.f32 %v2845_v21 }
 0x71d   :  { %2951 = vrot.lane.b32.xlu0 %v17708_v48, %s10921_s22  ;;  %2953 = vrot.lane.b32.xlu1 %v17709_v20, %s10921_s22  ;;  %v2827_v48 = vsub.f32 %v12970_v2, %v2804_v31  ;;  %v2830_v20 = vsub.f32 %v12955_v42, %v2810_v8  ;;  %10258 = vpow2.f32 %v2849_v23  ;;  %v13030_v23 = vpop.eup %10254 }
 0x71e   :  { %9459 = vmatpush3.bf16.msra.mxu0 %v2950_v15  ;;  %10260 = vpow2.f32 %v2853_v14 }
 0x71f   :  { %v2851_v46 = vmul.f32 1.442695, %v2827_v48  ;;  %v2857_v57 = vmul.f32 1.442695, %v2830_v20 }
 0x721   :  { %10262 = vpow2.f32 %v2851_v46 }
 0x722   :  { %10264 = vpow2.f32 %v2857_v57 }
 0x723   :  { %10266 = vpow2.f32 %v2855_v63 }
 0x724   :  { %10268 = vpow2.f32 %v2861_v3 }
 0x725   :  { %10270 = vpow2.f32 %v2859_v60 }
 0x726   :  { %v13032_v56 = vpop.eup %10256  ;;  %10272 = vpow2.f32 %v2865_v5 }
 0x727   :  { %v13037_v42 = vpop.eup %10258  ;;  %10274 = vpow2.f32 %v2863_v1  ;;  %v17724_v1 = vld [vmem:[#allocation18_spill] sm:$0xff] }
 0x728   :  { %v13039_v2 = vpop.eup %10260 }
 0x72b   :  { %v13043_v34 = vpop.eup %10262 }
 0x72c   :  { %v13045_v25 = vpop.eup %10264 }
 0x72d   :  { %v13049_v17 = vpop.eup %10266 }
 0x72e   :  { %v13051_v45 = vpop.eup %10268 }
 0x72f   :  { %v13055_v41 = vpop.eup %10270 }
 0x730   :  { %v13057_v59 = vpop.eup %10272 }
 0x731   :  { %v13061_v8 = vpop.eup %10274 }
 0x73c   :  { %2875 = vadd.xlane.f32.xlu0 %v13025_v55 }
 0x740   :  { %2879 = vadd.xlane.f32.xlu0 %v13030_v23 }
 0x741   :  { %2877 = vadd.xlane.f32.xlu1 %v13032_v56 }
 0x744   :  { %2881 = vadd.xlane.f32.xlu0 %v13037_v42 }
 0x745   :  { %2885 = vadd.xlane.f32.xlu1 %v13039_v2 }
 0x748   :  { %2883 = vadd.xlane.f32.xlu0 %v13043_v34 }
 0x749   :  { %2889 = vadd.xlane.f32.xlu1 %v13045_v25 }
 0x74c   :  { %2887 = vadd.xlane.f32.xlu0 %v13049_v17 }
 0x74d   :  { %2893 = vadd.xlane.f32.xlu1 %v13051_v45 }
 0x750   :  { %2891 = vadd.xlane.f32.xlu0 %v13055_v41 }
 0x751   :  { %2897 = vadd.xlane.f32.xlu1 %v13057_v59 }
 0x754   :  { %2895 = vadd.xlane.f32.xlu0 %v13061_v8 }
 0x762   :  { %3674 = vrot.lane.b32.xlu1 %v17710_v22, %s10919_s4 }
 0x76a   :  { %3672 = vrot.lane.b32.xlu0 %v17711_v18, %s10919_s4 }
 0x791   :  { %v2872_v31 = vpop.xlane.xlu1 %2871 }
 0x794   :  { %v2870_v30 = vpop.xlane.xlu0 %2869 }
 0x795   :  { %10276 = vrcp.f32 %v2870_v30  ;;  %v2868_v32 = vpop.xlane.xlu1 %2867 }
 0x796   :  { %10278 = vrcp.f32 %v2868_v32 }
 0x797   :  { %10280 = vrcp.f32 %v2872_v31 }
 0x798   :  { %v2952_v7 = vpop.permute.xlu0 %2951 }
 0x799   :  { %v2874_v9 = vpop.xlane.xlu1 %2873  ;;  %9460 = vmatprep.subr.bf16.mxu0 %v2952_v7 }
 0x79a   :  { %10282 = vrcp.f32 %v2874_v9  ;;  %9461 = vmatpush3.bf16.msra.mxu0 %v2952_v7 }
 0x79d   :  { %v2954_v15 = vpop.permute.xlu1 %2953 }
 0x79e   :  { %9462 = vmatprep.subr.bf16.mxu0 %v2954_v15 }
 0x79f   :  { %v10277_v21 = vpop.eup %10276  ;;  %9463 = vmatpush3.bf16.msra.mxu0 %v2954_v15  ;;  %v17727_v15 = vld [vmem:[#allocation22_spill] sm:$0xff] }
 0x7a0   :  { %v10279_v48 = vpop.eup %10278  ;;  %9832 = vmatprep.subr.msk.bf16.mxu0 %vm17712_vm8, %v17711_v18  ;;  %v2916_v20 = vmul.f32 %v10277_v21, %v13003_v37  ;;  %v3234_v37 = vsel %vm17714_vm14, %v17710_v22, 0  ;;  %vm17723_vm14 = vmmov %vm17719_vm0 }
 0x7a1   :  { %v2915_v14 = vmul.f32 %v10279_v48, %v13005_v38  ;;  %v10281_v29 = vpop.eup %10280  ;;  %v17715_v38 = vld [vmem:[#allocation29_spill] sm:$0xff]  ;;  %v3243_v60 = vsel %vm17723_vm14, %v17721_v12, 0  ;;  %vm17731_vm14 = vmmov %vm17719_vm0 }
 0x7a2   :  { %v2917_v49 = vmul.f32 %v10281_v29, %v13000_v26  ;;  %v3237_v26 = vsel %vm17717_vm15, %v17715_v38, 0  ;;  %vm17726_vm15 = vmmov %vm17719_vm0 }
 0x7a3   :  { %v2931_v46 = vpack.c.bf16 %v2916_v20, %v2915_v14  ;;  %v3246_v32 = vsel %vm17726_vm15, %v17724_v1, 0  ;;  %vm17734_vm15 = vmmov %vm17719_vm0 }
 0x7a4   :  { %v10283_v57 = vpop.eup %10282 }
 0x7a5   :  { %v2918_v63 = vmul.f32 %v10283_v57, %v13009_v51  ;;  %9464 = vmatprep.mubr.bf16.mxu0 %v2931_v46  ;;  %v17718_v51 = vld [vmem:[#allocation33_spill] sm:$0xff] }
 0x7a6   :  { %v3240_v3 = vsel %vm17720_vm12, %v17718_v51, 0  ;;  %vm17728_vm12 = vmmov %vm17719_vm0 }
 0x7a7   :  { %v2932_v52 = vpack.c.bf16 %v2918_v63, %v2917_v49  ;;  %v3249_v29 = vsel %vm17728_vm12, %v17727_v15, 0  ;;  %vm17737_vm12 = vmmov %vm17719_vm0 }
 0x7a9   :  { %9465 = vmatmul.mubr.bf16.vlgmr.msra.gmra.mrb[80].mxu0 %v2932_v52 }
 0x7aa   :  { %9481 = vmatpush3.bf16.xpose.msra.mxu0 %v3231_v33  ;;  %v17729_v33 = vld [vmem:[#allocation26_spill] sm:$0xff] }
 0x7ab   :  { %9833 = vmatprep.subr.msk.bf16.mxu0 %vm17712_vm8, %v17710_v22  ;;  %vm17722_vm8 = vmmov %vm17719_vm0 }
 0x7b2   :  { %9483 = vmatpush3.bf16.xpose.msra.mxu0 %v3234_v37 }
 0x7b3   :  { %9834 = vmatprep.subr.msk.bf16.mxu0 %vm17716_vm10, %v17715_v38  ;;  %vm17725_vm10 = vmmov %vm17719_vm0 }
 0x7ba   :  { %9485 = vmatpush3.bf16.xpose.msra.mxu0 %v3237_v26 }
 0x7bb   :  { %9835 = vmatprep.subr.msk.bf16.mxu0 %vm17719_vm0, %v17718_v51 }
 0x7c2   :  { %9487 = vmatpush3.bf16.xpose.msra.mxu0 %v3240_v3 }
 0x7c3   :  { %9836 = vmatprep.subr.msk.bf16.mxu0 %vm17722_vm8, %v17721_v12  ;;  %vm17730_vm8 = vmmov %vm17719_vm0 }
 0x7c9   :  { %v2876_v5 = vpop.xlane.xlu0 %2875 }
 0x7ca   :  { %9489 = vmatpush3.bf16.xpose.msra.mxu0 %v3243_v60  ;;  %10284 = vrcp.f32 %v2876_v5 }
 0x7cb   :  { %9837 = vmatprep.subr.msk.bf16.mxu0 %vm17725_vm10, %v17724_v1  ;;  %vm17732_vm10 = vmmov %vm17719_vm0 }
 0x7cd   :  { %v2880_v31 = vpop.xlane.xlu0 %2879 }
 0x7ce   :  { %v2878_v30 = vpop.xlane.xlu1 %2877 }
 0x7cf   :  { %10286 = vrcp.f32 %v2878_v30 }
 0x7d0   :  { %10288 = vrcp.f32 %v2880_v31 }
 0x7d1   :  { %v2882_v7 = vpop.xlane.xlu0 %2881 }
 0x7d2   :  { %9491 = vmatpush3.bf16.xpose.msra.mxu0 %v3246_v32  ;;  %10290 = vrcp.f32 %v2882_v7  ;;  %v2886_v9 = vpop.xlane.xlu1 %2885 }
 0x7d3   :  { %9838 = vmatprep.subr.msk.bf16.mxu0 %vm17719_vm0, %v17727_v15  ;;  %10292 = vrcp.f32 %v2886_v9 }
 0x7d4   :  { %v10285_v20 = vpop.eup %10284 }
 0x7d5   :  { %v2884_v21 = vpop.xlane.xlu0 %2883  ;;  %v2919_v63 = vmul.f32 %v10285_v20, %v13025_v55  ;;  %v3252_v55 = vsel %vm17731_vm14, %v17729_v33, 0  ;;  %vm17741_vm14 = vmmov %vm17719_vm0 }
 0x7d6   :  { %10294 = vrcp.f32 %v2884_v21  ;;  %v2890_v48 = vpop.xlane.xlu1 %2889 }
 0x7d7   :  { %10296 = vrcp.f32 %v2890_v48 }
 0x7d9   :  { %v10287_v14 = vpop.eup %10286  ;;  %v2888_v46 = vpop.xlane.xlu0 %2887 }
 0x7da   :  { %v10289_v57 = vpop.eup %10288  ;;  %9493 = vmatpush3.bf16.xpose.msra.mxu0 %v3249_v29  ;;  %10298 = vrcp.f32 %v2888_v46  ;;  %v2894_v49 = vpop.xlane.xlu1 %2893  ;;  %v2920_v52 = vmul.f32 %v10287_v14, %v13032_v56 }
 0x7db   :  { %9839 = vmatprep.subr.msk.bf16.mxu0 %vm17730_vm8, %v17729_v33  ;;  %10300 = vrcp.f32 %v2894_v49  ;;  %v2921_v60 = vmul.f32 %v10289_v57, %v13030_v23  ;;  %vm17739_vm8 = vmmov %vm17719_vm0 }
 0x7dc   :  { %v10291_v37 = vpop.eup %10290  ;;  %v2933_v26 = vpack.c.bf16 %v2920_v52, %v2919_v63 }
 0x7dd   :  { %v2892_v3 = vpop.xlane.xlu0 %2891  ;;  %v2922_v5 = vmul.f32 %v10291_v37, %v13037_v42  ;;  %v10293_v31 = vpop.eup %10292 }
 0x7de   :  { %10302 = vrcp.f32 %v2892_v3  ;;  %v2898_v30 = vpop.xlane.xlu1 %2897  ;;  %9468 = vmatprep.mubr.bf16.mxu0 %v2933_v26  ;;  %v2924_v21 = vmul.f32 %v10293_v31, %v13039_v2  ;;  %v17733_v3 = vld [vmem:[#allocation19_spill] sm:$0xff]  ;;  %v17746_v31 = vld [vmem:[#allocation24_spill] sm:$0xff] }
 0x7df   :  { %v2934_v32 = vpack.c.bf16 %v2922_v5, %v2921_v60  ;;  %10304 = vrcp.f32 %v2898_v30  ;;  %v17735_v60 = vld [vmem:[#allocation23_spill] sm:$0xff] }
 0x7e0   :  { %v10295_v7 = vpop.eup %10294  ;;  %v17736_v5 = vld [vmem:[#allocation27_spill] sm:$0xff] }
 0x7e1   :  { %9469 = vmatmul.mubr.bf16.gmra.mrb[84].mxu0 %v2934_v32  ;;  %v2896_v56 = vpop.xlane.xlu0 %2895  ;;  %v2923_v9 = vmul.f32 %v10295_v7, %v13043_v34  ;;  %v10297_v48 = vpop.eup %10296 }
 0x7e2   :  { %9495 = vmatpush3.bf16.xpose.msra.mxu0 %v3252_v55  ;;  %10306 = vrcp.f32 %v2896_v56  ;;  %v2926_v29 = vmul.f32 %v10297_v48, %v13045_v25 }
 0x7e3   :  { %v2935_v23 = vpack.c.bf16 %v2924_v21, %v2923_v9 }
 0x7e4   :  { %v10299_v42 = vpop.eup %10298 }
 0x7e5   :  { %9472 = vmatprep.mubr.bf16.mxu0 %v2935_v23  ;;  %v13110_v20 = vpop.permute.xlu0 %3672  ;;  %v2925_v14 = vmul.f32 %v10299_v42, %v13049_v17  ;;  %v10301_v46 = vpop.eup %10300 }
 0x7e6   :  { %9840 = vmatprep.subr.msk.bf16.mxu1 %vm17732_vm10, %v13110_v20  ;;  %v2928_v49 = vmul.f32 %v10301_v46, %v13051_v45  ;;  %v17738_v45 = vld [vmem:[#allocation31_spill] sm:$0xff]  ;;  %vm17743_vm10 = vmmov %vm17719_vm0 }
 0x7e7   :  { %v2936_v57 = vpack.c.bf16 %v2926_v29, %v2925_v14 }
 0x7e8   :  { %v10303_v34 = vpop.eup %10302 }
 0x7e9   :  { %9473 = vmatmul.mubr.bf16.gmra.mrb[88].mxu0 %v2936_v57  ;;  %v2927_v2 = vmul.f32 %v10303_v34, %v13055_v41  ;;  %v10305_v63 = vpop.eup %10304  ;;  %v17740_v41 = vld [vmem:[#allocation15_spill] sm:$0xff] }
 0x7ea   :  { %v2930_v17 = vmul.f32 %v10305_v63, %v13057_v59  ;;  %v17744_v59 = vld [vmem:[#allocation20_spill] sm:$0xff] }
 0x7eb   :  { %v2937_v52 = vpack.c.bf16 %v2928_v49, %v2927_v2 }
 0x7ec   :  { %v10307_v37 = vpop.eup %10306 }
 0x7ed   :  { %9476 = vmatprep.mubr.bf16.mxu0 %v2937_v52  ;;  %v2929_v26 = vmul.f32 %v10307_v37, %v13061_v8  ;;  %v17742_v8 = vld [vmem:[#allocation17_spill] sm:$0xff] }
 0x7ef   :  { %v2938_v25 = vpack.c.bf16 %v2930_v17, %v2929_v26 }
 0x7f1   :  { %9477 = vmatmul.mubr.bf16.gmra.mrb[92].mxu0 %v2938_v25 }
 0x7f2   :  { %9496 = vmatprep.mubr.msk.bf16.mxu0 %vm17734_vm15, %v17733_v3  ;;  %vm17747_vm15 = vmmov %vm17719_vm0 }
 0x7f9   :  { %9497 = vmatmul.mubr.msk.bf16.vlgmr.msra.gmra.mrb[96].mxu0 %vm17719_vm0, %v17735_v60  ;;  %vm17765_vm0 = vnez %v17696_v16 }
 0x7fa   :  { %9500 = vmatprep.mubr.msk.bf16.mxu0 %vm17737_vm12, %v17736_v5  ;;  %vm17766_vm12 = vnez %v17694_v27 }
 0x801   :  { %9501 = vmatmul.mubr.msk.bf16.gmra.mrb[100].mxu0 %vm17739_vm8, %v17738_v45  ;;  %vm17767_vm8 = vnez %v17700_v6 }
 0x802   :  { %9504 = vmatprep.mubr.msk.bf16.mxu0 %vm17741_vm14, %v17740_v41  ;;  %vm17768_vm14 = vnez %v17704_v58 }
 0x809   :  { %9505 = vmatmul.mubr.msk.bf16.gmra.mrb[104].mxu0 %vm17743_vm10, %v17742_v8  ;;  %vm17769_vm10 = vnez %v17698_v39 }
 0x80a   :  { %9508 = vmatprep.mubr.msk.bf16.mxu0 %vm17745_vm6, %v17744_v59  ;;  %vm17764_vm6 = vnez %v17692_v44 }
 0x811   :  { %9509 = vmatmul.mubr.msk.bf16.gmra.mrb[108].mxu0 %vm17747_vm15, %v17746_v31  ;;  %vm17770_vm15 = vnez %v17702_v47 }
 0x87c   :  { %v13136_v30 = vpop.f32.mrb[80].mxu0 }
 0x87d   :  { %17748 = vst [vmem:[#allocation48_spill] sm:$0xff] %v13136_v30  ;;  %v13138_v32 = vpop.f32.mrb[81].mxu0 }
 0x87e   :  { %17749 = vst [vmem:[#allocation50_spill] sm:$0xff] %v13138_v32  ;;  %v13140_v7 = vpop.f32.mrb[82].mxu0 }
 0x87f   :  { %17750 = vst [vmem:[#allocation35_spill] sm:$0xff] %v13140_v7  ;;  %v13144_v56 = vpop.f32.mrb[83].mxu0 }
 0x880   :  { %17751 = vst [vmem:[#allocation36_spill] sm:$0xff] %v13144_v56 }
 0x8b4   :  { %v13148_v21 = vpop.f32.mrb[84].mxu0 }
 0x8b5   :  { %17752 = vst [vmem:[#allocation38_spill] sm:$0xff] %v13148_v21  ;;  %v13150_v48 = vpop.f32.mrb[85].mxu0 }
 0x8b6   :  { %17753 = vst [vmem:[#allocation37_spill] sm:$0xff] %v13150_v48  ;;  %v13152_v23 = vpop.f32.mrb[86].mxu0 }
 0x8b7   :  { %17754 = vst [vmem:[#allocation25_spill] sm:$0xff] %v13152_v23  ;;  %v13156_v14 = vpop.f32.mrb[87].mxu0 }
 0x8b8   :  { %17755 = vst [vmem:[#allocation21_spill] sm:$0xff] %v13156_v14 }
 0x8bc   :  { %v13160_v46 = vpop.f32.mrb[88].mxu0 }
 0x8bd   :  { %17756 = vst [vmem:[#allocation22_spill] sm:$0xff] %v13160_v46  ;;  %v13162_v57 = vpop.f32.mrb[89].mxu0 }
 0x8be   :  { %17757 = vst [vmem:[#allocation26_spill] sm:$0xff] %v13162_v57  ;;  %v13164_v34 = vpop.f32.mrb[90].mxu0 }
 0x8bf   :  { %17758 = vst [vmem:[#allocation19_spill] sm:$0xff] %v13164_v34  ;;  %v13168_v49 = vpop.f32.mrb[91].mxu0 }
 0x8c0   :  { %17759 = vst [vmem:[#allocation23_spill] sm:$0xff] %v13168_v49 }
 0x8c4   :  { %v13172_v52 = vpop.f32.mrb[92].mxu0 }
 0x8c5   :  { %17760 = vst [vmem:[#allocation27_spill] sm:$0xff] %v13172_v52  ;;  %v13174_v37 = vpop.f32.mrb[93].mxu0 }
 0x8c6   :  { %17761 = vst [vmem:[#allocation31_spill] sm:$0xff] %v13174_v37  ;;  %v13176_v26 = vpop.f32.mrb[94].mxu0 }
 0x8c7   :  { %17762 = vst [vmem:[#allocation15_spill] sm:$0xff] %v13176_v26  ;;  %v13180_v25 = vpop.f32.mrb[95].mxu0 }
 0x8c8   :  { %17763 = vst [vmem:[#allocation17_spill] sm:$0xff] %v13180_v25 }
 0x8cc   :  { %v9498_v2 = vpop.f32.mrb[96].mxu0 }
 0x8cd   :  { %v3353_v29 = vmul.f32 0.17677669, %v9498_v2  ;;  %v3288_v55 = vpop.f32.mrb[97].mxu0 }
 0x8ce   :  { %v3351_v9 = vmul.f32 0.17677669, %v3288_v55  ;;  %v9499_v46 = vpop.f32.mrb[98].mxu0 }
 0x8cf   :  { %v3354_v63 = vmul.f32 0.17677669, %v9499_v46  ;;  %v3291_v34 = vpop.f32.mrb[99].mxu0  ;;  %v13186_v57 = vsel %vm12064_vm3, %v3353_v29, -1e+30 }
 0x8d0   :  { %3387 = vmax.xlane.f32.xlu0 %v13186_v57  ;;  %v3352_v49 = vmul.f32 0.17677669, %v3291_v34  ;;  %v13196_v2 = vsel %vm12086_vm5, %v3351_v9, -1e+30 }
 0x8d1   :  { %v13191_v17 = vsel %vm12108_vm7, %v3354_v63, -1e+30 }
 0x8d2   :  { %3389 = vmax.xlane.f32.xlu1 %v13191_v17  ;;  %v13201_v29 = vsel %vm12046_vm1, %v3352_v49, -1e+30 }
 0x8d4   :  { %3383 = vmax.xlane.f32.xlu0 %v13196_v2  ;;  %v9502_v55 = vpop.f32.mrb[100].mxu0 }
 0x8d5   :  { %v3357_v46 = vmul.f32 0.17677669, %v9502_v55  ;;  %v3304_v42 = vpop.f32.mrb[101].mxu0 }
 0x8d6   :  { %v3355_v34 = vmul.f32 0.17677669, %v3304_v42  ;;  %3385 = vmax.xlane.f32.xlu1 %v13201_v29  ;;  %v9503_v63 = vpop.f32.mrb[102].mxu0 }
 0x8d7   :  { %v3358_v52 = vmul.f32 0.17677669, %v9503_v63  ;;  %v3307_v26 = vpop.f32.mrb[103].mxu0  ;;  %v13206_v37 = vsel %vm12130_vm9, %v3357_v46, -1e+30 }
 0x8d8   :  { %3395 = vmax.xlane.f32.xlu0 %v13206_v37  ;;  %v3356_v9 = vmul.f32 0.17677669, %v3307_v26  ;;  %v13216_v42 = vsel %vm12152_vm11, %v3355_v34, -1e+30 }
 0x8d9   :  { %v13211_v55 = vsel %vm12058_vm2, %v3358_v52, -1e+30 }
 0x8da   :  { %3397 = vmax.xlane.f32.xlu1 %v13211_v55  ;;  %v13221_v46 = vsel %vm12074_vm4, %v3356_v9, -1e+30 }
 0x8dc   :  { %3391 = vmax.xlane.f32.xlu0 %v13216_v42  ;;  %v9506_v49 = vpop.f32.mrb[104].mxu0 }
 0x8dd   :  { %v3361_v63 = vmul.f32 0.17677669, %v9506_v49  ;;  %v3320_v25 = vpop.f32.mrb[105].mxu0 }
 0x8de   :  { %v3359_v26 = vmul.f32 0.17677669, %v3320_v25  ;;  %3393 = vmax.xlane.f32.xlu1 %v13221_v46  ;;  %v9507_v52 = vpop.f32.mrb[106].mxu0 }
 0x8df   :  { %v3362_v21 = vmul.f32 0.17677669, %v9507_v52  ;;  %v3323_v23 = vpop.f32.mrb[107].mxu0  ;;  %v13226_v48 = vsel %vm12173_vm13, %v3361_v63, -1e+30 }
 0x8e0   :  { %3403 = vmax.xlane.f32.xlu0 %v13226_v48  ;;  %v3360_v34 = vmul.f32 0.17677669, %v3323_v23  ;;  %v13236_v25 = vsel %vm17765_vm0, %v3359_v26, -1e+30 }
 0x8e1   :  { %v13231_v49 = vsel %vm17764_vm6, %v3362_v21, -1e+30 }
 0x8e2   :  { %3405 = vmax.xlane.f32.xlu1 %v13231_v49  ;;  %v13241_v63 = vsel %vm17766_vm12, %v3360_v34, -1e+30 }
 0x8e4   :  { %3399 = vmax.xlane.f32.xlu0 %v13236_v25  ;;  %v9510_v9 = vpop.f32.mrb[108].mxu0 }
 0x8e5   :  { %v3365_v52 = vmul.f32 0.17677669, %v9510_v9  ;;  %v3336_v14 = vpop.f32.mrb[109].mxu0 }
 0x8e6   :  { %3401 = vmax.xlane.f32.xlu1 %v13241_v63  ;;  %v9511_v23 = vpop.f32.mrb[110].mxu0  ;;  %v3363_v21 = vmul.f32 0.17677669, %v3336_v14 }
 0x8e7   :  { %v3339_v30 = vpop.f32.mrb[111].mxu0  ;;  %v3381_v7 = vsel %vm17767_vm8, %v3365_v52, -1e+30  ;;  %v3366_v34 = vmul.f32 0.17677669, %v9511_v23 }
 0x8e8   :  { %3411 = vmax.xlane.f32.xlu0 %v3381_v7  ;;  %v13248_v26 = vsel %vm17768_vm14, %v3363_v21, -1e+30  ;;  %v3364_v9 = vmul.f32 0.17677669, %v3339_v30  ;;  %v13265_v21 = vpop.permute.xlu1 %3674 }
 0x8e9   :  { %v13257_v14 = vsel %vm17769_vm10, %v3366_v34, -1e+30 }
 0x8ea   :  { %v13262_v52 = vsel %vm17770_vm15, %v3364_v9, -1e+30  ;;  %vm17771_vm15 = vcmask 261120  }
 0x8eb   :  { %vm17772_vm10 = vmmov %vm17771_vm15 }
 0x8ec   :  { %3407 = vmax.xlane.f32.xlu0 %v13248_v26  ;;  %vm17773_vm14 = vmmov %vm17772_vm10 }
 0x8ed   :  { %vm17774_vm8 = vmmov %vm17772_vm10 }
 0x8ee   :  { %vm17775_vm0 = vmmov %vm17774_vm8 }
 0x8ef   :  { %vm17776_vm12 = vmmov %vm17775_vm0 }
 0x8f0   :  { %vm17777_vm13 = vmmov %vm17775_vm0 }
 0x8f7   :  { %3678 = vrot.lane.b32.xlu1 %v17718_v51, %s10919_s4 }
 0x902   :  { %3676 = vrot.lane.b32.xlu0 %v17715_v38, %s10919_s4 }
 0x91b   :  { %3413 = vmax.xlane.f32.xlu1 %v13257_v14 }
 0x91f   :  { %3409 = vmax.xlane.f32.xlu1 %v13262_v52 }
 0x95d   :  { %v3388_v32 = vpop.xlane.xlu0 %3387 }
 0x95e   :  { %v3417_v56 = vsub.f32 %v13186_v57, %v3388_v32 }
 0x95f   :  { %v3390_v38 = vpop.xlane.xlu1 %3389 }
 0x960   :  { %v3435_v23 = vmul.f32 1.442695, %v3417_v56  ;;  %v3418_v30 = vsub.f32 %v13191_v17, %v3390_v38 }
 0x961   :  { %v3384_v39 = vpop.xlane.xlu0 %3383 }
 0x962   :  { %10308 = vpow2.f32 %v3435_v23  ;;  %v3437_v34 = vmul.f32 1.442695, %v3418_v30  ;;  %v3415_v51 = vsub.f32 %v13196_v2, %v3384_v39 }
 0x963   :  { %v3386_v58 = vpop.xlane.xlu1 %3385 }
 0x964   :  { %10310 = vpow2.f32 %v3437_v34  ;;  %v3431_v9 = vmul.f32 1.442695, %v3415_v51  ;;  %v3416_v47 = vsub.f32 %v13201_v29, %v3386_v58 }
 0x965   :  { %v3396_v58 = vpop.xlane.xlu0 %3395 }
 0x966   :  { %10312 = vpow2.f32 %v3431_v9  ;;  %v3433_v6 = vmul.f32 1.442695, %v3416_v47  ;;  %v3421_v17 = vsub.f32 %v13206_v37, %v3396_v58 }
 0x967   :  { %v3398_v47 = vpop.xlane.xlu1 %3397 }
 0x968   :  { %10314 = vpow2.f32 %v3433_v6  ;;  %v3443_v23 = vmul.f32 1.442695, %v3421_v17  ;;  %v3422_v9 = vsub.f32 %v13211_v55, %v3398_v47 }
 0x969   :  { %v3392_v51 = vpop.xlane.xlu0 %3391 }
 0x96a   :  { %v3419_v2 = vsub.f32 %v13216_v42, %v3392_v51  ;;  %10316 = vpow2.f32 %v3443_v23  ;;  %v3445_v44 = vmul.f32 1.442695, %v3422_v9 }
 0x96b   :  { %v3394_v57 = vpop.xlane.xlu1 %3393 }
 0x96c   :  { %v13271_v16 = vpop.eup %10308  ;;  %v3420_v30 = vsub.f32 %v13221_v46, %v3394_v57  ;;  %v3439_v27 = vmul.f32 1.442695, %v3419_v2 }
 0x96d   :  { %3467 = vadd.xlane.f32.xlu0 %v13271_v16  ;;  %v3404_v6 = vpop.xlane.xlu0 %3403 }
 0x96e   :  { %v13274_v32 = vpop.eup %10310  ;;  %10318 = vpow2.f32 %v3439_v27  ;;  %v3425_v0 = vsub.f32 %v13226_v48, %v3404_v6 }
 0x96f   :  { %3469 = vadd.xlane.f32.xlu1 %v13274_v32  ;;  %v3406_v34 = vpop.xlane.xlu1 %3405 }
 0x970   :  { %v13277_v38 = vpop.eup %10312  ;;  %v3451_v58 = vmul.f32 1.442695, %v3425_v0  ;;  %v3426_v51 = vsub.f32 %v13231_v49, %v3406_v34 }
 0x971   :  { %3463 = vadd.xlane.f32.xlu0 %v13277_v38  ;;  %v3400_v56 = vpop.xlane.xlu0 %3399 }
 0x972   :  { %v13280_v39 = vpop.eup %10314  ;;  %v3423_v46 = vsub.f32 %v13236_v25, %v3400_v56 }
 0x973   :  { %3465 = vadd.xlane.f32.xlu1 %v13280_v39  ;;  %v3402_v24 = vpop.xlane.xlu1 %3401 }
 0x974   :  { %v3447_v27 = vmul.f32 1.442695, %v3423_v46 }
 0x975   :  { %v3412_v29 = vpop.xlane.xlu0 %3411 }
 0x976   :  { %v3429_v35 = vsub.f32 %v3381_v7, %v3412_v29  ;;  %v13297_v7 = vpop.eup %10316 }
 0x977   :  { %v13295_v47 = vpop.permute.xlu1 %3678 }
 0x978   :  { %v3459_v37 = vmul.f32 1.442695, %v3429_v35  ;;  %v3453_v35 = vmul.f32 1.442695, %v3426_v51 }
 0x984   :  { %3682 = vrot.lane.b32.xlu1 %v17724_v1, %s10919_s4  ;;  %v3441_v1 = vmul.f32 1.442695, %v3420_v30 }
 0x986   :  { %10320 = vpow2.f32 %v3441_v1  ;;  %v13300_v1 = vpop.eup %10318 }
 0x987   :  { %3680 = vrot.lane.b32.xlu0 %v17721_v12, %s10919_s4  ;;  %v3408_v12 = vpop.xlane.xlu0 %3407  ;;  %10322 = vpow2.f32 %v3445_v44 }
 0x988   :  { %v3427_v42 = vsub.f32 %v13248_v26, %v3408_v12  ;;  %10324 = vpow2.f32 %v3459_v37  ;;  %v3424_v12 = vsub.f32 %v13241_v63, %v3402_v24 }
 0x989   :  { %10326 = vpow2.f32 %v3451_v58 }
 0x98a   :  { %v3455_v55 = vmul.f32 1.442695, %v3427_v42  ;;  %v3449_v56 = vmul.f32 1.442695, %v3424_v12 }
 0x98b   :  { %v3677_v30 = vpop.permute.xlu0 %3676 }
 0x98c   :  { %10328 = vpow2.f32 %v3455_v55 }
 0x98d   :  { %10330 = vpow2.f32 %v3447_v27 }
 0x98e   :  { %10332 = vpow2.f32 %v3453_v35 }
 0x990   :  { %v13303_v0 = vpop.eup %10320 }
 0x991   :  { %v13308_v49 = vpop.eup %10322 }
 0x992   :  { %v13311_v6 = vpop.eup %10324 }
 0x993   :  { %v13315_v24 = vpop.eup %10326 }
 0x996   :  { %v13318_v63 = vpop.eup %10328 }
 0x997   :  { %v13321_v17 = vpop.eup %10330 }
 0x998   :  { %v13324_v2 = vpop.eup %10332 }
 0x9a6   :  { %3475 = vadd.xlane.f32.xlu0 %v13297_v7 }
 0x9a8   :  { %v3414_v44 = vpop.xlane.xlu1 %3413  ;;  %3471 = vadd.xlane.f32.xlu1 %v13300_v1 }
 0x9a9   :  { %v3430_v48 = vsub.f32 %v13257_v14, %v3414_v44 }
 0x9aa   :  { %3473 = vadd.xlane.f32.xlu0 %v13303_v0 }
 0x9ab   :  { %v3461_v25 = vmul.f32 1.442695, %v3430_v48 }
 0x9ac   :  { %v3410_v26 = vpop.xlane.xlu1 %3409  ;;  %3477 = vadd.xlane.f32.xlu1 %v13308_v49 }
 0x9ad   :  { %10334 = vpow2.f32 %v3461_v25  ;;  %v3428_v57 = vsub.f32 %v13262_v52, %v3410_v26  ;;  %v3713_v26 = vsel %vm17771_vm15, %v13110_v20, 0  ;;  %vm17778_vm15 = vmmov %vm17775_vm0 }
 0x9ae   :  { %3491 = vadd.xlane.f32.xlu0 %v13311_v6  ;;  %10336 = vpow2.f32 %v3449_v56 }
 0x9af   :  { %v3457_v14 = vmul.f32 1.442695, %v3428_v57 }
 0x9b0   :  { %3483 = vadd.xlane.f32.xlu1 %v13315_v24 }
 0x9b1   :  { %10338 = vpow2.f32 %v3457_v14 }
 0x9b2   :  { %3487 = vadd.xlane.f32.xlu0 %v13318_v63 }
 0x9b4   :  { %3479 = vadd.xlane.f32.xlu1 %v13321_v17 }
 0x9b7   :  { %v13326_v52 = vpop.eup %10334 }
 0x9b8   :  { %3485 = vadd.xlane.f32.xlu1 %v13324_v2  ;;  %3493 = vadd.xlane.f32.xlu0 %v13326_v52  ;;  %v13330_v29 = vpop.eup %10336 }
 0x9bb   :  { %v13333_v23 = vpop.eup %10338 }
 0x9bc   :  { %3481 = vadd.xlane.f32.xlu1 %v13330_v29 }
 0x9c0   :  { %3489 = vadd.xlane.f32.xlu1 %v13333_v23 }
 0x9ce   :  { %3684 = vrot.lane.b32.xlu0 %v17727_v15, %s10919_s4 }
 0x9d1   :  { %3686 = vrot.lane.b32.xlu1 %v17729_v33, %s10919_s4 }
 0x9d2   :  { %3648 = vrot.lane.b32.xlu0 %v17733_v3, %s10919_s4 }
 0x9d5   :  { %3650 = vrot.lane.b32.xlu1 %v17735_v60, %s10919_s4 }
 0x9d6   :  { %3652 = vrot.lane.b32.xlu0 %v17736_v5, %s10919_s4 }
 0x9d9   :  { %3654 = vrot.lane.b32.xlu1 %v17738_v45, %s10919_s4 }
 0x9da   :  { %3656 = vrot.lane.b32.xlu0 %v17740_v41, %s10919_s4 }
 0x9dd   :  { %3658 = vrot.lane.b32.xlu1 %v17742_v8, %s10919_s4 }
 0x9de   :  { %3660 = vrot.lane.b32.xlu0 %v17744_v59, %s10919_s4 }
 0x9e1   :  { %3662 = vrot.lane.b32.xlu1 %v17746_v31, %s10919_s4 }
 0x9e2   :  { %4025 = vrot.lane.b32.xlu0 %v17641_v10, %s10919_s4 }
 0x9e5   :  { %4027 = vrot.lane.b32.xlu1 %v17645_v4, %s10919_s4 }
 0x9e6   :  { %4029 = vrot.lane.b32.xlu0 %v17646_v40, %s10919_s4 }
 0x9e9   :  { %4031 = vrot.lane.b32.xlu1 %v17648_v36, %s10919_s4 }
 0x9ea   :  { %4033 = vrot.lane.b32.xlu0 %v17649_v53, %s10919_s4 }
 0x9ed   :  { %4035 = vrot.lane.b32.xlu1 %v17652_v43, %s10919_s4 }
 0x9ee   :  { %4037 = vrot.lane.b32.xlu0 %v17653_v61, %s10919_s4 }
 0x9f1   :  { %4039 = vrot.lane.b32.xlu1 %v17655_v11, %s10919_s4 }
 0x9f2   :  { %4170 = vrot.lane.b32.xlu0 %v17711_v18, %s10920_s21 }
 0x9f5   :  { %4172 = vrot.lane.b32.xlu1 %v17710_v22, %s10920_s21 }
 0x9fa   :  { %v3468_v34 = vpop.xlane.xlu0 %3467 }
 0x9fc   :  { %v3470_v9 = vpop.xlane.xlu1 %3469 }
 0x9fd   :  { %10340 = vrcp.f32 %v3470_v9 }
 0x9fe   :  { %v3464_v37 = vpop.xlane.xlu0 %3463 }
 0x9ff   :  { %10342 = vrcp.f32 %v3464_v37 }
 0xa00   :  { %10344 = vrcp.f32 %v3468_v34  ;;  %v3466_v42 = vpop.xlane.xlu1 %3465 }
 0xa01   :  { %10346 = vrcp.f32 %v3466_v42 }
 0xa02   :  { %v3681_v20 = vpop.permute.xlu0 %3680 }
 0xa07   :  { %v10341_v58 = vpop.eup %10340 }
 0xa08   :  { %v3514_v27 = vmul.f32 %v10341_v58, %v13274_v32  ;;  %v3716_v32 = vsel %vm17773_vm14, %v13265_v21, 0  ;;  %vm17780_vm14 = vmmov %vm17775_vm0 }
 0xa09   :  { %v10343_v46 = vpop.eup %10342 }
 0xa0a   :  { %v10345_v55 = vpop.eup %10344  ;;  %v3511_v35 = vmul.f32 %v10343_v46, %v13277_v38  ;;  %v3719_v38 = vsel %vm17775_vm0, %v3677_v30, 0 }
 0xa0b   :  { %v10347_v51 = vpop.eup %10346  ;;  %v3513_v12 = vmul.f32 %v10345_v55, %v13271_v16  ;;  %v3722_v16 = vsel %vm17777_vm13, %v13295_v47, 0  ;;  %vm17781_vm13 = vmmov %vm17775_vm0 }
 0xa0c   :  { %v3512_v44 = vmul.f32 %v10347_v51, %v13280_v39  ;;  %v3683_v39 = vpop.permute.xlu1 %3682 }
 0xa0d   :  { %v3528_v25 = vpack.c.bf16 %v3514_v27, %v3513_v12  ;;  %v3728_v34 = vsel %vm17775_vm0, %v3683_v39, 0 }
 0xa0e   :  { %v3527_v48 = vpack.c.bf16 %v3512_v44, %v3511_v35 }
 0xa10   :  { %9528 = vmatprep.mubr.bf16.mxu1 %v3527_v48 }
 0xa11   :  { %9529 = vmatmul.mubr.bf16.vlgmr.msra.gmra.mrb[128].mxu1 %v3528_v25 }
 0xa12   :  { %9545 = vmatpush3.bf16.xpose.msra.mxu1 %v3713_v26 }
 0xa13   :  { %9841 = vmatprep.subr.msk.bf16.mxu1 %vm17772_vm10, %v13265_v21  ;;  %vm17779_vm10 = vmmov %vm17775_vm0 }
 0xa14   :  { %v3725_v56 = vsel %vm17779_vm10, %v3681_v20, 0  ;;  %vm17785_vm10 = vmmov %vm17775_vm0 }
 0xa1a   :  { %9547 = vmatpush3.bf16.xpose.msra.mxu1 %v3716_v32 }
 0xa1b   :  { %9842 = vmatprep.subr.msk.bf16.mxu1 %vm17774_vm8, %v3677_v30  ;;  %vm17783_vm8 = vmmov %vm17775_vm0 }
 0xa22   :  { %9549 = vmatpush3.bf16.xpose.msra.mxu1 %v3719_v38 }
 0xa23   :  { %9843 = vmatprep.subr.msk.bf16.mxu1 %vm17776_vm12, %v13295_v47  ;;  %vm17782_vm12 = vmmov %vm17775_vm0 }
 0xa2a   :  { %9551 = vmatpush3.bf16.xpose.msra.mxu1 %v3722_v16 }
 0xa2b   :  { %9844 = vmatprep.subr.msk.bf16.mxu1 %vm17778_vm15, %v3681_v20  ;;  %vm17784_vm15 = vmmov %vm17775_vm0 }
 0xa32   :  { %9553 = vmatpush3.bf16.xpose.msra.mxu1 %v3725_v56 }
 0xa33   :  { %9845 = vmatprep.subr.msk.bf16.mxu1 %vm17780_vm14, %v3683_v39  ;;  %v3476_v21 = vpop.xlane.xlu0 %3475  ;;  %vm17786_vm14 = vmmov %vm17775_vm0 }
 0xa35   :  { %v3472_v57 = vpop.xlane.xlu1 %3471 }
 0xa36   :  { %10348 = vrcp.f32 %v3472_v57 }
 0xa37   :  { %10350 = vrcp.f32 %v3476_v21  ;;  %v3474_v14 = vpop.xlane.xlu0 %3473 }
 0xa38   :  { %10352 = vrcp.f32 %v3474_v14 }
 0xa39   :  { %v3478_v30 = vpop.xlane.xlu1 %3477 }
 0xa3a   :  { %10354 = vrcp.f32 %v3478_v30  ;;  %9555 = vmatpush3.bf16.xpose.msra.mxu1 %v3728_v34 }
 0xa3b   :  { %v3492_v47 = vpop.xlane.xlu0 %3491 }
 0xa3d   :  { %v3484_v9 = vpop.xlane.xlu1 %3483 }
 0xa3f   :  { %v3488_v58 = vpop.xlane.xlu0 %3487 }
 0xa40   :  { %v10349_v37 = vpop.eup %10348 }
 0xa41   :  { %v10351_v42 = vpop.eup %10350  ;;  %v3480_v46 = vpop.xlane.xlu1 %3479  ;;  %v3515_v51 = vmul.f32 %v10349_v37, %v13300_v1 }
 0xa42   :  { %v10353_v55 = vpop.eup %10352  ;;  %v3517_v25 = vmul.f32 %v10351_v42, %v13297_v7 }
 0xa43   :  { %v3516_v27 = vmul.f32 %v10353_v55, %v13303_v0 }
 0xa44   :  { %v10355_v35 = vpop.eup %10354 }
 0xa45   :  { %v3486_v44 = vpop.xlane.xlu1 %3485  ;;  %v3494_v12 = vpop.xlane.xlu0 %3493  ;;  %v3529_v48 = vpack.c.bf16 %v3516_v27, %v3515_v51  ;;  %v3518_v26 = vmul.f32 %v10355_v35, %v13308_v49 }
 0xa46   :  { %10356 = vrcp.f32 %v3486_v44 }
 0xa47   :  { %9532 = vmatprep.mubr.bf16.mxu1 %v3529_v48  ;;  %v3530_v32 = vpack.c.bf16 %v3518_v26, %v3517_v25  ;;  %10358 = vrcp.f32 %v3480_v46 }
 0xa48   :  { %10360 = vrcp.f32 %v3484_v9 }
 0xa49   :  { %v3482_v38 = vpop.xlane.xlu1 %3481  ;;  %9533 = vmatmul.mubr.bf16.gmra.mrb[132].mxu1 %v3530_v32  ;;  %v3685_v16 = vpop.permute.xlu0 %3684 }
 0xa4a   :  { %10362 = vrcp.f32 %v3482_v38  ;;  %9846 = vmatprep.subr.msk.bf16.mxu1 %vm17781_vm13, %v3685_v16  ;;  %v3731_v1 = vsel %vm17782_vm12, %v3685_v16, 0  ;;  %vm17787_vm13 = vmmov %vm17775_vm0 }
 0xa4b   :  { %9557 = vmatpush3.bf16.xpose.msra.mxu1 %v3731_v1  ;;  %10364 = vrcp.f32 %v3488_v58  ;;  %vm17788_vm12 = vmmov %vm17775_vm0 }
 0xa4d   :  { %v3490_v0 = vpop.xlane.xlu1 %3489  ;;  %v3649_v20 = vpop.permute.xlu0 %3648 }
 0xa4e   :  { %10366 = vrcp.f32 %v3490_v0 }
 0xa4f   :  { %10368 = vrcp.f32 %v3494_v12 }
 0xa50   :  { %v10357_v7 = vpop.eup %10356  ;;  %10370 = vrcp.f32 %v3492_v47 }
 0xa51   :  { %v3687_v49 = vpop.permute.xlu1 %3686  ;;  %v3653_v39 = vpop.permute.xlu0 %3652  ;;  %v3522_v30 = vmul.f32 %v10357_v7, %v13324_v2 }
 0xa52   :  { %v10359_v56 = vpop.eup %10358  ;;  %9847 = vmatprep.subr.msk.bf16.mxu1 %vm17783_vm8, %v3687_v49  ;;  %v3734_v21 = vsel %vm17784_vm15, %v3687_v49, 0  ;;  %vm17789_vm8 = vmmov %vm17775_vm0 }
 0xa53   :  { %v10361_v57 = vpop.eup %10360  ;;  %9559 = vmatpush3.bf16.xpose.msra.mxu1 %v3734_v21  ;;  %v3519_v37 = vmul.f32 %v10359_v56, %v13321_v17  ;;  %vm17790_vm15 = vmmov %vm17775_vm0 }
 0xa54   :  { %v10363_v14 = vpop.eup %10362  ;;  %v3521_v47 = vmul.f32 %v10361_v57, %v13315_v24 }
 0xa55   :  { %v3651_v34 = vpop.permute.xlu1 %3650  ;;  %v3657_v9 = vpop.permute.xlu0 %3656  ;;  %v3520_v42 = vmul.f32 %v10363_v14, %v13330_v29 }
 0xa56   :  { %v10365_v58 = vpop.eup %10364  ;;  %v3532_v51 = vpack.c.bf16 %v3522_v30, %v3521_v47 }
 0xa57   :  { %v3531_v46 = vpack.c.bf16 %v3520_v42, %v3519_v37  ;;  %v3523_v12 = vmul.f32 %v10365_v58, %v13318_v63 }
 0xa58   :  { %v10367_v55 = vpop.eup %10366 }
 0xa59   :  { %v10369_v27 = vpop.eup %10368  ;;  %v3655_v35 = vpop.permute.xlu1 %3654  ;;  %9536 = vmatprep.mubr.bf16.mxu1 %v3531_v46  ;;  %v3524_v2 = vmul.f32 %v10367_v55, %v13333_v23 }
 0xa5a   :  { %v3661_v44 = vpop.permute.xlu0 %3660  ;;  %9537 = vmatmul.mubr.bf16.gmra.mrb[136].mxu1 %v3532_v51  ;;  %v10371_v48 = vpop.eup %10370  ;;  %v3526_v17 = vmul.f32 %v10369_v27, %v13326_v52 }
 0xa5b   :  { %v3533_v25 = vpack.c.bf16 %v3524_v2, %v3523_v12  ;;  %v3525_v24 = vmul.f32 %v10371_v48, %v13311_v6 }
 0xa5d   :  { %v3659_v29 = vpop.permute.xlu1 %3658  ;;  %9540 = vmatprep.mubr.bf16.mxu1 %v3533_v25  ;;  %v3534_v32 = vpack.c.bf16 %v3526_v17, %v3525_v24 }
 0xa5e   :  { %v4026_v26 = vpop.permute.xlu0 %4025 }
 0xa5f   :  { %9576 = vmatprep.subr.bf16.mxu0 %v4026_v26 }
 0xa60   :  { %9577 = vmatpush3.bf16.msra.mxu0 %v4026_v26 }
 0xa61   :  { %v3663_v38 = vpop.permute.xlu1 %3662 }
 0xa62   :  { %9541 = vmatmul.mubr.bf16.gmra.mrb[140].mxu1 %v3534_v32  ;;  %v4030_v23 = vpop.permute.xlu0 %4029 }
 0xa63   :  { %9560 = vmatprep.mubr.msk.bf16.mxu1 %vm17785_vm10, %v3649_v20  ;;  %vm17791_vm10 = vmmov %vm17775_vm0 }
 0xa65   :  { %v4028_v63 = vpop.permute.xlu1 %4027 }
 0xa66   :  { %9578 = vmatprep.subr.bf16.mxu0 %v4028_v63  ;;  %v4034_v16 = vpop.permute.xlu0 %4033 }
 0xa67   :  { %9579 = vmatpush3.bf16.msra.mxu0 %v4028_v63 }
 0xa68   :  { %9580 = vmatprep.subr.bf16.mxu0 %v4030_v23 }
 0xa69   :  { %v4032_v52 = vpop.permute.xlu1 %4031 }
 0xa6a   :  { %9561 = vmatmul.mubr.msk.bf16.vlgmr.msra.gmra.mrb[144].mxu1 %vm17786_vm14, %v3651_v34  ;;  %v4038_v1 = vpop.permute.xlu0 %4037  ;;  %vm17792_vm14 = vmmov %vm17775_vm0 }
 0xa6b   :  { %9564 = vmatprep.mubr.msk.bf16.mxu1 %vm17775_vm0, %v3653_v39  ;;  %9581 = vmatpush3.bf16.msra.mxu0 %v4030_v23 }
 0xa6c   :  { %9582 = vmatprep.subr.bf16.mxu0 %v4032_v52 }
 0xa6d   :  { %v4036_v6 = vpop.permute.xlu1 %4035 }
 0xa6e   :  { %v13419_v20 = vpop.permute.xlu0 %4170 }
 0xa6f   :  { %9583 = vmatpush3.bf16.msra.mxu0 %v4032_v52 }
 0xa70   :  { %9584 = vmatprep.subr.bf16.mxu0 %v4034_v16 }
 0xa71   :  { %v4040_v0 = vpop.permute.xlu1 %4039 }
 0xa72   :  { %9565 = vmatmul.mubr.msk.bf16.gmra.mrb[148].mxu1 %vm17787_vm13, %v3655_v35 }
 0xa73   :  { %9568 = vmatprep.mubr.msk.bf16.mxu1 %vm17788_vm12, %v3657_v9  ;;  %9585 = vmatpush3.bf16.msra.mxu0 %v4034_v16 }
 0xa74   :  { %9586 = vmatprep.subr.bf16.mxu0 %v4036_v6 }
 0xa77   :  { %9587 = vmatpush3.bf16.msra.mxu0 %v4036_v6 }
 0xa78   :  { %9588 = vmatprep.subr.bf16.mxu0 %v4038_v1 }
 0xa7a   :  { %9569 = vmatmul.mubr.msk.bf16.gmra.mrb[152].mxu1 %vm17789_vm8, %v3659_v29 }
 0xa7b   :  { %9572 = vmatprep.mubr.msk.bf16.mxu1 %vm17790_vm15, %v3661_v44  ;;  %9589 = vmatpush3.bf16.msra.mxu0 %v4038_v1 }
 0xa7c   :  { %9590 = vmatprep.subr.bf16.mxu0 %v4040_v0 }
 0xa7f   :  { %9591 = vmatpush3.bf16.msra.mxu0 %v4040_v0 }
 0xa80   :  { %9848 = vmatprep.subr.msk.bf16.mxu0 %vm17791_vm10, %v13419_v20 }
 0xa82   :  { %9573 = vmatmul.mubr.msk.bf16.gmra.mrb[156].mxu1 %vm17792_vm14, %v3663_v38 }
 0xae4   :  { %v13424_v7 = vpop.f32.mrb[128].mxu1 }
 0xae5   :  { %17793 = vst [vmem:[#allocation20_spill] sm:$0xff] %v13424_v7  ;;  %v13426_v49 = vpop.f32.mrb[129].mxu1 }
 0xae6   :  { %17794 = vst [vmem:[#allocation24_spill] sm:$0xff] %v13426_v49  ;;  %v13428_v39 = vpop.f32.mrb[130].mxu1 }
 0xae7   :  { %17795 = vst [vmem:[#allocation87_spill] sm:$0xff] %v13428_v39  ;;  %v13432_v21 = vpop.f32.mrb[131].mxu1 }
 0xae8   :  { %17796 = vst [vmem:[#allocation88_spill] sm:$0xff] %v13432_v21 }
 0xb1c   :  { %v13436_v14 = vpop.f32.mrb[132].mxu1 }
 0xb1d   :  { %17797 = vst [vmem:[#allocation89_spill] sm:$0xff] %v13436_v14  ;;  %v13438_v30 = vpop.f32.mrb[133].mxu1 }
 0xb1e   :  { %17798 = vst [vmem:[#allocation90_spill] sm:$0xff] %v13438_v30  ;;  %v13440_v34 = vpop.f32.mrb[134].mxu1  ;;  %v17826_v30 = vld [vmem:[#allocation54_spill] sm:$0xff] }
 0xb1f   :  { %17799 = vst [vmem:[#allocation91_spill] sm:$0xff] %v13440_v34  ;;  %v13444_v37 = vpop.f32.mrb[135].mxu1  ;;  %v17824_v34 = vld [vmem:[#allocation52_spill] sm:$0xff]  ;;  %vm17827_vm14 = vnez %v17826_v30 }
 0xb20   :  { %17800 = vst [vmem:[#allocation92_spill] sm:$0xff] %v13444_v37  ;;  %vm17825_vm10 = vnez %v17824_v34  ;;  %v13556_v37 = vpop.permute.xlu1 %4172 }
 0xb2d   :  { %v13448_v58 = vpop.f32.mrb[136].mxu1 }
 0xb2e   :  { %17801 = vst [vmem:[#allocation93_spill] sm:$0xff] %v13448_v58  ;;  %v13450_v47 = vpop.f32.mrb[137].mxu1  ;;  %v17816_v58 = vld [vmem:[#allocation56_spill] sm:$0xff] }
 0xb2f   :  { %17802 = vst [vmem:[#allocation94_spill] sm:$0xff] %v13450_v47  ;;  %v13452_v46 = vpop.f32.mrb[138].mxu1  ;;  %vm17817_vm12 = vnez %v17816_v58 }
 0xb30   :  { %17803 = vst [vmem:[#allocation95_spill] sm:$0xff] %v13452_v46  ;;  %v13456_v51 = vpop.f32.mrb[139].mxu1  ;;  %v17818_v46 = vld [vmem:[#allocation57_spill] sm:$0xff] }
 0xb31   :  { %17804 = vst [vmem:[#allocation96_spill] sm:$0xff] %v13456_v51  ;;  %vm17819_vm8 = vnez %v17818_v46 }
 0xb35   :  { %v13460_v35 = vpop.f32.mrb[140].mxu1 }
 0xb36   :  { %17805 = vst [vmem:[#allocation97_spill] sm:$0xff] %v13460_v35  ;;  %v13462_v44 = vpop.f32.mrb[141].mxu1  ;;  %v17812_v35 = vld [vmem:[#allocation55_spill] sm:$0xff] }
 0xb37   :  { %17806 = vst [vmem:[#allocation98_spill] sm:$0xff] %v13462_v44  ;;  %v13464_v12 = vpop.f32.mrb[142].mxu1  ;;  %vm17813_vm0 = vnez %v17812_v35 }
 0xb38   :  { %17807 = vst [vmem:[#allocation99_spill] sm:$0xff] %v13464_v12  ;;  %v13468_v48 = vpop.f32.mrb[143].mxu1 }
 0xb39   :  { %17808 = vst [vmem:[#allocation100_spill] sm:$0xff] %v13468_v48 }
 0xb3d   :  { %v9562_v17 = vpop.f32.mrb[144].mxu1 }
 0xb3e   :  { %v3835_v29 = vmul.f32 0.17677669, %v9562_v17  ;;  %v3770_v26 = vpop.f32.mrb[145].mxu1 }
 0xb3f   :  { %v9563_v24 = vpop.f32.mrb[146].mxu1  ;;  %v3833_v32 = vmul.f32 0.17677669, %v3770_v26 }
 0xb40   :  { %v3773_v38 = vpop.f32.mrb[147].mxu1  ;;  %v13474_v63 = vsel %vm12064_vm3, %v3835_v29, -1e+30  ;;  %v3836_v52 = vmul.f32 0.17677669, %v9563_v24 }
 0xb41   :  { %v3834_v23 = vmul.f32 0.17677669, %v3773_v38  ;;  %3869 = vmax.xlane.f32.xlu0 %v13474_v63  ;;  %v13484_v6 = vsel %vm12086_vm5, %v3833_v32, -1e+30 }
 0xb42   :  { %v13489_v29 = vsel %vm12108_vm7, %v3836_v52, -1e+30 }
 0xb43   :  { %v13479_v16 = vsel %vm12046_vm1, %v3834_v23, -1e+30 }
 0xb44   :  { %3867 = vmax.xlane.f32.xlu1 %v13479_v16 }
 0xb45   :  { %3865 = vmax.xlane.f32.xlu0 %v13484_v6  ;;  %v9566_v1 = vpop.f32.mrb[148].mxu1 }
 0xb46   :  { %v3786_v0 = vpop.f32.mrb[149].mxu1  ;;  %v3839_v26 = vmul.f32 0.17677669, %v9566_v1 }
 0xb47   :  { %v9567_v17 = vpop.f32.mrb[150].mxu1  ;;  %v3837_v32 = vmul.f32 0.17677669, %v3786_v0 }
 0xb48   :  { %v3840_v24 = vmul.f32 0.17677669, %v9567_v17  ;;  %v3789_v38 = vpop.f32.mrb[151].mxu1  ;;  %v13499_v25 = vsel %vm12130_vm9, %v3839_v26, -1e+30 }
 0xb49   :  { %3871 = vmax.xlane.f32.xlu0 %v13489_v29  ;;  %v3838_v23 = vmul.f32 0.17677669, %v3789_v38  ;;  %v13509_v0 = vsel %vm12152_vm11, %v3837_v32, -1e+30 }
 0xb4a   :  { %v13494_v2 = vsel %vm12058_vm2, %v3840_v24, -1e+30 }
 0xb4b   :  { %3879 = vmax.xlane.f32.xlu1 %v13494_v2  ;;  %v13504_v55 = vsel %vm12074_vm4, %v3838_v23, -1e+30 }
 0xb4d   :  { %3877 = vmax.xlane.f32.xlu0 %v13499_v25  ;;  %v9570_v52 = vpop.f32.mrb[152].mxu1 }
 0xb4e   :  { %v3802_v1 = vpop.f32.mrb[153].mxu1  ;;  %v3843_v27 = vmul.f32 0.17677669, %v9570_v52 }
 0xb4f   :  { %3875 = vmax.xlane.f32.xlu1 %v13504_v55  ;;  %v9571_v38 = vpop.f32.mrb[154].mxu1  ;;  %v3841_v23 = vmul.f32 0.17677669, %v3802_v1 }
 0xb50   :  { %v3844_v9 = vmul.f32 0.17677669, %v9571_v38  ;;  %v3805_v42 = vpop.f32.mrb[155].mxu1  ;;  %v13519_v12 = vsel %vm17813_vm0, %v3843_v27, -1e+30  ;;  %v17814_v38 = vld [vmem:[#allocation51_spill] sm:$0xff] }
 0xb51   :  { %3873 = vmax.xlane.f32.xlu0 %v13509_v0  ;;  %v3842_v26 = vmul.f32 0.17677669, %v3805_v42  ;;  %vm17815_vm13 = vnez %v17814_v38  ;;  %v13529_v1 = vsel %vm17817_vm12, %v3841_v23, -1e+30  ;;  %v17823_v23 = vld [vmem:[#allocation29_spill] sm:$0xff] }
 0xb52   :  { %v13514_v57 = vsel %vm17764_vm6, %v3844_v9, -1e+30 }
 0xb53   :  { %3887 = vmax.xlane.f32.xlu1 %v13514_v57  ;;  %v13524_v44 = vsel %vm17815_vm13, %v3842_v26, -1e+30  ;;  %v17820_v26 = vld [vmem:[#allocation58_spill] sm:$0xff] }
 0xb54   :  { %vm17821_vm15 = vnez %v17820_v26 }
 0xb55   :  { %3885 = vmax.xlane.f32.xlu0 %v13519_v12  ;;  %v9574_v32 = vpop.f32.mrb[156].mxu1 }
 0xb56   :  { %v3818_v52 = vpop.f32.mrb[157].mxu1  ;;  %v3847_v9 = vmul.f32 0.17677669, %v9574_v32  ;;  %v17822_v32 = vld [vmem:[#allocation33_spill] sm:$0xff] }
 0xb57   :  { %3883 = vmax.xlane.f32.xlu1 %v13524_v44  ;;  %v9575_v42 = vpop.f32.mrb[158].mxu1  ;;  %v3845_v27 = vmul.f32 0.17677669, %v3818_v52 }
 0xb58   :  { %v3821_v48 = vpop.f32.mrb[159].mxu1  ;;  %v13534_v47 = vsel %vm17819_vm8, %v3847_v9, -1e+30  ;;  %v3848_v14 = vmul.f32 0.17677669, %v9575_v42 }
 0xb59   :  { %3881 = vmax.xlane.f32.xlu0 %v13529_v1  ;;  %v13539_v51 = vsel %vm17821_vm15, %v3845_v27, -1e+30  ;;  %v3846_v52 = vmul.f32 0.17677669, %v3821_v48 }
 0xb5a   :  { %v13548_v9 = vsel %vm17825_vm10, %v3848_v14, -1e+30 }
 0xb5b   :  { %v13553_v27 = vsel %vm17827_vm14, %v3846_v52, -1e+30  ;;  %vm17830_vm14 = vcmask 261120  }
 0xb5c   :  { %vm17831_vm10 = vmmov %vm17830_vm14 }
 0xb5d   :  { %3893 = vmax.xlane.f32.xlu0 %v13534_v47  ;;  %vm17832_vm15 = vmmov %vm17831_vm10 }
 0xb5e   :  { %vm17833_vm8 = vmmov %vm17831_vm10 }
 0xb5f   :  { %vm17834_vm12 = vmmov %vm17833_vm8 }
 0xb60   :  { %vm17835_vm13 = vmmov %vm17833_vm8 }
 0xb61   :  { %3889 = vmax.xlane.f32.xlu0 %v13539_v51  ;;  %vm17836_vm0 = vmmov %vm17833_vm8 }
 0xb68   :  { %4176 = vrot.lane.b32.xlu1 %v17822_v32, %s10920_s21 }
 0xb77   :  { %4174 = vrot.lane.b32.xlu0 %v17823_v23, %s10920_s21 }
 0xb8c   :  { %3895 = vmax.xlane.f32.xlu1 %v13548_v9 }
 0xb90   :  { %3891 = vmax.xlane.f32.xlu1 %v13553_v27 }
 0xbce   :  { %v3870_v7 = vpop.xlane.xlu0 %3869 }
 0xbcf   :  { %v3899_v39 = vsub.f32 %v13474_v63, %v3870_v7 }
 0xbd1   :  { %v3917_v49 = vmul.f32 1.442695, %v3899_v39  ;;  %v3868_v42 = vpop.xlane.xlu1 %3867 }
 0xbd2   :  { %v3898_v48 = vsub.f32 %v13479_v16, %v3868_v42  ;;  %v3866_v21 = vpop.xlane.xlu0 %3865 }
 0xbd3   :  { %10372 = vpow2.f32 %v3917_v49  ;;  %v3897_v14 = vsub.f32 %v13484_v6, %v3866_v21 }
 0xbd4   :  { %v3915_v34 = vmul.f32 1.442695, %v3898_v48 }
 0xbd5   :  { %v3913_v23 = vmul.f32 1.442695, %v3897_v14 }
 0xbd6   :  { %10374 = vpow2.f32 %v3915_v34  ;;  %v3872_v52 = vpop.xlane.xlu0 %3871  ;;  %v17829_v34 = vld [vmem:[#allocation18_spill] sm:$0xff] }
 0xbd7   :  { %10376 = vpow2.f32 %v3913_v23  ;;  %v3900_v30 = vsub.f32 %v13489_v29, %v3872_v52 }
 0xbd8   :  { %v3880_v16 = vpop.xlane.xlu1 %3879 }
 0xbd9   :  { %v3919_v32 = vmul.f32 1.442695, %v3900_v30  ;;  %v17828_v30 = vld [vmem:[#allocation16_spill] sm:$0xff]  ;;  %v3904_v58 = vsub.f32 %v13494_v2, %v3880_v16 }
 0xbda   :  { %v3878_v21 = vpop.xlane.xlu0 %3877 }
 0xbdb   :  { %10378 = vpow2.f32 %v3919_v32  ;;  %v3903_v29 = vsub.f32 %v13499_v25, %v3878_v21  ;;  %v3927_v35 = vmul.f32 1.442695, %v3904_v58 }
 0xbdc   :  { %v3876_v32 = vpop.xlane.xlu1 %3875 }
 0xbdd   :  { %v13562_v26 = vpop.eup %10372  ;;  %v3925_v42 = vmul.f32 1.442695, %v3903_v29  ;;  %v3902_v14 = vsub.f32 %v13504_v55, %v3876_v32 }
 0xbde   :  { %3949 = vadd.xlane.f32.xlu1 %v13562_v26  ;;  %v3874_v63 = vpop.xlane.xlu0 %3873 }
 0xbdf   :  { %v3901_v48 = vsub.f32 %v13509_v0, %v3874_v63  ;;  %10380 = vpow2.f32 %v3925_v42  ;;  %v3923_v38 = vmul.f32 1.442695, %v3902_v14 }
 0xbe0   :  { %v13565_v7 = vpop.eup %10374  ;;  %v3888_v52 = vpop.xlane.xlu1 %3887 }
 0xbe1   :  { %v13567_v39 = vpop.eup %10376  ;;  %3947 = vadd.xlane.f32.xlu0 %v13565_v7  ;;  %v3908_v2 = vsub.f32 %v13514_v57, %v3888_v52 }
 0xbe2   :  { %3945 = vadd.xlane.f32.xlu1 %v13567_v39  ;;  %v3886_v6 = vpop.xlane.xlu0 %3885 }
 0xbe4   :  { %v3884_v56 = vpop.xlane.xlu1 %3883 }
 0xbe5   :  { %v13571_v49 = vpop.eup %10378 }
 0xbe6   :  { %3951 = vadd.xlane.f32.xlu1 %v13571_v49  ;;  %v3882_v23 = vpop.xlane.xlu0 %3881 }
 0xbe7   :  { %v3905_v0 = vsub.f32 %v13529_v1, %v3882_v23 }
 0xbe8   :  { %v13589_v58 = vpop.permute.xlu1 %4176 }
 0xbe9   :  { %v3929_v16 = vmul.f32 1.442695, %v3905_v0  ;;  %v13587_v32 = vpop.eup %10380 }
 0xbea   :  { %v3894_v46 = vpop.xlane.xlu0 %3893 }
 0xbeb   :  { %v3911_v25 = vsub.f32 %v13534_v47, %v3894_v46  ;;  %v3935_v46 = vmul.f32 1.442695, %v3908_v2 }
 0xbed   :  { %v3941_v55 = vmul.f32 1.442695, %v3911_v25 }
 0xbee   :  { %v3890_v63 = vpop.xlane.xlu0 %3889 }
 0xbef   :  { %v3909_v29 = vsub.f32 %v13539_v51, %v3890_v63 }
 0xbf1   :  { %v3937_v47 = vmul.f32 1.442695, %v3909_v29 }
 0xbf7   :  { %4178 = vrot.lane.b32.xlu0 %v17828_v30, %s10920_s21  ;;  %4180 = vrot.lane.b32.xlu1 %v17829_v34, %s10920_s21  ;;  %v3921_v30 = vmul.f32 1.442695, %v3901_v48  ;;  %v3907_v34 = vsub.f32 %v13519_v12, %v3886_v6  ;;  %v3906_v12 = vsub.f32 %v13524_v44, %v3884_v56 }
 0xbf9   :  { %10382 = vpow2.f32 %v3921_v30  ;;  %v3933_v21 = vmul.f32 1.442695, %v3907_v34  ;;  %v3931_v1 = vmul.f32 1.442695, %v3906_v12 }
 0xbfa   :  { %10384 = vpow2.f32 %v3923_v38 }
 0xbfb   :  { %10386 = vpow2.f32 %v3927_v35 }
 0xbfc   :  { %10388 = vpow2.f32 %v3933_v21  ;;  %v4175_v21 = vpop.permute.xlu0 %4174 }
 0xbfd   :  { %10390 = vpow2.f32 %v3941_v55 }
 0xbfe   :  { %10392 = vpow2.f32 %v3929_v16 }
 0xbff   :  { %10394 = vpow2.f32 %v3937_v47 }
 0xc00   :  { %10396 = vpow2.f32 %v3935_v46 }
 0xc03   :  { %v13593_v35 = vpop.eup %10382 }
 0xc04   :  { %v13595_v51 = vpop.eup %10384 }
 0xc05   :  { %v13600_v34 = vpop.eup %10386 }
 0xc06   :  { %v13602_v56 = vpop.eup %10388 }
 0xc07   :  { %v13607_v23 = vpop.eup %10390 }
 0xc08   :  { %v13609_v42 = vpop.eup %10392 }
 0xc09   :  { %v13613_v48 = vpop.eup %10394 }
 0xc0a   :  { %v13615_v14 = vpop.eup %10396 }
 0xc16   :  { %3957 = vadd.xlane.f32.xlu0 %v13587_v32 }
 0xc19   :  { %v3896_v38 = vpop.xlane.xlu1 %3895 }
 0xc1a   :  { %v3912_v57 = vsub.f32 %v13548_v9, %v3896_v38  ;;  %3953 = vadd.xlane.f32.xlu0 %v13593_v35 }
 0xc1b   :  { %3955 = vadd.xlane.f32.xlu1 %v13595_v51 }
 0xc1c   :  { %v3943_v30 = vmul.f32 1.442695, %v3912_v57 }
 0xc1d   :  { %v3892_v6 = vpop.xlane.xlu1 %3891 }
 0xc1e   :  { %10398 = vpow2.f32 %v3943_v30  ;;  %v3910_v44 = vsub.f32 %v13553_v27, %v3892_v6  ;;  %3959 = vadd.xlane.f32.xlu0 %v13600_v34  ;;  %v4211_v30 = vsel %vm17830_vm14, %v13419_v20, 0  ;;  %vm17837_vm14 = vmmov %vm17836_vm0 }
 0xc1f   :  { %3965 = vadd.xlane.f32.xlu1 %v13602_v56  ;;  %10400 = vpow2.f32 %v3931_v1 }
 0xc20   :  { %v3939_v9 = vmul.f32 1.442695, %v3910_v44 }
 0xc22   :  { %3973 = vadd.xlane.f32.xlu0 %v13607_v23  ;;  %10402 = vpow2.f32 %v3939_v9 }
 0xc23   :  { %3961 = vadd.xlane.f32.xlu1 %v13609_v42 }
 0xc26   :  { %3969 = vadd.xlane.f32.xlu0 %v13613_v48 }
 0xc27   :  { %3967 = vadd.xlane.f32.xlu1 %v13615_v14 }
 0xc28   :  { %v13619_v27 = vpop.eup %10398 }
 0xc29   :  { %v13621_v52 = vpop.eup %10400 }
 0xc2a   :  { %3975 = vadd.xlane.f32.xlu0 %v13619_v27 }
 0xc2b   :  { %3963 = vadd.xlane.f32.xlu1 %v13621_v52 }
 0xc2c   :  { %v13625_v25 = vpop.eup %10402 }
 0xc2f   :  { %3971 = vadd.xlane.f32.xlu1 %v13625_v25 }
 0xc40   :  { %4184 = vrot.lane.b32.xlu1 %v17729_v33, %s10920_s21  ;;  %4182 = vrot.lane.b32.xlu0 %v17727_v15, %s10920_s21 }
 0xc44   :  { %4156 = vrot.lane.b32.xlu1 %v17735_v60, %s10920_s21  ;;  %4154 = vrot.lane.b32.xlu0 %v17733_v3, %s10920_s21 }
 0xc48   :  { %4160 = vrot.lane.b32.xlu1 %v17738_v45, %s10920_s21  ;;  %4158 = vrot.lane.b32.xlu0 %v17736_v5, %s10920_s21 }
 0xc4c   :  { %4164 = vrot.lane.b32.xlu1 %v17742_v8, %s10920_s21  ;;  %4162 = vrot.lane.b32.xlu0 %v17740_v41, %s10920_s21 }
 0xc50   :  { %4168 = vrot.lane.b32.xlu1 %v17746_v31, %s10920_s21  ;;  %4166 = vrot.lane.b32.xlu0 %v17744_v59, %s10920_s21 }
 0xc54   :  { %4517 = vrot.lane.b32.xlu1 %v17645_v4, %s10920_s21  ;;  %4515 = vrot.lane.b32.xlu0 %v17641_v10, %s10920_s21 }
 0xc58   :  { %4521 = vrot.lane.b32.xlu1 %v17648_v36, %s10920_s21  ;;  %4519 = vrot.lane.b32.xlu0 %v17646_v40, %s10920_s21 }
 0xc5c   :  { %4525 = vrot.lane.b32.xlu1 %v17652_v43, %s10920_s21  ;;  %4523 = vrot.lane.b32.xlu0 %v17649_v53, %s10920_s21 }
 0xc60   :  { %4529 = vrot.lane.b32.xlu1 %v17655_v11, %s10920_s21  ;;  %4527 = vrot.lane.b32.xlu0 %v17653_v61, %s10920_s21 }
 0xc64   :  { %4662 = vrot.lane.b32.xlu1 %v17710_v22, %s10921_s22  ;;  %4660 = vrot.lane.b32.xlu0 %v17711_v18, %s10921_s22 }
 0xc6b   :  { %v3950_v0 = vpop.xlane.xlu1 %3949 }
 0xc6e   :  { %v3948_v63 = vpop.xlane.xlu0 %3947 }
 0xc6f   :  { %10404 = vrcp.f32 %v3948_v63  ;;  %v3946_v55 = vpop.xlane.xlu1 %3945 }
 0xc70   :  { %10406 = vrcp.f32 %v3946_v55 }
 0xc71   :  { %10408 = vrcp.f32 %v3950_v0 }
 0xc72   :  { %v4179_v20 = vpop.permute.xlu0 %4178 }
 0xc73   :  { %v3952_v29 = vpop.xlane.xlu1 %3951 }
 0xc74   :  { %10410 = vrcp.f32 %v3952_v29 }
 0xc79   :  { %v10405_v2 = vpop.eup %10404 }
 0xc7a   :  { %v10407_v16 = vpop.eup %10406  ;;  %v3994_v47 = vmul.f32 %v10405_v2, %v13565_v7  ;;  %v4214_v7 = vsel %vm17832_vm15, %v13556_v37, 0  ;;  %vm17839_vm15 = vmmov %vm17836_vm0 }
 0xc7b   :  { %v3993_v46 = vmul.f32 %v10407_v16, %v13567_v39  ;;  %v10409_v12 = vpop.eup %10408  ;;  %v4220_v39 = vsel %vm17836_vm0, %v13589_v58, 0 }
 0xc7c   :  { %v3995_v18 = vmul.f32 %v10409_v12, %v13562_v26  ;;  %v4217_v26 = vsel %vm17834_vm12, %v4175_v21, 0  ;;  %vm17841_vm12 = vmmov %vm17836_vm0 }
 0xc7d   :  { %v4009_v22 = vpack.c.bf16 %v3994_v47, %v3993_v46 }
 0xc7e   :  { %v10411_v38 = vpop.eup %10410 }
 0xc7f   :  { %v3996_v57 = vmul.f32 %v10411_v38, %v13571_v49  ;;  %9592 = vmatprep.mubr.bf16.mxu0 %v4009_v22 }
 0xc81   :  { %v4010_v1 = vpack.c.bf16 %v3996_v57, %v3995_v18 }
 0xc83   :  { %9593 = vmatmul.mubr.bf16.vlgmr.msra.gmra.mrb[112].mxu0 %v4010_v1 }
 0xc84   :  { %9609 = vmatpush3.bf16.xpose.msra.mxu0 %v4211_v30 }
 0xc85   :  { %9849 = vmatprep.subr.msk.bf16.mxu0 %vm17831_vm10, %v13556_v37  ;;  %vm17838_vm10 = vmmov %vm17836_vm0  ;;  %v4181_v37 = vpop.permute.xlu1 %4180 }
 0xc86   :  { %v4223_v49 = vsel %vm17838_vm10, %v4179_v20, 0  ;;  %vm17844_vm10 = vmmov %vm17836_vm0 }
 0xc8c   :  { %9611 = vmatpush3.bf16.xpose.msra.mxu0 %v4214_v7 }
 0xc8d   :  { %9850 = vmatprep.subr.msk.bf16.mxu0 %vm17833_vm8, %v4175_v21  ;;  %vm17842_vm8 = vmmov %vm17836_vm0 }
 0xc94   :  { %9613 = vmatpush3.bf16.xpose.msra.mxu0 %v4217_v26 }
 0xc95   :  { %9851 = vmatprep.subr.msk.bf16.mxu0 %vm17835_vm13, %v13589_v58  ;;  %vm17840_vm13 = vmmov %vm17836_vm0 }
 0xc96   :  { %v4226_v21 = vsel %vm17840_vm13, %v4181_v37, 0  ;;  %vm17846_vm13 = vmmov %vm17836_vm0 }
 0xc9c   :  { %9615 = vmatpush3.bf16.xpose.msra.mxu0 %v4220_v39 }
 0xc9d   :  { %9852 = vmatprep.subr.msk.bf16.mxu0 %vm17837_vm14, %v4179_v20  ;;  %vm17843_vm14 = vmmov %vm17836_vm0 }
 0xca3   :  { %v3958_v6 = vpop.xlane.xlu0 %3957 }
 0xca4   :  { %9617 = vmatpush3.bf16.xpose.msra.mxu0 %v4223_v49 }
 0xca5   :  { %9853 = vmatprep.subr.msk.bf16.mxu0 %vm17839_vm15, %v4181_v37  ;;  %vm17845_vm15 = vmmov %vm17836_vm0 }
 0xca7   :  { %v3954_v44 = vpop.xlane.xlu0 %3953 }
 0xca8   :  { %10412 = vrcp.f32 %v3954_v44  ;;  %v3956_v9 = vpop.xlane.xlu1 %3955 }
 0xca9   :  { %10414 = vrcp.f32 %v3956_v9 }
 0xcaa   :  { %10416 = vrcp.f32 %v3958_v6 }
 0xcab   :  { %v3960_v0 = vpop.xlane.xlu0 %3959 }
 0xcac   :  { %9619 = vmatpush3.bf16.xpose.msra.mxu0 %v4226_v21  ;;  %10418 = vrcp.f32 %v3960_v0  ;;  %v3966_v58 = vpop.xlane.xlu1 %3965 }
 0xcaf   :  { %v3974_v63 = vpop.xlane.xlu0 %3973 }
 0xcb0   :  { %v3962_v55 = vpop.xlane.xlu1 %3961 }
 0xcb2   :  { %v10413_v29 = vpop.eup %10412 }
 0xcb3   :  { %v10415_v2 = vpop.eup %10414  ;;  %v3970_v16 = vpop.xlane.xlu0 %3969  ;;  %v3997_v47 = vmul.f32 %v10413_v29, %v13593_v35 }
 0xcb4   :  { %v10417_v46 = vpop.eup %10416  ;;  %v3968_v12 = vpop.xlane.xlu1 %3967  ;;  %v3998_v22 = vmul.f32 %v10415_v2, %v13595_v51 }
 0xcb5   :  { %10420 = vrcp.f32 %v3968_v12  ;;  %v3999_v1 = vmul.f32 %v10417_v46, %v13587_v32 }
 0xcb6   :  { %v10419_v38 = vpop.eup %10418  ;;  %v4011_v18 = vpack.c.bf16 %v3998_v22, %v3997_v47  ;;  %10422 = vrcp.f32 %v3962_v55 }
 0xcb7   :  { %v3976_v57 = vpop.xlane.xlu0 %3975  ;;  %v4000_v30 = vmul.f32 %v10419_v38, %v13600_v34  ;;  %10424 = vrcp.f32 %v3966_v58 }
 0xcb8   :  { %v3964_v7 = vpop.xlane.xlu1 %3963  ;;  %9596 = vmatprep.mubr.bf16.mxu0 %v4011_v18 }
 0xcb9   :  { %10426 = vrcp.f32 %v3964_v7  ;;  %v4012_v26 = vpack.c.bf16 %v4000_v30, %v3999_v1 }
 0xcba   :  { %10428 = vrcp.f32 %v3970_v16 }
 0xcbb   :  { %9597 = vmatmul.mubr.bf16.gmra.mrb[116].mxu0 %v4012_v26  ;;  %v4183_v35 = vpop.permute.xlu0 %4182 }
 0xcbc   :  { %v3972_v39 = vpop.xlane.xlu1 %3971  ;;  %9854 = vmatprep.subr.msk.bf16.mxu0 %vm17836_vm0, %v4183_v35  ;;  %v4229_v51 = vsel %vm17841_vm12, %v4183_v35, 0  ;;  %vm17847_vm12 = vmmov %vm17836_vm0 }
 0xcbd   :  { %10430 = vrcp.f32 %v3972_v39  ;;  %9621 = vmatpush3.bf16.xpose.msra.mxu0 %v4229_v51 }
 0xcbe   :  { %10432 = vrcp.f32 %v3976_v57 }
 0xcbf   :  { %v4155_v20 = vpop.permute.xlu0 %4154  ;;  %v10421_v32 = vpop.eup %10420  ;;  %10434 = vrcp.f32 %v3974_v63 }
 0xcc0   :  { %v4185_v34 = vpop.permute.xlu1 %4184  ;;  %v10423_v49 = vpop.eup %10422  ;;  %v4004_v9 = vmul.f32 %v10421_v32, %v13615_v14 }
 0xcc1   :  { %9855 = vmatprep.subr.msk.bf16.mxu0 %vm17842_vm8, %v4185_v34  ;;  %v10425_v6 = vpop.eup %10424  ;;  %v4232_v0 = vsel %vm17843_vm14, %v4185_v34, 0  ;;  %v4001_v58 = vmul.f32 %v10423_v49, %v13609_v42  ;;  %vm17848_vm8 = vmmov %vm17836_vm0 }
 0xcc2   :  { %v4003_v63 = vmul.f32 %v10425_v6, %v13602_v56  ;;  %vm17849_vm14 = vmmov %vm17836_vm0  ;;  %v17869_v6 = vld [vmem:[#allocation55_spill] sm:$0xff] }
 0xcc3   :  { %v10427_v37 = vpop.eup %10426  ;;  %v4159_v44 = vpop.permute.xlu0 %4158 }
 0xcc4   :  { %v4157_v21 = vpop.permute.xlu1 %4156  ;;  %v4002_v55 = vmul.f32 %v10427_v37, %v13621_v52  ;;  %v10429_v29 = vpop.eup %10428  ;;  %v4014_v46 = vpack.c.bf16 %v4004_v9, %v4003_v63 }
 0xcc5   :  { %9623 = vmatpush3.bf16.xpose.msra.mxu0 %v4232_v0  ;;  %v4005_v14 = vmul.f32 %v10429_v29, %v13613_v48 }
 0xcc6   :  { %v4013_v2 = vpack.c.bf16 %v4002_v55, %v4001_v58 }
 0xcc7   :  { %v10431_v16 = vpop.eup %10430  ;;  %v4163_v47 = vpop.permute.xlu0 %4162 }
 0xcc8   :  { %v10433_v12 = vpop.eup %10432  ;;  %v4161_v22 = vpop.permute.xlu1 %4160  ;;  %9600 = vmatprep.mubr.bf16.mxu0 %v4013_v2  ;;  %v4006_v38 = vmul.f32 %v10431_v16, %v13625_v25 }
 0xcc9   :  { %9601 = vmatmul.mubr.bf16.gmra.mrb[120].mxu0 %v4014_v46  ;;  %v10435_v18 = vpop.eup %10434  ;;  %v4008_v52 = vmul.f32 %v10433_v12, %v13619_v27 }
 0xcca   :  { %v4015_v42 = vpack.c.bf16 %v4006_v38, %v4005_v14  ;;  %v4007_v56 = vmul.f32 %v10435_v18, %v13607_v23 }
 0xccb   :  { %v4167_v57 = vpop.permute.xlu0 %4166 }
 0xccc   :  { %v4165_v1 = vpop.permute.xlu1 %4164  ;;  %9604 = vmatprep.mubr.bf16.mxu0 %v4015_v42  ;;  %v4016_v7 = vpack.c.bf16 %v4008_v52, %v4007_v56 }
 0xccf   :  { %v4516_v30 = vpop.permute.xlu0 %4515 }
 0xcd0   :  { %v4169_v26 = vpop.permute.xlu1 %4168  ;;  %9640 = vmatprep.subr.bf16.mxu1 %v4516_v30 }
 0xcd1   :  { %9605 = vmatmul.mubr.bf16.gmra.mrb[124].mxu0 %v4016_v7  ;;  %9641 = vmatpush3.bf16.msra.mxu1 %v4516_v30 }
 0xcd2   :  { %9624 = vmatprep.mubr.msk.bf16.mxu0 %vm17844_vm10, %v4155_v20  ;;  %vm17850_vm10 = vmmov %vm17836_vm0 }
 0xcd3   :  { %v4520_v25 = vpop.permute.xlu0 %4519 }
 0xcd4   :  { %v4518_v48 = vpop.permute.xlu1 %4517 }
 0xcd5   :  { %9642 = vmatprep.subr.bf16.mxu1 %v4518_v48 }
 0xcd6   :  { %9643 = vmatpush3.bf16.msra.mxu1 %v4518_v48 }
 0xcd7   :  { %9644 = vmatprep.subr.bf16.mxu1 %v4520_v25  ;;  %v4524_v23 = vpop.permute.xlu0 %4523 }
 0xcd8   :  { %v4522_v27 = vpop.permute.xlu1 %4521 }
 0xcd9   :  { %9625 = vmatmul.mubr.msk.bf16.vlgmr.msra.gmra.mrb[128].mxu0 %vm17845_vm15, %v4157_v21  ;;  %vm17851_vm15 = vmmov %vm17836_vm0 }
 0xcda   :  { %9628 = vmatprep.mubr.msk.bf16.mxu0 %vm17846_vm13, %v4159_v44  ;;  %9645 = vmatpush3.bf16.msra.mxu1 %v4520_v25  ;;  %vm17870_vm13 = vnez %v17869_v6 }
 0xcdb   :  { %9646 = vmatprep.subr.bf16.mxu1 %v4522_v27  ;;  %v4528_v39 = vpop.permute.xlu0 %4527 }
 0xcdc   :  { %v4526_v35 = vpop.permute.xlu1 %4525 }
 0xcde   :  { %9647 = vmatpush3.bf16.msra.mxu1 %v4522_v27 }
 0xcdf   :  { %9648 = vmatprep.subr.bf16.mxu1 %v4524_v23  ;;  %v13711_v20 = vpop.permute.xlu0 %4660 }
 0xce0   :  { %v4530_v51 = vpop.permute.xlu1 %4529 }
 0xce1   :  { %9629 = vmatmul.mubr.msk.bf16.gmra.mrb[132].mxu0 %vm17836_vm0, %v4161_v22 }
 0xce2   :  { %9632 = vmatprep.mubr.msk.bf16.mxu0 %vm17847_vm12, %v4163_v47  ;;  %9649 = vmatpush3.bf16.msra.mxu1 %v4524_v23 }
 0xce3   :  { %9650 = vmatprep.subr.bf16.mxu1 %v4526_v35 }
 0xce6   :  { %9651 = vmatpush3.bf16.msra.mxu1 %v4526_v35 }
 0xce7   :  { %9652 = vmatprep.subr.bf16.mxu1 %v4528_v39 }
 0xce9   :  { %9633 = vmatmul.mubr.msk.bf16.gmra.mrb[136].mxu0 %vm17848_vm8, %v4165_v1 }
 0xcea   :  { %9636 = vmatprep.mubr.msk.bf16.mxu0 %vm17849_vm14, %v4167_v57  ;;  %9653 = vmatpush3.bf16.msra.mxu1 %v4528_v39 }
 0xceb   :  { %9654 = vmatprep.subr.bf16.mxu1 %v4530_v51 }
 0xcee   :  { %9655 = vmatpush3.bf16.msra.mxu1 %v4530_v51 }
 0xcef   :  { %9856 = vmatprep.subr.msk.bf16.mxu1 %vm17850_vm10, %v13711_v20 }
 0xcf1   :  { %9637 = vmatmul.mubr.msk.bf16.gmra.mrb[140].mxu0 %vm17851_vm15, %v4169_v26 }
 0xd56   :  { %v13716_v32 = vpop.f32.mrb[112].mxu0 }
 0xd57   :  { %17852 = vst [vmem:[#allocation47_spill] sm:$0xff] %v13716_v32  ;;  %v13718_v34 = vpop.f32.mrb[113].mxu0 }
 0xd58   :  { %17853 = vst [vmem:[#allocation53_spill] sm:$0xff] %v13718_v34  ;;  %v13720_v49 = vpop.f32.mrb[114].mxu0 }
 0xd59   :  { %17854 = vst [vmem:[#allocation101_spill] sm:$0xff] %v13720_v49  ;;  %v13724_v37 = vpop.f32.mrb[115].mxu0 }
 0xd5a   :  { %17855 = vst [vmem:[#allocation102_spill] sm:$0xff] %v13724_v37 }
 0xd8e   :  { %v13728_v9 = vpop.f32.mrb[116].mxu0 }
 0xd8f   :  { %17856 = vst [vmem:[#allocation103_spill] sm:$0xff] %v13728_v9  ;;  %v13730_v21 = vpop.f32.mrb[117].mxu0 }
 0xd90   :  { %17857 = vst [vmem:[#allocation104_spill] sm:$0xff] %v13730_v21  ;;  %v13732_v0 = vpop.f32.mrb[118].mxu0  ;;  %v17883_v21 = vld [vmem:[#allocation54_spill] sm:$0xff] }
 0xd91   :  { %17858 = vst [vmem:[#allocation105_spill] sm:$0xff] %v13732_v0  ;;  %v13736_v55 = vpop.f32.mrb[119].mxu0  ;;  %vm17884_vm15 = vnez %v17883_v21 }
 0xd92   :  { %17859 = vst [vmem:[#allocation106_spill] sm:$0xff] %v13736_v55  ;;  %v13848_v55 = vpop.permute.xlu1 %4662 }
 0xd9c   :  { %v13740_v63 = vpop.f32.mrb[120].mxu0 }
 0xd9d   :  { %17860 = vst [vmem:[#allocation107_spill] sm:$0xff] %v13740_v63  ;;  %v13742_v2 = vpop.f32.mrb[121].mxu0 }
 0xd9e   :  { %17861 = vst [vmem:[#allocation108_spill] sm:$0xff] %v13742_v2  ;;  %v13744_v16 = vpop.f32.mrb[122].mxu0 }
 0xd9f   :  { %17862 = vst [vmem:[#allocation109_spill] sm:$0xff] %v13744_v16  ;;  %v13748_v46 = vpop.f32.mrb[123].mxu0  ;;  %v17881_v16 = vld [vmem:[#allocation52_spill] sm:$0xff] }
 0xda0   :  { %17863 = vst [vmem:[#allocation110_spill] sm:$0xff] %v13748_v46  ;;  %vm17882_vm10 = vnez %v17881_v16 }
 0xda4   :  { %v13752_v22 = vpop.f32.mrb[124].mxu0 }
 0xda5   :  { %17864 = vst [vmem:[#allocation111_spill] sm:$0xff] %v13752_v22  ;;  %v13754_v14 = vpop.f32.mrb[125].mxu0  ;;  %v17873_v22 = vld [vmem:[#allocation56_spill] sm:$0xff] }
 0xda6   :  { %17865 = vst [vmem:[#allocation112_spill] sm:$0xff] %v13754_v14  ;;  %v13756_v38 = vpop.f32.mrb[126].mxu0  ;;  %vm17874_vm12 = vnez %v17873_v22 }
 0xda7   :  { %17866 = vst [vmem:[#allocation113_spill] sm:$0xff] %v13756_v38  ;;  %v13760_v42 = vpop.f32.mrb[127].mxu0  ;;  %v17875_v38 = vld [vmem:[#allocation57_spill] sm:$0xff] }
 0xda8   :  { %17867 = vst [vmem:[#allocation114_spill] sm:$0xff] %v13760_v42  ;;  %vm17876_vm8 = vnez %v17875_v38 }
 0xdac   :  { %v9626_v52 = vpop.f32.mrb[128].mxu0 }
 0xdad   :  { %v4333_v1 = vmul.f32 0.17677669, %v9626_v52  ;;  %v4268_v56 = vpop.f32.mrb[129].mxu0 }
 0xdae   :  { %v9627_v30 = vpop.f32.mrb[130].mxu0  ;;  %v4331_v7 = vmul.f32 0.17677669, %v4268_v56 }
 0xdaf   :  { %v4271_v26 = vpop.f32.mrb[131].mxu0  ;;  %v13766_v48 = vsel %vm12064_vm3, %v4333_v1, -1e+30  ;;  %v4334_v27 = vmul.f32 0.17677669, %v9627_v30 }
 0xdb0   :  { %v4332_v25 = vmul.f32 0.17677669, %v4271_v26  ;;  %4367 = vmax.xlane.f32.xlu0 %v13766_v48  ;;  %v13776_v35 = vsel %vm12086_vm5, %v4331_v7, -1e+30 }
 0xdb1   :  { %v13781_v1 = vsel %vm12108_vm7, %v4334_v27, -1e+30 }
 0xdb2   :  { %v13771_v23 = vsel %vm12046_vm1, %v4332_v25, -1e+30 }
 0xdb3   :  { %4365 = vmax.xlane.f32.xlu1 %v13771_v23 }
 0xdb4   :  { %4363 = vmax.xlane.f32.xlu0 %v13776_v35  ;;  %v9630_v39 = vpop.f32.mrb[132].mxu0 }
 0xdb5   :  { %v4284_v51 = vpop.f32.mrb[133].mxu0  ;;  %v4337_v56 = vmul.f32 0.17677669, %v9630_v39 }
 0xdb6   :  { %v9631_v52 = vpop.f32.mrb[134].mxu0  ;;  %v4335_v7 = vmul.f32 0.17677669, %v4284_v51 }
 0xdb7   :  { %v4338_v30 = vmul.f32 0.17677669, %v9631_v52  ;;  %v4287_v26 = vpop.f32.mrb[135].mxu0  ;;  %v13791_v18 = vsel %vm12130_vm9, %v4337_v56, -1e+30 }
 0xdb8   :  { %4369 = vmax.xlane.f32.xlu0 %v13781_v1  ;;  %v4336_v25 = vmul.f32 0.17677669, %v4287_v26  ;;  %v13801_v51 = vsel %vm12152_vm11, %v4335_v7, -1e+30 }
 0xdb9   :  { %v13786_v57 = vsel %vm12058_vm2, %v4338_v30, -1e+30 }
 0xdba   :  { %4377 = vmax.xlane.f32.xlu1 %v13786_v57  ;;  %v13796_v52 = vsel %vm12074_vm4, %v4336_v25, -1e+30 }
 0xdbc   :  { %4375 = vmax.xlane.f32.xlu0 %v13791_v18  ;;  %v9634_v27 = vpop.f32.mrb[136].mxu0 }
 0xdbd   :  { %v4300_v39 = vpop.f32.mrb[137].mxu0  ;;  %v4341_v30 = vmul.f32 0.17677669, %v9634_v27 }
 0xdbe   :  { %4373 = vmax.xlane.f32.xlu1 %v13796_v52  ;;  %v9635_v26 = vpop.f32.mrb[138].mxu0  ;;  %v4339_v25 = vmul.f32 0.17677669, %v4300_v39 }
 0xdbf   :  { %v4342_v12 = vmul.f32 0.17677669, %v9635_v26  ;;  %v4303_v47 = vpop.f32.mrb[139].mxu0  ;;  %v13811_v44 = vsel %vm17870_vm13, %v4341_v30, -1e+30  ;;  %v17871_v26 = vld [vmem:[#allocation51_spill] sm:$0xff] }
 0xdc0   :  { %4371 = vmax.xlane.f32.xlu0 %v13801_v51  ;;  %v4340_v56 = vmul.f32 0.17677669, %v4303_v47  ;;  %vm17872_vm0 = vnez %v17871_v26  ;;  %v13821_v39 = vsel %vm17874_vm12, %v4339_v25, -1e+30  ;;  %v17880_v25 = vld [vmem:[#allocation29_spill] sm:$0xff] }
 0xdc1   :  { %v13806_v58 = vsel %vm17764_vm6, %v4342_v12, -1e+30 }
 0xdc2   :  { %4385 = vmax.xlane.f32.xlu1 %v13806_v58  ;;  %v13816_v14 = vsel %vm17872_vm0, %v4340_v56, -1e+30  ;;  %v17877_v56 = vld [vmem:[#allocation58_spill] sm:$0xff] }
 0xdc3   :  { %vm17878_vm14 = vnez %v17877_v56 }
 0xdc4   :  { %4383 = vmax.xlane.f32.xlu0 %v13811_v44  ;;  %v9638_v7 = vpop.f32.mrb[140].mxu0 }
 0xdc5   :  { %v4316_v27 = vpop.f32.mrb[141].mxu0  ;;  %v4345_v12 = vmul.f32 0.17677669, %v9638_v7  ;;  %v17879_v7 = vld [vmem:[#allocation33_spill] sm:$0xff] }
 0xdc6   :  { %4381 = vmax.xlane.f32.xlu1 %v13816_v14  ;;  %v9639_v47 = vpop.f32.mrb[142].mxu0  ;;  %v4343_v30 = vmul.f32 0.17677669, %v4316_v27 }
 0xdc7   :  { %v4319_v42 = vpop.f32.mrb[143].mxu0  ;;  %v13826_v2 = vsel %vm17876_vm8, %v4345_v12, -1e+30  ;;  %v4346_v63 = vmul.f32 0.17677669, %v9639_v47 }
 0xdc8   :  { %4379 = vmax.xlane.f32.xlu0 %v13821_v39  ;;  %v13831_v46 = vsel %vm17878_vm14, %v4343_v30, -1e+30  ;;  %v4344_v27 = vmul.f32 0.17677669, %v4319_v42 }
 0xdc9   :  { %v13840_v12 = vsel %vm17882_vm10, %v4346_v63, -1e+30 }
 0xdca   :  { %v13845_v30 = vsel %vm17884_vm15, %v4344_v27, -1e+30  ;;  %vm17887_vm15 = vcmask 261120  }
 0xdcb   :  { %vm17888_vm10 = vmmov %vm17887_vm15 }
 0xdcc   :  { %4391 = vmax.xlane.f32.xlu0 %v13826_v2  ;;  %vm17889_vm14 = vmmov %vm17888_vm10 }
 0xdcd   :  { %vm17890_vm8 = vmmov %vm17888_vm10 }
 0xdce   :  { %vm17891_vm12 = vmmov %vm17890_vm8 }
 0xdcf   :  { %vm17892_vm0 = vmmov %vm17890_vm8 }
 0xdd0   :  { %4387 = vmax.xlane.f32.xlu0 %v13831_v46  ;;  %vm17893_vm13 = vmmov %vm17892_vm0 }
 0xdd7   :  { %4666 = vrot.lane.b32.xlu1 %v17879_v7, %s10921_s22 }
 0xde6   :  { %4664 = vrot.lane.b32.xlu0 %v17880_v25, %s10921_s22 }
 0xdfb   :  { %4393 = vmax.xlane.f32.xlu1 %v13840_v12 }
 0xdff   :  { %4389 = vmax.xlane.f32.xlu1 %v13845_v30 }
 0xe3d   :  { %v4368_v7 = vpop.xlane.xlu0 %4367 }
 0xe3e   :  { %v4397_v9 = vsub.f32 %v13766_v48, %v4368_v7 }
 0xe40   :  { %v4415_v25 = vmul.f32 1.442695, %v4397_v9  ;;  %v4366_v47 = vpop.xlane.xlu1 %4365 }
 0xe41   :  { %v4396_v42 = vsub.f32 %v13771_v23, %v4366_v47  ;;  %v4364_v0 = vpop.xlane.xlu0 %4363 }
 0xe42   :  { %10436 = vpow2.f32 %v4415_v25  ;;  %v4395_v63 = vsub.f32 %v13776_v35, %v4364_v0 }
 0xe43   :  { %v4413_v32 = vmul.f32 1.442695, %v4396_v42 }
 0xe44   :  { %v4411_v49 = vmul.f32 1.442695, %v4395_v63 }
 0xe45   :  { %10438 = vpow2.f32 %v4413_v32  ;;  %v4370_v27 = vpop.xlane.xlu0 %4369 }
 0xe46   :  { %10440 = vpow2.f32 %v4411_v49  ;;  %v4398_v34 = vsub.f32 %v13781_v1, %v4370_v27  ;;  %v17886_v49 = vld [vmem:[#allocation18_spill] sm:$0xff] }
 0xe47   :  { %v4378_v23 = vpop.xlane.xlu1 %4377 }
 0xe48   :  { %v4417_v37 = vmul.f32 1.442695, %v4398_v34  ;;  %v17885_v34 = vld [vmem:[#allocation16_spill] sm:$0xff]  ;;  %v4402_v21 = vsub.f32 %v13786_v57, %v4378_v23 }
 0xe49   :  { %v4376_v32 = vpop.xlane.xlu0 %4375 }
 0xe4a   :  { %10442 = vpow2.f32 %v4417_v37  ;;  %v4401_v1 = vsub.f32 %v13791_v18, %v4376_v32  ;;  %v4425_v53 = vmul.f32 1.442695, %v4402_v21 }
 0xe4b   :  { %v4374_v7 = vpop.xlane.xlu1 %4373 }
 0xe4c   :  { %v13854_v61 = vpop.eup %10436  ;;  %v4423_v47 = vmul.f32 1.442695, %v4401_v1  ;;  %v4400_v63 = vsub.f32 %v13796_v52, %v4374_v7 }
 0xe4d   :  { %4447 = vadd.xlane.f32.xlu1 %v13854_v61  ;;  %v4372_v37 = vpop.xlane.xlu0 %4371 }
 0xe4e   :  { %v4399_v42 = vsub.f32 %v13801_v51, %v4372_v37  ;;  %10444 = vpow2.f32 %v4423_v47  ;;  %v4421_v16 = vmul.f32 1.442695, %v4400_v63 }
 0xe4f   :  { %v13857_v9 = vpop.eup %10438  ;;  %v4386_v27 = vpop.xlane.xlu1 %4385 }
 0xe50   :  { %v13859_v48 = vpop.eup %10440  ;;  %4445 = vadd.xlane.f32.xlu0 %v13857_v9  ;;  %v4406_v57 = vsub.f32 %v13806_v58, %v4386_v27 }
 0xe51   :  { %4443 = vadd.xlane.f32.xlu1 %v13859_v48  ;;  %v4384_v35 = vpop.xlane.xlu0 %4383 }
 0xe52   :  { %v4433_v21 = vmul.f32 1.442695, %v4406_v57 }
 0xe53   :  { %v4382_v43 = vpop.xlane.xlu1 %4381 }
 0xe54   :  { %v13863_v0 = vpop.eup %10442 }
 0xe55   :  { %4449 = vadd.xlane.f32.xlu1 %v13863_v0  ;;  %v4380_v25 = vpop.xlane.xlu0 %4379 }
 0xe56   :  { %v4403_v51 = vsub.f32 %v13821_v39, %v4380_v25 }
 0xe58   :  { %v4427_v23 = vmul.f32 1.442695, %v4403_v51  ;;  %v13879_v7 = vpop.eup %10444  ;;  %v4701_v51 = vsel %vm17887_vm15, %v13711_v20, 0  ;;  %vm17894_vm15 = vmmov %vm17892_vm0 }
 0xe59   :  { %v4392_v11 = vpop.xlane.xlu0 %4391 }
 0xe5a   :  { %v4409_v18 = vsub.f32 %v13826_v2, %v4392_v11  ;;  %v4404_v2 = vsub.f32 %v13816_v14, %v4382_v43 }
 0xe5c   :  { %v4439_v52 = vmul.f32 1.442695, %v4409_v18  ;;  %v4429_v39 = vmul.f32 1.442695, %v4404_v2 }
 0xe5d   :  { %v4388_v37 = vpop.xlane.xlu0 %4387 }
 0xe5e   :  { %v4407_v1 = vsub.f32 %v13831_v46, %v4388_v37 }
 0xe60   :  { %v4435_v11 = vmul.f32 1.442695, %v4407_v1 }
 0xe66   :  { %4668 = vrot.lane.b32.xlu0 %v17885_v34, %s10921_s22  ;;  %4670 = vrot.lane.b32.xlu1 %v17886_v49, %s10921_s22  ;;  %v4419_v34 = vmul.f32 1.442695, %v4399_v42  ;;  %v4405_v49 = vsub.f32 %v13811_v44, %v4384_v35  ;;  %v13881_v44 = vpop.permute.xlu1 %4666 }
 0xe68   :  { %10446 = vpow2.f32 %v4419_v34  ;;  %v4431_v32 = vmul.f32 1.442695, %v4405_v49 }
 0xe69   :  { %10448 = vpow2.f32 %v4421_v16 }
 0xe6a   :  { %10450 = vpow2.f32 %v4425_v53 }
 0xe6b   :  { %10452 = vpow2.f32 %v4431_v32 }
 0xe6c   :  { %10454 = vpow2.f32 %v4439_v52 }
 0xe6d   :  { %10456 = vpow2.f32 %v4427_v23 }
 0xe6e   :  { %10458 = vpow2.f32 %v4435_v11 }
 0xe6f   :  { %10460 = vpow2.f32 %v4433_v21 }
 0xe72   :  { %v13885_v53 = vpop.eup %10446 }
 0xe73   :  { %v13887_v46 = vpop.eup %10448 }
 0xe74   :  { %v13892_v25 = vpop.eup %10450 }
 0xe75   :  { %v13894_v43 = vpop.eup %10452 }
 0xe76   :  { %v13899_v42 = vpop.eup %10454 }
 0xe77   :  { %v13901_v63 = vpop.eup %10456 }
 0xe78   :  { %v13905_v27 = vpop.eup %10458 }
 0xe79   :  { %v13907_v34 = vpop.eup %10460 }
 0xe85   :  { %4455 = vadd.xlane.f32.xlu0 %v13879_v7 }
 0xe88   :  { %v4394_v16 = vpop.xlane.xlu1 %4393 }
 0xe89   :  { %v4410_v58 = vsub.f32 %v13840_v12, %v4394_v16  ;;  %4451 = vadd.xlane.f32.xlu0 %v13885_v53 }
 0xe8a   :  { %4453 = vadd.xlane.f32.xlu1 %v13887_v46 }
 0xe8b   :  { %v4441_v35 = vmul.f32 1.442695, %v4410_v58 }
 0xe8c   :  { %v4390_v47 = vpop.xlane.xlu1 %4389 }
 0xe8d   :  { %10462 = vpow2.f32 %v4441_v35  ;;  %v4408_v14 = vsub.f32 %v13845_v30, %v4390_v47  ;;  %4457 = vadd.xlane.f32.xlu0 %v13892_v25 }
 0xe8e   :  { %4463 = vadd.xlane.f32.xlu1 %v13894_v43  ;;  %10464 = vpow2.f32 %v4429_v39 }
 0xe8f   :  { %v4437_v12 = vmul.f32 1.442695, %v4408_v14 }
 0xe91   :  { %4471 = vadd.xlane.f32.xlu0 %v13899_v42  ;;  %10466 = vpow2.f32 %v4437_v12 }
 0xe92   :  { %4459 = vadd.xlane.f32.xlu1 %v13901_v63 }
 0xe95   :  { %4467 = vadd.xlane.f32.xlu0 %v13905_v27 }
 0xe96   :  { %4465 = vadd.xlane.f32.xlu1 %v13907_v34 }
 0xe97   :  { %v13911_v30 = vpop.eup %10462 }
 0xe98   :  { %v13913_v49 = vpop.eup %10464 }
 0xe99   :  { %4473 = vadd.xlane.f32.xlu0 %v13911_v30 }
 0xe9a   :  { %4461 = vadd.xlane.f32.xlu1 %v13913_v49 }
 0xe9b   :  { %v13917_v18 = vpop.eup %10466 }
 0xe9e   :  { %4469 = vadd.xlane.f32.xlu1 %v13917_v18 }
 0xeaf   :  { %4674 = vrot.lane.b32.xlu1 %v17729_v33, %s10921_s22  ;;  %4672 = vrot.lane.b32.xlu0 %v17727_v15, %s10921_s22  ;;  %v4665_v15 = vpop.permute.xlu0 %4664 }
 0xeb3   :  { %4646 = vrot.lane.b32.xlu1 %v17735_v60, %s10921_s22  ;;  %4644 = vrot.lane.b32.xlu0 %v17733_v3, %s10921_s22 }
 0xeb7   :  { %4650 = vrot.lane.b32.xlu1 %v17738_v45, %s10921_s22  ;;  %4648 = vrot.lane.b32.xlu0 %v17736_v5, %s10921_s22 }
 0xebb   :  { %4654 = vrot.lane.b32.xlu1 %v17742_v8, %s10921_s22  ;;  %4652 = vrot.lane.b32.xlu0 %v17740_v41, %s10921_s22 }
 0xebf   :  { %4658 = vrot.lane.b32.xlu1 %v17746_v31, %s10921_s22  ;;  %4656 = vrot.lane.b32.xlu0 %v17744_v59, %s10921_s22 }
 0xec3   :  { %5007 = vrot.lane.b32.xlu1 %v17645_v4, %s10921_s22  ;;  %5005 = vrot.lane.b32.xlu0 %v17641_v10, %s10921_s22 }
 0xec7   :  { %5009 = vrot.lane.b32.xlu0 %v17646_v40, %s10921_s22 }
 0xecb   :  { %5011 = vrot.lane.b32.xlu0 %v17648_v36, %s10921_s22 }
 0xeda   :  { %v4448_v33 = vpop.xlane.xlu1 %4447 }
 0xedd   :  { %v4446_v3 = vpop.xlane.xlu0 %4445 }
 0xede   :  { %10468 = vrcp.f32 %v4446_v3  ;;  %v4444_v60 = vpop.xlane.xlu1 %4443 }
 0xedf   :  { %10470 = vrcp.f32 %v4444_v60 }
 0xee0   :  { %10472 = vrcp.f32 %v4448_v33 }
 0xee1   :  { %v4669_v20 = vpop.permute.xlu0 %4668 }
 0xee2   :  { %v4450_v5 = vpop.xlane.xlu1 %4449 }
 0xee3   :  { %10474 = vrcp.f32 %v4450_v5 }
 0xee8   :  { %v10469_v45 = vpop.eup %10468 }
 0xee9   :  { %v10471_v4 = vpop.eup %10470  ;;  %v4492_v41 = vmul.f32 %v10469_v45, %v13857_v9  ;;  %v4704_v9 = vsel %vm17889_vm14, %v13848_v55, 0  ;;  %vm17896_vm14 = vmmov %vm17892_vm0 }
 0xeea   :  { %v4491_v10 = vmul.f32 %v10471_v4, %v13859_v48  ;;  %v10473_v8 = vpop.eup %10472  ;;  %v4710_v48 = vsel %vm17893_vm13, %v13881_v44, 0  ;;  %vm17897_vm13 = vmmov %vm17892_vm0 }
 0xeeb   :  { %v4493_v36 = vmul.f32 %v10473_v8, %v13854_v61  ;;  %v4707_v61 = vsel %vm17891_vm12, %v4665_v15, 0  ;;  %vm17898_vm12 = vmmov %vm17892_vm0 }
 0xeec   :  { %v4507_v40 = vpack.c.bf16 %v4492_v41, %v4491_v10 }
 0xeed   :  { %v10475_v59 = vpop.eup %10474 }
 0xeee   :  { %v4494_v31 = vmul.f32 %v10475_v59, %v13863_v0  ;;  %9656 = vmatprep.mubr.bf16.mxu1 %v4507_v40 }
 0xef0   :  { %v4508_v32 = vpack.c.bf16 %v4494_v31, %v4493_v36 }
 0xef2   :  { %9657 = vmatmul.mubr.bf16.vlgmr.msra.gmra.mrb[160].mxu1 %v4508_v32 }
 0xef3   :  { %9673 = vmatpush3.bf16.xpose.msra.mxu1 %v4701_v51 }
 0xef4   :  { %9857 = vmatprep.subr.msk.bf16.mxu1 %vm17888_vm10, %v13848_v55  ;;  %vm17895_vm10 = vmmov %vm17892_vm0  ;;  %v4671_v55 = vpop.permute.xlu1 %4670 }
 0xef5   :  { %v4713_v0 = vsel %vm17895_vm10, %v4669_v20, 0  ;;  %v4716_v57 = vsel %vm17892_vm0, %v4671_v55, 0  ;;  %vm17901_vm10 = vmmov %vm17892_vm0 }
 0xefb   :  { %9675 = vmatpush3.bf16.xpose.msra.mxu1 %v4704_v9 }
 0xefc   :  { %9858 = vmatprep.subr.msk.bf16.mxu1 %vm17890_vm8, %v4665_v15  ;;  %vm17899_vm8 = vmmov %vm17892_vm0 }
 0xf03   :  { %9677 = vmatpush3.bf16.xpose.msra.mxu1 %v4707_v61 }
 0xf04   :  { %9859 = vmatprep.subr.msk.bf16.mxu1 %vm17892_vm0, %v13881_v44 }
 0xf0b   :  { %9679 = vmatpush3.bf16.xpose.msra.mxu1 %v4710_v48 }
 0xf0c   :  { %9860 = vmatprep.subr.msk.bf16.mxu1 %vm17894_vm15, %v4669_v20  ;;  %vm17900_vm15 = vmmov %vm17892_vm0 }
 0xf12   :  { %v4456_v37 = vpop.xlane.xlu0 %4455 }
 0xf13   :  { %9681 = vmatpush3.bf16.xpose.msra.mxu1 %v4713_v0 }
 0xf14   :  { %9861 = vmatprep.subr.msk.bf16.mxu1 %vm17896_vm14, %v4671_v55  ;;  %vm17902_vm14 = vmmov %vm17892_vm0 }
 0xf16   :  { %v4452_v52 = vpop.xlane.xlu0 %4451 }
 0xf17   :  { %10476 = vrcp.f32 %v4452_v52  ;;  %v4454_v1 = vpop.xlane.xlu1 %4453 }
 0xf18   :  { %10478 = vrcp.f32 %v4454_v1 }
 0xf19   :  { %10480 = vrcp.f32 %v4456_v37 }
 0xf1a   :  { %v4458_v23 = vpop.xlane.xlu0 %4457 }
 0xf1b   :  { %9683 = vmatpush3.bf16.xpose.msra.mxu1 %v4716_v57  ;;  %10482 = vrcp.f32 %v4458_v23  ;;  %v4464_v44 = vpop.xlane.xlu1 %4463 }
 0xf1e   :  { %v4472_v11 = vpop.xlane.xlu0 %4471 }
 0xf1f   :  { %v4460_v21 = vpop.xlane.xlu1 %4459 }
 0xf21   :  { %v10477_v2 = vpop.eup %10476 }
 0xf22   :  { %v10479_v16 = vpop.eup %10478  ;;  %v4468_v58 = vpop.xlane.xlu0 %4467  ;;  %v4495_v39 = vmul.f32 %v10477_v2, %v13885_v53 }
 0xf23   :  { %v10481_v35 = vpop.eup %10480  ;;  %v4466_v47 = vpop.xlane.xlu1 %4465  ;;  %v4496_v14 = vmul.f32 %v10479_v16, %v13887_v46 }
 0xf24   :  { %10484 = vrcp.f32 %v4466_v47  ;;  %v4497_v3 = vmul.f32 %v10481_v35, %v13879_v7 }
 0xf25   :  { %v10483_v12 = vpop.eup %10482  ;;  %v4509_v15 = vpack.c.bf16 %v4496_v14, %v4495_v39  ;;  %10486 = vrcp.f32 %v4460_v21 }
 0xf26   :  { %v4474_v33 = vpop.xlane.xlu0 %4473  ;;  %v4498_v60 = vmul.f32 %v10483_v12, %v13892_v25  ;;  %10488 = vrcp.f32 %v4464_v44 }
 0xf27   :  { %v4462_v5 = vpop.xlane.xlu1 %4461  ;;  %9660 = vmatprep.mubr.bf16.mxu1 %v4509_v15 }
 0xf28   :  { %10490 = vrcp.f32 %v4462_v5  ;;  %v4510_v45 = vpack.c.bf16 %v4498_v60, %v4497_v3 }
 0xf29   :  { %10492 = vrcp.f32 %v4468_v58 }
 0xf2a   :  { %9661 = vmatmul.mubr.bf16.gmra.mrb[164].mxu1 %v4510_v45  ;;  %v4673_v53 = vpop.permute.xlu0 %4672 }
 0xf2b   :  { %v4470_v4 = vpop.xlane.xlu1 %4469  ;;  %9862 = vmatprep.subr.msk.bf16.mxu1 %vm17897_vm13, %v4673_v53  ;;  %v4719_v46 = vsel %vm17898_vm12, %v4673_v53, 0  ;;  %vm17903_vm13 = vmmov %vm17892_vm0 }
 0xf2c   :  { %10494 = vrcp.f32 %v4470_v4  ;;  %9685 = vmatpush3.bf16.xpose.msra.mxu1 %v4719_v46  ;;  %vm17904_vm12 = vmmov %vm17892_vm0 }
 0xf2d   :  { %10496 = vrcp.f32 %v4474_v33 }
 0xf2e   :  { %v4645_v41 = vpop.permute.xlu0 %4644  ;;  %v10485_v7 = vpop.eup %10484  ;;  %10498 = vrcp.f32 %v4472_v11 }
 0xf2f   :  { %v4675_v25 = vpop.permute.xlu1 %4674  ;;  %v10487_v10 = vpop.eup %10486  ;;  %v4502_v36 = vmul.f32 %v10485_v7, %v13907_v34 }
 0xf30   :  { %9863 = vmatprep.subr.msk.bf16.mxu1 %vm17899_vm8, %v4675_v25  ;;  %v10489_v8 = vpop.eup %10488  ;;  %v4722_v32 = vsel %vm17900_vm15, %v4675_v25, 0  ;;  %v4499_v51 = vmul.f32 %v10487_v10, %v13901_v63  ;;  %vm17905_vm8 = vmmov %vm17892_vm0 }
 0xf31   :  { %v4501_v48 = vmul.f32 %v10489_v8, %v13894_v43  ;;  %vm17906_vm15 = vmmov %vm17892_vm0 }
 0xf32   :  { %v10491_v40 = vpop.eup %10490  ;;  %v4649_v59 = vpop.permute.xlu0 %4648 }
 0xf33   :  { %v4647_v31 = vpop.permute.xlu1 %4646  ;;  %v4500_v9 = vmul.f32 %v10491_v40, %v13913_v49  ;;  %v10493_v61 = vpop.eup %10492  ;;  %v4512_v55 = vpack.c.bf16 %v4502_v36, %v4501_v48 }
 0xf34   :  { %9687 = vmatpush3.bf16.xpose.msra.mxu1 %v4722_v32  ;;  %v4503_v34 = vmul.f32 %v10493_v61, %v13905_v27 }
 0xf35   :  { %v4511_v20 = vpack.c.bf16 %v4500_v9, %v4499_v51 }
 0xf36   :  { %v10495_v0 = vpop.eup %10494  ;;  %v4653_v37 = vpop.permute.xlu0 %4652 }
 0xf37   :  { %v10497_v52 = vpop.eup %10496  ;;  %v4651_v1 = vpop.permute.xlu1 %4650  ;;  %9664 = vmatprep.mubr.bf16.mxu1 %v4511_v20  ;;  %v4504_v57 = vmul.f32 %v10495_v0, %v13917_v18 }
 0xf38   :  { %9665 = vmatmul.mubr.bf16.gmra.mrb[168].mxu1 %v4512_v55  ;;  %v10499_v23 = vpop.eup %10498  ;;  %v4506_v49 = vmul.f32 %v10497_v52, %v13911_v30 }
 0xf39   :  { %v4513_v63 = vpack.c.bf16 %v4504_v57, %v4503_v34  ;;  %v4505_v43 = vmul.f32 %v10499_v23, %v13899_v42  ;;  %v17908_v42 = vmov 0  }
 0xf3a   :  { %v4657_v44 = vpop.permute.xlu0 %4656 }
 0xf3b   :  { %v4655_v11 = vpop.permute.xlu1 %4654  ;;  %9668 = vmatprep.mubr.bf16.mxu1 %v4513_v63  ;;  %v4514_v2 = vpack.c.bf16 %v4506_v49, %v4505_v43 }
 0xf3e   :  { %v5006_v21 = vpop.permute.xlu0 %5005 }
 0xf3f   :  { %v4659_v16 = vpop.permute.xlu1 %4658  ;;  %9704 = vmatprep.subr.bf16.mxu0 %v5006_v21 }
 0xf40   :  { %9669 = vmatmul.mubr.bf16.gmra.mrb[172].mxu1 %v4514_v2  ;;  %9705 = vmatpush3.bf16.msra.mxu0 %v5006_v21 }
 0xf41   :  { %9688 = vmatprep.mubr.msk.bf16.mxu1 %vm17901_vm10, %v4645_v41  ;;  %vm17907_vm10 = vmmov %vm17892_vm0 }
 0xf42   :  { %v5010_v27 = vpop.permute.xlu0 %5009 }
 0xf43   :  { %v5008_v18 = vpop.permute.xlu1 %5007 }
 0xf44   :  { %9706 = vmatprep.subr.bf16.mxu0 %v5008_v18 }
 0xf45   :  { %9707 = vmatpush3.bf16.msra.mxu0 %v5008_v18 }
 0xf46   :  { %9708 = vmatprep.subr.bf16.mxu0 %v5010_v27  ;;  %v5012_v30 = vpop.permute.xlu0 %5011 }
 0xf48   :  { %9689 = vmatmul.mubr.msk.bf16.vlgmr.msra.gmra.mrb[176].mxu1 %vm17902_vm14, %v4647_v31  ;;  %vm3181_vm14 = vcmask 785408  }
 0xf49   :  { %9692 = vmatprep.mubr.msk.bf16.mxu1 %vm17892_vm0, %v4649_v59  ;;  %9709 = vmatpush3.bf16.msra.mxu0 %v5010_v27 }
 0xf4a   :  { %9710 = vmatprep.subr.bf16.mxu0 %v5012_v30 }
 0xf4d   :  { %9711 = vmatpush3.bf16.msra.mxu0 %v5012_v30 }
 0xf50   :  { %9693 = vmatmul.mubr.msk.bf16.gmra.mrb[180].mxu1 %vm17903_vm13, %v4651_v1  ;;  %vm18010_vm13 = vmmov %vm17892_vm0 }
 0xf51   :  { %9696 = vmatprep.mubr.msk.bf16.mxu1 %vm17904_vm12, %v4653_v37  ;;  %vm18014_vm12 = vmmov %vm17892_vm0 }
 0xf58   :  { %9697 = vmatmul.mubr.msk.bf16.gmra.mrb[184].mxu1 %vm17905_vm8, %v4655_v11  ;;  %vm18018_vm8 = vmmov %vm17892_vm0 }
 0xf59   :  { %9700 = vmatprep.mubr.msk.bf16.mxu1 %vm17906_vm15, %v4657_v44  ;;  %vm18022_vm15 = vmmov %vm17892_vm0 }
 0xf60   :  { %9701 = vmatmul.mubr.msk.bf16.gmra.mrb[188].mxu1 %vm17907_vm10, %v4659_v16  ;;  %vm18026_vm10 = vmmov %vm17892_vm0 }
 0xf61   :  { %6226 = vmatprep.mubr.bf16.mxu1 %v17908_v42 }
 0xfc5   :  { %v13993_v58 = vpop.f32.mrb[160].mxu1 }
 0xfc6   :  { %v13995_v39 = vpop.f32.mrb[161].mxu1 }
 0xfc7   :  { %v13997_v35 = vpop.f32.mrb[162].mxu1 }
 0xfc8   :  { %v4637_v47 = vpack.c.bf16 %v13997_v35, %v13993_v58  ;;  %v14001_v14 = vpop.f32.mrb[163].mxu1 }
 0xfc9   :  { %v4636_v12 = vpack.c.bf16 %v14001_v14, %v13995_v39 }
 0xffd   :  { %v14005_v15 = vpop.f32.mrb[164].mxu1 }
 0xffe   :  { %v14007_v33 = vpop.f32.mrb[165].mxu1 }
 0xfff   :  { %v14009_v3 = vpop.f32.mrb[166].mxu1 }
0x1000   :  { %v4639_v60 = vpack.c.bf16 %v14009_v3, %v14005_v15  ;;  %v14013_v5 = vpop.f32.mrb[167].mxu1 }
0x1001   :  { %v4638_v45 = vpack.c.bf16 %v14013_v5, %v14007_v33 }
0x100b   :  { %v14017_v53 = vpop.f32.mrb[168].mxu1 }
0x100c   :  { %v14019_v4 = vpop.f32.mrb[169].mxu1 }
0x100d   :  { %v14021_v46 = vpop.f32.mrb[170].mxu1 }
0x100e   :  { %v4641_v41 = vpack.c.bf16 %v14021_v46, %v14017_v53  ;;  %v14025_v7 = vpop.f32.mrb[171].mxu1  ;;  %v18044_v53 = vld [vmem:[#allocation111_spill] sm:$0xff] }
0x100f   :  { %v4640_v25 = vpack.c.bf16 %v14025_v7, %v14019_v4  ;;  %v18046_v4 = vld [vmem:[#allocation114_spill] sm:$0xff]  ;;  %v18047_v7 = vld [vmem:[#allocation112_spill] sm:$0xff] }
0x1013   :  { %v14029_v10 = vpop.f32.mrb[172].mxu1 }
0x1014   :  { %v14031_v8 = vpop.f32.mrb[173].mxu1 }
0x1015   :  { %v14033_v40 = vpop.f32.mrb[174].mxu1 }
0x1016   :  { %v4643_v59 = vpack.c.bf16 %v14033_v40, %v14029_v10  ;;  %v14037_v36 = vpop.f32.mrb[175].mxu1 }
0x1017   :  { %v4642_v31 = vpack.c.bf16 %v14037_v36, %v14031_v8  ;;  %v14438_v8 = vld [vmem:[%s17149_s6] ss:$0 sm:$0xff] }
0x101b   :  { %v9690_v32 = vpop.f32.mrb[176].mxu1 }
0x101c   :  { %v4823_v51 = vmul.f32 0.17677669, %v9690_v32  ;;  %v4758_v9 = vpop.f32.mrb[177].mxu1 }
0x101d   :  { %v9691_v61 = vpop.f32.mrb[178].mxu1  ;;  %v4821_v48 = vmul.f32 0.17677669, %v4758_v9 }
0x101e   :  { %v4761_v20 = vpop.f32.mrb[179].mxu1  ;;  %v4839_v0 = vsel %vm12064_vm3, %v4823_v51, -1e+30  ;;  %v4824_v55 = vmul.f32 0.17677669, %v9691_v61  ;;  %vm17911_vm3 = vnez %v17873_v22  ;;  %v17915_v22 = vld [vmem:[#allocation44_spill] sm:$0xff] }
0x101f   :  { %v4822_v37 = vmul.f32 0.17677669, %v4761_v20  ;;  %4857 = vmax.xlane.f32.xlu0 %v4839_v0  ;;  %v4837_v1 = vsel %vm12086_vm5, %v4821_v48, -1e+30  ;;  %vm17913_vm5 = vnez %v17877_v56 }
0x1020   :  { %v4840_v19 = vsel %vm12108_vm7, %v4824_v55, -1e+30 }
0x1021   :  { %v14045_v52 = vsel %vm12046_vm1, %v4822_v37, -1e+30  ;;  %vm17909_vm1 = vnez %v17869_v6 }
0x1022   :  { %4855 = vmax.xlane.f32.xlu1 %v14045_v52 }
0x1023   :  { %4853 = vmax.xlane.f32.xlu0 %v4837_v1  ;;  %v9694_v34 = vpop.f32.mrb[180].mxu1 }
0x1024   :  { %v4774_v57 = vpop.f32.mrb[181].mxu1  ;;  %v4827_v63 = vmul.f32 0.17677669, %v9694_v34  ;;  %v17914_v34 = vld [vmem:[#allocation43_spill] sm:$0xff] }
0x1025   :  { %v9695_v23 = vpop.f32.mrb[182].mxu1  ;;  %v4825_v43 = vmul.f32 0.17677669, %v4774_v57 }
0x1026   :  { %v4828_v44 = vmul.f32 0.17677669, %v9695_v23  ;;  %v4777_v49 = vpop.f32.mrb[183].mxu1  ;;  %v4843_v54 = vsel %vm12130_vm9, %v4827_v63, -1e+30  ;;  %v17916_v63 = vld [vmem:[#allocation52_spill] sm:$0xff] }
0x1027   :  { %4859 = vmax.xlane.f32.xlu0 %v4840_v19  ;;  %v4826_v11 = vmul.f32 0.17677669, %v4777_v49  ;;  %v14066_v28 = vsel %vm12152_vm11, %v4825_v43, -1e+30  ;;  %vm17917_vm7 = vnez %v17916_v63  ;;  %vm18003_vm11 = vmmov %vm17892_vm0 }
0x1028   :  { %v14054_v62 = vsel %vm12058_vm2, %v4828_v44, -1e+30  ;;  %vm17910_vm2 = vnez %v17871_v26  ;;  %v17918_v44 = vld [vmem:[#allocation54_spill] sm:$0xff] }
0x1029   :  { %4867 = vmax.xlane.f32.xlu1 %v14054_v62  ;;  %v14061_v50 = vsel %vm12074_vm4, %v4826_v11, -1e+30  ;;  %vm17912_vm4 = vnez %v17875_v38  ;;  %vm17919_vm9 = vnez %v17918_v44 }
0x102b   :  { %4865 = vmax.xlane.f32.xlu0 %v4843_v54  ;;  %v9698_v21 = vpop.f32.mrb[184].mxu1 }
0x102c   :  { %v4790_v2 = vpop.f32.mrb[185].mxu1  ;;  %v4831_v27 = vmul.f32 0.17677669, %v9698_v21 }
0x102d   :  { %4863 = vmax.xlane.f32.xlu1 %v14061_v50  ;;  %v9699_v16 = vpop.f32.mrb[186].mxu1  ;;  %v4829_v17 = vmul.f32 0.17677669, %v4790_v2 }
0x102e   :  { %v4832_v18 = vmul.f32 0.17677669, %v9699_v16  ;;  %v4793_v30 = vpop.f32.mrb[187].mxu1  ;;  %v14076_v51 = vsel %vm17909_vm1, %v4831_v27, -1e+30  ;;  %vm18030_vm1 = vmmov %vm17892_vm0 }
0x102f   :  { %4861 = vmax.xlane.f32.xlu0 %v14066_v28  ;;  %v4830_v13 = vmul.f32 0.17677669, %v4793_v30  ;;  %v14086_v37 = vsel %vm17911_vm3, %v4829_v17, -1e+30  ;;  %vm18063_vm3 = vmmov %vm17892_vm0 }
0x1030   :  { %v14071_v32 = vsel %vm17764_vm6, %v4832_v18, -1e+30  ;;  %vm3164_vm6 = vcmask 523264  }
0x1031   :  { %4875 = vmax.xlane.f32.xlu1 %v14071_v32  ;;  %v14081_v61 = vsel %vm17910_vm2, %v4830_v13, -1e+30  ;;  %vm18057_vm2 = vmmov %vm17892_vm0 }
0x1033   :  { %4873 = vmax.xlane.f32.xlu0 %v14076_v51  ;;  %v9702_v24 = vpop.f32.mrb[188].mxu1 }
0x1034   :  { %v4806_v9 = vpop.f32.mrb[189].mxu1  ;;  %v4835_v48 = vmul.f32 0.17677669, %v9702_v24 }
0x1035   :  { %4871 = vmax.xlane.f32.xlu1 %v14081_v61  ;;  %v9703_v29 = vpop.f32.mrb[190].mxu1  ;;  %v4833_v6 = vmul.f32 0.17677669, %v4806_v9 }
0x1036   :  { %v4809_v20 = vpop.f32.mrb[191].mxu1  ;;  %v14091_v55 = vsel %vm17912_vm4, %v4835_v48, -1e+30  ;;  %v4836_v57 = vmul.f32 0.17677669, %v9703_v29  ;;  %vm18073_vm4 = vmmov %vm17892_vm0 }
0x1037   :  { %4869 = vmax.xlane.f32.xlu0 %v14086_v37  ;;  %v14096_v26 = vsel %vm17913_vm5, %v4833_v6, -1e+30  ;;  %v4834_v23 = vmul.f32 0.17677669, %v4809_v20  ;;  %vm18077_vm5 = vmmov %vm17892_vm0 }
0x1038   :  { %v14105_v38 = vsel %vm17917_vm7, %v4836_v57, -1e+30  ;;  %vm18084_vm7 = vmmov %vm17892_vm0 }
0x1039   :  { %v14110_v56 = vsel %vm17919_vm9, %v4834_v23, -1e+30  ;;  %vm18088_vm9 = vmmov %vm17892_vm0 }
0x103b   :  { %4881 = vmax.xlane.f32.xlu0 %v14091_v55 }
0x103f   :  { %4877 = vmax.xlane.f32.xlu0 %v14096_v26 }
0x1046   :  { %5015 = vrot.lane.b32.xlu1 %v17914_v34, %s10921_s22 }
0x1055   :  { %5013 = vrot.lane.b32.xlu0 %v17915_v22, %s10921_s22 }
0x106a   :  { %4883 = vmax.xlane.f32.xlu1 %v14105_v38 }
0x106e   :  { %4879 = vmax.xlane.f32.xlu1 %v14110_v56 }
0x10ac   :  { %v4858_v49 = vpop.xlane.xlu0 %4857 }
0x10ad   :  { %v4887_v11 = vsub.f32 %v4839_v0, %v4858_v49 }
0x10af   :  { %v4905_v43 = vmul.f32 1.442695, %v4887_v11  ;;  %v4856_v2 = vpop.xlane.xlu1 %4855 }
0x10b0   :  { %v4854_v21 = vpop.xlane.xlu0 %4853  ;;  %v4886_v18 = vsub.f32 %v14045_v52, %v4856_v2 }
0x10b1   :  { %10500 = vpow2.f32 %v4905_v43  ;;  %v4885_v16 = vsub.f32 %v4837_v1, %v4854_v21 }
0x10b2   :  { %v4903_v9 = vmul.f32 1.442695, %v4886_v18 }
0x10b3   :  { %v4901_v27 = vmul.f32 1.442695, %v4885_v16 }
0x10b4   :  { %v4860_v30 = vpop.xlane.xlu0 %4859 }
0x10b5   :  { %10502 = vpow2.f32 %v4901_v27  ;;  %v4888_v13 = vsub.f32 %v4840_v19, %v4860_v30 }
0x10b6   :  { %v4868_v17 = vpop.xlane.xlu1 %4867 }
0x10b7   :  { %v4907_v24 = vmul.f32 1.442695, %v4888_v13  ;;  %v4892_v29 = vsub.f32 %v14054_v62, %v4868_v17  ;;  %v17920_v13 = vld [vmem:[#allocation45_spill] sm:$0xff]  ;;  %v17921_v17 = vld [vmem:[#allocation46_spill] sm:$0xff] }
0x10b8   :  { %v4866_v48 = vpop.xlane.xlu0 %4865 }
0x10b9   :  { %10504 = vpow2.f32 %v4907_v24  ;;  %v4891_v20 = vsub.f32 %v4843_v54, %v4866_v48  ;;  %v4915_v1 = vmul.f32 1.442695, %v4892_v29 }
0x10ba   :  { %v4864_v0 = vpop.xlane.xlu1 %4863  ;;  %10506 = vpow2.f32 %v4903_v9 }
0x10bb   :  { %v14115_v6 = vpop.eup %10500  ;;  %v4913_v34 = vmul.f32 1.442695, %v4891_v20  ;;  %v4890_v19 = vsub.f32 %v14061_v50, %v4864_v0 }
0x10bc   :  { %4937 = vadd.xlane.f32.xlu1 %v14115_v6  ;;  %v4862_v52 = vpop.xlane.xlu0 %4861 }
0x10bd   :  { %10508 = vpow2.f32 %v4913_v34  ;;  %v4889_v22 = vsub.f32 %v14066_v28, %v4862_v52  ;;  %v4911_v23 = vmul.f32 1.442695, %v4890_v19 }
0x10be   :  { %10510 = vpow2.f32 %v4915_v1  ;;  %v4876_v50 = vpop.xlane.xlu1 %4875 }
0x10bf   :  { %v14120_v57 = vpop.eup %10502  ;;  %v4909_v62 = vmul.f32 1.442695, %v4889_v22  ;;  %v4896_v9 = vsub.f32 %v14071_v32, %v4876_v50 }
0x10c0   :  { %4933 = vadd.xlane.f32.xlu1 %v14120_v57  ;;  %v4874_v54 = vpop.xlane.xlu0 %4873 }
0x10c1   :  { %10512 = vpow2.f32 %v4909_v62  ;;  %v4923_v20 = vmul.f32 1.442695, %v4896_v9  ;;  %v4895_v0 = vsub.f32 %v14076_v51, %v4874_v54  ;;  %v17928_v9 = vld [vmem:[#allocation68_spill] sm:$0xff] }
0x10c2   :  { %10514 = vpow2.f32 %v4911_v23  ;;  %v4872_v2 = vpop.xlane.xlu1 %4871 }
0x10c3   :  { %v14123_v63 = vpop.eup %10504  ;;  %v4894_v29 = vsub.f32 %v14081_v61, %v4872_v2  ;;  %v4921_v52 = vmul.f32 1.442695, %v4895_v0  ;;  %v17932_v0 = vld [vmem:[#allocation74_spill] sm:$0xff] }
0x10c4   :  { %4939 = vadd.xlane.f32.xlu1 %v14123_v63  ;;  %v4870_v44 = vpop.xlane.xlu0 %4869  ;;  %v14126_v49 = vpop.eup %10506 }
0x10c5   :  { %v4893_v24 = vsub.f32 %v14086_v37, %v4870_v44  ;;  %v4919_v34 = vmul.f32 1.442695, %v4894_v29  ;;  %v17929_v29 = vld [vmem:[#allocation69_spill] sm:$0xff] }
0x10c6   :  { %v5016_v30 = vpop.permute.xlu1 %5015 }
0x10c7   :  { %v14128_v11 = vpop.eup %10508  ;;  %v4917_v48 = vmul.f32 1.442695, %v4893_v24 }
0x10c8   :  { %4935 = vadd.xlane.f32.xlu1 %v14126_v49  ;;  %4945 = vadd.xlane.f32.xlu0 %v14128_v11  ;;  %v4882_v28 = vpop.xlane.xlu0 %4881  ;;  %v14132_v43 = vpop.eup %10510 }
0x10c9   :  { %10516 = vpow2.f32 %v4917_v48  ;;  %v4899_v32 = vsub.f32 %v14091_v55, %v4882_v28  ;;  %v17930_v48 = vpack.c.bf16 %v17928_v9, %v17929_v29  ;;  %v17952_v29 = vld [vmem:[#allocation21_spill] sm:$0xff] }
0x10ca   :  { %10518 = vpow2.f32 %v4923_v20  ;;  %v17931_v20 = vld [vmem:[#allocation32_spill] sm:$0xff] }
0x10cb   :  { %v14134_v21 = vpop.eup %10512  ;;  %10520 = vpow2.f32 %v4919_v34  ;;  %v4929_v54 = vmul.f32 1.442695, %v4899_v32  ;;  %v17933_v34 = vpack.c.bf16 %v17931_v20, %v17932_v0  ;;  %v17940_v32 = vld [vmem:[#allocation70_spill] sm:$0xff]  ;;  %v17955_v0 = vld [vmem:[#allocation25_spill] sm:$0xff] }
0x10cc   :  { %4947 = vadd.xlane.f32.xlu0 %v14132_v43  ;;  %4941 = vadd.xlane.f32.xlu1 %v14134_v21  ;;  %v4878_v16 = vpop.xlane.xlu0 %4877  ;;  %v14138_v27 = vpop.eup %10514  ;;  %10522 = vpow2.f32 %v4921_v52  ;;  %v17935_v52 = vld [vmem:[#allocation50_spill] sm:$0xff] }
0x10cd   :  { %v4897_v19 = vsub.f32 %v14096_v26, %v4878_v16  ;;  %v17922_v16 = vld [vmem:[#allocation14_spill] sm:$0xff] }
0x10cf   :  { %v4925_v61 = vmul.f32 1.442695, %v4897_v19 }
0x10d0   :  { %4943 = vadd.xlane.f32.xlu0 %v14138_v27  ;;  %v5014_v18 = vpop.permute.xlu0 %5013 }
0x10d1   :  { %9712 = vmatprep.subr.bf16.mxu0 %v5014_v18 }
0x10d2   :  { %9713 = vmatpush3.bf16.msra.mxu0 %v5014_v18  ;;  %v17923_v18 = vld [vmem:[#allocation66_spill] sm:$0xff] }
0x10d3   :  { %9714 = vmatprep.subr.bf16.mxu0 %v5016_v30  ;;  %v14153_v44 = vpop.eup %10516 }
0x10d4   :  { %v14156_v50 = vpop.eup %10518 }
0x10d5   :  { %v14158_v26 = vpop.eup %10520 }
0x10d6   :  { %9715 = vmatpush3.bf16.msra.mxu0 %v5016_v30  ;;  %v14162_v55 = vpop.eup %10522  ;;  %v17924_v30 = vpack.c.bf16 %v17922_v16, %v17923_v18  ;;  %v17946_v18 = vld [vmem:[#allocation76_spill] sm:$0xff] }
0x10dd   :  { %5019 = vrot.lane.b32.xlu1 %v17920_v13, %s10921_s22  ;;  %v17925_v13 = vld [vmem:[#allocation11_spill] sm:$0xff] }
0x10e6   :  { %5017 = vrot.lane.b32.xlu0 %v17921_v17, %s10921_s22  ;;  %v17926_v17 = vld [vmem:[#allocation7_spill] sm:$0xff] }
0x10e7   :  { %v17927_v24 = vpack.c.bf16 %v17925_v13, %v17926_v17  ;;  %v17949_v17 = vld [vmem:[#allocation73_spill] sm:$0xff] }
0x10f7   :  { %v4884_v1 = vpop.xlane.xlu1 %4883 }
0x10f8   :  { %v4900_v62 = vsub.f32 %v14105_v38, %v4884_v1  ;;  %v17934_v1 = vld [vmem:[#allocation36_spill] sm:$0xff] }
0x10f9   :  { %v17936_v19 = vpack.c.bf16 %v17934_v1, %v17935_v52  ;;  %v17958_v52 = vld [vmem:[#allocation3_spill] sm:$0xff] }
0x10fa   :  { %v4931_v51 = vmul.f32 1.442695, %v4900_v62  ;;  %v17938_v62 = vld [vmem:[#allocation48_spill] sm:$0xff] }
0x10fb   :  { %v4880_v22 = vpop.xlane.xlu1 %4879 }
0x10fc   :  { %v4898_v37 = vsub.f32 %v14110_v56, %v4880_v22  ;;  %v17937_v22 = vld [vmem:[#allocation35_spill] sm:$0xff] }
0x10fe   :  { %v4927_v23 = vmul.f32 1.442695, %v4898_v37  ;;  %v17939_v37 = vpack.c.bf16 %v17937_v22, %v17938_v62  ;;  %v17961_v62 = vld [vmem:[#allocation78_spill] sm:$0xff] }
0x1100   :  { %10524 = vpow2.f32 %v4927_v23 }
0x1101   :  { %4949 = vadd.xlane.f32.xlu1 %v14153_v44  ;;  %10526 = vpow2.f32 %v4925_v61  ;;  %v17941_v61 = vld [vmem:[#allocation71_spill] sm:$0xff] }
0x1102   :  { %10528 = vpow2.f32 %v4931_v51  ;;  %v17942_v23 = vpack.c.bf16 %v17940_v32, %v17941_v61  ;;  %v17943_v51 = vld [vmem:[#allocation6_spill] sm:$0xff] }
0x1103   :  { %10530 = vpow2.f32 %v4929_v54  ;;  %v17944_v54 = vld [vmem:[#allocation4_spill] sm:$0xff]  ;;  %v17964_v61 = vld [vmem:[#allocation42_spill] sm:$0xff] }
0x1104   :  { %v17945_v16 = vpack.c.bf16 %v17943_v51, %v17944_v54  ;;  %v17967_v54 = vld [vmem:[#allocation39_spill] sm:$0xff] }
0x1105   :  { %4951 = vadd.xlane.f32.xlu0 %v14158_v26  ;;  %4955 = vadd.xlane.f32.xlu1 %v14156_v50 }
0x1109   :  { %4953 = vadd.xlane.f32.xlu0 %v14162_v55 }
0x110a   :  { %v14165_v38 = vpop.eup %10524 }
0x110b   :  { %4959 = vadd.xlane.f32.xlu1 %v14165_v38  ;;  %v14168_v56 = vpop.eup %10526 }
0x110c   :  { %v14171_v28 = vpop.eup %10528 }
0x110d   :  { %4957 = vadd.xlane.f32.xlu0 %v14168_v56  ;;  %v14174_v2 = vpop.eup %10530 }
0x110f   :  { %4963 = vadd.xlane.f32.xlu1 %v14171_v28 }
0x1111   :  { %4961 = vadd.xlane.f32.xlu0 %v14174_v2 }
0x1120   :  { %3078 = vrot.lane.b32.xlu1 %v17924_v30, %s10921_s22  ;;  %v17947_v30 = vld [vmem:[#allocation34_spill] sm:$0xff] }
0x1121   :  { %v17948_v13 = vpack.c.bf16 %v17946_v18, %v17947_v30  ;;  %v17970_v30 = vld [vmem:[#allocation23_spill] sm:$0xff] }
0x1124   :  { %3100 = vrot.lane.b32.xlu1 %v17927_v24, %s10920_s21  ;;  %v17950_v24 = vld [vmem:[#allocation30_spill] sm:$0xff] }
0x1125   :  { %v17951_v9 = vpack.c.bf16 %v17949_v17, %v17950_v24  ;;  %v17973_v24 = vld [vmem:[#allocation19_spill] sm:$0xff] }
0x1127   :  { %3076 = vrot.lane.b32.xlu0 %v17930_v48, %s10921_s22  ;;  %v17953_v48 = vld [vmem:[#allocation37_spill] sm:$0xff] }
0x1128   :  { %3102 = vrot.lane.b32.xlu1 %v17933_v34, %s10920_s21  ;;  %v17954_v20 = vpack.c.bf16 %v17952_v29, %v17953_v48  ;;  %v17956_v34 = vld [vmem:[#allocation38_spill] sm:$0xff]  ;;  %v17976_v48 = vld [vmem:[#allocation28_spill] sm:$0xff] }
0x1129   :  { %v17957_v1 = vpack.c.bf16 %v17955_v0, %v17956_v34  ;;  %v17979_v34 = vld [vmem:[#allocation5_spill] sm:$0xff] }
0x112b   :  { %3124 = vrot.lane.b32.xlu0 %v17936_v19, %s10919_s4  ;;  %v17959_v19 = vld [vmem:[#allocation9_spill] sm:$0xff] }
0x112c   :  { %3126 = vrot.lane.b32.xlu1 %v17939_v37, %s10919_s4  ;;  %v17960_v22 = vpack.c.bf16 %v17958_v52, %v17959_v19  ;;  %v17962_v37 = vld [vmem:[#allocation12_spill] sm:$0xff] }
0x112d   :  { %v17963_v32 = vpack.c.bf16 %v17961_v62, %v17962_v37  ;;  %v17983_v62 = vld [vmem:[#allocation84_spill] sm:$0xff] }
0x112f   :  { %3080 = vrot.lane.b32.xlu0 %v17942_v23, %s10921_s22  ;;  %v17965_v23 = vld [vmem:[#allocation40_spill] sm:$0xff] }
0x1130   :  { %3082 = vrot.lane.b32.xlu1 %v17945_v16, %s10921_s22  ;;  %v17966_v51 = vpack.c.bf16 %v17964_v61, %v17965_v23  ;;  %v17968_v16 = vld [vmem:[#allocation75_spill] sm:$0xff]  ;;  %v17986_v61 = vld [vmem:[#allocation41_spill] sm:$0xff] }
0x1131   :  { %v17969_v18 = vpack.c.bf16 %v17967_v54, %v17968_v16  ;;  %v17988_v54 = vld [vmem:[#allocation17_spill] sm:$0xff]  ;;  %v17989_v16 = vld [vmem:[#allocation31_spill] sm:$0xff] }
0x1133   :  { %3104 = vrot.lane.b32.xlu0 %v17948_v13, %s10920_s21  ;;  %v17971_v13 = vld [vmem:[#allocation26_spill] sm:$0xff] }
0x1134   :  { %3106 = vrot.lane.b32.xlu1 %v17951_v9, %s10920_s21  ;;  %v17972_v17 = vpack.c.bf16 %v17970_v30, %v17971_v13  ;;  %v17974_v9 = vld [vmem:[#allocation22_spill] sm:$0xff]  ;;  %v17991_v30 = vld [vmem:[#allocation15_spill] sm:$0xff] }
0x1135   :  { %v17975_v29 = vpack.c.bf16 %v17973_v24, %v17974_v9  ;;  %v17992_v13 = vld [vmem:[#allocation27_spill] sm:$0xff]  ;;  %v17994_v9 = vld [vmem:[#allocation102_spill] sm:$0xff] }
0x1137   :  { %3128 = vrot.lane.b32.xlu0 %v17954_v20, %s10919_s4  ;;  %v17977_v20 = vld [vmem:[#allocation72_spill] sm:$0xff] }
0x1138   :  { %3130 = vrot.lane.b32.xlu1 %v17957_v1, %s10919_s4  ;;  %v17978_v0 = vpack.c.bf16 %v17976_v48, %v17977_v20  ;;  %v17980_v1 = vld [vmem:[#allocation13_spill] sm:$0xff] }
0x1139   :  { %v17981_v52 = vpack.c.bf16 %v17979_v34, %v17980_v1  ;;  %v17997_v20 = vld [vmem:[#allocation101_spill] sm:$0xff] }
0x113b   :  { %3084 = vrot.lane.b32.xlu0 %v17960_v22, %s10921_s22  ;;  %v17982_v22 = vld [vmem:[#allocation86_spill] sm:$0xff] }
0x113c   :  { %3086 = vrot.lane.b32.xlu1 %v17963_v32, %s10921_s22  ;;  %v17984_v37 = vpack.c.bf16 %v17982_v22, %v17983_v62  ;;  %v17985_v32 = vld [vmem:[#allocation85_spill] sm:$0xff] }
0x113d   :  { %v17987_v23 = vpack.c.bf16 %v17985_v32, %v17986_v61 }
0x113f   :  { %3108 = vrot.lane.b32.xlu0 %v17966_v51, %s10920_s21 }
0x1140   :  { %3110 = vrot.lane.b32.xlu1 %v17969_v18, %s10920_s21  ;;  %v17990_v18 = vpack.c.bf16 %v17988_v54, %v17989_v16 }
0x1143   :  { %3132 = vrot.lane.b32.xlu0 %v17972_v17, %s10919_s4  ;;  %v17993_v17 = vpack.c.bf16 %v17991_v30, %v17992_v13 }
0x1144   :  { %3134 = vrot.lane.b32.xlu1 %v17975_v29, %s10919_s4  ;;  %v17995_v29 = vld [vmem:[#allocation53_spill] sm:$0xff] }
0x1145   :  { %v17996_v48 = vpack.c.bf16 %v17994_v9, %v17995_v29 }
0x1147   :  { %3088 = vrot.lane.b32.xlu0 %v17978_v0, %s10921_s22  ;;  %v17998_v0 = vld [vmem:[#allocation47_spill] sm:$0xff] }
0x1148   :  { %3090 = vrot.lane.b32.xlu1 %v17981_v52, %s10921_s22  ;;  %v17999_v34 = vpack.c.bf16 %v17997_v20, %v17998_v0  ;;  %v9907_v20 = vld [vmem:[%s17148_s5 + $0x38] sm:$0xff]  }
0x1149   :  { %v4938_v19 = vpop.xlane.xlu1 %4937 }
0x114b   :  { %3112 = vrot.lane.b32.xlu0 %v17984_v37, %s10920_s21 }
0x114c   :  { %3114 = vrot.lane.b32.xlu1 %v17987_v23, %s10920_s21 }
0x114d   :  { %v4934_v51 = vpop.xlane.xlu1 %4933 }
0x114e   :  { %10532 = vrcp.f32 %v4934_v51 }
0x114f   :  { %3136 = vrot.lane.b32.xlu0 %v17990_v18, %s10919_s4 }
0x1150   :  { %3138 = vrot.lane.b32.xlu1 %v17993_v17, %s10919_s4 }
0x1151   :  { %v4940_v24 = vpop.xlane.xlu1 %4939 }
0x1153   :  { %5142 = vrot.lane.b32.xlu0 %v17996_v48, %s10921_s22 }
0x1154   :  { %5144 = vrot.lane.b32.xlu1 %v17999_v34, %s10921_s22 }
0x1155   :  { %v4936_v1 = vpop.xlane.xlu1 %4935  ;;  %v4946_v52 = vpop.xlane.xlu0 %4945 }
0x1156   :  { %10534 = vrcp.f32 %v4936_v1 }
0x1157   :  { %10536 = vrcp.f32 %v4940_v24  ;;  %5166 = vrot.lane.b32.xlu0 %v4636_v12, %s10920_s21 }
0x1158   :  { %5168 = vrot.lane.b32.xlu1 %v4637_v47, %s10920_s21  ;;  %10538 = vrcp.f32 %v4938_v19  ;;  %v10533_v32 = vpop.eup %10532  ;;  %v9900_v19 = vld [vmem:[%s17148_s5] sm:$0xff]  }
0x1159   :  { %v4942_v22 = vpop.xlane.xlu1 %4941  ;;  %v4948_v62 = vpop.xlane.xlu0 %4947  ;;  %v4981_v39 = vmul.f32 %v10533_v32, %v14120_v57 }
0x115a   :  { %10540 = vrcp.f32 %v4942_v22 }
0x115d   :  { %v4944_v37 = vpop.xlane.xlu0 %4943  ;;  %v5020_v58 = vpop.permute.xlu1 %5019 }
0x115e   :  { %10542 = vrcp.f32 %v4944_v37 }
0x115f   :  { %10544 = vrcp.f32 %v4948_v62 }
0x1160   :  { %v10535_v61 = vpop.eup %10534  ;;  %10546 = vrcp.f32 %v4946_v52 }
0x1161   :  { %v10537_v23 = vpop.eup %10536  ;;  %v5018_v51 = vpop.permute.xlu0 %5017  ;;  %v4982_v14 = vmul.f32 %v10535_v61, %v14126_v49  ;;  %v9901_v49 = vld [vmem:[%s17148_s5 + $0x8] sm:$0xff]  }
0x1162   :  { %9716 = vmatprep.subr.bf16.mxu0 %v5018_v51  ;;  %v10539_v12 = vpop.eup %10538  ;;  %v4984_v47 = vmul.f32 %v10537_v23, %v14123_v63 }
0x1163   :  { %9717 = vmatpush3.bf16.msra.mxu0 %v5018_v51  ;;  %v4997_v35 = vpack.c.bf16 %v4982_v14, %v4981_v39  ;;  %v4983_v16 = vmul.f32 %v10539_v12, %v14115_v6  ;;  %v9902_v6 = vld [vmem:[%s17148_s5 + $0x10] sm:$0xff]  }
0x1164   :  { %9718 = vmatprep.subr.bf16.mxu0 %v5020_v58  ;;  %v10541_v54 = vpop.eup %10540 }
0x1165   :  { %9720 = vmatprep.mubr.bf16.mxu0 %v4997_v35  ;;  %v4998_v18 = vpack.c.bf16 %v4984_v47, %v4983_v16  ;;  %v4985_v63 = vmul.f32 %v10541_v54, %v14134_v21  ;;  %v9903_v21 = vld [vmem:[%s17148_s5 + $0x18] sm:$0xff]  }
0x1167   :  { %9719 = vmatpush3.bf16.msra.mxu0 %v5020_v58 }
0x1168   :  { %v10543_v57 = vpop.eup %10542  ;;  %9736 = vmatprep.subr.bf16.mxu0 %v9900_v19 }
0x1169   :  { %v10545_v30 = vpop.eup %10544  ;;  %v4986_v13 = vmul.f32 %v10543_v57, %v14138_v27  ;;  %v9906_v27 = vld [vmem:[%s17148_s5 + $0x30] sm:$0xff]  }
0x116a   :  { %9721 = vmatmul.mubr.bf16.vlgmr.msra.gmra.mrb[144].mxu0 %v4998_v18  ;;  %v10547_v17 = vpop.eup %10546  ;;  %v4988_v9 = vmul.f32 %v10545_v30, %v14132_v43  ;;  %v9904_v43 = vld [vmem:[%s17148_s5 + $0x20] sm:$0xff]  }
0x116b   :  { %v4999_v24 = vpack.c.bf16 %v4986_v13, %v4985_v63  ;;  %9737 = vmatpush3.bf16.msra.mxu0 %v9900_v19  ;;  %v4987_v29 = vmul.f32 %v10547_v17, %v14128_v11  ;;  %v9905_v11 = vld [vmem:[%s17148_s5 + $0x28] sm:$0xff]   ;;  %v18000_v13 = vld [vmem:[#allocation81_spill] sm:$0xff] }
0x116c   :  { %9738 = vmatprep.subr.bf16.mxu0 %v9901_v49  ;;  %v18001_v17 = vld [vmem:[#allocation61_spill] sm:$0xff] }
0x116d   :  { %9724 = vmatprep.mubr.bf16.mxu0 %v4999_v24  ;;  %v5000_v48 = vpack.c.bf16 %v4988_v9, %v4987_v29  ;;  %v18002_v24 = vpack.c.bf16 %v18000_v13, %v18001_v17 }
0x116f   :  { %9739 = vmatpush3.bf16.msra.mxu0 %v9901_v49 }
0x1170   :  { %9740 = vmatprep.subr.bf16.mxu0 %v9902_v6 }
0x1172   :  { %9725 = vmatmul.mubr.bf16.gmra.mrb[148].mxu0 %v5000_v48 }
0x1173   :  { %9741 = vmatpush3.bf16.msra.mxu0 %v9902_v6 }
0x1174   :  { %9742 = vmatprep.subr.bf16.mxu0 %v9903_v21 }
0x1177   :  { %9743 = vmatpush3.bf16.msra.mxu0 %v9903_v21 }
0x1178   :  { %9744 = vmatprep.subr.bf16.mxu0 %v9904_v43 }
0x117b   :  { %9745 = vmatpush3.bf16.msra.mxu0 %v9904_v43 }
0x117c   :  { %9746 = vmatprep.subr.bf16.mxu0 %v9905_v11 }
0x117f   :  { %9747 = vmatpush3.bf16.msra.mxu0 %v9905_v11 }
0x1180   :  { %9748 = vmatprep.subr.bf16.mxu0 %v9906_v27 }
0x1183   :  { %9749 = vmatpush3.bf16.msra.mxu0 %v9906_v27 }
0x1184   :  { %9750 = vmatprep.subr.bf16.mxu0 %v9907_v20 }
0x1187   :  { %9751 = vmatpush3.bf16.msra.mxu0 %v9907_v20 }
0x118e   :  { %v4950_v0 = vpop.xlane.xlu1 %4949 }
0x118f   :  { %10548 = vrcp.f32 %v4950_v0 }
0x1192   :  { %v4956_v34 = vpop.xlane.xlu1 %4955  ;;  %v4952_v1 = vpop.xlane.xlu0 %4951 }
0x1193   :  { %10550 = vrcp.f32 %v4952_v1  ;;  %v18005_v1 = vld [vmem:[#allocation59_spill] sm:$0xff] }
0x1194   :  { %10552 = vrcp.f32 %v4956_v34  ;;  %v18004_v34 = vld [vmem:[#allocation80_spill] sm:$0xff] }
0x1196   :  { %v4954_v52 = vpop.xlane.xlu0 %4953 }
0x1197   :  { %10554 = vrcp.f32 %v4954_v52  ;;  %v18006_v52 = vpack.c.bf16 %v18004_v34, %v18005_v1 }
0x1198   :  { %v4960_v22 = vpop.xlane.xlu1 %4959 }
0x1199   :  { %10556 = vrcp.f32 %v4960_v22  ;;  %v10549_v37 = vpop.eup %10548 }
0x119a   :  { %v4958_v62 = vpop.xlane.xlu0 %4957  ;;  %v4989_v39 = vmul.f32 %v10549_v37, %v14153_v44 }
0x119b   :  { %10558 = vrcp.f32 %v4958_v62  ;;  %v18008_v62 = vld [vmem:[#allocation63_spill] sm:$0xff] }
0x119c   :  { %v4964_v32 = vpop.xlane.xlu1 %4963 }
0x119d   :  { %10560 = vrcp.f32 %v4964_v32  ;;  %v10551_v61 = vpop.eup %10550 }
0x119e   :  { %v4962_v23 = vpop.xlane.xlu0 %4961  ;;  %v10553_v51 = vpop.eup %10552  ;;  %v4990_v14 = vmul.f32 %v10551_v61, %v14158_v26 }
0x119f   :  { %10562 = vrcp.f32 %v4962_v23  ;;  %v4992_v54 = vmul.f32 %v10553_v51, %v14156_v50 }
0x11a0   :  { %v3079_v12 = vpop.permute.xlu1 %3078  ;;  %v5001_v35 = vpack.c.bf16 %v4990_v14, %v4989_v39 }
0x11a1   :  { %v10555_v58 = vpop.eup %10554  ;;  %v3145_v22 = vsel %vm17892_vm0, %v18006_v52, %v3079_v12  ;;  %v18011_v12 = vld [vmem:[#allocation60_spill] sm:$0xff] }
0x11a2   :  { %v3077_v47 = vpop.permute.xlu0 %3076  ;;  %v4991_v19 = vmul.f32 %v10555_v58, %v14162_v55  ;;  %9728 = vmatprep.mubr.bf16.mxu0 %v5001_v35 }
0x11a3   :  { %v10557_v16 = vpop.eup %10556  ;;  %v3142_v9 = vsel %vm18003_vm11, %v18002_v24, %v3077_v47  ;;  %v18012_v47 = vld [vmem:[#allocation79_spill] sm:$0xff]  ;;  %vm18092_vm11 = vmmov %vm17892_vm0 }
0x11a4   :  { %v3101_v57 = vpop.permute.xlu1 %3100  ;;  %v5002_v18 = vpack.c.bf16 %v4992_v54, %v4991_v19  ;;  %v4994_v44 = vmul.f32 %v10557_v16, %v14165_v38  ;;  %v18013_v19 = vpack.c.bf16 %v18011_v12, %v18012_v47 }
0x11a5   :  { %v10559_v49 = vpop.eup %10558 }
0x11a6   :  { %9729 = vmatmul.mubr.bf16.gmra.mrb[152].mxu0 %v5002_v18  ;;  %v3125_v30 = vpop.permute.xlu0 %3124  ;;  %v4993_v63 = vmul.f32 %v10559_v49, %v14168_v56  ;;  %v3166_v56 = vsel %vm3164_vm6, %v3142_v9, %v3101_v57  ;;  %v18015_v18 = vld [vmem:[#allocation77_spill] sm:$0xff] }
0x11a7   :  { %v10561_v26 = vpop.eup %10560  ;;  %v3183_v27 = vsel %vm3181_vm14, %v3166_v56, %v3125_v30  ;;  %v18016_v49 = vld [vmem:[#allocation65_spill] sm:$0xff] }
0x11a8   :  { %v3103_v55 = vpop.permute.xlu1 %3102  ;;  %v5003_v50 = vpack.c.bf16 %v4994_v44, %v4993_v63  ;;  %v4996_v21 = vmul.f32 %v10561_v26, %v14171_v28  ;;  %v18007_v28 = vld [vmem:[#allocation83_spill] sm:$0xff]  ;;  %v18017_v30 = vpack.c.bf16 %v18015_v18, %v18016_v49  ;;  %v18034_v18 = vld [vmem:[#allocation106_spill] sm:$0xff]  ;;  %v18035_v49 = vld [vmem:[#allocation104_spill] sm:$0xff] }
0x11a9   :  { %v10563_v6 = vpop.eup %10562  ;;  %v18009_v37 = vpack.c.bf16 %v18007_v28, %v18008_v62  ;;  %v18028_v28 = vld [vmem:[#allocation64_spill] sm:$0xff] }
0x11aa   :  { %9732 = vmatprep.mubr.bf16.mxu0 %v5003_v50  ;;  %v3081_v29 = vpop.permute.xlu0 %3080  ;;  %v4995_v48 = vmul.f32 %v10563_v6, %v14174_v2  ;;  %v3168_v2 = vsel %vm3164_vm6, %v3145_v22, %v3103_v55  ;;  %v18019_v55 = vld [vmem:[#allocation62_spill] sm:$0xff] }
0x11ab   :  { %v3148_v32 = vsel %vm18010_vm13, %v18009_v37, %v3081_v29  ;;  %v18020_v50 = vld [vmem:[#allocation82_spill] sm:$0xff] }
0x11ac   :  { %v3127_v38 = vpop.permute.xlu1 %3126  ;;  %v5004_v43 = vpack.c.bf16 %v4996_v21, %v4995_v48  ;;  %v18021_v6 = vpack.c.bf16 %v18019_v55, %v18020_v50  ;;  %v18040_v55 = vld [vmem:[#allocation110_spill] sm:$0xff]  ;;  %v18041_v50 = vld [vmem:[#allocation108_spill] sm:$0xff] }
0x11ad   :  { %v3186_v23 = vsel %vm3181_vm14, %v3168_v2, %v3127_v38  ;;  %v18027_v2 = vld [vmem:[#allocation10_spill] sm:$0xff] }
0x11ae   :  { %9733 = vmatmul.mubr.bf16.gmra.mrb[156].mxu0 %v5004_v43  ;;  %v3105_v11 = vpop.permute.xlu0 %3104  ;;  %v18029_v62 = vpack.c.bf16 %v18027_v2, %v18028_v28 }
0x11af   :  { %9752 = vmatprep.mubr.bf16.mxu0 %v3183_v27  ;;  %v3170_v51 = vsel %vm3164_vm6, %v3148_v32, %v3105_v11  ;;  %v18023_v11 = vld [vmem:[#allocation8_spill] sm:$0xff]  ;;  %v18024_v27 = vld [vmem:[#allocation67_spill] sm:$0xff] }
0x11b0   :  { %v3083_v20 = vpop.permute.xlu1 %3082 }
0x11b1   :  { %v3151_v54 = vsel %vm18014_vm12, %v18013_v19, %v3083_v20  ;;  %v18025_v20 = vpack.c.bf16 %v18023_v11, %v18024_v27  ;;  %v18031_v19 = vld [vmem:[#allocation105_spill] sm:$0xff] }
0x11b2   :  { %v3129_v0 = vpop.permute.xlu0 %3128 }
0x11b3   :  { %v3189_v14 = vsel %vm3181_vm14, %v3170_v51, %v3129_v0 }
0x11b4   :  { %v3107_v61 = vpop.permute.xlu1 %3106 }
0x11b5   :  { %v3172_v16 = vsel %vm3164_vm6, %v3151_v54, %v3107_v61  ;;  %v18032_v54 = vld [vmem:[#allocation103_spill] sm:$0xff] }
0x11b6   :  { %9753 = vmatmul.mubr.bf16.vlgmr.msra.gmra.mrb[160].mxu0 %v3186_v23  ;;  %v3085_v39 = vpop.permute.xlu0 %3084 }
0x11b7   :  { %9756 = vmatprep.mubr.bf16.mxu0 %v3189_v14  ;;  %v3154_v63 = vsel %vm18018_vm8, %v18017_v30, %v3085_v39  ;;  %v18036_v30 = vpack.c.bf16 %v18034_v18, %v18035_v49 }
0x11b8   :  { %v3131_v58 = vpop.permute.xlu1 %3130 }
0x11b9   :  { %v3192_v44 = vsel %vm3181_vm14, %v3172_v16, %v3131_v58  ;;  %v18033_v16 = vpack.c.bf16 %v18031_v19, %v18032_v54 }
0x11ba   :  { %v3109_v35 = vpop.permute.xlu0 %3108 }
0x11bb   :  { %v3174_v26 = vsel %vm3164_vm6, %v3154_v63, %v3109_v35 }
0x11bc   :  { %v3087_v57 = vpop.permute.xlu1 %3086 }
0x11bd   :  { %v3157_v29 = vsel %vm18022_vm15, %v18021_v6, %v3087_v57  ;;  %v18042_v6 = vpack.c.bf16 %v18040_v55, %v18041_v50  ;;  %v10889_v50 = vld [vmem:[%s17143_s0 + $0x20] sm:$0xff] }
0x11be   :  { %9757 = vmatmul.mubr.bf16.gmra.mrb[164].mxu0 %v3192_v44  ;;  %v3133_v13 = vpop.permute.xlu0 %3132 }
0x11bf   :  { %v3195_v17 = vsel %vm3181_vm14, %v3174_v26, %v3133_v13 }
0x11c0   :  { %v3111_v24 = vpop.permute.xlu1 %3110  ;;  %9760 = vmatprep.mubr.bf16.mxu0 %v3195_v17  ;;  %v18037_v17 = vld [vmem:[#allocation109_spill] sm:$0xff] }
0x11c1   :  { %v3176_v48 = vsel %vm3164_vm6, %v3157_v29, %v3111_v24  ;;  %v18038_v24 = vld [vmem:[#allocation107_spill] sm:$0xff] }
0x11c2   :  { %v3089_v9 = vpop.permute.xlu0 %3088 }
0x11c3   :  { %v3160_v0 = vsel %vm18026_vm10, %v18025_v20, %v3089_v9  ;;  %v18039_v9 = vpack.c.bf16 %v18037_v17, %v18038_v24  ;;  %v18055_v17 = vld [vmem:[#allocation24_spill] sm:$0xff] }
0x11c4   :  { %v3135_v21 = vpop.permute.xlu1 %3134 }
0x11c5   :  { %v3198_v56 = vsel %vm3181_vm14, %v3176_v48, %v3135_v21  ;;  %v18043_v48 = vld [vmem:[#allocation113_spill] sm:$0xff] }
0x11c6   :  { %9761 = vmatmul.mubr.bf16.gmra.mrb[168].mxu0 %v3198_v56  ;;  %v3113_v38 = vpop.permute.xlu0 %3112  ;;  %v18045_v46 = vpack.c.bf16 %v18043_v48, %v18044_v53 }
0x11c7   :  { %v3178_v34 = vsel %vm3164_vm6, %v3160_v0, %v3113_v38 }
0x11c8   :  { %v3091_v43 = vpop.permute.xlu1 %3090 }
0x11c9   :  { %v3163_v37 = vsel %vm18030_vm1, %v18029_v62, %v3091_v43 }
0x11ca   :  { %v3137_v1 = vpop.permute.xlu0 %3136 }
0x11cb   :  { %v3201_v52 = vsel %vm3181_vm14, %v3178_v34, %v3137_v1 }
0x11cc   :  { %v3115_v22 = vpop.permute.xlu1 %3114  ;;  %9764 = vmatprep.mubr.bf16.mxu0 %v3201_v52 }
0x11cd   :  { %v3180_v32 = vsel %vm3164_vm6, %v3163_v37, %v3115_v22 }
0x11d0   :  { %v3139_v61 = vpop.permute.xlu1 %3138 }
0x11d1   :  { %v3204_v23 = vsel %vm3181_vm14, %v3180_v32, %v3139_v61  ;;  %v10884_v32 = vld [vmem:[%s17143_s0] sm:$0xff] }
0x11d2   :  { %9765 = vmatmul.mubr.bf16.gmra.mrb[172].mxu0 %v3204_v23 }
0x123d   :  { %v9722_v51 = vpop.f32.mrb[144].mxu0 }
0x123e   :  { %v5063_v39 = vpop.f32.mrb[145].mxu0 }
0x123f   :  { %v9723_v14 = vpop.f32.mrb[146].mxu0 }
0x1240   :  { %v5127_v58 = vpack.c.bf16 %v9723_v14, %v9722_v51  ;;  %v5066_v35 = vpop.f32.mrb[147].mxu0  ;;  %v5143_v14 = vpop.permute.xlu0 %5142 }
0x1241   :  { %v5126_v12 = vpack.c.bf16 %v5066_v35, %v5063_v39  ;;  %v5145_v39 = vpop.permute.xlu1 %5144 }
0x1242   :  { %5192 = vrot.lane.b32.xlu1 %v5127_v58, %s10919_s4  ;;  %v10885_v58 = vld [vmem:[%s17143_s0 + $0x10] sm:$0xff] }
0x1243   :  { %5190 = vrot.lane.b32.xlu0 %v5126_v12, %s10919_s4 }
0x1245   :  { %v9726_v47 = vpop.f32.mrb[148].mxu0 }
0x1246   :  { %5148 = vrot.lane.b32.xlu1 %v18033_v16, %s10921_s22  ;;  %v5079_v57 = vpop.f32.mrb[149].mxu0  ;;  %v5169_v16 = vpop.permute.xlu1 %5168 }
0x1247   :  { %5146 = vrot.lane.b32.xlu0 %v18036_v30, %s10921_s22  ;;  %v9727_v63 = vpop.f32.mrb[150].mxu0 }
0x1248   :  { %v5129_v44 = vpack.c.bf16 %v9727_v63, %v9726_v47  ;;  %v5082_v26 = vpop.f32.mrb[151].mxu0  ;;  %v10886_v47 = vld [vmem:[%s17143_s0 + $0x8] sm:$0xff] }
0x1249   :  { %v5128_v13 = vpack.c.bf16 %v5082_v26, %v5079_v57  ;;  %v10887_v57 = vld [vmem:[%s17143_s0 + $0x18] sm:$0xff]  ;;  %v10888_v63 = vld [vmem:[%s17143_s0 + $0x28] sm:$0xff]  ;;  %v5167_v26 = vpop.permute.xlu0 %5166 }
0x124a   :  { %5172 = vrot.lane.b32.xlu1 %v4639_v60, %s10920_s21 }
0x124b   :  { %5170 = vrot.lane.b32.xlu0 %v4638_v45, %s10920_s21 }
0x124e   :  { %5196 = vrot.lane.b32.xlu1 %v5129_v44, %s10919_s4 }
0x124f   :  { %5194 = vrot.lane.b32.xlu0 %v5128_v13, %s10919_s4  ;;  %v18054_v13 = vld [vmem:[#allocation88_spill] sm:$0xff] }
0x1250   :  { %v18056_v24 = vpack.c.bf16 %v18054_v13, %v18055_v17  ;;  %v10897_v17 = vld [vmem:[%s17143_s0 + $0x60] sm:$0xff] }
0x1252   :  { %5152 = vrot.lane.b32.xlu1 %v18039_v9, %s10921_s22  ;;  %v5208_v9 = vsel %vm18057_vm2, %v18056_v24, %v5143_v14  ;;  %v18071_v14 = vld [vmem:[#allocation90_spill] sm:$0xff] }
0x1253   :  { %5150 = vrot.lane.b32.xlu0 %v18042_v6, %s10921_s22 }
0x1256   :  { %5176 = vrot.lane.b32.xlu1 %v4641_v41, %s10920_s21 }
0x1257   :  { %5174 = vrot.lane.b32.xlu0 %v4640_v25, %s10920_s21  ;;  %v18048_v25 = vpack.c.bf16 %v18046_v4, %v18047_v7 }
0x1279   :  { %v9730_v15 = vpop.f32.mrb[152].mxu0 }
0x127a   :  { %v5095_v33 = vpop.f32.mrb[153].mxu0 }
0x127b   :  { %v9731_v3 = vpop.f32.mrb[154].mxu0 }
0x127c   :  { %v5131_v60 = vpack.c.bf16 %v9731_v3, %v9730_v15  ;;  %v5098_v5 = vpop.f32.mrb[155].mxu0  ;;  %v10890_v15 = vld [vmem:[%s17143_s0 + $0x38] sm:$0xff] }
0x127d   :  { %v5130_v45 = vpack.c.bf16 %v5098_v5, %v5095_v33  ;;  %v5231_v5 = vsel %vm3164_vm6, %v5208_v9, %v5167_v26  ;;  %v10898_v9 = vld [vmem:[%s17143_s0 + $0x78] sm:$0xff] }
0x127e   :  { %5200 = vrot.lane.b32.xlu1 %v5131_v60, %s10919_s4 }
0x127f   :  { %5198 = vrot.lane.b32.xlu0 %v5130_v45, %s10919_s4  ;;  %v18060_v45 = vld [vmem:[#allocation87_spill] sm:$0xff] }
0x1281   :  { %v9734_v29 = vpop.f32.mrb[156].mxu0 }
0x1282   :  { %5156 = vrot.lane.b32.xlu1 %v18045_v46, %s10921_s22  ;;  %v5111_v41 = vpop.f32.mrb[157].mxu0 }
0x1283   :  { %5154 = vrot.lane.b32.xlu0 %v18048_v25, %s10921_s22  ;;  %v9735_v21 = vpop.f32.mrb[158].mxu0  ;;  %v10891_v25 = vld [vmem:[%s17143_s0 + $0x30] sm:$0xff] }
0x1284   :  { %v5133_v56 = vpack.c.bf16 %v9735_v21, %v9734_v29  ;;  %v5114_v38 = vpop.f32.mrb[159].mxu0  ;;  %v18061_v29 = vld [vmem:[#allocation20_spill] sm:$0xff] }
0x1285   :  { %v5132_v43 = vpack.c.bf16 %v5114_v38, %v5111_v41  ;;  %v18062_v48 = vpack.c.bf16 %v18060_v45, %v18061_v29  ;;  %v18081_v45 = vld [vmem:[#allocation96_spill] sm:$0xff]  ;;  %v18082_v29 = vld [vmem:[#allocation94_spill] sm:$0xff] }
0x1286   :  { %5180 = vrot.lane.b32.xlu1 %v4643_v59, %s10920_s21 }
0x1287   :  { %5178 = vrot.lane.b32.xlu0 %v4642_v31, %s10920_s21  ;;  %v5211_v53 = vsel %vm18063_vm3, %v18062_v48, %v5145_v39  ;;  %v18070_v39 = vld [vmem:[#allocation92_spill] sm:$0xff]  ;;  %v18083_v48 = vpack.c.bf16 %v18081_v45, %v18082_v29  ;;  %v10901_v29 = vld [vmem:[%s17143_s0 + $0x88] sm:$0xff] }
0x1288   :  { %v5233_v41 = vsel %vm3164_vm6, %v5211_v53, %v5169_v16  ;;  %v18075_v16 = vld [vmem:[#allocation89_spill] sm:$0xff] }
0x1289   :  { %v9754_v11 = vpop.f32.mrb[160].mxu0 }
0x128a   :  { %5204 = vrot.lane.b32.xlu1 %v5133_v56, %s10919_s4  ;;  %v5375_v27 = vpop.f32.mrb[161].mxu0  ;;  %v5384_v37 = vadd.f32 %v9754_v11, %v14438_v8 }
0x128b   :  { %5202 = vrot.lane.b32.xlu0 %v5132_v43, %s10919_s4  ;;  %v9755_v20 = vpop.f32.mrb[162].mxu0  ;;  %v5376_v36 = vadd.f32 %v14438_v8, %v5375_v27  ;;  %v10892_v43 = vld [vmem:[%s17143_s0 + $0x48] sm:$0xff] }
0x128c   :  { %v5378_v0 = vpop.f32.mrb[163].mxu0  ;;  %v14458_v35 = vadd.f32 %v10885_v58, %v5384_v37  ;;  %v5387_v12 = vadd.f32 %v9755_v20, %v14438_v8  ;;  %v18072_v58 = vpack.c.bf16 %v18070_v39, %v18071_v14  ;;  %v18094_v39 = vld [vmem:[#allocation97_spill] sm:$0xff] }
0x128d   :  { %v14451_v61 = vadd.f32 %v10884_v32, %v5376_v36  ;;  %v5379_v23 = vadd.f32 %v14438_v8, %v5378_v0 }
0x128e   :  { %18050 = vst [vmem:[#allocation55_spill] sm:$0xff] %v14458_v35  ;;  %v14472_v18 = vadd.f32 %v10887_v57, %v5387_v12 }
0x128f   :  { %18049 = vst [vmem:[#allocation49_spill] sm:$0xff] %v14451_v61  ;;  %v14464_v19 = vadd.f32 %v10886_v47, %v5379_v23  ;;  %v10896_v23 = vld [vmem:[%s17143_s0 + $0x68] sm:$0xff] }
0x1290   :  { %18052 = vst [vmem:[#allocation56_spill] sm:$0xff] %v14472_v18 }
0x1291   :  { %v9758_v34 = vpop.f32.mrb[164].mxu0  ;;  %18051 = vst [vmem:[#allocation51_spill] sm:$0xff] %v14464_v19 }
0x1292   :  { %v5391_v1 = vpop.f32.mrb[165].mxu0  ;;  %v5400_v55 = vadd.f32 %v9758_v34, %v14438_v8  ;;  %v10893_v34 = vld [vmem:[%s17143_s0 + $0x40] sm:$0xff] }
0x1293   :  { %v9759_v52 = vpop.f32.mrb[166].mxu0  ;;  %v5392_v49 = vadd.f32 %v14438_v8, %v5391_v1 }
0x1294   :  { %v5394_v22 = vpop.f32.mrb[167].mxu0  ;;  %v5403_v30 = vadd.f32 %v9759_v52, %v14438_v8  ;;  %v14512_v21 = vadd.f32 %v10891_v25, %v5400_v55  ;;  %v10894_v52 = vld [vmem:[%s17143_s0 + $0x58] sm:$0xff] }
0x1295   :  { %v5395_v54 = vadd.f32 %v14438_v8, %v5394_v22  ;;  %v14491_v6 = vadd.f32 %v10889_v50, %v5392_v49 }
0x1296   :  { %v14496_v33 = vadd.f32 %v10890_v15, %v5403_v30  ;;  %18064 = vst [vmem:[#allocation29_spill] sm:$0xff] %v14512_v21 }
0x1297   :  { %v14479_v44 = vadd.f32 %v10888_v63, %v5395_v54  ;;  %18058 = vst [vmem:[#allocation58_spill] sm:$0xff] %v14491_v6  ;;  %v18074_v54 = vld [vmem:[#allocation91_spill] sm:$0xff] }
0x1298   :  { %18059 = vst [vmem:[#allocation33_spill] sm:$0xff] %v14496_v33  ;;  %v18076_v57 = vpack.c.bf16 %v18074_v54, %v18075_v16 }
0x1299   :  { %v14433_v2 = vpop.f32.mrb[168].mxu0  ;;  %18053 = vst [vmem:[#allocation57_spill] sm:$0xff] %v14479_v44 }
0x129a   :  { %v5407_v10 = vpop.f32.mrb[169].mxu0  ;;  %v5416_v0 = vadd.f32 %v14433_v2, %v14438_v8  ;;  %v10895_v2 = vld [vmem:[%s17143_s0 + $0x50] sm:$0xff] }
0x129b   :  { %v9763_v40 = vpop.f32.mrb[170].mxu0  ;;  %v5408_v56 = vadd.f32 %v14438_v8, %v5407_v10 }
0x129c   :  { %v5410_v59 = vpop.f32.mrb[171].mxu0  ;;  %v5419_v38 = vadd.f32 %v9763_v40, %v14438_v8  ;;  %v14541_v36 = vadd.f32 %v10895_v2, %v5416_v0 }
0x129d   :  { %v5411_v3 = vadd.f32 %v14438_v8, %v5410_v59  ;;  %v14528_v1 = vadd.f32 %v10893_v34, %v5408_v56 }
0x129e   :  { %v14533_v22 = vadd.f32 %v10894_v52, %v5419_v38  ;;  %18068 = vst [vmem:[#allocation44_spill] sm:$0xff] %v14541_v36 }
0x129f   :  { %v14519_v11 = vadd.f32 %v10892_v43, %v5411_v3  ;;  %18066 = vst [vmem:[#allocation18_spill] sm:$0xff] %v14528_v1 }
0x12a0   :  { %18067 = vst [vmem:[#allocation43_spill] sm:$0xff] %v14533_v22 }
0x12a1   :  { %18065 = vst [vmem:[#allocation16_spill] sm:$0xff] %v14519_v11 }
0x12a5   :  { %v14441_v31 = vpop.f32.mrb[172].mxu0 }
0x12a6   :  { %v14443_v28 = vpop.f32.mrb[173].mxu0  ;;  %v5432_v13 = vadd.f32 %v14441_v31, %v14438_v8  ;;  %v10899_v31 = vld [vmem:[%s17143_s0 + $0x70] sm:$0xff] }
0x12a7   :  { %v14445_v62 = vpop.f32.mrb[174].mxu0  ;;  %v5424_v37 = vadd.f32 %v14438_v8, %v14443_v28 }
0x12a8   :  { %v5426_v51 = vpop.f32.mrb[175].mxu0  ;;  %v5435_v32 = vadd.f32 %v14445_v62, %v14438_v8  ;;  %v14583_v50 = vadd.f32 %v10899_v31, %v5432_v13  ;;  %v10900_v31 = vld [vmem:[%s17143_s0 + $0x80] sm:$0xff] }
0x12a9   :  { %v5427_v10 = vadd.f32 %v14438_v8, %v5426_v51  ;;  %v14571_v24 = vadd.f32 %v10897_v17, %v5424_v37 }
0x12aa   :  { %5536 = vadd.xlane.f32.xlu0 %v14451_v61  ;;  %v14576_v55 = vadd.f32 %v10898_v9, %v5435_v32  ;;  %18080 = vst [vmem:[#allocation46_spill] sm:$0xff] %v14583_v50 }
0x12ab   :  { %v14550_v51 = vadd.f32 %v10896_v23, %v5427_v10  ;;  %18078 = vst [vmem:[#allocation54_spill] sm:$0xff] %v14571_v24  ;;  %v18093_v23 = vld [vmem:[#allocation99_spill] sm:$0xff] }
0x12ac   :  { %18079 = vst [vmem:[#allocation45_spill] sm:$0xff] %v14576_v55  ;;  %v18095_v14 = vpack.c.bf16 %v18093_v23, %v18094_v39 }
0x12ad   :  { %18069 = vst [vmem:[#allocation52_spill] sm:$0xff] %v14550_v51 }
0x12ae   :  { %5538 = vadd.xlane.f32.xlu1 %v14464_v19  ;;  %5540 = vadd.xlane.f32.xlu0 %v14458_v35 }
0x12b2   :  { %5542 = vadd.xlane.f32.xlu0 %v14472_v18  ;;  %5546 = vadd.xlane.f32.xlu1 %v14479_v44 }
0x12b4   :  { %v5193_v60 = vpop.permute.xlu1 %5192 }
0x12b5   :  { %v5191_v46 = vpop.permute.xlu0 %5190  ;;  %v5250_v7 = vsel %vm3181_vm14, %v5233_v41, %v5193_v60  ;;  %v18085_v41 = vld [vmem:[#allocation95_spill] sm:$0xff] }
0x12b6   :  { %5550 = vadd.xlane.f32.xlu1 %v14496_v33  ;;  %5544 = vadd.xlane.f32.xlu0 %v14491_v6  ;;  %v5247_v4 = vsel %vm3181_vm14, %v5231_v5, %v5191_v46 }
0x12b7   :  { %9768 = vmatprep.mubr.bf16.mxu0 %v5247_v4  ;;  %v18086_v4 = vld [vmem:[#allocation93_spill] sm:$0xff] }
0x12b8   :  { %v5149_v27 = vpop.permute.xlu1 %5148  ;;  %9769 = vmatmul.mubr.bf16.gmra.mrb[176].mxu0 %v5250_v7  ;;  %v18087_v7 = vpack.c.bf16 %v18085_v41, %v18086_v4 }
0x12b9   :  { %v5147_v20 = vpop.permute.xlu0 %5146  ;;  %v5217_v28 = vsel %vm18077_vm5, %v18076_v57, %v5149_v27 }
0x12ba   :  { %5548 = vadd.xlane.f32.xlu0 %v14512_v21  ;;  %5554 = vadd.xlane.f32.xlu1 %v14519_v11  ;;  %v5214_v12 = vsel %vm18073_vm4, %v18072_v58, %v5147_v20 }
0x12bc   :  { %v5173_v40 = vpop.permute.xlu1 %5172 }
0x12bd   :  { %v5171_v59 = vpop.permute.xlu0 %5170  ;;  %v5237_v30 = vsel %vm3164_vm6, %v5217_v28, %v5173_v40  ;;  %v18089_v40 = vld [vmem:[#allocation100_spill] sm:$0xff] }
0x12be   :  { %5558 = vadd.xlane.f32.xlu1 %v14533_v22  ;;  %5552 = vadd.xlane.f32.xlu0 %v14528_v1  ;;  %v5235_v49 = vsel %vm3164_vm6, %v5214_v12, %v5171_v59  ;;  %v18090_v59 = vld [vmem:[#allocation98_spill] sm:$0xff] }
0x12bf   :  { %v18091_v2 = vpack.c.bf16 %v18089_v40, %v18090_v59 }
0x12c0   :  { %v5197_v47 = vpop.permute.xlu1 %5196 }
0x12c1   :  { %v5195_v62 = vpop.permute.xlu0 %5194  ;;  %v5256_v26 = vsel %vm3181_vm14, %v5237_v30, %v5197_v47 }
0x12c2   :  { %5556 = vadd.xlane.f32.xlu0 %v14541_v36  ;;  %5562 = vadd.xlane.f32.xlu1 %v14550_v51  ;;  %v5253_v63 = vsel %vm3181_vm14, %v5235_v49, %v5195_v62 }
0x12c3   :  { %9772 = vmatprep.mubr.bf16.mxu0 %v5253_v63 }
0x12c4   :  { %9773 = vmatmul.mubr.bf16.gmra.mrb[180].mxu0 %v5256_v26  ;;  %v5153_v15 = vpop.permute.xlu1 %5152 }
0x12c5   :  { %v5151_v3 = vpop.permute.xlu0 %5150  ;;  %v5223_v25 = vsel %vm18088_vm9, %v18087_v7, %v5153_v15  ;;  %v10903_v7 = vld [vmem:[%s17143_s0 + $0x98] sm:$0xff] }
0x12c6   :  { %5566 = vadd.xlane.f32.xlu1 %v14576_v55  ;;  %5560 = vadd.xlane.f32.xlu0 %v14571_v24  ;;  %v5220_v53 = vsel %vm18084_vm7, %v18083_v48, %v5151_v3 }
0x12c8   :  { %v5177_v60 = vpop.permute.xlu1 %5176 }
0x12c9   :  { %v5175_v5 = vpop.permute.xlu0 %5174  ;;  %v5241_v43 = vsel %vm3164_vm6, %v5223_v25, %v5177_v60 }
0x12ca   :  { %5564 = vadd.xlane.f32.xlu0 %v14583_v50  ;;  %v5239_v56 = vsel %vm3164_vm6, %v5220_v53, %v5175_v5 }
0x12f0   :  { %v5201_v46 = vpop.permute.xlu1 %5200 }
0x12f1   :  { %v5199_v38 = vpop.permute.xlu0 %5198  ;;  %v5262_v20 = vsel %vm3181_vm14, %v5241_v43, %v5201_v46  ;;  %v10902_v46 = vld [vmem:[%s17143_s0 + $0x90] sm:$0xff] }
0x12f2   :  { %v5259_v27 = vsel %vm3181_vm14, %v5239_v56, %v5199_v38 }
0x12f3   :  { %9776 = vmatprep.mubr.bf16.mxu0 %v5259_v27 }
0x12f4   :  { %v5157_v0 = vpop.permute.xlu1 %5156  ;;  %9777 = vmatmul.mubr.bf16.gmra.mrb[184].mxu0 %v5262_v20 }
0x12f5   :  { %v5155_v34 = vpop.permute.xlu0 %5154  ;;  %v5229_v58 = vsel %vm17892_vm0, %v18095_v14, %v5157_v0  ;;  %v10905_v14 = vld [vmem:[%s17143_s0 + $0xa8] sm:$0xff] }
0x12f6   :  { %v5226_v37 = vsel %vm18092_vm11, %v18091_v2, %v5155_v34  ;;  %v10904_v2 = vld [vmem:[%s17143_s0 + $0xa0] sm:$0xff] }
0x12f8   :  { %v5181_v52 = vpop.permute.xlu1 %5180 }
0x12f9   :  { %v5179_v10 = vpop.permute.xlu0 %5178  ;;  %v5245_v54 = vsel %vm3164_vm6, %v5229_v58, %v5181_v52 }
0x12fa   :  { %v5243_v12 = vsel %vm3164_vm6, %v5226_v37, %v5179_v10 }
0x12fc   :  { %v5205_v32 = vpop.permute.xlu1 %5204 }
0x12fd   :  { %v5203_v47 = vpop.permute.xlu0 %5202  ;;  %v5268_v57 = vsel %vm3181_vm14, %v5245_v54, %v5205_v32 }
0x12fe   :  { %v5265_v16 = vsel %vm3181_vm14, %v5243_v12, %v5203_v47 }
0x12ff   :  { %9780 = vmatprep.mubr.bf16.mxu0 %v5265_v16 }
0x1300   :  { %9781 = vmatmul.mubr.bf16.gmra.mrb[188].mxu0 %v5268_v57  ;;  %v9910_v57 = vld [vmem:[%s17150_s9 + $0x4] ss:$16 sps:$4 sm:$0xff]  }
0x1301   :  { %6419 = vmatprep.mubr.bf16.mxu0 %v17908_v42  ;;  %6194 = vmatprep.subr.bf16.mxu1 %v9910_v57  ;;  %v9949_v57 = vld [vmem:[%s17150_s9 + $0xcc] ss:$16 sps:$4 sm:$0xff]  }
0x1337   :  { %v5537_v28 = vpop.xlane.xlu0 %5536 }
0x1338   :  { %v5600_v17 = vmul.f32 0.0078125, %v5537_v28 }
0x133a   :  { %v14627_v53 = vsub.f32 %v14451_v61, %v5600_v17  ;;  %v10906_v17 = vld [vmem:[%s17143_s0 + $0xb0] sm:$0xff] }
0x133b   :  { %v5539_v26 = vpop.xlane.xlu1 %5538  ;;  %v5541_v60 = vpop.xlane.xlu0 %5540 }
0x133c   :  { %v5601_v5 = vmul.f32 0.0078125, %v5539_v26  ;;  %v5602_v38 = vmul.f32 0.0078125, %v5541_v60  ;;  %v5664_v27 = vmul.f32 %v14627_v53, %v14627_v53  ;;  %v9913_v26 = vld [vmem:[%s17150_s9 + $0xc] ss:$16 sps:$4 sm:$0xff]  }
0x133d   :  { %6387 = vmatprep.subr.bf16.mxu0 %v9913_v26  ;;  %v9953_v26 = vld [vmem:[%s17150_s9 + $0xe8] ss:$16 sps:$4 sm:$0xff]  }
0x133e   :  { %v14636_v4 = vsub.f32 %v14464_v19, %v5601_v5  ;;  %v14651_v59 = vsub.f32 %v14458_v35, %v5602_v38  ;;  %v10907_v5 = vld [vmem:[%s17143_s0 + $0xb8] sm:$0xff] }
0x133f   :  { %v5543_v56 = vpop.xlane.xlu0 %5542  ;;  %v5547_v12 = vpop.xlane.xlu1 %5546  ;;  %v9925_v38 = vld [vmem:[%s17150_s9 + $0x4c] ss:$16 sps:$4 sm:$0xff]  }
0x1340   :  { %v5603_v0 = vmul.f32 0.0078125, %v5543_v56  ;;  %v5665_v10 = vmul.f32 %v14636_v4, %v14636_v4  ;;  %v5666_v16 = vmul.f32 %v14651_v59, %v14651_v59  ;;  %v5605_v28 = vmul.f32 0.0078125, %v5547_v12  ;;  %v9922_v56 = vld [vmem:[%s17150_s9 + $0x44] ss:$16 sps:$4 sm:$0xff]   ;;  %v9943_v12 = vld [vmem:[%s17150_s9 + $0xac] ss:$16 sps:$4 sm:$0xff]  }
0x1342   :  { %v14660_v39 = vsub.f32 %v14472_v18, %v5603_v0  ;;  %v14702_v60 = vsub.f32 %v14479_v44, %v5605_v28  ;;  %v9928_v0 = vld [vmem:[%s17150_s9 + $0x64] ss:$16 sps:$4 sm:$0xff]   ;;  %v9944_v28 = vld [vmem:[%s17150_s9 + $0xc0] ss:$16 sps:$4 sm:$0xff]  }
0x1343   :  { %v5545_v23 = vpop.xlane.xlu0 %5544 }
0x1344   :  { %v5604_v47 = vmul.f32 0.0078125, %v5545_v23  ;;  %v9935_v23 = vld [vmem:[%s17150_s9 + $0x88] ss:$16 sps:$4 sm:$0xff]  }
0x138b   :  { %v9770_v49 = vpop.f32.mrb[176].mxu0 }
0x138c   :  { %v5439_v62 = vpop.f32.mrb[177].mxu0  ;;  %v5448_v9 = vadd.f32 %v9770_v49, %v14438_v8 }
0x138d   :  { %v5440_v30 = vadd.f32 %v14438_v8, %v5439_v62  ;;  %v9771_v63 = vpop.f32.mrb[178].mxu0  ;;  %v5667_v62 = vmul.f32 %v14660_v39, %v14660_v39 }
0x138e   :  { %v5442_v13 = vpop.f32.mrb[179].mxu0  ;;  %v5451_v45 = vadd.f32 %v9771_v63, %v14438_v8  ;;  %v14632_v41 = vadd.f32 %v10902_v46, %v5448_v9  ;;  %v9911_v63 = vld [vmem:[%s17150_s9 + $0x8] ss:$16 sps:$4 sm:$0xff]  }
0x138f   :  { %v14616_v15 = vadd.f32 %v10900_v31, %v5440_v30  ;;  %v5443_v3 = vadd.f32 %v14438_v8, %v5442_v13  ;;  %v9908_v30 = vld [vmem:[%s17150_s9] ss:$16 sps:$4 sm:$0xff]   ;;  %v14688_v13 = vsub.f32 %v14491_v6, %v5604_v47  ;;  %v9916_v31 = vld [vmem:[%s17150_s9 + $0x24] ss:$16 sps:$4 sm:$0xff]   ;;  %6388 = vmatpush1.bf16.msra.mxu0 %v9911_v63  ;;  %v9917_v46 = vld [vmem:[%s17150_s9 + $0x28] ss:$16 sps:$4 sm:$0xff]  }
0x1390   :  { %18098 = vst [vmem:[#allocation11_spill] sm:$0xff] %v14632_v41  ;;  %v14641_v25 = vadd.f32 %v10903_v7, %v5451_v45  ;;  %6195 = vmatpush1.bf16.msra.mxu1 %v9908_v30  ;;  %v9938_v47 = vld [vmem:[%s17150_s9 + $0xa0] ss:$16 sps:$4 sm:$0xff]   ;;  %v9955_v30 = vld [vmem:[%s17150_s9 + $0xec] ss:$16 sps:$4 sm:$0xff]  }
0x1391   :  { %18096 = vst [vmem:[#allocation14_spill] sm:$0xff] %v14616_v15  ;;  %v14623_v48 = vadd.f32 %v10901_v29, %v5443_v3  ;;  %5568 = vadd.xlane.f32.xlu0 %v14616_v15  ;;  %v9919_v3 = vld [vmem:[%s17150_s9 + $0x2c] ss:$16 sps:$4 sm:$0xff]   ;;  %v9914_v29 = vld [vmem:[%s17150_s9 + $0x20] ss:$16 sps:$4 sm:$0xff]   ;;  %6196 = vmatprep.subr.bf16.mxu1 %v9916_v31  ;;  %v5668_v7 = vmul.f32 %v14688_v13, %v14688_v13  ;;  %v5551_v31 = vpop.xlane.xlu1 %5550 }
0x1392   :  { %18099 = vst [vmem:[#allocation7_spill] sm:$0xff] %v14641_v25  ;;  %6389 = vmatprep.subr.bf16.mxu0 %v9919_v3  ;;  %v9950_v63 = vld [vmem:[%s17150_s9 + $0xe0] ss:$16 sps:$4 sm:$0xff]  }
0x1393   :  { %18097 = vst [vmem:[#allocation66_spill] sm:$0xff] %v14623_v48  ;;  %5570 = vadd.xlane.f32.xlu1 %v14623_v48  ;;  %6390 = vmatpush1.bf16.msra.mxu0 %v9917_v46  ;;  %v5607_v46 = vmul.f32 0.0078125, %v5551_v31 }
0x1394   :  { %6197 = vmatpush1.bf16.msra.mxu1 %v9914_v29  ;;  %6391 = vmatprep.subr.bf16.mxu0 %v9925_v38 }
0x1395   :  { %5572 = vadd.xlane.f32.xlu0 %v14632_v41  ;;  %6198 = vmatprep.subr.bf16.mxu1 %v9922_v56 }
0x1397   :  { %5574 = vadd.xlane.f32.xlu1 %v14641_v25  ;;  %v9774_v43 = vpop.f32.mrb[180].mxu0 }
0x1398   :  { %v5455_v20 = vpop.f32.mrb[181].mxu0  ;;  %v5464_v54 = vadd.f32 %v9774_v43, %v14438_v8  ;;  %v5669_v43 = vmul.f32 %v14702_v60, %v14702_v60 }
0x1399   :  { %v5456_v34 = vadd.f32 %v14438_v8, %v5455_v20  ;;  %v9775_v52 = vpop.f32.mrb[182].mxu0  ;;  %5696 = vadd.xlane.f32.xlu0 %v5664_v27  ;;  %v9920_v27 = vld [vmem:[%s17150_s9 + $0x40] ss:$16 sps:$4 sm:$0xff]   ;;  %v9923_v20 = vld [vmem:[%s17150_s9 + $0x48] ss:$16 sps:$4 sm:$0xff]  }
0x139a   :  { %v5458_v40 = vpop.f32.mrb[183].mxu0  ;;  %v5467_v49 = vadd.f32 %v9775_v52, %v14438_v8  ;;  %v14693_v9 = vadd.f32 %v10906_v17, %v5464_v54  ;;  %6199 = vmatpush1.bf16.msra.mxu1 %v9920_v27  ;;  %6392 = vmatpush1.bf16.msra.mxu0 %v9923_v20  ;;  %v9926_v52 = vld [vmem:[%s17150_s9 + $0x60] ss:$16 sps:$4 sm:$0xff]   ;;  %v9941_v54 = vld [vmem:[%s17150_s9 + $0xa8] ss:$16 sps:$4 sm:$0xff]   ;;  %v5549_v17 = vpop.xlane.xlu0 %5548 }
0x139b   :  { %v14656_v37 = vadd.f32 %v10904_v2, %v5456_v34  ;;  %v5459_v32 = vadd.f32 %v14438_v8, %v5458_v40  ;;  %5698 = vadd.xlane.f32.xlu1 %v5665_v10  ;;  %v9931_v34 = vld [vmem:[%s17150_s9 + $0x6c] ss:$16 sps:$4 sm:$0xff]   ;;  %v9929_v10 = vld [vmem:[%s17150_s9 + $0x68] ss:$16 sps:$4 sm:$0xff]   ;;  %6200 = vmatprep.subr.bf16.mxu1 %v9928_v0  ;;  %v9934_v40 = vld [vmem:[%s17150_s9 + $0x84] ss:$16 sps:$4 sm:$0xff]  }
0x139c   :  { %18102 = vst [vmem:[#allocation32_spill] sm:$0xff] %v14693_v9  ;;  %v14707_v45 = vadd.f32 %v10907_v5, %v5467_v49  ;;  %6393 = vmatprep.subr.bf16.mxu0 %v9931_v34  ;;  %v9937_v2 = vld [vmem:[%s17150_s9 + $0x8c] ss:$16 sps:$4 sm:$0xff]   ;;  %v9947_v49 = vld [vmem:[%s17150_s9 + $0xc8] ss:$16 sps:$4 sm:$0xff]   ;;  %v5606_v3 = vmul.f32 0.0078125, %v5549_v17 }
0x139d   :  { %18100 = vst [vmem:[#allocation68_spill] sm:$0xff] %v14656_v37  ;;  %v14665_v58 = vadd.f32 %v10905_v14, %v5459_v32  ;;  %5576 = vadd.xlane.f32.xlu0 %v14656_v37  ;;  %v9932_v32 = vld [vmem:[%s17150_s9 + $0x80] ss:$16 sps:$4 sm:$0xff]   ;;  %v9940_v14 = vld [vmem:[%s17150_s9 + $0xa4] ss:$16 sps:$4 sm:$0xff]  }
0x139e   :  { %18103 = vst [vmem:[#allocation74_spill] sm:$0xff] %v14707_v45  ;;  %6201 = vmatpush1.bf16.msra.mxu1 %v9926_v52  ;;  %6394 = vmatpush1.bf16.msra.mxu0 %v9929_v10  ;;  %v10908_v27 = vld [vmem:[%s17143_s0 + $0xc0] sm:$0xff]  ;;  %v5553_v34 = vpop.xlane.xlu0 %5552  ;;  %v14804_v52 = vsub.f32 %v14496_v33, %v5607_v46  ;;  %v10909_v10 = vld [vmem:[%s17143_s0 + $0xc8] sm:$0xff] }
0x139f   :  { %18101 = vst [vmem:[#allocation69_spill] sm:$0xff] %v14665_v58  ;;  %5578 = vadd.xlane.f32.xlu1 %v14665_v58  ;;  %6202 = vmatprep.subr.bf16.mxu1 %v9934_v40 }
0x13a0   :  { %6395 = vmatprep.subr.bf16.mxu0 %v9937_v2  ;;  %v5555_v2 = vpop.xlane.xlu1 %5554 }
0x13a1   :  { %5700 = vadd.xlane.f32.xlu0 %v5666_v16  ;;  %v9946_v16 = vld [vmem:[%s17150_s9 + $0xc4] ss:$16 sps:$4 sm:$0xff]  }
0x13a2   :  { %6203 = vmatpush1.bf16.msra.mxu1 %v9932_v32  ;;  %6396 = vmatpush1.bf16.msra.mxu0 %v9935_v23  ;;  %v5608_v32 = vmul.f32 0.0078125, %v5553_v34 }
0x13a3   :  { %5702 = vadd.xlane.f32.xlu1 %v5667_v62  ;;  %6204 = vmatprep.subr.bf16.mxu1 %v9940_v14  ;;  %v9952_v62 = vld [vmem:[%s17150_s9 + $0xe4] ss:$16 sps:$4 sm:$0xff]  }
0x13a4   :  { %6397 = vmatprep.subr.bf16.mxu0 %v9943_v12  ;;  %v5609_v12 = vmul.f32 0.0078125, %v5555_v2 }
0x13a5   :  { %5580 = vadd.xlane.f32.xlu0 %v14693_v9 }
0x13a6   :  { %6205 = vmatpush1.bf16.msra.mxu1 %v9938_v47  ;;  %6398 = vmatpush1.bf16.msra.mxu0 %v9941_v54  ;;  %v5671_v54 = vmul.f32 %v14804_v52, %v14804_v52 }
0x13a7   :  { %5582 = vadd.xlane.f32.xlu1 %v14707_v45  ;;  %6206 = vmatprep.subr.bf16.mxu1 %v9946_v16  ;;  %v14820_v16 = vsub.f32 %v14528_v1, %v5608_v32 }
0x13a8   :  { %6399 = vmatprep.subr.bf16.mxu0 %v9949_v57  ;;  %v10910_v57 = vld [vmem:[%s17143_s0 + $0xd0] sm:$0xff] }
0x13a9   :  { %5704 = vadd.xlane.f32.xlu0 %v5668_v7 }
0x13aa   :  { %6207 = vmatpush1.bf16.msra.mxu1 %v9944_v28  ;;  %6400 = vmatpush1.bf16.msra.mxu0 %v9947_v49 }
0x13ab   :  { %5706 = vadd.xlane.f32.xlu1 %v5669_v43  ;;  %6208 = vmatprep.subr.bf16.mxu1 %v9952_v62  ;;  %v14795_v43 = vsub.f32 %v14512_v21, %v5606_v3  ;;  %v5557_v62 = vpop.xlane.xlu0 %5556  ;;  %v5559_v3 = vpop.xlane.xlu1 %5558 }
0x13ac   :  { %6401 = vmatprep.subr.bf16.mxu0 %v9955_v30 }
0x13ad   :  { %v5670_v14 = vmul.f32 %v14795_v43, %v14795_v43 }
0x13ae   :  { %6209 = vmatpush1.bf16.msra.mxu1 %v9950_v63  ;;  %6402 = vmatpush1.bf16.msra.mxu0 %v9953_v26  ;;  %v14828_v63 = vsub.f32 %v14519_v11, %v5609_v12  ;;  %v10911_v26 = vld [vmem:[%s17143_s0 + $0xd8] sm:$0xff] }
0x13af   :  { %v5563_v32 = vpop.xlane.xlu1 %5562 }
0x13c7   :  { %v9778_v5 = vpop.f32.mrb[184].mxu0 }
0x13c8   :  { %v5471_v29 = vpop.f32.mrb[185].mxu0  ;;  %v5480_v23 = vadd.f32 %v9778_v5, %v14438_v8 }
0x13c9   :  { %v5472_v7 = vadd.f32 %v14438_v8, %v5471_v29  ;;  %v9779_v56 = vpop.f32.mrb[186].mxu0  ;;  %v5610_v29 = vmul.f32 0.0078125, %v5557_v62 }
0x13ca   :  { %v5474_v38 = vpop.f32.mrb[187].mxu0  ;;  %v5483_v47 = vadd.f32 %v9779_v56, %v14438_v8  ;;  %v14825_v28 = vadd.f32 %v10910_v57, %v5480_v23  ;;  %v5611_v56 = vmul.f32 0.0078125, %v5559_v3 }
0x13cb   :  { %v14800_v20 = vadd.f32 %v10908_v27, %v5472_v7  ;;  %v5475_v0 = vadd.f32 %v14438_v8, %v5474_v38  ;;  %v5672_v7 = vmul.f32 %v14820_v16, %v14820_v16  ;;  %v5673_v27 = vmul.f32 %v14828_v63, %v14828_v63 }
0x13cc   :  { %18106 = vst [vmem:[#allocation35_spill] sm:$0xff] %v14825_v28  ;;  %v14833_v17 = vadd.f32 %v10911_v26, %v5483_v47  ;;  %v14844_v34 = vsub.f32 %v14541_v36, %v5610_v29  ;;  %v14852_v23 = vsub.f32 %v14533_v22, %v5611_v56 }
0x13cd   :  { %18104 = vst [vmem:[#allocation36_spill] sm:$0xff] %v14800_v20  ;;  %v14809_v40 = vadd.f32 %v10909_v10, %v5475_v0  ;;  %5584 = vadd.xlane.f32.xlu0 %v14800_v20  ;;  %v5561_v0 = vpop.xlane.xlu0 %5560  ;;  %v10912_v10 = vld [vmem:[%s17143_s0 + $0xe0] sm:$0xff] }
0x13ce   :  { %18107 = vst [vmem:[#allocation48_spill] sm:$0xff] %v14833_v17  ;;  %v5612_v47 = vmul.f32 0.0078125, %v5561_v0  ;;  %v5674_v57 = vmul.f32 %v14844_v34, %v14844_v34  ;;  %v5675_v3 = vmul.f32 %v14852_v23, %v14852_v23 }
0x13cf   :  { %18105 = vst [vmem:[#allocation50_spill] sm:$0xff] %v14809_v40  ;;  %5586 = vadd.xlane.f32.xlu1 %v14809_v40 }
0x13d0   :  { %v14868_v29 = vsub.f32 %v14571_v24, %v5612_v47 }
0x13d1   :  { %5708 = vadd.xlane.f32.xlu0 %v5670_v14  ;;  %v10913_v14 = vld [vmem:[%s17143_s0 + $0xe8] sm:$0xff]  ;;  %v5565_v62 = vpop.xlane.xlu0 %5564 }
0x13d2   :  { %v5676_v0 = vmul.f32 %v14868_v29, %v14868_v29 }
0x13d3   :  { %v9782_v49 = vpop.f32.mrb[188].mxu0  ;;  %5710 = vadd.xlane.f32.xlu1 %v5671_v54 }
0x13d4   :  { %v5487_v30 = vpop.f32.mrb[189].mxu0  ;;  %v5496_v54 = vadd.f32 %v9782_v49, %v14438_v8  ;;  %v10914_v49 = vld [vmem:[%s17143_s0 + $0xf0] sm:$0xff] }
0x13d5   :  { %v9783_v31 = vpop.f32.mrb[190].mxu0  ;;  %5588 = vadd.xlane.f32.xlu0 %v14825_v28  ;;  %v5488_v46 = vadd.f32 %v14438_v8, %v5487_v30  ;;  %v5613_v30 = vmul.f32 0.0078125, %v5563_v32 }
0x13d6   :  { %v5490_v5 = vpop.f32.mrb[191].mxu0  ;;  %v5499_v26 = vadd.f32 %v9783_v31, %v14438_v8  ;;  %v10915_v31 = vld [vmem:[%s17143_s0 + $0xf8] sm:$0xff] }
0x13d7   :  { %5590 = vadd.xlane.f32.xlu1 %v14833_v17  ;;  %v5491_v38 = vadd.f32 %v14438_v8, %v5490_v5  ;;  %v14849_v2 = vadd.f32 %v10912_v10, %v5488_v46  ;;  %v5567_v5 = vpop.xlane.xlu1 %5566  ;;  %v5614_v46 = vmul.f32 0.0078125, %v5565_v62  ;;  %v14876_v56 = vsub.f32 %v14550_v51, %v5613_v30 }
0x13d8   :  { %v5615_v8 = vmul.f32 0.0078125, %v5567_v5 }
0x13d9   :  { %5712 = vadd.xlane.f32.xlu0 %v5672_v7  ;;  %18108 = vst [vmem:[#allocation70_spill] sm:$0xff] %v14849_v2  ;;  %v14857_v12 = vadd.f32 %v10913_v14, %v5491_v38  ;;  %v14873_v7 = vadd.f32 %v10914_v49, %v5496_v54  ;;  %v14881_v38 = vadd.f32 %v10915_v31, %v5499_v26 }
0x13da   :  { %v14891_v10 = vsub.f32 %v14576_v55, %v5615_v8  ;;  %v5677_v32 = vmul.f32 %v14876_v56, %v14876_v56 }
0x13db   :  { %5714 = vadd.xlane.f32.xlu1 %v5673_v27  ;;  %18109 = vst [vmem:[#allocation71_spill] sm:$0xff] %v14857_v12  ;;  %18110 = vst [vmem:[#allocation6_spill] sm:$0xff] %v14873_v7  ;;  %v14885_v27 = vsub.f32 %v14583_v50, %v5614_v46 }
0x13dc   :  { %18111 = vst [vmem:[#allocation4_spill] sm:$0xff] %v14881_v38  ;;  %v5679_v47 = vmul.f32 %v14891_v10, %v14891_v10 }
0x13dd   :  { %5592 = vadd.xlane.f32.xlu0 %v14849_v2  ;;  %v5678_v14 = vmul.f32 %v14885_v27, %v14885_v27 }
0x13df   :  { %5594 = vadd.xlane.f32.xlu1 %v14857_v12 }
0x13e1   :  { %5716 = vadd.xlane.f32.xlu0 %v5674_v57 }
0x13e3   :  { %5718 = vadd.xlane.f32.xlu1 %v5675_v3 }
0x13e5   :  { %5596 = vadd.xlane.f32.xlu0 %v14873_v7 }
0x13e7   :  { %5598 = vadd.xlane.f32.xlu1 %v14881_v38 }
0x13e9   :  { %5720 = vadd.xlane.f32.xlu0 %v5676_v0 }
0x13eb   :  { %5722 = vadd.xlane.f32.xlu1 %v5677_v32 }
0x13ed   :  { %5724 = vadd.xlane.f32.xlu0 %v5678_v14 }
0x13ef   :  { %5726 = vadd.xlane.f32.xlu1 %v5679_v47 }
0x141e   :  { %v5569_v54 = vpop.xlane.xlu0 %5568 }
0x141f   :  { %v5616_v57 = vmul.f32 0.0078125, %v5569_v54 }
0x1420   :  { %v5571_v62 = vpop.xlane.xlu1 %5570 }
0x1421   :  { %v14900_v30 = vsub.f32 %v14616_v15, %v5616_v57  ;;  %v5617_v26 = vmul.f32 0.0078125, %v5571_v62 }
0x1422   :  { %v5573_v3 = vpop.xlane.xlu0 %5572 }
0x1423   :  { %v14903_v5 = vsub.f32 %v14623_v48, %v5617_v26  ;;  %v5618_v46 = vmul.f32 0.0078125, %v5573_v3  ;;  %v5680_v49 = vmul.f32 %v14900_v30, %v14900_v30 }
0x1424   :  { %v5575_v8 = vpop.xlane.xlu1 %5574 }
0x1425   :  { %v14908_v31 = vsub.f32 %v14632_v41, %v5618_v46  ;;  %v5619_v0 = vmul.f32 0.0078125, %v5575_v8  ;;  %5728 = vadd.xlane.f32.xlu0 %v5680_v49  ;;  %v5681_v32 = vmul.f32 %v14903_v5, %v14903_v5 }
0x1426   :  { %v5697_v14 = vpop.xlane.xlu0 %5696 }
0x1427   :  { %v14913_v47 = vsub.f32 %v14641_v25, %v5619_v0  ;;  %v5760_v54 = vmul.f32 0.0078125, %v5697_v14  ;;  %5730 = vadd.xlane.f32.xlu1 %v5681_v32  ;;  %v5682_v57 = vmul.f32 %v14908_v31, %v14908_v31 }
0x1428   :  { %v5699_v62 = vpop.xlane.xlu1 %5698 }
0x1429   :  { %v5792_v26 = vadd.f32 1e-05, %v5760_v54  ;;  %v5761_v3 = vmul.f32 0.0078125, %v5699_v62  ;;  %5732 = vadd.xlane.f32.xlu0 %v5682_v57  ;;  %v5683_v46 = vmul.f32 %v14913_v47, %v14913_v47 }
0x142a   :  { %v5577_v49 = vpop.xlane.xlu0 %5576 }
0x142b   :  { %10564 = vrsqrt.f32 %v5792_v26  ;;  %v5793_v8 = vadd.f32 1e-05, %v5761_v3  ;;  %v5620_v41 = vmul.f32 0.0078125, %v5577_v49  ;;  %5734 = vadd.xlane.f32.xlu1 %v5683_v46 }
0x142c   :  { %v5579_v48 = vpop.xlane.xlu1 %5578 }
0x142d   :  { %10566 = vrsqrt.f32 %v5793_v8  ;;  %v14920_v0 = vsub.f32 %v14656_v37, %v5620_v41  ;;  %v5621_v32 = vmul.f32 0.0078125, %v5579_v48 }
0x142e   :  { %v5701_v14 = vpop.xlane.xlu0 %5700 }
0x142f   :  { %v14923_v25 = vsub.f32 %v14665_v58, %v5621_v32  ;;  %v5762_v54 = vmul.f32 0.0078125, %v5701_v14  ;;  %v5684_v57 = vmul.f32 %v14920_v0, %v14920_v0  ;;  %v14932_v32 = vld [vmem:[%s17151_s7] ss:$0 sm:$0xff] }
0x1430   :  { %v5703_v62 = vpop.xlane.xlu1 %5702 }
0x1431   :  { %v5794_v15 = vadd.f32 1e-05, %v5762_v54  ;;  %v5763_v26 = vmul.f32 0.0078125, %v5703_v62  ;;  %5736 = vadd.xlane.f32.xlu0 %v5684_v57  ;;  %v5685_v3 = vmul.f32 %v14923_v25, %v14923_v25 }
0x1432   :  { %v5581_v46 = vpop.xlane.xlu0 %5580 }
0x1433   :  { %10568 = vrsqrt.f32 %v5794_v15  ;;  %v5795_v41 = vadd.f32 1e-05, %v5763_v26  ;;  %v5622_v49 = vmul.f32 0.0078125, %v5581_v46  ;;  %5738 = vadd.xlane.f32.xlu1 %v5685_v3 }
0x1434   :  { %v5583_v48 = vpop.xlane.xlu1 %5582 }
0x1435   :  { %v10565_v8 = vpop.eup %10564  ;;  %10570 = vrsqrt.f32 %v5795_v41  ;;  %v14935_v14 = vsub.f32 %v14693_v9, %v5622_v49  ;;  %v5623_v54 = vmul.f32 0.0078125, %v5583_v48  ;;  %v14950_v48 = vld [vmem:[%s17152_s8] ss:$0 sm:$0xff] }
0x1436   :  { %v5856_v57 = vmul.f32 %v10565_v8, %v14627_v53  ;;  %v5705_v62 = vpop.xlane.xlu0 %5704 }
0x1437   :  { %v10567_v58 = vpop.eup %10566  ;;  %v14939_v15 = vsub.f32 %v14707_v45, %v5623_v54  ;;  %v5764_v26 = vmul.f32 0.0078125, %v5705_v62  ;;  %v5686_v3 = vmul.f32 %v14935_v14, %v14935_v14 }
0x1438   :  { %v5894_v46 = vmul.f32 %v14932_v32, %v5856_v57  ;;  %v5857_v37 = vmul.f32 %v10567_v58, %v14636_v4  ;;  %v5707_v41 = vpop.xlane.xlu1 %5706 }
0x1439   :  { %v5796_v55 = vadd.f32 1e-05, %v5764_v26  ;;  %v5765_v49 = vmul.f32 0.0078125, %v5707_v41  ;;  %5740 = vadd.xlane.f32.xlu0 %v5686_v3  ;;  %v5687_v53 = vmul.f32 %v14939_v15, %v14939_v15 }
0x143a   :  { %v5895_v8 = vmul.f32 %v14932_v32, %v5857_v37  ;;  %v5932_v57 = vadd.f32 %v14950_v48, %v5894_v46 }
0x143b   :  { %10572 = vrsqrt.f32 %v5796_v55  ;;  %v5797_v54 = vadd.f32 1e-05, %v5765_v49  ;;  %5742 = vadd.xlane.f32.xlu1 %v5687_v53 }
0x143c   :  { %v5933_v4 = vadd.f32 %v14950_v48, %v5895_v8 }
0x143d   :  { %v10569_v58 = vpop.eup %10568  ;;  %10574 = vrsqrt.f32 %v5797_v54 }
0x143e   :  { %v5964_v62 = vpack.c.bf16 %v5933_v4, %v5932_v57  ;;  %v5858_v26 = vmul.f32 %v10569_v58, %v14651_v59 }
0x143f   :  { %v10571_v3 = vpop.eup %10570 }
0x1440   :  { %6227 = vmatmul.mubr.bf16.vlgmr.msra.gmra.mrb[192].mxu1 %v5964_v62  ;;  %6420 = vmatmul.mubr.bf16.vlgmr.msra.gmra.mrb[192].mxu0 %v5964_v62  ;;  %v5859_v41 = vmul.f32 %v10571_v3, %v14660_v39  ;;  %v5896_v45 = vmul.f32 %v14932_v32, %v5858_v26 }
0x1441   :  { %6236 = vmatprep.mubr.bf16.mxu1 %v17908_v42  ;;  %6429 = vmatprep.mubr.bf16.mxu0 %v17908_v42 }
0x1442   :  { %v5897_v55 = vmul.f32 %v14932_v32, %v5859_v41  ;;  %v5934_v37 = vadd.f32 %v14950_v48, %v5896_v45 }
0x1444   :  { %v5935_v46 = vadd.f32 %v14950_v48, %v5897_v55 }
0x1445   :  { %v10573_v49 = vpop.eup %10572 }
0x1446   :  { %v5965_v53 = vpack.c.bf16 %v5935_v46, %v5934_v37  ;;  %v5860_v59 = vmul.f32 %v10573_v49, %v14688_v13 }
0x1447   :  { %v10575_v8 = vpop.eup %10574 }
0x1448   :  { %6237 = vmatmul.mubr.bf16.gmra.mrb[196].mxu1 %v5965_v53  ;;  %6430 = vmatmul.mubr.bf16.gmra.mrb[196].mxu0 %v5965_v53  ;;  %v5861_v39 = vmul.f32 %v10575_v8, %v14702_v60  ;;  %v5898_v54 = vmul.f32 %v14932_v32, %v5860_v59 }
0x1449   :  { %6246 = vmatprep.mubr.bf16.mxu1 %v17908_v42  ;;  %6439 = vmatprep.mubr.bf16.mxu0 %v17908_v42 }
0x144a   :  { %v5899_v57 = vmul.f32 %v14932_v32, %v5861_v39  ;;  %v5936_v45 = vadd.f32 %v14950_v48, %v5898_v54 }
0x144c   :  { %v5937_v4 = vadd.f32 %v14950_v48, %v5899_v57 }
0x144e   :  { %v5966_v58 = vpack.c.bf16 %v5937_v4, %v5936_v45 }
0x1450   :  { %6247 = vmatmul.mubr.bf16.gmra.mrb[200].mxu1 %v5966_v58  ;;  %6440 = vmatmul.mubr.bf16.gmra.mrb[200].mxu0 %v5966_v58 }
0x1451   :  { %6256 = vmatprep.mubr.bf16.mxu1 %v17908_v42  ;;  %6449 = vmatprep.mubr.bf16.mxu0 %v17908_v42 }
0x145a   :  { %v5585_v13 = vpop.xlane.xlu0 %5584 }
0x145b   :  { %v5624_v60 = vmul.f32 0.0078125, %v5585_v13 }
0x145c   :  { %v5587_v62 = vpop.xlane.xlu1 %5586 }
0x145d   :  { %v14974_v26 = vsub.f32 %v14800_v20, %v5624_v60  ;;  %v5625_v3 = vmul.f32 0.0078125, %v5587_v62 }
0x145e   :  { %v5709_v41 = vpop.xlane.xlu0 %5708 }
0x145f   :  { %v14977_v55 = vsub.f32 %v14809_v40, %v5625_v3  ;;  %v5766_v37 = vmul.f32 0.0078125, %v5709_v41  ;;  %v5688_v46 = vmul.f32 %v14974_v26, %v14974_v26 }
0x1460   :  { %v5711_v49 = vpop.xlane.xlu1 %5710 }
0x1461   :  { %v5798_v53 = vadd.f32 1e-05, %v5766_v37  ;;  %v5767_v59 = vmul.f32 0.0078125, %v5711_v49  ;;  %5744 = vadd.xlane.f32.xlu0 %v5688_v46  ;;  %v5689_v8 = vmul.f32 %v14977_v55, %v14977_v55 }
0x1462   :  { %v5589_v39 = vpop.xlane.xlu0 %5588 }
0x1463   :  { %10576 = vrsqrt.f32 %v5798_v53  ;;  %v5799_v54 = vadd.f32 1e-05, %v5767_v59  ;;  %v5626_v57 = vmul.f32 0.0078125, %v5589_v39  ;;  %5746 = vadd.xlane.f32.xlu1 %v5689_v8 }
0x1464   :  { %v5591_v45 = vpop.xlane.xlu1 %5590 }
0x1465   :  { %10578 = vrsqrt.f32 %v5799_v54  ;;  %v14984_v4 = vsub.f32 %v14825_v28, %v5626_v57  ;;  %v5627_v58 = vmul.f32 0.0078125, %v5591_v45 }
0x1466   :  { %v5713_v13 = vpop.xlane.xlu0 %5712 }
0x1467   :  { %v14987_v60 = vsub.f32 %v14833_v17, %v5627_v58  ;;  %v5768_v62 = vmul.f32 0.0078125, %v5713_v13  ;;  %v5690_v3 = vmul.f32 %v14984_v4, %v14984_v4 }
0x1468   :  { %v5715_v41 = vpop.xlane.xlu1 %5714 }
0x1469   :  { %v5800_v37 = vadd.f32 1e-05, %v5768_v62  ;;  %v5769_v46 = vmul.f32 0.0078125, %v5715_v41  ;;  %5748 = vadd.xlane.f32.xlu0 %v5690_v3  ;;  %v5691_v49 = vmul.f32 %v14987_v60, %v14987_v60 }
0x146a   :  { %v5593_v53 = vpop.xlane.xlu0 %5592 }
0x146b   :  { %10580 = vrsqrt.f32 %v5800_v37  ;;  %v5801_v59 = vadd.f32 1e-05, %v5769_v46  ;;  %v5628_v8 = vmul.f32 0.0078125, %v5593_v53  ;;  %5750 = vadd.xlane.f32.xlu1 %v5691_v49 }
0x146c   :  { %v5595_v39 = vpop.xlane.xlu1 %5594 }
0x146d   :  { %v10577_v54 = vpop.eup %10576  ;;  %10582 = vrsqrt.f32 %v5801_v59  ;;  %v14994_v57 = vsub.f32 %v14849_v2, %v5628_v8  ;;  %v5629_v45 = vmul.f32 0.0078125, %v5595_v39 }
0x146e   :  { %v5717_v58 = vpop.xlane.xlu0 %5716  ;;  %v5862_v13 = vmul.f32 %v10577_v54, %v14795_v43 }
0x146f   :  { %v10579_v62 = vpop.eup %10578  ;;  %v14998_v3 = vsub.f32 %v14857_v12, %v5629_v45  ;;  %v5770_v41 = vmul.f32 0.0078125, %v5717_v58  ;;  %v5692_v37 = vmul.f32 %v14994_v57, %v14994_v57 }
0x1470   :  { %v5719_v46 = vpop.xlane.xlu1 %5718  ;;  %v5863_v49 = vmul.f32 %v10579_v62, %v14804_v52  ;;  %v5900_v53 = vmul.f32 %v14932_v32, %v5862_v13 }
0x1471   :  { %v5802_v59 = vadd.f32 1e-05, %v5770_v41  ;;  %v5771_v8 = vmul.f32 0.0078125, %v5719_v46  ;;  %5752 = vadd.xlane.f32.xlu0 %v5692_v37  ;;  %v5693_v39 = vmul.f32 %v14998_v3, %v14998_v3 }
0x1472   :  { %v5597_v43 = vpop.xlane.xlu0 %5596  ;;  %v5901_v54 = vmul.f32 %v14932_v32, %v5863_v49  ;;  %v5938_v2 = vadd.f32 %v14950_v48, %v5900_v53 }
0x1473   :  { %10584 = vrsqrt.f32 %v5802_v59  ;;  %v5803_v45 = vadd.f32 1e-05, %v5771_v8  ;;  %v5630_v58 = vmul.f32 0.0078125, %v5597_v43  ;;  %5754 = vadd.xlane.f32.xlu1 %v5693_v39 }
0x1474   :  { %v5599_v12 = vpop.xlane.xlu1 %5598  ;;  %v5939_v52 = vadd.f32 %v14950_v48, %v5901_v54 }
0x1475   :  { %v10581_v62 = vpop.eup %10580  ;;  %10586 = vrsqrt.f32 %v5803_v45  ;;  %v15010_v13 = vsub.f32 %v14873_v7, %v5630_v58  ;;  %v5631_v41 = vmul.f32 0.0078125, %v5599_v12 }
0x1476   :  { %v5721_v37 = vpop.xlane.xlu0 %5720  ;;  %v5967_v46 = vpack.c.bf16 %v5939_v52, %v5938_v2  ;;  %v5864_v17 = vmul.f32 %v10581_v62, %v14820_v16 }
0x1477   :  { %v10583_v49 = vpop.eup %10582  ;;  %v15014_v59 = vsub.f32 %v14881_v38, %v5631_v41  ;;  %v5772_v8 = vmul.f32 0.0078125, %v5721_v37  ;;  %v5694_v53 = vmul.f32 %v15010_v13, %v15010_v13 }
0x1478   :  { %v5723_v39 = vpop.xlane.xlu1 %5722  ;;  %6257 = vmatmul.mubr.bf16.gmra.mrb[204].mxu1 %v5967_v46  ;;  %6450 = vmatmul.mubr.bf16.gmra.mrb[204].mxu0 %v5967_v46  ;;  %v5865_v43 = vmul.f32 %v10583_v49, %v14828_v63  ;;  %v5902_v54 = vmul.f32 %v14932_v32, %v5864_v17 }
0x1479   :  { %v5804_v12 = vadd.f32 1e-05, %v5772_v8  ;;  %v5773_v45 = vmul.f32 0.0078125, %v5723_v39  ;;  %5756 = vadd.xlane.f32.xlu0 %v5694_v53  ;;  %v5695_v16 = vmul.f32 %v15014_v59, %v15014_v59  ;;  %6266 = vmatprep.mubr.bf16.mxu1 %v17908_v42 }
0x147a   :  { %v5725_v2 = vpop.xlane.xlu0 %5724  ;;  %6459 = vmatprep.mubr.bf16.mxu0 %v17908_v42  ;;  %v5903_v58 = vmul.f32 %v14932_v32, %v5865_v43  ;;  %v5940_v17 = vadd.f32 %v14950_v48, %v5902_v54 }
0x147b   :  { %10588 = vrsqrt.f32 %v5804_v12  ;;  %v5805_v52 = vadd.f32 1e-05, %v5773_v45  ;;  %v5774_v62 = vmul.f32 0.0078125, %v5725_v2  ;;  %5758 = vadd.xlane.f32.xlu1 %v5695_v16 }
0x147c   :  { %v5727_v63 = vpop.xlane.xlu1 %5726  ;;  %v5941_v41 = vadd.f32 %v14950_v48, %v5903_v58 }
0x147d   :  { %v10585_v37 = vpop.eup %10584  ;;  %10590 = vrsqrt.f32 %v5805_v52  ;;  %v5806_v46 = vadd.f32 1e-05, %v5774_v62  ;;  %v5775_v49 = vmul.f32 0.0078125, %v5727_v63 }
0x147e   :  { %v5968_v8 = vpack.c.bf16 %v5941_v41, %v5940_v17  ;;  %v5866_v53 = vmul.f32 %v10585_v37, %v14844_v34 }
0x147f   :  { %v10587_v39 = vpop.eup %10586  ;;  %10592 = vrsqrt.f32 %v5806_v46  ;;  %v5807_v38 = vadd.f32 1e-05, %v5775_v49 }
0x1480   :  { %6267 = vmatmul.mubr.bf16.gmra.mrb[208].mxu1 %v5968_v8  ;;  %6460 = vmatmul.mubr.bf16.gmra.mrb[208].mxu0 %v5968_v8  ;;  %v5867_v43 = vmul.f32 %v10587_v39, %v14852_v23  ;;  %v5904_v12 = vmul.f32 %v14932_v32, %v5866_v53 }
0x1481   :  { %10594 = vrsqrt.f32 %v5807_v38  ;;  %6276 = vmatprep.mubr.bf16.mxu1 %v17908_v42  ;;  %6469 = vmatprep.mubr.bf16.mxu0 %v17908_v42 }
0x1482   :  { %v5905_v54 = vmul.f32 %v14932_v32, %v5867_v43  ;;  %v5942_v45 = vadd.f32 %v14950_v48, %v5904_v12  ;;  %v9957_v43 = vld [vmem:[%s17153_s11 + $0xc0] sm:$0xff]  }
0x1483   :  { %v9958_v12 = vld [vmem:[%s17153_s11] sm:$0xff]   ;;  %9064 = vmatprep.subr.bf16.mxu0 %v9957_v43 }
0x1484   :  { %v5943_v34 = vadd.f32 %v14950_v48, %v5905_v54  ;;  %v9959_v54 = vld [vmem:[%s17153_s11 + $0x80] sm:$0xff]  }
0x1485   :  { %v10589_v16 = vpop.eup %10588  ;;  %9065 = vmatpush3.bf16.msra.mxu0 %v9959_v54  ;;  %v9973_v43 = vld [vmem:[%s17153_s11 + $0xe0] sm:$0xff]  }
0x1486   :  { %v5969_v2 = vpack.c.bf16 %v5943_v34, %v5942_v45  ;;  %v5868_v58 = vmul.f32 %v10589_v16, %v14868_v29  ;;  %v9960_v45 = vld [vmem:[%s17153_s11 + $0x48] sm:$0xff]  }
0x1487   :  { %v10591_v52 = vpop.eup %10590  ;;  %v9961_v34 = vld [vmem:[%s17153_s11 + $0xc8] sm:$0xff]  }
0x1488   :  { %6277 = vmatmul.mubr.bf16.gmra.mrb[212].mxu1 %v5969_v2  ;;  %6470 = vmatmul.mubr.bf16.gmra.mrb[212].mxu0 %v5969_v2  ;;  %v5869_v23 = vmul.f32 %v10591_v52, %v14876_v56  ;;  %v5906_v38 = vmul.f32 %v14932_v32, %v5868_v58  ;;  %v9962_v16 = vld [vmem:[%s17153_s11 + $0x8] sm:$0xff]   ;;  %v9964_v58 = vld [vmem:[%s17153_s11 + $0x50] sm:$0xff]  }
0x1489   :  { %v10593_v62 = vpop.eup %10592  ;;  %6286 = vmatprep.mubr.bf16.mxu1 %v17908_v42  ;;  %6479 = vmatprep.mubr.bf16.mxu0 %v17908_v42  ;;  %v9963_v2 = vld [vmem:[%s17153_s11 + $0x88] sm:$0xff]   ;;  %v9965_v52 = vld [vmem:[%s17153_s11 + $0xd0] sm:$0xff]  }
0x148a   :  { %v5907_v63 = vmul.f32 %v14932_v32, %v5869_v23  ;;  %v5944_v41 = vadd.f32 %v14950_v48, %v5906_v38  ;;  %v5870_v29 = vmul.f32 %v10593_v62, %v14885_v27  ;;  %v9956_v27 = vld [vmem:[%s17153_s11 + $0x40] sm:$0xff]   ;;  %9066 = vmatprep.subr.bf16.mxu0 %v9961_v34  ;;  %v9966_v23 = vld [vmem:[%s17153_s11 + $0x10] sm:$0xff]  }
0x148b   :  { %v10595_v17 = vpop.eup %10594  ;;  %8952 = vmatprep.subr.bf16.mxu1 %v9956_v27  ;;  %9067 = vmatpush3.bf16.msra.mxu0 %v9963_v2  ;;  %v9967_v38 = vld [vmem:[%s17153_s11 + $0x90] sm:$0xff]   ;;  %v9975_v34 = vld [vmem:[%s17153_s11 + $0xa0] sm:$0xff]   ;;  %v9976_v2 = vld [vmem:[%s17153_s11 + $0x68] sm:$0xff]  }
0x148c   :  { %v5945_v37 = vadd.f32 %v14950_v48, %v5907_v63  ;;  %v5871_v46 = vmul.f32 %v10595_v17, %v14891_v10  ;;  %v5908_v8 = vmul.f32 %v14932_v32, %v5870_v29  ;;  %8953 = vmatpush3.bf16.msra.mxu1 %v9958_v12  ;;  %9068 = vmatprep.subr.bf16.mxu0 %v9965_v52  ;;  %v9978_v52 = vld [vmem:[%s17153_s11 + $0x28] sm:$0xff]  }
0x148d   :  { %8954 = vmatprep.subr.bf16.mxu1 %v9960_v45  ;;  %v9974_v45 = vld [vmem:[%s17153_s11 + $0x20] sm:$0xff]  }
0x148e   :  { %v5970_v49 = vpack.c.bf16 %v5945_v37, %v5944_v41  ;;  %v5909_v56 = vmul.f32 %v14932_v32, %v5871_v46  ;;  %v5946_v39 = vadd.f32 %v14950_v48, %v5908_v8  ;;  %v9968_v41 = vld [vmem:[%s17153_s11 + $0x58] sm:$0xff]  }
0x148f   :  { %9069 = vmatpush3.bf16.msra.mxu0 %v9967_v38  ;;  %v9969_v37 = vld [vmem:[%s17153_s11 + $0xd8] sm:$0xff]  }
0x1490   :  { %6287 = vmatmul.mubr.bf16.gmra.mrb[216].mxu1 %v5970_v49  ;;  %6480 = vmatmul.mubr.bf16.gmra.mrb[216].mxu0 %v5970_v49  ;;  %v5947_v53 = vadd.f32 %v14950_v48, %v5909_v56  ;;  %v9970_v49 = vld [vmem:[%s17153_s11 + $0x18] sm:$0xff]  }
0x1491   :  { %6296 = vmatprep.mubr.bf16.mxu1 %v17908_v42  ;;  %6489 = vmatprep.mubr.bf16.mxu0 %v17908_v42  ;;  %v9971_v56 = vld [vmem:[%s17153_s11 + $0x98] sm:$0xff]  }
0x1492   :  { %v5971_v10 = vpack.c.bf16 %v5947_v53, %v5946_v39  ;;  %8955 = vmatpush3.bf16.msra.mxu1 %v9962_v16  ;;  %9070 = vmatprep.subr.bf16.mxu0 %v9969_v37 }
0x1493   :  { %8956 = vmatprep.subr.bf16.mxu1 %v9964_v58  ;;  %9071 = vmatpush3.bf16.msra.mxu0 %v9971_v56  ;;  %v9977_v58 = vld [vmem:[%s17153_s11 + $0xe8] sm:$0xff]   ;;  %v9983_v56 = vld [vmem:[%s17153_s11 + $0xb0] sm:$0xff]  }
0x1494   :  { %9072 = vmatprep.subr.bf16.mxu0 %v9973_v43  ;;  %v9984_v43 = vld [vmem:[%s17153_s11 + $0x78] sm:$0xff]  }
0x1496   :  { %8957 = vmatpush3.bf16.msra.mxu1 %v9966_v23  ;;  %v9979_v23 = vld [vmem:[%s17153_s11 + $0xa8] sm:$0xff]  }
0x1497   :  { %8958 = vmatprep.subr.bf16.mxu1 %v9968_v41  ;;  %9073 = vmatpush3.bf16.msra.mxu0 %v9975_v34  ;;  %v9981_v41 = vld [vmem:[%s17153_s11 + $0xf0] sm:$0xff]  }
0x1498   :  { %6297 = vmatmul.mubr.bf16.gmra.mrb[220].mxu1 %v5971_v10  ;;  %6490 = vmatmul.mubr.bf16.gmra.mrb[220].mxu0 %v5971_v10  ;;  %v9972_v10 = vld [vmem:[%s17153_s11 + $0x60] sm:$0xff]  }
0x1499   :  { %6306 = vmatprep.mubr.bf16.mxu1 %v17908_v42  ;;  %6499 = vmatprep.mubr.bf16.mxu0 %v17908_v42 }
0x149a   :  { %8959 = vmatpush3.bf16.msra.mxu1 %v9970_v49  ;;  %9074 = vmatprep.subr.bf16.mxu0 %v9977_v58  ;;  %v9982_v49 = vld [vmem:[%s17153_s11 + $0x30] sm:$0xff]  }
0x149b   :  { %8960 = vmatprep.subr.bf16.mxu1 %v9972_v10  ;;  %9075 = vmatpush3.bf16.msra.mxu0 %v9979_v23 }
0x149c   :  { %9076 = vmatprep.subr.bf16.mxu0 %v9981_v41 }
0x149e   :  { %8961 = vmatpush3.bf16.msra.mxu1 %v9974_v45 }
0x149f   :  { %8962 = vmatprep.subr.bf16.mxu1 %v9976_v2  ;;  %9077 = vmatpush3.bf16.msra.mxu0 %v9983_v56 }
0x14a2   :  { %8963 = vmatpush3.bf16.msra.mxu1 %v9978_v52 }
0x14b2   :  { %v5729_v62 = vpop.xlane.xlu0 %5728 }
0x14b3   :  { %v5776_v63 = vmul.f32 0.0078125, %v5729_v62 }
0x14b4   :  { %v5731_v17 = vpop.xlane.xlu1 %5730 }
0x14b5   :  { %v5808_v29 = vadd.f32 1e-05, %v5776_v63  ;;  %v5777_v46 = vmul.f32 0.0078125, %v5731_v17  ;;  %v9980_v17 = vld [vmem:[%s17153_s11 + $0x70] sm:$0xff]  }
0x14b6   :  { %v5733_v8 = vpop.xlane.xlu0 %5732  ;;  %8964 = vmatprep.subr.bf16.mxu1 %v9980_v17 }
0x14b7   :  { %10596 = vrsqrt.f32 %v5808_v29  ;;  %v5809_v53 = vadd.f32 1e-05, %v5777_v46  ;;  %v5778_v39 = vmul.f32 0.0078125, %v5733_v8  ;;  %8965 = vmatpush3.bf16.msra.mxu1 %v9982_v49 }
0x14b8   :  { %v5735_v27 = vpop.xlane.xlu1 %5734  ;;  %8966 = vmatprep.subr.bf16.mxu1 %v9984_v43 }
0x14b9   :  { %10598 = vrsqrt.f32 %v5809_v53  ;;  %v5810_v12 = vadd.f32 1e-05, %v5778_v39  ;;  %v5779_v54 = vmul.f32 0.0078125, %v5735_v27 }
0x14bb   :  { %10600 = vrsqrt.f32 %v5810_v12  ;;  %v5811_v16 = vadd.f32 1e-05, %v5779_v54  ;;  %v9985_v12 = vld [vmem:[%s17153_s11 + $0xf8] sm:$0xff]  }
0x14bc   :  { %v9986_v54 = vld [vmem:[%s17153_s11 + $0x38] sm:$0xff]   ;;  %9078 = vmatprep.subr.bf16.mxu0 %v9985_v12 }
0x14bd   :  { %10602 = vrsqrt.f32 %v5811_v16  ;;  %8967 = vmatpush3.bf16.msra.mxu1 %v9986_v54 }
0x14be   :  { %v5737_v38 = vpop.xlane.xlu0 %5736 }
0x14bf   :  { %v5780_v62 = vmul.f32 0.0078125, %v5737_v38 }
0x14c0   :  { %v5739_v63 = vpop.xlane.xlu1 %5738 }
0x14c1   :  { %v10597_v37 = vpop.eup %10596  ;;  %v5812_v29 = vadd.f32 1e-05, %v5780_v62  ;;  %v5781_v46 = vmul.f32 0.0078125, %v5739_v63 }
0x14c2   :  { %v5872_v8 = vmul.f32 %v10597_v37, %v14900_v30 }
0x14c3   :  { %v10599_v53 = vpop.eup %10598  ;;  %10604 = vrsqrt.f32 %v5812_v29  ;;  %v5813_v39 = vadd.f32 1e-05, %v5781_v46 }
0x14c4   :  { %v5873_v27 = vmul.f32 %v10599_v53, %v14903_v5  ;;  %v5910_v10 = vmul.f32 %v14932_v32, %v5872_v8  ;;  %v9987_v5 = vld [vmem:[%s17153_s11 + $0xb8] sm:$0xff]  }
0x14c5   :  { %v10601_v30 = vpop.eup %10600  ;;  %10606 = vrsqrt.f32 %v5813_v39  ;;  %9079 = vmatpush3.bf16.msra.mxu0 %v9987_v5 }
0x14c6   :  { %v5741_v45 = vpop.xlane.xlu0 %5740  ;;  %v5911_v34 = vmul.f32 %v14932_v32, %v5873_v27  ;;  %v5948_v52 = vadd.f32 %v14950_v48, %v5910_v10  ;;  %v5874_v38 = vmul.f32 %v10601_v30, %v14908_v31 }
0x14c7   :  { %v10603_v16 = vpop.eup %10602  ;;  %v5782_v2 = vmul.f32 0.0078125, %v5741_v45 }
0x14c8   :  { %v5743_v58 = vpop.xlane.xlu1 %5742  ;;  %v5949_v23 = vadd.f32 %v14950_v48, %v5911_v34  ;;  %v5875_v62 = vmul.f32 %v10603_v16, %v14913_v47  ;;  %v5912_v46 = vmul.f32 %v14932_v32, %v5874_v38 }
0x14c9   :  { %v5814_v63 = vadd.f32 1e-05, %v5782_v2  ;;  %v5783_v17 = vmul.f32 0.0078125, %v5743_v58 }
0x14ca   :  { %v5972_v41 = vpack.c.bf16 %v5949_v23, %v5948_v52  ;;  %v5913_v37 = vmul.f32 %v14932_v32, %v5875_v62  ;;  %v5950_v56 = vadd.f32 %v14950_v48, %v5912_v46 }
0x14cb   :  { %10608 = vrsqrt.f32 %v5814_v63  ;;  %v5815_v29 = vadd.f32 1e-05, %v5783_v17 }
0x14cc   :  { %6307 = vmatmul.mubr.bf16.gmra.mrb[224].mxu1 %v5972_v41  ;;  %6500 = vmatmul.mubr.bf16.gmra.mrb[224].mxu0 %v5972_v41  ;;  %v5951_v31 = vadd.f32 %v14950_v48, %v5913_v37 }
0x14cd   :  { %v10605_v49 = vpop.eup %10604  ;;  %10610 = vrsqrt.f32 %v5815_v29  ;;  %6316 = vmatprep.mubr.bf16.mxu1 %v17908_v42  ;;  %6509 = vmatprep.mubr.bf16.mxu0 %v17908_v42 }
0x14ce   :  { %v5876_v8 = vmul.f32 %v10605_v49, %v14920_v0  ;;  %v5973_v39 = vpack.c.bf16 %v5951_v31, %v5950_v56 }
0x14cf   :  { %v10607_v47 = vpop.eup %10606 }
0x14d0   :  { %v5877_v53 = vmul.f32 %v10607_v47, %v14923_v25  ;;  %v5914_v10 = vmul.f32 %v14932_v32, %v5876_v8 }
0x14d2   :  { %v5915_v27 = vmul.f32 %v14932_v32, %v5877_v53  ;;  %v5952_v54 = vadd.f32 %v14950_v48, %v5914_v10 }
0x14d4   :  { %6317 = vmatmul.mubr.bf16.gmra.mrb[228].mxu1 %v5973_v39  ;;  %6510 = vmatmul.mubr.bf16.gmra.mrb[228].mxu0 %v5973_v39  ;;  %v5953_v12 = vadd.f32 %v14950_v48, %v5915_v27 }
0x14d5   :  { %v10609_v43 = vpop.eup %10608  ;;  %6326 = vmatprep.mubr.bf16.mxu1 %v17908_v42  ;;  %6519 = vmatprep.mubr.bf16.mxu0 %v17908_v42 }
0x14d6   :  { %v5878_v0 = vmul.f32 %v10609_v43, %v14935_v14  ;;  %v5974_v5 = vpack.c.bf16 %v5953_v12, %v5952_v54 }
0x14d7   :  { %v10611_v30 = vpop.eup %10610 }
0x14d8   :  { %v5879_v25 = vmul.f32 %v10611_v30, %v14939_v15  ;;  %v5916_v34 = vmul.f32 %v14932_v32, %v5878_v0 }
0x14da   :  { %v5917_v45 = vmul.f32 %v14932_v32, %v5879_v25  ;;  %v5954_v2 = vadd.f32 %v14950_v48, %v5916_v34 }
0x14dc   :  { %6327 = vmatmul.mubr.bf16.gmra.mrb[232].mxu1 %v5974_v5  ;;  %6520 = vmatmul.mubr.bf16.gmra.mrb[232].mxu0 %v5974_v5  ;;  %v5955_v16 = vadd.f32 %v14950_v48, %v5917_v45 }
0x14dd   :  { %6336 = vmatprep.mubr.bf16.mxu1 %v17908_v42  ;;  %6529 = vmatprep.mubr.bf16.mxu0 %v17908_v42 }
0x14de   :  { %v5975_v58 = vpack.c.bf16 %v5955_v16, %v5954_v2 }
0x14e4   :  { %6337 = vmatmul.mubr.bf16.gmra.mrb[236].mxu1 %v5975_v58  ;;  %6530 = vmatmul.mubr.bf16.gmra.mrb[236].mxu0 %v5975_v58 }
0x14e5   :  { %6346 = vmatprep.mubr.bf16.mxu1 %v17908_v42  ;;  %6539 = vmatprep.mubr.bf16.mxu0 %v17908_v42 }
0x14ee   :  { %v5745_v14 = vpop.xlane.xlu0 %5744 }
0x14ef   :  { %v5784_v15 = vmul.f32 0.0078125, %v5745_v14 }
0x14f0   :  { %v5747_v52 = vpop.xlane.xlu1 %5746 }
0x14f1   :  { %v5816_v23 = vadd.f32 1e-05, %v5784_v15  ;;  %v5785_v38 = vmul.f32 0.0078125, %v5747_v52 }
0x14f3   :  { %10612 = vrsqrt.f32 %v5816_v23  ;;  %v5817_v62 = vadd.f32 1e-05, %v5785_v38 }
0x14f5   :  { %10614 = vrsqrt.f32 %v5817_v62  ;;  %v18112_v62 = vld [vmem:[#allocation2_spill] sm:$0xff] }
0x14f6   :  { %v5749_v63 = vpop.xlane.xlu0 %5748 }
0x14f7   :  { %v5786_v17 = vmul.f32 0.0078125, %v5749_v63  ;;  %v6028_v63 = vsub.s32 3, %v18112_v62 }
0x14f8   :  { %v5751_v41 = vpop.xlane.xlu1 %5750 }
0x14f9   :  { %v5818_v37 = vadd.f32 1e-05, %v5786_v17  ;;  %v5787_v29 = vmul.f32 0.0078125, %v5751_v41  ;;  %v18113_v41 = vsub.s32 0, %v18112_v62 }
0x14fb   :  { %10616 = vrsqrt.f32 %v5818_v37  ;;  %v5819_v46 = vadd.f32 1e-05, %v5787_v29  ;;  %v18114_v29 = vsub.s32 2, %v18112_v62 }
0x14fd   :  { %v10613_v49 = vpop.eup %10612  ;;  %10618 = vrsqrt.f32 %v5819_v46 }
0x14fe   :  { %v5753_v31 = vpop.xlane.xlu0 %5752  ;;  %v5880_v47 = vmul.f32 %v10613_v49, %v14974_v26 }
0x14ff   :  { %v10615_v56 = vpop.eup %10614  ;;  %v5788_v8 = vmul.f32 0.0078125, %v5753_v31 }
0x1500   :  { %v5755_v53 = vpop.xlane.xlu1 %5754  ;;  %v5881_v39 = vmul.f32 %v10615_v56, %v14977_v55  ;;  %v5918_v27 = vmul.f32 %v14932_v32, %v5880_v47  ;;  %v18115_v47 = vsub.s32 1, %v18112_v62 }
0x1501   :  { %v5820_v10 = vadd.f32 1e-05, %v5788_v8  ;;  %v5789_v43 = vmul.f32 0.0078125, %v5755_v53 }
0x1502   :  { %v5919_v12 = vmul.f32 %v14932_v32, %v5881_v39  ;;  %v5956_v54 = vadd.f32 %v14950_v48, %v5918_v27 }
0x1503   :  { %v5821_v30 = vadd.f32 1e-05, %v5789_v43  ;;  %10620 = vrsqrt.f32 %v5820_v10 }
0x1504   :  { %v5957_v0 = vadd.f32 %v14950_v48, %v5919_v12 }
0x1505   :  { %v10617_v25 = vpop.eup %10616  ;;  %10622 = vrsqrt.f32 %v5821_v30 }
0x1506   :  { %v5976_v26 = vpack.c.bf16 %v5957_v0, %v5956_v54  ;;  %v5882_v5 = vmul.f32 %v10617_v25, %v14984_v4  ;;  %v5757_v2 = vpop.xlane.xlu0 %5756  ;;  %v6012_v4 = vld [vmem:[%s17154_s10] sm:$0xf] }
0x1507   :  { %v10619_v45 = vpop.eup %10618  ;;  %v5790_v38 = vmul.f32 0.0078125, %v5757_v2  ;;  %v15201_v37 = vrot.slane %v6012_v4, %v18113_v41  ;;  %v15205_v46 = vrot.slane %v6012_v4, %v18114_v29  ;;  %v15213_v56 = vrot.slane %v6012_v4, %v18115_v47 }
0x1508   :  { %6347 = vmatmul.mubr.bf16.gmra.mrb[240].mxu1 %v5976_v26  ;;  %6540 = vmatmul.mubr.bf16.gmra.mrb[240].mxu0 %v5976_v26  ;;  %v5883_v55 = vmul.f32 %v10619_v45, %v14987_v60  ;;  %v5920_v34 = vmul.f32 %v14932_v32, %v5882_v5  ;;  %v5759_v15 = vpop.xlane.xlu1 %5758  ;;  %v15215_v27 = vrot.slane %v6012_v4, %v6028_v63 }
0x1509   :  { %6356 = vmatprep.mubr.bf16.mxu1 %v17908_v42  ;;  %6549 = vmatprep.mubr.bf16.mxu0 %v17908_v42  ;;  %v5791_v17 = vmul.f32 0.0078125, %v5759_v15  ;;  %18116 = vst [vmem:[#allocation76_spill] sm:$0xff] %v15213_v56  ;;  %v5822_v8 = vadd.f32 1e-05, %v5790_v38 }
0x150a   :  { %v5921_v16 = vmul.f32 %v14932_v32, %v5883_v55  ;;  %v5958_v58 = vadd.f32 %v14950_v48, %v5920_v34  ;;  %18117 = vst [vmem:[#allocation34_spill] sm:$0xff] %v15215_v27 }
0x150b   :  { %v5823_v10 = vadd.f32 1e-05, %v5791_v17  ;;  %10624 = vrsqrt.f32 %v5822_v8 }
0x150c   :  { %v5959_v14 = vadd.f32 %v14950_v48, %v5921_v16 }
0x150d   :  { %v10621_v52 = vpop.eup %10620  ;;  %10626 = vrsqrt.f32 %v5823_v10 }
0x150e   :  { %v5977_v60 = vpack.c.bf16 %v5959_v14, %v5958_v58  ;;  %v5884_v49 = vmul.f32 %v10621_v52, %v14994_v57 }
0x150f   :  { %v10623_v23 = vpop.eup %10622 }
0x1510   :  { %6357 = vmatmul.mubr.bf16.gmra.mrb[244].mxu1 %v5977_v60  ;;  %6550 = vmatmul.mubr.bf16.gmra.mrb[244].mxu0 %v5977_v60  ;;  %v5885_v31 = vmul.f32 %v10623_v23, %v14998_v3  ;;  %v5922_v3 = vmul.f32 %v14932_v32, %v5884_v49 }
0x1511   :  { %6366 = vmatprep.mubr.bf16.mxu1 %v17908_v42  ;;  %6559 = vmatprep.mubr.bf16.mxu0 %v17908_v42 }
0x1512   :  { %v5923_v25 = vmul.f32 %v14932_v32, %v5885_v31  ;;  %v5960_v60 = vadd.f32 %v14950_v48, %v5922_v3 }
0x1513   :  { %v6228_v53 = vpop.f32.mrb[192].mxu1  ;;  %v6421_v39 = vpop.f32.mrb[192].mxu0 }
0x1514   :  { %v6229_v43 = vadd.f32 %v6228_v53, %v15201_v37  ;;  %v6422_v12 = vadd.f32 %v6421_v39, %v15205_v46  ;;  %v6230_v30 = vpop.f32.mrb[193].mxu1  ;;  %v6423_v54 = vpop.f32.mrb[193].mxu0  ;;  %v5961_v23 = vadd.f32 %v14950_v48, %v5923_v25 }
0x1515   :  { %v6232_v0 = vpop.f32.mrb[194].mxu1  ;;  %v6425_v57 = vpop.f32.mrb[194].mxu0  ;;  %v15222_v45 = vadd.f32 %v6230_v30, %v15213_v56  ;;  %v15225_v55 = vadd.f32 %v6423_v54, %v15215_v27 }
0x1516   :  { %v6708_v26 = vmul.f32 0.044715, %v6229_v43  ;;  %v6710_v5 = vmul.f32 0.044715, %v6422_v12  ;;  %v6233_v34 = vadd.f32 %v6232_v0, %v15201_v37  ;;  %v6426_v16 = vadd.f32 %v6425_v57, %v15205_v46  ;;  %v6234_v2 = vpop.f32.mrb[195].mxu1  ;;  %v6427_v58 = vpop.f32.mrb[195].mxu0 }
0x1517   :  { %v15230_v32 = vadd.f32 %v6234_v2, %v15213_v56  ;;  %v15233_v52 = vadd.f32 %v6427_v58, %v15215_v27  ;;  %v6709_v63 = vmul.f32 0.044715, %v15222_v45  ;;  %v15238_v41 = vmul.f32 0.5, %v6229_v43 }
0x1518   :  { %v6836_v14 = vmul.f32 %v6708_v26, %v6229_v43  ;;  %v6838_v15 = vmul.f32 %v6710_v5, %v6422_v12  ;;  %v6712_v4 = vmul.f32 0.044715, %v6233_v34  ;;  %v6714_v17 = vmul.f32 0.044715, %v6426_v16 }
0x1519   :  { %v15240_v29 = vmul.f32 0.5, %v6422_v12  ;;  %v6711_v49 = vmul.f32 0.044715, %v15225_v55  ;;  %v6713_v30 = vmul.f32 0.044715, %v15230_v32  ;;  %v5978_v3 = vpack.c.bf16 %v5961_v23, %v5960_v60 }
0x151a   :  { %v6964_v38 = vmul.f32 %v6836_v14, %v6229_v43  ;;  %v6966_v62 = vmul.f32 %v6838_v15, %v6422_v12  ;;  %v6840_v31 = vmul.f32 %v6712_v4, %v6233_v34  ;;  %v6842_v10 = vmul.f32 %v6714_v17, %v6426_v16 }
0x151b   :  { %v6238_v47 = vpop.f32.mrb[196].mxu1  ;;  %v6431_v8 = vpop.f32.mrb[196].mxu0  ;;  %v6715_v57 = vmul.f32 0.044715, %v15233_v52  ;;  %v6837_v14 = vmul.f32 %v6709_v63, %v15222_v45  ;;  %v6839_v4 = vmul.f32 %v6711_v49, %v15225_v55  ;;  %6367 = vmatmul.mubr.bf16.gmra.mrb[248].mxu1 %v5978_v3  ;;  %6560 = vmatmul.mubr.bf16.gmra.mrb[248].mxu0 %v5978_v3  ;;  %v15250_v60 = vmul.f32 0.5, %v6426_v16 }
0x151c   :  { %v7092_v53 = vadd.f32 %v6964_v38, %v6229_v43  ;;  %v7094_v39 = vadd.f32 %v6966_v62, %v6422_v12  ;;  %v6240_v48 = vpop.f32.mrb[197].mxu1  ;;  %v6433_v54 = vpop.f32.mrb[197].mxu0  ;;  %v6968_v0 = vmul.f32 %v6840_v31, %v6233_v34  ;;  %v6239_v25 = vadd.f32 %v6238_v47, %v15201_v37  ;;  %6376 = vmatprep.mubr.bf16.mxu1 %v17908_v42 }
0x151d   :  { %v6242_v26 = vpop.f32.mrb[198].mxu1  ;;  %v6435_v5 = vpop.f32.mrb[198].mxu0  ;;  %v6970_v15 = vmul.f32 %v6842_v10, %v6426_v16  ;;  %v15248_v38 = vmul.f32 0.5, %v6233_v34  ;;  %v6432_v31 = vadd.f32 %v6431_v8, %v15205_v46  ;;  %6569 = vmatprep.mubr.bf16.mxu0 %v17908_v42  ;;  %v6841_v49 = vmul.f32 %v6713_v30, %v15230_v32 }
0x151e   :  { %v7220_v2 = vmul.f32 0.7978846, %v7092_v53  ;;  %v7222_v58 = vmul.f32 0.7978846, %v7094_v39  ;;  %v6244_v43 = vpop.f32.mrb[199].mxu1  ;;  %v6437_v12 = vpop.f32.mrb[199].mxu0  ;;  %v7096_v62 = vadd.f32 %v6968_v0, %v6233_v34  ;;  %v15257_v39 = vmul.f32 %v6837_v14, %v15222_v45 }
0x151f   :  { %v6716_v17 = vmul.f32 0.044715, %v6239_v25  ;;  %v7098_v23 = vadd.f32 %v6970_v15, %v6426_v16  ;;  %v10625_v63 = vpop.eup %10624  ;;  %v6843_v0 = vmul.f32 %v6715_v57, %v15233_v52  ;;  %v6718_v16 = vmul.f32 0.044715, %v6432_v31 }
0x1520   :  { %10628 = vtanh.f32 %v7220_v2  ;;  %v7224_v47 = vmul.f32 0.7978846, %v7096_v62  ;;  %v10627_v34 = vpop.eup %10626  ;;  %v15261_v3 = vadd.f32 %v6240_v48, %v15213_v56  ;;  %v6243_v42 = vadd.f32 %v6242_v26, %v15201_v37 }
0x1521   :  { %10630 = vtanh.f32 %v7222_v58  ;;  %v6844_v53 = vmul.f32 %v6716_v17, %v6239_v25  ;;  %v7226_v10 = vmul.f32 0.7978846, %v7098_v23  ;;  %v6846_v30 = vmul.f32 %v6718_v16, %v6432_v31 }
0x1522   :  { %10632 = vtanh.f32 %v7224_v47  ;;  %v15269_v14 = vadd.f32 %v6433_v54, %v15215_v27  ;;  %v15272_v15 = vadd.f32 %v6435_v5, %v15205_v46  ;;  %v15279_v48 = vmul.f32 %v6839_v4, %v15225_v55 }
0x1523   :  { %v6972_v8 = vmul.f32 %v6844_v53, %v6239_v25  ;;  %v15264_v2 = vpop.f32.mrb[200].mxu1  ;;  %v15266_v58 = vpop.f32.mrb[200].mxu0  ;;  %10634 = vtanh.f32 %v7226_v10  ;;  %v15282_v26 = vmul.f32 %v6841_v49, %v15230_v32  ;;  %v6720_v23 = vmul.f32 0.044715, %v6243_v42 }
0x1524   :  { %v15274_v57 = vpop.f32.mrb[201].mxu1  ;;  %v15276_v62 = vpop.f32.mrb[201].mxu0  ;;  %v15289_v54 = vmul.f32 %v6843_v0, %v15233_v52  ;;  %v15291_v5 = vmul.f32 0.5, %v6239_v25  ;;  %v6974_v10 = vmul.f32 %v6846_v30, %v6432_v31  ;;  %v6722_v16 = vmul.f32 0.044715, %v15272_v15 }
0x1525   :  { %v7100_v17 = vadd.f32 %v6972_v8, %v6239_v25  ;;  %v15284_v47 = vpop.f32.mrb[202].mxu1  ;;  %v15286_v53 = vpop.f32.mrb[202].mxu0  ;;  %v6717_v8 = vmul.f32 0.044715, %v15261_v3  ;;  %v6848_v28 = vmul.f32 %v6720_v23, %v6243_v42  ;;  %v15300_v40 = vadd.f32 %v6244_v43, %v15213_v56 }
0x1526   :  { %v15294_v7 = vpop.f32.mrb[203].mxu1  ;;  %v15296_v4 = vpop.f32.mrb[203].mxu0  ;;  %v15302_v20 = vmul.f32 0.5, %v6432_v31  ;;  %v7102_v0 = vadd.f32 %v6974_v10, %v6432_v31  ;;  %v6719_v25 = vmul.f32 0.044715, %v15269_v14  ;;  %v6850_v30 = vmul.f32 %v6722_v16, %v15272_v15 }
0x1527   :  { %v7228_v49 = vmul.f32 0.7978846, %v7100_v17  ;;  %v6976_v9 = vmul.f32 %v6848_v28, %v6243_v42  ;;  %v15307_v50 = vadd.f32 %v6437_v12, %v15215_v27  ;;  %v5886_v17 = vmul.f32 %v10625_v63, %v15010_v13  ;;  %v10916_v28 = vld [vmem:[%s17151_s7] ss:$0 sm:$0xff] }
0x1528   :  { %v7230_v24 = vmul.f32 0.7978846, %v7102_v0  ;;  %v6978_v23 = vmul.f32 %v6850_v30, %v15272_v15  ;;  %v6721_v43 = vmul.f32 0.044715, %v15300_v40  ;;  %v5887_v22 = vmul.f32 %v10627_v34, %v15014_v59 }
0x1529   :  { %10636 = vtanh.f32 %v7228_v49  ;;  %v6845_v36 = vmul.f32 %v6717_v8, %v15261_v3  ;;  %v7104_v16 = vadd.f32 %v6976_v9, %v6243_v42  ;;  %v5924_v12 = vmul.f32 %v10916_v28, %v5886_v17 }
0x152a   :  { %v10629_v51 = vpop.eup %10628  ;;  %10638 = vtanh.f32 %v7230_v24  ;;  %v6847_v13 = vmul.f32 %v6719_v25, %v15269_v14  ;;  %v15318_v63 = vmul.f32 0.5, %v6243_v42  ;;  %v7106_v49 = vadd.f32 %v6978_v23, %v15272_v15  ;;  %v10917_v42 = vld [vmem:[%s17152_s8] ss:$0 sm:$0xff] }
0x152b   :  { %v10631_v31 = vpop.eup %10630  ;;  %v7476_v10 = vadd.f32 1.0, %v10629_v51  ;;  %v7232_v59 = vmul.f32 0.7978846, %v7104_v16  ;;  %v6723_v51 = vmul.f32 0.044715, %v15307_v50  ;;  %v5925_v34 = vmul.f32 %v10916_v28, %v5887_v22 }
0x152c   :  { %v10633_v0 = vpop.eup %10632  ;;  %v7478_v30 = vadd.f32 1.0, %v10631_v31  ;;  %v7234_v1 = vmul.f32 0.7978846, %v7106_v49  ;;  %v6849_v24 = vmul.f32 %v6721_v43, %v15300_v40  ;;  %v5962_v25 = vadd.f32 %v10917_v42, %v5924_v12 }
0x152d   :  { %v10635_v8 = vpop.eup %10634  ;;  %v15323_v9 = vmul.f32 %v7476_v10, %v15238_v41  ;;  %v7480_v11 = vadd.f32 1.0, %v10633_v0  ;;  %10640 = vtanh.f32 %v7232_v59  ;;  %v5963_v23 = vadd.f32 %v10917_v42, %v5925_v34 }
0x152e   :  { %v7482_v17 = vadd.f32 1.0, %v10635_v8  ;;  %10642 = vtanh.f32 %v7234_v1  ;;  %v6249_v22 = vadd.f32 %v15264_v2, %v15201_v37  ;;  %v6442_v41 = vadd.f32 %v15266_v58, %v15205_v46 }
0x152f   :  { %v15330_v31 = vmul.f32 %v7480_v11, %v15248_v38  ;;  %v15337_v43 = vmul.f32 %v7478_v30, %v15240_v29  ;;  %v5979_v16 = vpack.c.bf16 %v5963_v23, %v5962_v25  ;;  %v15344_v28 = vadd.f32 %v15274_v57, %v15213_v56 }
0x1530   :  { %v15340_v10 = vmul.f32 %v7482_v17, %v15250_v60  ;;  %v6594_v1 = vmul.f32 0.5, %v15272_v15  ;;  %v6851_v38 = vmul.f32 %v6723_v51, %v15307_v50  ;;  %v6724_v2 = vmul.f32 0.044715, %v6249_v22 }
0x1531   :  { %v15353_v60 = vmul.f32 %v6845_v36, %v15261_v3  ;;  %6377 = vmatmul.mubr.bf16.gmra.mrb[252].mxu1 %v5979_v16  ;;  %6570 = vmatmul.mubr.bf16.gmra.mrb[252].mxu0 %v5979_v16  ;;  %v6726_v12 = vmul.f32 0.044715, %v6442_v41  ;;  %v15357_v57 = vadd.f32 %v15276_v62, %v15215_v27  ;;  %v6725_v15 = vmul.f32 0.044715, %v15344_v28 }
0x1532   :  { %v6852_v49 = vmul.f32 %v6724_v2, %v6249_v22  ;;  %v6253_v0 = vadd.f32 %v15284_v47, %v15201_v37  ;;  %v6446_v30 = vadd.f32 %v15286_v53, %v15205_v46  ;;  %v15365_v59 = vmul.f32 %v6847_v13, %v15269_v14 }
0x1533   :  { %v10637_v58 = vpop.eup %10636  ;;  %v15368_v36 = vmul.f32 %v6849_v24, %v15300_v40  ;;  %v6854_v51 = vmul.f32 %v6726_v12, %v6442_v41  ;;  %v15372_v62 = vadd.f32 %v15294_v7, %v15213_v56  ;;  %v15375_v8 = vmul.f32 %v6851_v38, %v15307_v50 }
0x1534   :  { %v10639_v34 = vpop.eup %10638  ;;  %v15377_v17 = vmul.f32 0.5, %v6249_v22  ;;  %v6980_v47 = vmul.f32 %v6852_v49, %v6249_v22  ;;  %v6728_v42 = vmul.f32 0.044715, %v6253_v0  ;;  %v7484_v53 = vadd.f32 1.0, %v10637_v58 }
0x1535   :  { %v15379_v25 = vmul.f32 0.5, %v6442_v41  ;;  %v6982_v13 = vmul.f32 %v6854_v51, %v6442_v41  ;;  %v6727_v24 = vmul.f32 0.044715, %v15357_v57  ;;  %v6853_v16 = vmul.f32 %v6725_v15, %v15344_v28 }
0x1536   :  { %v7108_v23 = vadd.f32 %v6980_v47, %v6249_v22  ;;  %v6856_v2 = vmul.f32 %v6728_v42, %v6253_v0  ;;  %v6730_v7 = vmul.f32 0.044715, %v6446_v30  ;;  %v7486_v29 = vadd.f32 1.0, %v10639_v34 }
0x1537   :  { %v10641_v12 = vpop.eup %10640  ;;  %v7110_v11 = vadd.f32 %v6982_v13, %v6442_v41  ;;  %v6729_v38 = vmul.f32 0.044715, %v15372_v62  ;;  %v15386_v49 = vadd.f32 %v15296_v4, %v15215_v27  ;;  %v15389_v22 = vmul.f32 %v7484_v53, %v15291_v5 }
0x1538   :  { %v10643_v58 = vpop.eup %10642  ;;  %v7488_v33 = vadd.f32 1.0, %v10641_v12  ;;  %v7236_v21 = vmul.f32 0.7978846, %v7108_v23  ;;  %v6984_v51 = vmul.f32 %v6856_v2, %v6253_v0  ;;  %v6858_v44 = vmul.f32 %v6730_v7, %v6446_v30 }
0x1539   :  { %v7490_v15 = vadd.f32 1.0, %v10643_v58  ;;  %v7238_v47 = vmul.f32 0.7978846, %v7110_v11  ;;  %v6731_v42 = vmul.f32 0.044715, %v15386_v49  ;;  %v15396_v4 = vmul.f32 %v7486_v29, %v15302_v20 }
0x153a   :  { %v15393_v41 = vmul.f32 %v7488_v33, %v15318_v63  ;;  %10644 = vtanh.f32 %v7236_v21  ;;  %v7112_v34 = vadd.f32 %v6984_v51, %v6253_v0  ;;  %v6986_v13 = vmul.f32 %v6858_v44, %v6446_v30 }
0x153b   :  { %v15398_v12 = vmul.f32 %v7490_v15, %v6594_v1  ;;  %10646 = vtanh.f32 %v7238_v47  ;;  %v6855_v23 = vmul.f32 %v6727_v24, %v15357_v57  ;;  %v6857_v2 = vmul.f32 %v6729_v38, %v15372_v62 }
0x153c   :  { %v7736_v5 = vpack.c.bf16 %v15393_v41, %v15389_v22  ;;  %v7240_v11 = vmul.f32 0.7978846, %v7112_v34  ;;  %v7114_v53 = vadd.f32 %v6986_v13, %v6446_v30  ;;  %v6981_v44 = vmul.f32 %v6853_v16, %v15344_v28 }
0x153d   :  { %v7738_v33 = vpack.c.bf16 %v15398_v12, %v15396_v4  ;;  %v15407_v21 = vmul.f32 0.5, %v6253_v0  ;;  %v7093_v20 = vadd.f32 %v15257_v39, %v15222_v45  ;;  %v6859_v1 = vmul.f32 %v6731_v42, %v15386_v49 }
0x153e   :  { %10648 = vtanh.f32 %v7240_v11  ;;  %v7242_v63 = vmul.f32 0.7978846, %v7114_v53  ;;  %v7097_v29 = vadd.f32 %v15282_v26, %v15230_v32  ;;  %v6983_v24 = vmul.f32 %v6855_v23, %v15357_v57 }
0x153f   :  { %v7221_v7 = vmul.f32 0.7978846, %v7093_v20  ;;  %v7095_v38 = vadd.f32 %v15279_v48, %v15225_v55  ;;  %v7099_v0 = vadd.f32 %v15289_v54, %v15233_v52  ;;  %v15419_v16 = vmul.f32 0.5, %v6446_v30 }
0x1540   :  { %10650 = vtanh.f32 %v7242_v63  ;;  %v6985_v39 = vmul.f32 %v6857_v2, %v15372_v62  ;;  %v7225_v58 = vmul.f32 0.7978846, %v7097_v29  ;;  %v7101_v26 = vadd.f32 %v15353_v60, %v15261_v3 }
0x1541   :  { %10652 = vtanh.f32 %v7221_v7  ;;  %v7223_v51 = vmul.f32 0.7978846, %v7095_v38  ;;  %v7227_v15 = vmul.f32 0.7978846, %v7099_v0  ;;  %v6987_v47 = vmul.f32 %v6859_v1, %v15386_v49 }
0x1542   :  { %v15426_v42 = vmul.f32 0.5, %v15222_v45  ;;  %10654 = vtanh.f32 %v7225_v58  ;;  %v7105_v48 = vadd.f32 %v15368_v36, %v15300_v40  ;;  %v7229_v54 = vmul.f32 0.7978846, %v7101_v26 }
0x1543   :  { %10656 = vtanh.f32 %v7223_v51  ;;  %v7103_v30 = vadd.f32 %v15365_v59, %v15269_v14  ;;  %v7107_v34 = vadd.f32 %v15375_v8, %v15307_v50  ;;  %v6585_v60 = vmul.f32 0.5, %v15230_v32 }
0x1544   :  { %v10645_v13 = vpop.eup %10644  ;;  %v15436_v23 = vmul.f32 0.5, %v15225_v55  ;;  %10658 = vtanh.f32 %v7227_v15  ;;  %v7233_v45 = vmul.f32 0.7978846, %v7105_v48  ;;  %v7109_v59 = vadd.f32 %v6981_v44, %v15344_v28 }
0x1545   :  { %v10647_v11 = vpop.eup %10646  ;;  %v7492_v53 = vadd.f32 1.0, %v10645_v13  ;;  %10660 = vtanh.f32 %v7229_v54  ;;  %v7231_v36 = vmul.f32 0.7978846, %v7103_v30  ;;  %v7235_v2 = vmul.f32 0.7978846, %v7107_v34 }
0x1546   :  { %v7494_v20 = vadd.f32 1.0, %v10647_v11  ;;  %10662 = vtanh.f32 %v7233_v45  ;;  %v7113_v63 = vadd.f32 %v6985_v39, %v15372_v62  ;;  %v6587_v8 = vmul.f32 0.5, %v15233_v52 }
0x1547   :  { %v15442_v32 = vmul.f32 0.5, %v15261_v3  ;;  %v15445_v55 = vmul.f32 0.5, %v15300_v40  ;;  %10664 = vtanh.f32 %v7231_v36  ;;  %v15448_v29 = vmul.f32 0.5, %v15269_v14 }
0x1548   :  { %v10649_v1 = vpop.eup %10648  ;;  %10666 = vtanh.f32 %v7235_v2  ;;  %v7237_v7 = vmul.f32 0.7978846, %v7109_v59  ;;  %v7241_v38 = vmul.f32 0.7978846, %v7113_v63  ;;  %v15451_v44 = vmul.f32 0.5, %v15307_v50 }
0x1549   :  { %v7496_v0 = vadd.f32 1.0, %v10649_v1  ;;  %v7111_v52 = vadd.f32 %v6983_v24, %v15357_v57  ;;  %v7115_v3 = vadd.f32 %v6987_v47, %v15386_v49  ;;  %v15456_v51 = vmul.f32 %v7492_v53, %v15377_v17 }
0x154a   :  { %v10651_v40 = vpop.eup %10650  ;;  %v15459_v14 = vmul.f32 %v7494_v20, %v15379_v25  ;;  %10668 = vtanh.f32 %v7237_v7  ;;  %v6597_v7 = vmul.f32 0.5, %v15344_v28 }
0x154b   :  { %v6258_v39 = vpop.f32.mrb[204].mxu1  ;;  %v6451_v58 = vpop.f32.mrb[204].mxu0  ;;  %v15465_v24 = vmul.f32 %v7496_v0, %v15407_v21  ;;  %v7498_v47 = vadd.f32 1.0, %v10651_v40  ;;  %10670 = vtanh.f32 %v7241_v38  ;;  %v7239_v54 = vmul.f32 0.7978846, %v7111_v52 }
0x154c   :  { %v15462_v15 = vadd.f32 %v6258_v39, %v15201_v37  ;;  %v6260_v26 = vpop.f32.mrb[205].mxu1  ;;  %v6453_v50 = vpop.f32.mrb[205].mxu0  ;;  %v7243_v13 = vmul.f32 0.7978846, %v7115_v3  ;;  %v15473_v11 = vadd.f32 %v6451_v58, %v15205_v46 }
0x154d   :  { %v10653_v48 = vpop.eup %10652  ;;  %v15467_v30 = vpop.f32.mrb[206].mxu1  ;;  %v7740_v21 = vpack.c.bf16 %v15465_v24, %v15456_v51  ;;  %v15478_v36 = vmul.f32 %v7498_v47, %v15419_v16  ;;  %10672 = vtanh.f32 %v7239_v54 }
0x154e   :  { %v15469_v17 = vpop.f32.mrb[206].mxu0  ;;  %v10655_v34 = vpop.eup %10654  ;;  %v7477_v25 = vadd.f32 1.0, %v10653_v48  ;;  %v6732_v45 = vmul.f32 0.044715, %v15462_v15  ;;  %10674 = vtanh.f32 %v7243_v13  ;;  %v6734_v54 = vmul.f32 0.044715, %v15473_v11 }
0x154f   :  { %v10657_v53 = vpop.eup %10656  ;;  %v7481_v2 = vadd.f32 1.0, %v10655_v34  ;;  %v15480_v20 = vpop.f32.mrb[207].mxu1  ;;  %v6604_v41 = vmul.f32 0.5, %v15462_v15  ;;  %v18121_v24 = vpack.c.bf16 %v15478_v36, %v15459_v14 }
0x1550   :  { %v15482_v59 = vpop.f32.mrb[207].mxu0  ;;  %v10659_v63 = vpop.eup %10658  ;;  %v7479_v1 = vadd.f32 1.0, %v10657_v53  ;;  %v6860_v38 = vmul.f32 %v6732_v45, %v15462_v15  ;;  %v7605_v16 = vmul.f32 %v7477_v25, %v15426_v42  ;;  %v15493_v53 = vadd.f32 %v6260_v26, %v15213_v56 }
0x1551   :  { %v10661_v0 = vpop.eup %10660  ;;  %v7609_v3 = vmul.f32 %v7481_v2, %v6585_v60  ;;  %v7483_v39 = vadd.f32 1.0, %v10659_v63  ;;  %v6862_v63 = vmul.f32 %v6734_v54, %v15473_v11 }
0x1552   :  { %v10663_v58 = vpop.eup %10662  ;;  %v7607_v40 = vmul.f32 %v7479_v1, %v15436_v23  ;;  %v7485_v48 = vadd.f32 1.0, %v10661_v0  ;;  %v6988_v47 = vmul.f32 %v6860_v38, %v15462_v15  ;;  %v6601_v23 = vmul.f32 0.5, %v15372_v62 }
0x1553   :  { %v10665_v28 = vpop.eup %10664  ;;  %v7733_v34 = vpack.c.bf16 %v7609_v3, %v7605_v16  ;;  %v7611_v13 = vmul.f32 %v7483_v39, %v6587_v8  ;;  %v7489_v45 = vadd.f32 1.0, %v10663_v58  ;;  %v15495_v52 = vpop.f32.mrb[208].mxu1  ;;  %v18118_v58 = vpack.c.bf16 %v15330_v31, %v15323_v9 }
0x1554   :  { %v15497_v42 = vpop.f32.mrb[208].mxu0  ;;  %v10667_v60 = vpop.eup %10666  ;;  %v7487_v25 = vadd.f32 1.0, %v10665_v28  ;;  %v7116_v2 = vadd.f32 %v6988_v47, %v15462_v15  ;;  %v7613_v26 = vmul.f32 %v7485_v48, %v15442_v32  ;;  %v6990_v54 = vmul.f32 %v6862_v63, %v15473_v11 }
0x1555   :  { %v15502_v1 = vpop.f32.mrb[209].mxu1  ;;  %v15504_v38 = vpop.f32.mrb[209].mxu0  ;;  %8091 = vmatprep.mubr.bf16.mxu1 %v7733_v34  ;;  %v7735_v8 = vpack.c.bf16 %v7611_v13, %v7607_v40  ;;  %v7617_v0 = vmul.f32 %v7489_v45, %v15445_v55  ;;  %v7491_v16 = vadd.f32 1.0, %v10667_v60  ;;  %v6733_v28 = vmul.f32 0.044715, %v15493_v53 }
0x1556   :  { %v15508_v3 = vpop.f32.mrb[210].mxu1  ;;  %v15510_v39 = vpop.f32.mrb[210].mxu0  ;;  %8092 = vmatmul.mubr.bf16.vlgmr.msra.gmra.mrb[0].mxu1 %v18118_v58  ;;  %v7244_v47 = vmul.f32 0.7978846, %v7116_v2  ;;  %v15518_v40 = vadd.f32 %v6453_v50, %v15215_v27  ;;  %v7615_v13 = vmul.f32 %v7487_v25, %v15448_v29  ;;  %v18119_v45 = vpack.c.bf16 %v15340_v10, %v15337_v43 }
0x1557   :  { %v10669_v62 = vpop.eup %10668  ;;  %v15520_v32 = vpop.f32.mrb[211].mxu1  ;;  %8252 = vmatprep.mubr.bf16.mxu0 %v7735_v8  ;;  %v7737_v34 = vpack.c.bf16 %v7617_v0, %v7613_v26  ;;  %v7619_v9 = vmul.f32 %v7491_v16, %v15451_v44  ;;  %v7118_v50 = vadd.f32 %v6990_v54, %v15473_v11  ;;  %v6599_v8 = vmul.f32 0.5, %v15357_v57 }
0x1558   :  { %v15522_v55 = vpop.f32.mrb[211].mxu0  ;;  %v10671_v48 = vpop.eup %10670  ;;  %v7493_v31 = vadd.f32 1.0, %v10669_v62  ;;  %8253 = vmatmul.mubr.bf16.vlgmr.msra.gmra.mrb[0].mxu0 %v18119_v45  ;;  %10676 = vtanh.f32 %v7244_v47  ;;  %v6735_v2 = vmul.f32 0.044715, %v15518_v40  ;;  %v6263_v29 = vadd.f32 %v15467_v30, %v15201_v37 }
0x1559   :  { %v7497_v60 = vadd.f32 1.0, %v10671_v48  ;;  %v10673_v63 = vpop.eup %10672  ;;  %8099 = vmatprep.mubr.bf16.mxu1 %v7737_v34  ;;  %v7739_v58 = vpack.c.bf16 %v7619_v9, %v7615_v13  ;;  %v7246_v43 = vmul.f32 0.7978846, %v7118_v50  ;;  %v6603_v10 = vmul.f32 0.5, %v15386_v49 }
0x155a   :  { %v10675_v44 = vpop.eup %10674  ;;  %v7621_v25 = vmul.f32 %v7493_v31, %v6597_v7  ;;  %v7495_v0 = vadd.f32 1.0, %v10673_v63  ;;  %v6736_v62 = vmul.f32 0.044715, %v6263_v29  ;;  %v6456_v47 = vadd.f32 %v15469_v17, %v15205_v46 }
0x155b   :  { %v7625_v26 = vmul.f32 %v7497_v60, %v6601_v23  ;;  %8260 = vmatprep.mubr.bf16.mxu0 %v7739_v58  ;;  %v7499_v16 = vadd.f32 1.0, %v10675_v44  ;;  %v15537_v54 = vpop.f32.mrb[212].mxu1  ;;  %v15539_v48 = vpop.f32.mrb[212].mxu0  ;;  %v6861_v30 = vmul.f32 %v6733_v28, %v15493_v53  ;;  %v6863_v7 = vmul.f32 %v6735_v2, %v15518_v40 }
0x155c   :  { %v7623_v34 = vmul.f32 %v7495_v0, %v6599_v8  ;;  %v15543_v23 = vpop.f32.mrb[213].mxu1  ;;  %v15545_v13 = vpop.f32.mrb[213].mxu0  ;;  %10678 = vtanh.f32 %v7246_v43  ;;  %v6864_v9 = vmul.f32 %v6736_v62, %v6263_v29  ;;  %v6738_v31 = vmul.f32 0.044715, %v6456_v47 }
0x155d   :  { %v7741_v57 = vpack.c.bf16 %v7625_v26, %v7621_v25  ;;  %v7627_v49 = vmul.f32 %v7499_v16, %v6603_v10  ;;  %v15547_v45 = vpop.f32.mrb[214].mxu1  ;;  %v15549_v17 = vpop.f32.mrb[214].mxu0  ;;  %v15556_v28 = vadd.f32 %v15480_v20, %v15213_v56  ;;  %v15560_v60 = vadd.f32 %v15482_v59, %v15215_v27 }
0x155e   :  { %8100 = vmatmul.mubr.bf16.gmra.mrb[4].mxu1 %v7736_v5  ;;  %v6269_v50 = vadd.f32 %v15495_v52, %v15201_v37  ;;  %v6462_v2 = vadd.f32 %v15497_v42, %v15205_v46  ;;  %v15566_v63 = vpop.f32.mrb[215].mxu1  ;;  %v15568_v58 = vpop.f32.mrb[215].mxu0  ;;  %v6992_v5 = vmul.f32 %v6864_v9, %v6263_v29  ;;  %v6866_v20 = vmul.f32 %v6738_v31, %v6456_v47 }
0x155f   :  { %8107 = vmatprep.mubr.bf16.mxu1 %v7741_v57  ;;  %v7743_v22 = vpack.c.bf16 %v7627_v49, %v7623_v34  ;;  %v15575_v59 = vmul.f32 0.5, %v15473_v11  ;;  %v6737_v52 = vmul.f32 0.044715, %v15556_v28  ;;  %v6739_v42 = vmul.f32 0.044715, %v15560_v60 }
0x1560   :  { %8261 = vmatmul.mubr.bf16.gmra.mrb[4].mxu0 %v7738_v33  ;;  %v15581_v8 = vadd.f32 %v15502_v1, %v15213_v56  ;;  %v7120_v44 = vadd.f32 %v6992_v5, %v6263_v29  ;;  %v6994_v15 = vmul.f32 %v6866_v20, %v6456_v47  ;;  %v6740_v25 = vmul.f32 0.044715, %v6269_v50 }
0x1561   :  { %8268 = vmatprep.mubr.bf16.mxu0 %v7743_v22  ;;  %v6742_v26 = vmul.f32 0.044715, %v6462_v2  ;;  %v15584_v4 = vmul.f32 %v6861_v30, %v15493_v53  ;;  %v15587_v12 = vmul.f32 %v6863_v7, %v15518_v40  ;;  %v15589_v33 = vmul.f32 0.5, %v6263_v29 }
0x1562   :  { %18120 = vst [vmem:[#allocation73_spill] sm:$0xff] %v15581_v8  ;;  %v10677_v0 = vpop.eup %10676  ;;  %v15591_v11 = vmul.f32 0.5, %v6456_v47  ;;  %v7248_v43 = vmul.f32 0.7978846, %v7120_v44  ;;  %v7122_v10 = vadd.f32 %v6994_v15, %v6456_v47  ;;  %v6865_v1 = vmul.f32 %v6737_v52, %v15556_v28 }
0x1563   :  { %v6868_v16 = vmul.f32 %v6740_v25, %v6269_v50  ;;  %v15594_v62 = vpop.f32.mrb[216].mxu1  ;;  %v15596_v57 = vpop.f32.mrb[216].mxu0  ;;  %v6867_v34 = vmul.f32 %v6739_v42, %v15560_v60  ;;  %v6870_v30 = vmul.f32 %v6742_v26, %v6462_v2  ;;  %v6741_v49 = vmul.f32 0.044715, %v15581_v8 }
0x1564   :  { %v15602_v29 = vadd.f32 %v15504_v38, %v15215_v27  ;;  %v15604_v7 = vpop.f32.mrb[217].mxu1  ;;  %v15606_v9 = vpop.f32.mrb[217].mxu0  ;;  %v7500_v47 = vadd.f32 1.0, %v10677_v0  ;;  %10680 = vtanh.f32 %v7248_v43  ;;  %v7250_v31 = vmul.f32 0.7978846, %v7122_v10 }
0x1565   :  { %v6996_v22 = vmul.f32 %v6868_v16, %v6269_v50  ;;  %v15608_v5 = vpop.f32.mrb[218].mxu1  ;;  %v15610_v20 = vpop.f32.mrb[218].mxu0  ;;  %v15615_v52 = vmul.f32 0.5, %v6269_v50  ;;  %v15617_v38 = vmul.f32 0.5, %v6462_v2  ;;  %v6998_v42 = vmul.f32 %v6870_v30, %v6462_v2 }
0x1566   :  { %8108 = vmatmul.mubr.bf16.gmra.mrb[8].mxu1 %v7740_v21  ;;  %v6273_v44 = vadd.f32 %v15508_v3, %v15201_v37  ;;  %v15621_v15 = vpop.f32.mrb[219].mxu1  ;;  %v15623_v25 = vpop.f32.mrb[219].mxu0  ;;  %10682 = vtanh.f32 %v7250_v31  ;;  %v15626_v0 = vmul.f32 %v6865_v1, %v15556_v28  ;;  %v6466_v51 = vadd.f32 %v15510_v39, %v15205_v46 }
0x1567   :  { %v10679_v26 = vpop.eup %10678  ;;  %v7124_v43 = vadd.f32 %v6996_v22, %v6269_v50  ;;  %v15634_v21 = vmul.f32 %v6867_v34, %v15560_v60  ;;  %v7126_v3 = vadd.f32 %v6998_v42, %v6462_v2  ;;  %v6869_v10 = vmul.f32 %v6741_v49, %v15581_v8 }
0x1568   :  { %8269 = vmatmul.mubr.bf16.gmra.mrb[8].mxu0 %v18121_v24  ;;  %v6744_v16 = vmul.f32 0.044715, %v6273_v44  ;;  %v15637_v30 = vmul.f32 %v7500_v47, %v6604_v41  ;;  %v6743_v1 = vmul.f32 0.044715, %v15602_v29  ;;  %v6746_v50 = vmul.f32 0.044715, %v6466_v51 }
0x1569   :  { %v7252_v31 = vmul.f32 0.7978846, %v7124_v43  ;;  %v7502_v22 = vadd.f32 1.0, %v10679_v26  ;;  %v7254_v6 = vmul.f32 0.7978846, %v7126_v3  ;;  %v15642_v14 = vadd.f32 %v15520_v32, %v15213_v56 }
0x156a   :  { %18122 = vst [vmem:[#allocation30_spill] sm:$0xff] %v15637_v30  ;;  %v6872_v39 = vmul.f32 %v6744_v16, %v6273_v44  ;;  %v6874_v36 = vmul.f32 %v6746_v50, %v6466_v51  ;;  %v15646_v2 = vadd.f32 %v15522_v55, %v15215_v27  ;;  %v6279_v41 = vadd.f32 %v15537_v54, %v15201_v37 }
0x156b   :  { %10684 = vtanh.f32 %v7252_v31  ;;  %v15650_v34 = vpop.f32.mrb[220].mxu1  ;;  %v15652_v49 = vpop.f32.mrb[220].mxu0  ;;  %v15655_v47 = vmul.f32 %v6869_v10, %v15581_v8  ;;  %v6472_v32 = vadd.f32 %v15539_v48, %v15205_v46  ;;  %v6871_v55 = vmul.f32 %v6743_v1, %v15602_v29 }
0x156c   :  { %10686 = vtanh.f32 %v7254_v6  ;;  %v7000_v42 = vmul.f32 %v6872_v39, %v6273_v44  ;;  %v15659_v26 = vpop.f32.mrb[221].mxu1  ;;  %v15661_v43 = vpop.f32.mrb[221].mxu0  ;;  %v7002_v24 = vmul.f32 %v6874_v36, %v6466_v51  ;;  %v6745_v54 = vmul.f32 0.044715, %v15642_v14 }
0x156d   :  { %18123 = vst [vmem:[#allocation21_spill] sm:$0xff] %v15655_v47  ;;  %v6748_v3 = vmul.f32 0.044715, %v6279_v41  ;;  %v15665_v16 = vpop.f32.mrb[222].mxu1  ;;  %v15668_v6 = vmul.f32 %v7502_v22, %v15575_v59  ;;  %v15670_v10 = vmul.f32 0.5, %v6273_v44  ;;  %v15672_v48 = vpop.f32.mrb[222].mxu0  ;;  %v15679_v19 = vadd.f32 %v15543_v23, %v15213_v56 }
0x156e   :  { %18124 = vst [vmem:[#allocation37_spill] sm:$0xff] %v15665_v16  ;;  %v7128_v31 = vadd.f32 %v7000_v42, %v6273_v44  ;;  %v6750_v50 = vmul.f32 0.044715, %v6472_v32  ;;  %18126 = vst [vmem:[#allocation38_spill] sm:$0xff] %v15672_v48  ;;  %v15674_v39 = vpop.f32.mrb[223].mxu1  ;;  %v10681_v18 = vpop.eup %10680  ;;  %v7130_v35 = vadd.f32 %v7002_v24, %v6466_v51  ;;  %v15683_v47 = vmul.f32 0.5, %v6466_v51 }
0x156f   :  { %18125 = vst [vmem:[#allocation25_spill] sm:$0xff] %v15668_v6  ;;  %18127 = vst [vmem:[#allocation3_spill] sm:$0xff] %v15674_v39  ;;  %v6747_v1 = vmul.f32 0.044715, %v15646_v2  ;;  %v6876_v36 = vmul.f32 %v6748_v3, %v6279_v41  ;;  %v15681_v61 = vpop.f32.mrb[223].mxu0  ;;  %v7504_v59 = vadd.f32 1.0, %v10681_v18  ;;  %v6873_v39 = vmul.f32 %v6745_v54, %v15642_v14 }
0x1570   :  { %v7256_v22 = vmul.f32 0.7978846, %v7128_v31  ;;  %v6878_v44 = vmul.f32 %v6750_v50, %v6472_v32  ;;  %v10683_v42 = vpop.eup %10682  ;;  %v7258_v8 = vmul.f32 0.7978846, %v7130_v35  ;;  %v6749_v24 = vmul.f32 0.044715, %v15679_v19 }
0x1571   :  { %v7004_v48 = vmul.f32 %v6876_v36, %v6279_v41  ;;  %v15688_v3 = vmul.f32 %v7504_v59, %v15589_v33  ;;  %v7506_v16 = vadd.f32 1.0, %v10683_v42  ;;  %v6875_v18 = vmul.f32 %v6747_v1, %v15646_v2 }
0x1572   :  { %10688 = vtanh.f32 %v7256_v22  ;;  %v7006_v23 = vmul.f32 %v6878_v44, %v6472_v32  ;;  %v15693_v51 = vadd.f32 %v15545_v13, %v15215_v27  ;;  %v6283_v33 = vadd.f32 %v15547_v45, %v15201_v37 }
0x1573   :  { %18128 = vst [vmem:[#allocation9_spill] sm:$0xff] %v15688_v3  ;;  %10690 = vtanh.f32 %v7258_v8  ;;  %v7132_v31 = vadd.f32 %v7004_v48, %v6279_v41  ;;  %v15698_v54 = vmul.f32 %v7506_v16, %v15591_v11  ;;  %v15703_v8 = vmul.f32 %v6871_v55, %v15602_v29 }
0x1574   :  { %v7134_v50 = vadd.f32 %v7006_v23, %v6472_v32  ;;  %v6877_v48 = vmul.f32 %v6749_v24, %v15679_v19  ;;  %v6476_v13 = vadd.f32 %v15549_v17, %v15205_v46  ;;  %v15710_v11 = vmul.f32 0.5, %v6279_v41 }
0x1575   :  { %18129 = vst [vmem:[#allocation78_spill] sm:$0xff] %v15698_v54  ;;  %v10685_v36 = vpop.eup %10684  ;;  %v7260_v1 = vmul.f32 0.7978846, %v7132_v31  ;;  %v15712_v16 = vmul.f32 0.5, %v6472_v32  ;;  %v6751_v55 = vmul.f32 0.044715, %v15693_v51  ;;  %v15716_v23 = vmul.f32 %v6873_v39, %v15642_v14 }
0x1576   :  { %v10687_v59 = vpop.eup %10686  ;;  %v7262_v44 = vmul.f32 0.7978846, %v7134_v50  ;;  %v7508_v45 = vadd.f32 1.0, %v10685_v36  ;;  %v6752_v42 = vmul.f32 0.044715, %v6283_v33  ;;  %v15719_v24 = vmul.f32 %v6875_v18, %v15646_v2 }
0x1577   :  { %10692 = vtanh.f32 %v7260_v1  ;;  %v6754_v17 = vmul.f32 0.044715, %v6476_v13  ;;  %v7510_v31 = vadd.f32 1.0, %v10687_v59  ;;  %v15722_v41 = vmul.f32 %v6877_v48, %v15679_v19 }
0x1578   :  { %10694 = vtanh.f32 %v7262_v44  ;;  %v6880_v32 = vmul.f32 %v6752_v42, %v6283_v33  ;;  %v15726_v50 = vadd.f32 %v15566_v63, %v15213_v56  ;;  %v15728_v36 = vmul.f32 0.5, %v6283_v33 }
0x1579   :  { %18130 = vst [vmem:[#allocation12_spill] sm:$0xff] %v15722_v41  ;;  %v6882_v1 = vmul.f32 %v6754_v17, %v6476_v13  ;;  %v15732_v39 = vadd.f32 %v15568_v58, %v15215_v27  ;;  %v6289_v18 = vadd.f32 %v15594_v62, %v15201_v37  ;;  %v15737_v59 = vmul.f32 %v7508_v45, %v15615_v52 }
0x157a   :  { %v6879_v48 = vmul.f32 %v6751_v55, %v15693_v51  ;;  %v7008_v44 = vmul.f32 %v6880_v32, %v6283_v33  ;;  %v6482_v63 = vadd.f32 %v15596_v57, %v15205_v46  ;;  %v15742_v22 = vmul.f32 0.5, %v6476_v13 }
0x157b   :  { %18131 = vst [vmem:[#allocation42_spill] sm:$0xff] %v15737_v59  ;;  %v7010_v17 = vmul.f32 %v6882_v1, %v6476_v13  ;;  %v6753_v35 = vmul.f32 0.044715, %v15726_v50  ;;  %v6756_v58 = vmul.f32 0.044715, %v6289_v18  ;;  %v15746_v54 = vmul.f32 %v7510_v31, %v15617_v38 }
0x157c   :  { %v10689_v42 = vpop.eup %10688  ;;  %v7136_v52 = vadd.f32 %v7008_v44, %v6283_v33  ;;  %v6755_v45 = vmul.f32 0.044715, %v15732_v39  ;;  %v15751_v57 = vadd.f32 %v15604_v7, %v15213_v56  ;;  %v6758_v41 = vmul.f32 0.044715, %v6482_v63 }
0x157d   :  { %v10691_v6 = vpop.eup %10690  ;;  %18132 = vst [vmem:[#allocation40_spill] sm:$0xff] %v15746_v54  ;;  %v7512_v62 = vadd.f32 1.0, %v10689_v42  ;;  %v7138_v32 = vadd.f32 %v7010_v17, %v6476_v13  ;;  %v6884_v30 = vmul.f32 %v6756_v58, %v6289_v18  ;;  %v15758_v38 = vadd.f32 %v15606_v9, %v15215_v27 }
0x157e   :  { %v7514_v55 = vadd.f32 1.0, %v10691_v6  ;;  %18133 = vst [vmem:[#allocation39_spill] sm:$0xff] %v15751_v57  ;;  %v7264_v3 = vmul.f32 0.7978846, %v7136_v52  ;;  %v6881_v6 = vmul.f32 %v6753_v35, %v15726_v50  ;;  %v6886_v42 = vmul.f32 %v6758_v41, %v6482_v63 }
0x157f   :  { %v15754_v1 = vmul.f32 %v7512_v62, %v15670_v10  ;;  %v7266_v31 = vmul.f32 0.7978846, %v7138_v32  ;;  %v7012_v13 = vmul.f32 %v6884_v30, %v6289_v18  ;;  %v6883_v10 = vmul.f32 %v6755_v45, %v15732_v39 }
0x1580   :  { %v15761_v33 = vmul.f32 %v7514_v55, %v15683_v47  ;;  %10696 = vtanh.f32 %v7264_v3  ;;  %v6757_v47 = vmul.f32 0.044715, %v15751_v57  ;;  %v15771_v35 = vmul.f32 %v6879_v48, %v15693_v51 }
0x1581   :  { %18134 = vst [vmem:[#allocation75_spill] sm:$0xff] %v15754_v1  ;;  %v10693_v44 = vpop.eup %10692  ;;  %10698 = vtanh.f32 %v7266_v31  ;;  %v7140_v58 = vadd.f32 %v7012_v13, %v6289_v18  ;;  %v15773_v30 = vmul.f32 0.5, %v6289_v18  ;;  %v7014_v52 = vmul.f32 %v6886_v42, %v6482_v63 }
0x1582   :  { %18135 = vst [vmem:[#allocation23_spill] sm:$0xff] %v15761_v33  ;;  %v10695_v17 = vpop.eup %10694  ;;  %v7516_v62 = vadd.f32 1.0, %v10693_v44  ;;  %v15775_v3 = vmul.f32 0.5, %v6482_v63  ;;  %v6293_v41 = vadd.f32 %v15608_v5, %v15201_v37  ;;  %v6486_v45 = vadd.f32 %v15610_v20, %v15205_v46 }
0x1583   :  { %v7268_v55 = vmul.f32 0.7978846, %v7140_v58  ;;  %v7518_v32 = vadd.f32 1.0, %v10695_v17  ;;  %v15782_v31 = vmul.f32 %v6881_v6, %v15726_v50  ;;  %v15785_v13 = vmul.f32 %v6883_v10, %v15732_v39 }
0x1584   :  { %v7142_v48 = vadd.f32 %v7014_v52, %v6482_v63  ;;  %v6885_v18 = vmul.f32 %v6757_v47, %v15751_v57  ;;  %v6759_v44 = vmul.f32 0.044715, %v15758_v38  ;;  %v6760_v42 = vmul.f32 0.044715, %v6293_v41 }
0x1585   :  { %10700 = vtanh.f32 %v7268_v55  ;;  %v15790_v58 = vmul.f32 %v7516_v62, %v15710_v11  ;;  %v6762_v9 = vmul.f32 0.044715, %v6486_v45  ;;  %v15794_v20 = vadd.f32 %v15621_v15, %v15213_v56 }
0x1586   :  { %v7270_v5 = vmul.f32 0.7978846, %v7142_v48  ;;  %v6888_v6 = vmul.f32 %v6760_v42, %v6293_v41  ;;  %v15798_v10 = vadd.f32 %v15623_v25, %v15215_v27  ;;  %v6299_v63 = vadd.f32 %v15650_v34, %v15201_v37 }
0x1587   :  { %18136 = vst [vmem:[#allocation26_spill] sm:$0xff] %v15790_v58  ;;  %v6492_v17 = vadd.f32 %v15652_v49, %v15205_v46  ;;  %v15805_v11 = vmul.f32 %v7518_v32, %v15712_v16  ;;  %v6890_v47 = vmul.f32 %v6762_v9, %v6486_v45  ;;  %v6761_v62 = vmul.f32 0.044715, %v15794_v20 }
0x1588   :  { %10702 = vtanh.f32 %v7270_v5  ;;  %v15809_v15 = vmul.f32 %v6885_v18, %v15751_v57  ;;  %v7016_v52 = vmul.f32 %v6888_v6, %v6293_v41  ;;  %v6763_v25 = vmul.f32 0.044715, %v15798_v10 }
0x1589   :  { %18137 = vst [vmem:[#allocation19_spill] sm:$0xff] %v15805_v11  ;;  %v6764_v55 = vmul.f32 0.044715, %v6299_v63  ;;  %v6887_v34 = vmul.f32 %v6759_v44, %v15758_v38  ;;  %v7018_v42 = vmul.f32 %v6890_v47, %v6486_v45  ;;  %v6766_v7 = vmul.f32 0.044715, %v6492_v17 }
0x158a   :  { %18138 = vst [vmem:[#allocation22_spill] sm:$0xff] %v15809_v15  ;;  %v10697_v48 = vpop.eup %10696  ;;  %v15815_v49 = vadd.f32 %v15659_v26, %v15213_v56  ;;  %v15817_v32 = vmul.f32 0.5, %v6293_v41  ;;  %v7144_v5 = vadd.f32 %v7016_v52, %v6293_v41  ;;  %v6889_v33 = vmul.f32 %v6761_v62, %v15794_v20 }
0x158b   :  { %v10699_v16 = vpop.eup %10698  ;;  %v7520_v9 = vadd.f32 1.0, %v10697_v48  ;;  %v6892_v18 = vmul.f32 %v6764_v55, %v6299_v63  ;;  %v7146_v6 = vadd.f32 %v7018_v42, %v6486_v45  ;;  %v6894_v59 = vmul.f32 %v6766_v7, %v6492_v17 }
0x158c   :  { %v7522_v54 = vadd.f32 1.0, %v10699_v16  ;;  %v7272_v44 = vmul.f32 0.7978846, %v7144_v5  ;;  %v6891_v47 = vmul.f32 %v6763_v25, %v15798_v10  ;;  %v6765_v41 = vmul.f32 0.044715, %v15815_v49 }
0x158d   :  { %v15821_v1 = vmul.f32 %v7520_v9, %v15728_v36  ;;  %v7020_v15 = vmul.f32 %v6892_v18, %v6299_v63  ;;  %v7274_v48 = vmul.f32 0.7978846, %v7146_v6  ;;  %v7022_v57 = vmul.f32 %v6894_v59, %v6492_v17 }
0x158e   :  { %v15825_v26 = vmul.f32 %v7522_v54, %v15742_v22  ;;  %10704 = vtanh.f32 %v7272_v44  ;;  %v15832_v36 = vadd.f32 %v15661_v43, %v15215_v27  ;;  %v15837_v22 = vmul.f32 %v6887_v34, %v15758_v38 }
0x158f   :  { %18139 = vst [vmem:[#allocation28_spill] sm:$0xff] %v15821_v1  ;;  %v10701_v52 = vpop.eup %10700  ;;  %v7148_v7 = vadd.f32 %v7020_v15, %v6299_v63  ;;  %10706 = vtanh.f32 %v7274_v48  ;;  %v7150_v54 = vadd.f32 %v7022_v57, %v6492_v17  ;;  %v6634_v59 = vmul.f32 0.5, %v6486_v45 }
0x1590   :  { %18140 = vst [vmem:[#allocation72_spill] sm:$0xff] %v15825_v26  ;;  %v7524_v25 = vadd.f32 1.0, %v10701_v52  ;;  %v15839_v42 = vmul.f32 0.5, %v6299_v63  ;;  %v15842_v15 = vmul.f32 %v6889_v33, %v15794_v20  ;;  %v15844_v5 = vmul.f32 0.5, %v6492_v17 }
0x1591   :  { %v7276_v16 = vmul.f32 0.7978846, %v7148_v7  ;;  %v7278_v43 = vmul.f32 0.7978846, %v7150_v54  ;;  %v7117_v18 = vadd.f32 %v15584_v4, %v15493_v53  ;;  %v15849_v6 = vmul.f32 %v6891_v47, %v15798_v10 }
0x1592   :  { %v10703_v9 = vpop.eup %10702  ;;  %v6893_v57 = vmul.f32 %v6765_v41, %v15815_v49  ;;  %v6767_v45 = vmul.f32 0.044715, %v15832_v36  ;;  %v15854_v63 = vmul.f32 0.5, %v15493_v53  ;;  %v15857_v34 = vmul.f32 %v7524_v25, %v15773_v30  ;;  %v18142_v30 = vld [vmem:[#allocation37_spill] sm:$0xff]  ;;  %v18144_v25 = vld [vmem:[#allocation3_spill] sm:$0xff] }
0x1593   :  { %10708 = vtanh.f32 %v7276_v16  ;;  %v7121_v33 = vadd.f32 %v15626_v0, %v15556_v28  ;;  %v7245_v17 = vmul.f32 0.7978846, %v7117_v18  ;;  %v7526_v44 = vadd.f32 1.0, %v10703_v9  ;;  %v18143_v0 = vld [vmem:[#allocation38_spill] sm:$0xff] }
0x1594   :  { %18141 = vst [vmem:[#allocation5_spill] sm:$0xff] %v15857_v34  ;;  %10710 = vtanh.f32 %v7278_v43  ;;  %v15862_v4 = vmul.f32 0.5, %v15556_v28  ;;  %v7119_v47 = vadd.f32 %v15587_v12, %v15518_v40  ;;  %v7123_v53 = vadd.f32 %v15634_v21, %v15560_v60 }
0x1595   :  { %v7249_v48 = vmul.f32 0.7978846, %v7121_v33  ;;  %10712 = vtanh.f32 %v7245_v17  ;;  %v6303_v41 = vadd.f32 %v18142_v30, %v15201_v37  ;;  %v6496_v7 = vadd.f32 %v18143_v0, %v15205_v46 }
0x1596   :  { %v7247_v52 = vmul.f32 0.7978846, %v7119_v47  ;;  %v15874_v54 = vadd.f32 %v18144_v25, %v15213_v56  ;;  %v15878_v28 = vadd.f32 %v15681_v61, %v15215_v27  ;;  %v15881_v12 = vmul.f32 %v6893_v57, %v15815_v49 }
0x1597   :  { %10714 = vtanh.f32 %v7249_v48  ;;  %v7251_v21 = vmul.f32 0.7978846, %v7123_v53  ;;  %v6768_v16 = vmul.f32 0.044715, %v6303_v41  ;;  %v6895_v43 = vmul.f32 %v6767_v45, %v15832_v36 }
0x1598   :  { %v10705_v9 = vpop.eup %10704  ;;  %10716 = vtanh.f32 %v7247_v52  ;;  %v6770_v18 = vmul.f32 0.044715, %v6496_v7  ;;  %v6769_v33 = vmul.f32 0.044715, %v15874_v54  ;;  %v15886_v30 = vmul.f32 0.5, %v15518_v40 }
0x1599   :  { %v10707_v17 = vpop.eup %10706  ;;  %v7528_v47 = vadd.f32 1.0, %v10705_v9  ;;  %10718 = vtanh.f32 %v7251_v21  ;;  %v6896_v61 = vmul.f32 %v6768_v16, %v6303_v41  ;;  %v15889_v57 = vmul.f32 %v7526_v44, %v15775_v3  ;;  %v18148_v16 = vld [vmem:[#allocation73_spill] sm:$0xff] }
0x159a   :  { %v7530_v48 = vadd.f32 1.0, %v10707_v17  ;;  %v6898_v53 = vmul.f32 %v6770_v18, %v6496_v7  ;;  %v6771_v0 = vmul.f32 0.044715, %v15878_v28  ;;  %v6611_v52 = vmul.f32 0.5, %v15560_v60  ;;  %v18149_v3 = vld [vmem:[#allocation21_spill] sm:$0xff] }
0x159b   :  { %18145 = vst [vmem:[#allocation13_spill] sm:$0xff] %v15889_v57  ;;  %v15893_v45 = vmul.f32 %v7528_v47, %v15817_v32  ;;  %v15896_v25 = vmul.f32 0.5, %v6303_v41  ;;  %v7024_v9 = vmul.f32 %v6896_v61, %v6303_v41  ;;  %v6897_v21 = vmul.f32 %v6769_v33, %v15874_v54 }
0x159c   :  { %v15898_v62 = vmul.f32 %v7530_v48, %v6634_v59  ;;  %v7026_v40 = vmul.f32 %v6898_v53, %v6496_v7  ;;  %v7125_v44 = vadd.f32 %v18149_v3, %v18148_v16  ;;  %v15905_v32 = vmul.f32 0.5, %v6496_v7 }
0x159d   :  { %18146 = vst [vmem:[#allocation86_spill] sm:$0xff] %v15893_v45  ;;  %v10709_v17 = vpop.eup %10708  ;;  %v7152_v55 = vadd.f32 %v7024_v9, %v6303_v41  ;;  %v15908_v60 = vmul.f32 0.5, %v18148_v16  ;;  %v6899_v53 = vmul.f32 %v6771_v0, %v15878_v28  ;;  %v7129_v3 = vadd.f32 %v15716_v23, %v15642_v14 }
0x159e   :  { %18147 = vst [vmem:[#allocation84_spill] sm:$0xff] %v15898_v62  ;;  %v10711_v61 = vpop.eup %10710  ;;  %v7154_v48 = vadd.f32 %v7026_v40, %v6496_v7  ;;  %v15924_v18 = vmul.f32 %v6895_v43, %v15832_v36  ;;  %v15927_v45 = vmul.f32 0.5, %v15642_v14  ;;  %v7253_v11 = vmul.f32 0.7978846, %v7125_v44 }
0x159f   :  { %v15910_v47 = vpop.f32.mrb[224].mxu1  ;;  %v15912_v59 = vpop.f32.mrb[224].mxu0  ;;  %v7280_v34 = vmul.f32 0.7978846, %v7152_v55  ;;  %v15932_v40 = vmul.f32 %v6897_v21, %v15874_v54  ;;  %v7257_v23 = vmul.f32 0.7978846, %v7129_v3  ;;  %v7127_v55 = vadd.f32 %v15703_v8, %v15602_v29 }
0x15a0   :  { %v15919_v41 = vpop.f32.mrb[225].mxu1  ;;  %v15921_v9 = vpop.f32.mrb[225].mxu0  ;;  %v7282_v0 = vmul.f32 0.7978846, %v7154_v48  ;;  %v7532_v26 = vadd.f32 1.0, %v10709_v17  ;;  %v7131_v14 = vadd.f32 %v15719_v24, %v15646_v2  ;;  %v15945_v3 = vmul.f32 %v6899_v53, %v15878_v28 }
0x15a1   :  { %v10713_v16 = vpop.eup %10712  ;;  %v15929_v33 = vpop.f32.mrb[226].mxu1  ;;  %10720 = vtanh.f32 %v7280_v34  ;;  %v7255_v34 = vmul.f32 0.7978846, %v7127_v55  ;;  %v7137_v53 = vadd.f32 %v15782_v31, %v15726_v50  ;;  %v7135_v31 = vadd.f32 %v15771_v35, %v15693_v51 }
0x15a2   :  { %v7501_v7 = vadd.f32 1.0, %v10713_v16  ;;  %v15934_v57 = vpop.f32.mrb[226].mxu0  ;;  %v10715_v62 = vpop.eup %10714  ;;  %v7534_v16 = vadd.f32 1.0, %v10711_v61  ;;  %10722 = vtanh.f32 %v7282_v0  ;;  %v7259_v58 = vmul.f32 0.7978846, %v7131_v14 }
0x15a3   :  { %18150 = vst [vmem:[#allocation85_spill] sm:$0xff] %v15934_v57  ;;  %v15940_v43 = vpop.f32.mrb[227].mxu1  ;;  %v15942_v44 = vpop.f32.mrb[227].mxu0  ;;  %v7505_v21 = vadd.f32 1.0, %v10715_v62  ;;  %10724 = vtanh.f32 %v7253_v11  ;;  %v18152_v62 = vld [vmem:[#allocation12_spill] sm:$0xff] }
0x15a4   :  { %18151 = vst [vmem:[#allocation41_spill] sm:$0xff] %v15942_v44  ;;  %v10717_v48 = vpop.eup %10716  ;;  %v7629_v8 = vmul.f32 %v7501_v7, %v15854_v63  ;;  %10726 = vtanh.f32 %v7257_v23  ;;  %v15950_v44 = vmul.f32 %v7532_v26, %v15839_v42  ;;  %v7133_v61 = vadd.f32 %v18152_v62, %v15679_v19 }
0x15a5   :  { %v10719_v57 = vpop.eup %10718  ;;  %v7503_v17 = vadd.f32 1.0, %v10717_v48  ;;  %v7633_v24 = vmul.f32 %v7505_v21, %v15862_v4  ;;  %10728 = vtanh.f32 %v7255_v34  ;;  %v15966_v42 = vmul.f32 0.5, %v15602_v29  ;;  %v18153_v21 = vld [vmem:[#allocation9_spill] sm:$0xff] }
0x15a6   :  { %v7507_v1 = vadd.f32 1.0, %v10719_v57  ;;  %10730 = vtanh.f32 %v7259_v58  ;;  %v7261_v7 = vmul.f32 0.7978846, %v7133_v61  ;;  %v7265_v23 = vmul.f32 0.7978846, %v7137_v53 }
0x15a7   :  { %v15956_v0 = vpop.f32.mrb[228].mxu1  ;;  %v15958_v11 = vpop.f32.mrb[228].mxu0  ;;  %v7745_v55 = vpack.c.bf16 %v7633_v24, %v7629_v8  ;;  %v7631_v63 = vmul.f32 %v7503_v17, %v15886_v30  ;;  %v15973_v48 = vmul.f32 %v7534_v16, %v15844_v5  ;;  %v15976_v58 = vmul.f32 0.5, %v15646_v2  ;;  %v18154_v17 = vld [vmem:[#allocation30_spill] sm:$0xff]  ;;  %v18156_v5 = vld [vmem:[#allocation39_spill] sm:$0xff] }
0x15a8   :  { %v7635_v4 = vmul.f32 %v7507_v1, %v6611_v52  ;;  %v15961_v57 = vpop.f32.mrb[229].mxu1  ;;  %v15963_v26 = vpop.f32.mrb[229].mxu0  ;;  %v7139_v30 = vadd.f32 %v15785_v13, %v15732_v39  ;;  %v18155_v35 = vpack.c.bf16 %v18153_v21, %v18154_v17  ;;  %10732 = vtanh.f32 %v7261_v7  ;;  %v18157_v16 = vld [vmem:[#allocation22_spill] sm:$0xff] }
0x15a9   :  { %v15970_v14 = vpop.f32.mrb[230].mxu1  ;;  %8115 = vmatprep.mubr.bf16.mxu1 %v7745_v55  ;;  %v15980_v29 = vpop.f32.mrb[230].mxu0  ;;  %v7263_v34 = vmul.f32 0.7978846, %v7135_v31  ;;  %v7141_v8 = vadd.f32 %v18157_v16, %v18156_v5  ;;  %v7145_v2 = vadd.f32 %v15842_v15, %v15794_v20  ;;  %v15994_v13 = vmul.f32 0.5, %v15679_v19  ;;  %v18158_v55 = vld [vmem:[#allocation78_spill] sm:$0xff] }
0x15aa   :  { %v7747_v1 = vpack.c.bf16 %v7635_v4, %v7631_v63  ;;  %v15982_v52 = vpop.f32.mrb[231].mxu1  ;;  %8116 = vmatmul.mubr.bf16.gmra.mrb[12].mxu1 %v18155_v35  ;;  %v15991_v24 = vpop.f32.mrb[231].mxu0  ;;  %v15997_v62 = vmul.f32 0.5, %v15726_v50  ;;  %10734 = vtanh.f32 %v7265_v23  ;;  %v7267_v61 = vmul.f32 0.7978846, %v7139_v30  ;;  %v18159_v63 = vld [vmem:[#allocation25_spill] sm:$0xff] }
0x15ab   :  { %v10721_v53 = vpop.eup %10720  ;;  %v18160_v4 = vpack.c.bf16 %v18158_v55, %v18159_v63  ;;  %10736 = vtanh.f32 %v7263_v34  ;;  %v7269_v7 = vmul.f32 0.7978846, %v7141_v8  ;;  %v7273_v31 = vmul.f32 0.7978846, %v7145_v2 }
0x15ac   :  { %8276 = vmatprep.mubr.bf16.mxu0 %v7747_v1  ;;  %v7143_v15 = vadd.f32 %v15837_v22, %v15758_v38  ;;  %v10723_v1 = vpop.eup %10722  ;;  %v7536_v21 = vadd.f32 1.0, %v10721_v53  ;;  %v16005_v19 = vmul.f32 0.5, %v15693_v51  ;;  %10738 = vtanh.f32 %v7267_v61 }
0x15ad   :  { %8277 = vmatmul.mubr.bf16.gmra.mrb[12].mxu0 %v18160_v4  ;;  %v7147_v50 = vadd.f32 %v15849_v6, %v15798_v10  ;;  %v10725_v23 = vpop.eup %10724  ;;  %v7538_v30 = vadd.f32 1.0, %v10723_v1  ;;  %v16010_v17 = vmul.f32 0.5, %v15732_v39  ;;  %10740 = vtanh.f32 %v7269_v7 }
0x15ae   :  { %v7271_v35 = vmul.f32 0.7978846, %v7143_v15  ;;  %v10727_v22 = vpop.eup %10726  ;;  %v16017_v8 = vmul.f32 %v7536_v21, %v15896_v25  ;;  %v7509_v51 = vadd.f32 1.0, %v10725_v23  ;;  %10742 = vtanh.f32 %v7273_v31 }
0x15af   :  { %v16012_v34 = vpop.f32.mrb[232].mxu1  ;;  %v16014_v16 = vpop.f32.mrb[232].mxu0  ;;  %v7275_v2 = vmul.f32 0.7978846, %v7147_v50  ;;  %v16024_v39 = vmul.f32 %v7538_v30, %v15905_v32  ;;  %v7513_v55 = vadd.f32 1.0, %v10727_v22  ;;  %v7149_v63 = vadd.f32 %v15881_v12, %v15815_v49 }
0x15b0   :  { %v16019_v61 = vpop.f32.mrb[233].mxu1  ;;  %v16021_v6 = vpop.f32.mrb[233].mxu0  ;;  %10744 = vtanh.f32 %v7271_v35  ;;  %v7637_v15 = vmul.f32 %v7509_v51, %v15908_v60  ;;  %v7153_v30 = vadd.f32 %v15932_v40, %v15874_v54  ;;  %v6629_v22 = vmul.f32 0.5, %v18156_v5 }
0x15b1   :  { %v10729_v53 = vpop.eup %10728  ;;  %v16028_v4 = vpop.f32.mrb[234].mxu1  ;;  %10746 = vtanh.f32 %v7275_v2  ;;  %v7641_v12 = vmul.f32 %v7513_v55, %v15927_v45  ;;  %v6633_v60 = vmul.f32 0.5, %v15794_v20  ;;  %v7277_v51 = vmul.f32 0.7978846, %v7149_v63 }
0x15b2   :  { %v16030_v25 = vpop.f32.mrb[234].mxu0  ;;  %v10731_v7 = vpop.eup %10730  ;;  %v7511_v1 = vadd.f32 1.0, %v10729_v53  ;;  %v7151_v50 = vadd.f32 %v15924_v18, %v15832_v36  ;;  %v7155_v40 = vadd.f32 %v15945_v3, %v15878_v28 }
0x15b3   :  { %v16035_v21 = vpop.f32.mrb[235].mxu1  ;;  %v16037_v32 = vpop.f32.mrb[235].mxu0  ;;  %v7515_v23 = vadd.f32 1.0, %v10731_v7  ;;  %v7749_v53 = vpack.c.bf16 %v7641_v12, %v7637_v15  ;;  %10748 = vtanh.f32 %v7277_v51  ;;  %v18163_v12 = vld [vmem:[#allocation42_spill] sm:$0xff] }
0x15b4   :  { %18161 = vst [vmem:[#allocation17_spill] sm:$0xff] %v16037_v32  ;;  %v7639_v35 = vmul.f32 %v7511_v1, %v15966_v42  ;;  %v10733_v2 = vpop.eup %10732  ;;  %v7281_v32 = vmul.f32 0.7978846, %v7153_v30  ;;  %v16054_v42 = vadd.f32 %v15910_v47, %v15201_v37  ;;  %v18162_v1 = vld [vmem:[#allocation75_spill] sm:$0xff]  ;;  %v6631_v47 = vmul.f32 0.5, %v15758_v38  ;;  %v18168_v38 = vld [vmem:[#allocation40_spill] sm:$0xff] }
0x15b5   :  { %v7643_v31 = vmul.f32 %v7515_v23, %v15976_v58  ;;  %v10735_v45 = vpop.eup %10734  ;;  %v7517_v55 = vadd.f32 1.0, %v10733_v2  ;;  %8123 = vmatprep.mubr.bf16.mxu1 %v7749_v53  ;;  %v7279_v58 = vmul.f32 0.7978846, %v7151_v50  ;;  %v18164_v23 = vpack.c.bf16 %v18162_v1, %v18163_v12 }
0x15b6   :  { %v10737_v20 = vpop.eup %10736  ;;  %v7521_v63 = vadd.f32 1.0, %v10735_v45  ;;  %10750 = vtanh.f32 %v7281_v32  ;;  %v7283_v51 = vmul.f32 0.7978846, %v7155_v40  ;;  %v6772_v53 = vmul.f32 0.044715, %v16054_v42 }
0x15b7   :  { %v7751_v5 = vpack.c.bf16 %v7643_v31, %v7639_v35  ;;  %v16056_v7 = vpop.f32.mrb[236].mxu1  ;;  %v16058_v15 = vpop.f32.mrb[236].mxu0  ;;  %8124 = vmatmul.mubr.bf16.gmra.mrb[16].mxu1 %v18164_v23  ;;  %v7645_v3 = vmul.f32 %v7517_v55, %v15994_v13  ;;  %v7519_v30 = vadd.f32 1.0, %v10737_v20  ;;  %10752 = vtanh.f32 %v7279_v58  ;;  %v18167_v55 = vld [vmem:[#allocation23_spill] sm:$0xff] }
0x15b8   :  { %v10739_v18 = vpop.eup %10738  ;;  %v16065_v2 = vpop.f32.mrb[237].mxu1  ;;  %v7649_v50 = vmul.f32 %v7521_v63, %v15997_v62  ;;  %v18169_v40 = vpack.c.bf16 %v18167_v55, %v18168_v38  ;;  %10754 = vtanh.f32 %v7283_v51  ;;  %v16081_v62 = vadd.f32 %v15912_v59, %v15205_v46 }
0x15b9   :  { %v16067_v31 = vpop.f32.mrb[237].mxu0  ;;  %v10741_v32 = vpop.eup %10740  ;;  %8284 = vmatprep.mubr.bf16.mxu0 %v7751_v5  ;;  %v7523_v35 = vadd.f32 1.0, %v10739_v18  ;;  %v7647_v20 = vmul.f32 %v7519_v30, %v16005_v19  ;;  %v6900_v55 = vmul.f32 %v6772_v53, %v16054_v42  ;;  %v6635_v19 = vmul.f32 0.5, %v15798_v10 }
0x15ba   :  { %v16071_v45 = vpop.f32.mrb[238].mxu1  ;;  %v16073_v1 = vpop.f32.mrb[238].mxu0  ;;  %8285 = vmatmul.mubr.bf16.gmra.mrb[16].mxu0 %v18169_v40  ;;  %v7525_v12 = vadd.f32 1.0, %v10741_v32  ;;  %v7753_v18 = vpack.c.bf16 %v7649_v50, %v7645_v3  ;;  %v6774_v51 = vmul.f32 0.044715, %v16081_v62 }
0x15bb   :  { %18165 = vst [vmem:[#allocation31_spill] sm:$0xff] %v16071_v45  ;;  %18166 = vst [vmem:[#allocation15_spill] sm:$0xff] %v16073_v1  ;;  %v10743_v13 = vpop.eup %10742  ;;  %v16083_v5 = vpop.f32.mrb[239].mxu1  ;;  %v7651_v23 = vmul.f32 %v7523_v35, %v16010_v17  ;;  %v16095_v17 = vadd.f32 %v15919_v41, %v15213_v56  ;;  %v6637_v41 = vmul.f32 0.5, %v15815_v49  ;;  %v6639_v49 = vmul.f32 0.5, %v15832_v36 }
0x15bc   :  { %18170 = vst [vmem:[#allocation27_spill] sm:$0xff] %v16083_v5  ;;  %v16085_v63 = vpop.f32.mrb[239].mxu0  ;;  %v10745_v58 = vpop.eup %10744  ;;  %v7529_v1 = vadd.f32 1.0, %v10743_v13  ;;  %v7653_v40 = vmul.f32 %v7525_v12, %v6629_v22  ;;  %8131 = vmatprep.mubr.bf16.mxu1 %v7753_v18  ;;  %v6902_v3 = vmul.f32 %v6774_v51, %v16081_v62  ;;  %v16099_v22 = vadd.f32 %v15921_v9, %v15215_v27 }
0x15bd   :  { %18171 = vst [vmem:[#allocation102_spill] sm:$0xff] %v16085_v63  ;;  %v10747_v38 = vpop.eup %10746  ;;  %v7527_v30 = vadd.f32 1.0, %v10745_v58  ;;  %v7755_v59 = vpack.c.bf16 %v7651_v23, %v7647_v20  ;;  %v7028_v63 = vmul.f32 %v6900_v55, %v16054_v42  ;;  %v6641_v20 = vmul.f32 0.5, %v15874_v54  ;;  %v18176_v55 = vld [vmem:[#allocation72_spill] sm:$0xff] }
0x15be   :  { %v7657_v32 = vmul.f32 %v7529_v1, %v6633_v60  ;;  %v7531_v5 = vadd.f32 1.0, %v10747_v38  ;;  %v6313_v60 = vadd.f32 %v15929_v33, %v15201_v37  ;;  %v10749_v53 = vpop.eup %10748  ;;  %v18173_v1 = vld [vmem:[#allocation26_spill] sm:$0xff]  ;;  %v7030_v9 = vmul.f32 %v6902_v3, %v16081_v62  ;;  %v18175_v33 = vld [vmem:[#allocation85_spill] sm:$0xff]  ;;  %v18177_v38 = vld [vmem:[#allocation19_spill] sm:$0xff] }
0x15bf   :  { %v7655_v45 = vmul.f32 %v7527_v30, %v6631_v47  ;;  %8292 = vmatprep.mubr.bf16.mxu0 %v7755_v59  ;;  %v7156_v35 = vadd.f32 %v7028_v63, %v16054_v42  ;;  %v18172_v47 = vld [vmem:[#allocation28_spill] sm:$0xff]  ;;  %v6773_v12 = vmul.f32 0.044715, %v16095_v17  ;;  %v7533_v63 = vadd.f32 1.0, %v10749_v53 }
0x15c0   :  { %v7757_v10 = vpack.c.bf16 %v7657_v32, %v7653_v40  ;;  %v7659_v50 = vmul.f32 %v7531_v5, %v6635_v19  ;;  %v18174_v13 = vpack.c.bf16 %v18172_v47, %v18173_v1  ;;  %v10751_v58 = vpop.eup %10750  ;;  %v6506_v23 = vadd.f32 %v18175_v33, %v15205_v46  ;;  %v18181_v33 = vld [vmem:[#allocation5_spill] sm:$0xff] }
0x15c1   :  { %v7284_v18 = vmul.f32 0.7978846, %v7156_v35  ;;  %v18178_v40 = vpack.c.bf16 %v18176_v55, %v18177_v38  ;;  %v7537_v19 = vadd.f32 1.0, %v10751_v58  ;;  %v6643_v54 = vmul.f32 0.5, %v15878_v28  ;;  %v10753_v51 = vpop.eup %10752 }
0x15c2   :  { %8132 = vmatmul.mubr.bf16.gmra.mrb[20].mxu1 %v18174_v13  ;;  %v7759_v5 = vpack.c.bf16 %v7659_v50, %v7655_v45  ;;  %v7158_v30 = vadd.f32 %v7030_v9, %v16081_v62  ;;  %v16120_v45 = vmul.f32 0.5, %v16054_v42  ;;  %v6775_v59 = vmul.f32 0.044715, %v16099_v22  ;;  %v10755_v3 = vpop.eup %10754 }
0x15c3   :  { %8139 = vmatprep.mubr.bf16.mxu1 %v7757_v10  ;;  %8293 = vmatmul.mubr.bf16.gmra.mrb[20].mxu0 %v18178_v40  ;;  %10756 = vtanh.f32 %v7284_v18  ;;  %v6776_v32 = vmul.f32 0.044715, %v6313_v60  ;;  %v7661_v10 = vmul.f32 %v7533_v63, %v6637_v41  ;;  %v7665_v50 = vmul.f32 %v7537_v19, %v6641_v20  ;;  %v18179_v41 = vld [vmem:[#allocation41_spill] sm:$0xff]  ;;  %v18180_v63 = vld [vmem:[#allocation86_spill] sm:$0xff] }
0x15c4   :  { %8300 = vmatprep.mubr.bf16.mxu0 %v7759_v5  ;;  %v7535_v35 = vadd.f32 1.0, %v10753_v51  ;;  %v7286_v53 = vmul.f32 0.7978846, %v7158_v30  ;;  %v7539_v47 = vadd.f32 1.0, %v10755_v3  ;;  %v6901_v36 = vmul.f32 %v6773_v12, %v16095_v17  ;;  %v18183_v51 = vld [vmem:[#allocation84_spill] sm:$0xff] }
0x15c5   :  { %v6904_v28 = vmul.f32 %v6776_v32, %v6313_v60  ;;  %v6778_v1 = vmul.f32 0.044715, %v6506_v23  ;;  %v7761_v13 = vpack.c.bf16 %v7665_v50, %v7661_v10  ;;  %v16126_v42 = vadd.f32 %v15940_v43, %v15213_v56  ;;  %v18184_v32 = vld [vmem:[#allocation13_spill] sm:$0xff] }
0x15c6   :  { %v7663_v9 = vmul.f32 %v7535_v35, %v6639_v49  ;;  %10758 = vtanh.f32 %v7286_v53  ;;  %v7667_v58 = vmul.f32 %v7539_v47, %v6643_v54  ;;  %v16130_v20 = vadd.f32 %v18179_v41, %v15215_v27 }
0x15c7   :  { %v7032_v5 = vmul.f32 %v6904_v28, %v6313_v60  ;;  %v6906_v18 = vmul.f32 %v6778_v1, %v6506_v23  ;;  %v18182_v55 = vpack.c.bf16 %v18180_v63, %v18181_v33  ;;  %v6777_v12 = vmul.f32 0.044715, %v16126_v42 }
0x15c8   :  { %v6319_v38 = vadd.f32 %v15956_v0, %v15201_v37  ;;  %v6512_v43 = vadd.f32 %v15958_v11, %v15205_v46  ;;  %v16142_v40 = vadd.f32 %v15961_v57, %v15213_v56  ;;  %v7763_v19 = vpack.c.bf16 %v7667_v58, %v7663_v9 }
0x15c9   :  { %v7160_v49 = vadd.f32 %v7032_v5, %v6313_v60  ;;  %v7034_v54 = vmul.f32 %v6906_v18, %v6506_v23  ;;  %v6779_v30 = vmul.f32 0.044715, %v16130_v20  ;;  %v18185_v3 = vpack.c.bf16 %v18183_v51, %v18184_v32 }
0x15ca   :  { %8140 = vmatmul.mubr.bf16.gmra.mrb[24].mxu1 %v18182_v55  ;;  %v6646_v10 = vmul.f32 0.5, %v16081_v62  ;;  %v6903_v0 = vmul.f32 %v6775_v59, %v16099_v22  ;;  %v16150_v50 = vmul.f32 0.5, %v6313_v60  ;;  %v6780_v11 = vmul.f32 0.044715, %v6319_v38 }
0x15cb   :  { %8147 = vmatprep.mubr.bf16.mxu1 %v7761_v13  ;;  %8301 = vmatmul.mubr.bf16.gmra.mrb[24].mxu0 %v18185_v3  ;;  %v7288_v57 = vmul.f32 0.7978846, %v7160_v49  ;;  %v16152_v35 = vmul.f32 0.5, %v6506_v23  ;;  %v7162_v53 = vadd.f32 %v7034_v54, %v6506_v23  ;;  %v6782_v47 = vmul.f32 0.044715, %v6512_v43 }
0x15cc   :  { %8308 = vmatprep.mubr.bf16.mxu0 %v7763_v19  ;;  %v16155_v28 = vmul.f32 %v6901_v36, %v16095_v17  ;;  %v6905_v1 = vmul.f32 %v6777_v12, %v16126_v42  ;;  %v6908_v13 = vmul.f32 %v6780_v11, %v6319_v38  ;;  %v6781_v9 = vmul.f32 0.044715, %v16142_v40 }
0x15cd   :  { %v10757_v62 = vpop.eup %10756  ;;  %10760 = vtanh.f32 %v7288_v57  ;;  %v7290_v59 = vmul.f32 0.7978846, %v7162_v53  ;;  %v6907_v60 = vmul.f32 %v6779_v30, %v16130_v20  ;;  %v6910_v58 = vmul.f32 %v6782_v47, %v6512_v43 }
0x15ce   :  { %v7540_v5 = vadd.f32 1.0, %v10757_v62  ;;  %v7036_v18 = vmul.f32 %v6908_v13, %v6319_v38  ;;  %v6909_v41 = vmul.f32 %v6781_v9, %v16142_v40  ;;  %v16163_v23 = vadd.f32 %v15963_v26, %v15215_v27 }
0x15cf   :  { %10762 = vtanh.f32 %v7290_v59  ;;  %v7038_v36 = vmul.f32 %v6910_v58, %v6512_v43  ;;  %v6323_v63 = vadd.f32 %v15970_v14, %v15201_v37  ;;  %v6516_v33 = vadd.f32 %v15980_v29, %v15205_v46 }
0x15d0   :  { %v10759_v55 = vpop.eup %10758  ;;  %v18186_v12 = vpack.c.bf16 %v16017_v8, %v15950_v44  ;;  %v16173_v19 = vmul.f32 %v6903_v0, %v16099_v22  ;;  %v16175_v49 = vmul.f32 0.5, %v6319_v38  ;;  %v7164_v26 = vadd.f32 %v7036_v18, %v6319_v38 }
0x15d1   :  { %v16177_v54 = vmul.f32 0.5, %v6512_v43  ;;  %v16180_v30 = vmul.f32 %v6905_v1, %v16126_v42  ;;  %v16183_v14 = vmul.f32 %v6907_v60, %v16130_v20  ;;  %v7166_v29 = vadd.f32 %v7038_v36, %v6512_v43 }
0x15d2   :  { %8148 = vmatmul.mubr.bf16.gmra.mrb[28].mxu1 %v18186_v12  ;;  %v6784_v51 = vmul.f32 0.044715, %v6323_v63  ;;  %v18187_v44 = vpack.c.bf16 %v16024_v39, %v15973_v48  ;;  %v16189_v8 = vmul.f32 %v7540_v5, %v16120_v45  ;;  %v7292_v32 = vmul.f32 0.7978846, %v7164_v26 }
0x15d3   :  { %v6783_v38 = vmul.f32 0.044715, %v16163_v23  ;;  %v6786_v3 = vmul.f32 0.044715, %v6516_v33  ;;  %v7294_v0 = vmul.f32 0.7978846, %v7166_v29  ;;  %v16193_v11 = vmul.f32 %v6909_v41, %v16142_v40 }
0x15d4   :  { %8309 = vmatmul.mubr.bf16.gmra.mrb[28].mxu0 %v18187_v44  ;;  %v6912_v57 = vmul.f32 %v6784_v51, %v6323_v63  ;;  %v16197_v43 = vadd.f32 %v15982_v52, %v15213_v56  ;;  %v7542_v53 = vadd.f32 1.0, %v10759_v55  ;;  %10764 = vtanh.f32 %v7292_v32 }
0x15d5   :  { %v6914_v48 = vmul.f32 %v6786_v3, %v6516_v33  ;;  %v6329_v39 = vadd.f32 %v16012_v34, %v15201_v37  ;;  %10766 = vtanh.f32 %v7294_v0  ;;  %v16203_v47 = vadd.f32 %v15991_v24, %v15215_v27 }
0x15d6   :  { %v7040_v45 = vmul.f32 %v6912_v57, %v6323_v63  ;;  %v6522_v1 = vadd.f32 %v16014_v16, %v15205_v46  ;;  %v6911_v13 = vmul.f32 %v6783_v38, %v16163_v23  ;;  %v6785_v52 = vmul.f32 0.044715, %v16197_v43 }
0x15d7   :  { %v7042_v9 = vmul.f32 %v6914_v48, %v6516_v33  ;;  %v6788_v62 = vmul.f32 0.044715, %v6329_v39  ;;  %v10761_v59 = vpop.eup %10760  ;;  %v16209_v60 = vmul.f32 0.5, %v6323_v63  ;;  %v16211_v34 = vmul.f32 0.5, %v6516_v33 }
0x15d8   :  { %v7168_v58 = vadd.f32 %v7040_v45, %v6323_v63  ;;  %v6790_v5 = vmul.f32 0.044715, %v6522_v1  ;;  %v16213_v18 = vmul.f32 %v7542_v53, %v6646_v10  ;;  %v7544_v24 = vadd.f32 1.0, %v10761_v59 }
0x15d9   :  { %v7170_v41 = vadd.f32 %v7042_v9, %v6516_v33  ;;  %v6916_v36 = vmul.f32 %v6788_v62, %v6329_v39  ;;  %v10763_v55 = vpop.eup %10762  ;;  %v6787_v12 = vmul.f32 0.044715, %v16203_v47  ;;  %v16218_v29 = vadd.f32 %v16019_v61, %v15213_v56 }
0x15da   :  { %18188 = vst [vmem:[#allocation53_spill] sm:$0xff] %v16213_v18  ;;  %v7296_v16 = vmul.f32 0.7978846, %v7168_v58  ;;  %v6918_v26 = vmul.f32 %v6790_v5, %v6522_v1  ;;  %v16221_v51 = vmul.f32 %v7544_v24, %v16150_v50  ;;  %v7546_v63 = vadd.f32 1.0, %v10763_v55 }
0x15db   :  { %v7298_v44 = vmul.f32 0.7978846, %v7170_v41  ;;  %v6913_v10 = vmul.f32 %v6785_v52, %v16197_v43  ;;  %v7044_v32 = vmul.f32 %v6916_v36, %v6329_v39  ;;  %v6789_v38 = vmul.f32 0.044715, %v16218_v29  ;;  %v16225_v3 = vpop.f32.mrb[240].mxu1  ;;  %v16227_v0 = vpop.f32.mrb[240].mxu0 }
0x15dc   :  { %10768 = vtanh.f32 %v7296_v16  ;;  %v7046_v33 = vmul.f32 %v6918_v26, %v6522_v1  ;;  %v16232_v57 = vmul.f32 %v7546_v63, %v16152_v35  ;;  %v16236_v50 = vadd.f32 %v16021_v6, %v15215_v27  ;;  %v16238_v53 = vpop.f32.mrb[241].mxu1  ;;  %v16240_v48 = vpop.f32.mrb[241].mxu0  ;;  %v18195_v6 = vld [vmem:[#allocation17_spill] sm:$0xff] }
0x15dd   :  { %10770 = vtanh.f32 %v7298_v44  ;;  %18189 = vst [vmem:[#allocation101_spill] sm:$0xff] %v16238_v53  ;;  %18190 = vst [vmem:[#allocation47_spill] sm:$0xff] %v16240_v48  ;;  %v6915_v45 = vmul.f32 %v6787_v12, %v16203_v47  ;;  %v7172_v9 = vadd.f32 %v7044_v32, %v6329_v39  ;;  %v6333_v62 = vadd.f32 %v16028_v4, %v15201_v37  ;;  %v16245_v59 = vpop.f32.mrb[242].mxu1  ;;  %v16247_v35 = vpop.f32.mrb[242].mxu0 }
0x15de   :  { %v7174_v52 = vadd.f32 %v7046_v33, %v6522_v1  ;;  %18191 = vst [vmem:[#allocation81_spill] sm:$0xff] %v16245_v59  ;;  %18192 = vst [vmem:[#allocation61_spill] sm:$0xff] %v16247_v35  ;;  %v10765_v58 = vpop.eup %10764  ;;  %v16251_v5 = vmul.f32 0.5, %v6329_v39  ;;  %v6917_v24 = vmul.f32 %v6789_v38, %v16218_v29  ;;  %v6526_v41 = vadd.f32 %v16030_v25, %v15205_v46  ;;  %v16256_v36 = vpop.f32.mrb[243].mxu1 }
0x15df   :  { %18193 = vst [vmem:[#allocation80_spill] sm:$0xff] %v16256_v36  ;;  %v16258_v55 = vpop.f32.mrb[243].mxu0  ;;  %v10767_v4 = vpop.eup %10766  ;;  %v16261_v16 = vmul.f32 %v6911_v13, %v16163_v23  ;;  %v7300_v12 = vmul.f32 0.7978846, %v7172_v9  ;;  %v6791_v63 = vmul.f32 0.044715, %v16236_v50  ;;  %v16265_v39 = vmul.f32 %v6913_v10, %v16197_v43 }
0x15e0   :  { %18194 = vst [vmem:[#allocation59_spill] sm:$0xff] %v16258_v55  ;;  %v7302_v26 = vmul.f32 0.7978846, %v7174_v52  ;;  %v7548_v44 = vadd.f32 1.0, %v10765_v58  ;;  %v16267_v32 = vmul.f32 0.5, %v6522_v1  ;;  %v16270_v25 = vmul.f32 %v6915_v45, %v16203_v47 }
0x15e1   :  { %v6792_v33 = vmul.f32 0.044715, %v6333_v62  ;;  %10772 = vtanh.f32 %v7300_v12  ;;  %v6794_v38 = vmul.f32 0.044715, %v6526_v41  ;;  %v16274_v13 = vadd.f32 %v16035_v21, %v15213_v56 }
0x15e2   :  { %v7550_v9 = vadd.f32 1.0, %v10767_v4  ;;  %10774 = vtanh.f32 %v7302_v26  ;;  %v16277_v52 = vmul.f32 %v6917_v24, %v16218_v29  ;;  %v6919_v10 = vmul.f32 %v6791_v63, %v16236_v50 }
0x15e3   :  { %v6920_v58 = vmul.f32 %v6792_v33, %v6333_v62  ;;  %v6922_v1 = vmul.f32 %v6794_v38, %v6526_v41  ;;  %v16282_v61 = vadd.f32 %v18195_v6, %v15215_v27  ;;  %v6339_v45 = vadd.f32 %v16056_v7, %v15201_v37  ;;  %v16286_v12 = vpop.f32.mrb[244].mxu1  ;;  %v16288_v21 = vpop.f32.mrb[244].mxu0 }
0x15e4   :  { %18196 = vst [vmem:[#allocation83_spill] sm:$0xff] %v16286_v12  ;;  %18197 = vst [vmem:[#allocation63_spill] sm:$0xff] %v16288_v21  ;;  %v16291_v4 = vmul.f32 %v7548_v44, %v16175_v49  ;;  %v16293_v24 = vmul.f32 0.5, %v6333_v62  ;;  %v6532_v63 = vadd.f32 %v16058_v15, %v15205_v46  ;;  %v16297_v33 = vpop.f32.mrb[245].mxu1  ;;  %v16299_v6 = vpop.f32.mrb[245].mxu0  ;;  %v16301_v55 = vmul.f32 0.5, %v6526_v41 }
0x15e5   :  { %v7048_v26 = vmul.f32 %v6920_v58, %v6333_v62  ;;  %18199 = vst [vmem:[#allocation79_spill] sm:$0xff] %v16297_v33  ;;  %18200 = vst [vmem:[#allocation77_spill] sm:$0xff] %v16299_v6  ;;  %v7050_v7 = vmul.f32 %v6922_v1, %v6526_v41  ;;  %v6793_v12 = vmul.f32 0.044715, %v16274_v13  ;;  %v16306_v49 = vadd.f32 %v16065_v2, %v15213_v56  ;;  %v16308_v44 = vpop.f32.mrb[246].mxu1  ;;  %v16310_v58 = vpop.f32.mrb[246].mxu0 }
0x15e6   :  { %18198 = vst [vmem:[#allocation60_spill] sm:$0xff] %v16291_v4  ;;  %v10769_v38 = vpop.eup %10768  ;;  %18201 = vst [vmem:[#allocation65_spill] sm:$0xff] %v16308_v44  ;;  %v16313_v15 = vmul.f32 %v7550_v9, %v16177_v54  ;;  %v6796_v36 = vmul.f32 0.044715, %v6339_v45  ;;  %v16315_v35 = vpop.f32.mrb[247].mxu1  ;;  %v16322_v44 = vadd.f32 %v16067_v31, %v15215_v27 }
0x15e7   :  { %18202 = vst [vmem:[#allocation62_spill] sm:$0xff] %v16310_v58  ;;  %v10771_v21 = vpop.eup %10770  ;;  %v7552_v33 = vadd.f32 1.0, %v10769_v38  ;;  %v7176_v6 = vadd.f32 %v7048_v26, %v6333_v62  ;;  %18204 = vst [vmem:[#allocation8_spill] sm:$0xff] %v16315_v35  ;;  %v16317_v1 = vpop.f32.mrb[247].mxu0  ;;  %v7178_v48 = vadd.f32 %v7050_v7, %v6526_v41  ;;  %v6795_v2 = vmul.f32 0.044715, %v16282_v61 }
0x15e8   :  { %18203 = vst [vmem:[#allocation82_spill] sm:$0xff] %v16313_v15  ;;  %18205 = vst [vmem:[#allocation67_spill] sm:$0xff] %v16317_v1  ;;  %v7554_v59 = vadd.f32 1.0, %v10771_v21  ;;  %v6924_v9 = vmul.f32 %v6796_v36, %v6339_v45  ;;  %v6798_v38 = vmul.f32 0.044715, %v6532_v63  ;;  %v6921_v1 = vmul.f32 %v6793_v12, %v16274_v13 }
0x15e9   :  { %v16325_v58 = vmul.f32 %v7552_v33, %v16209_v60  ;;  %v7304_v54 = vmul.f32 0.7978846, %v7176_v6  ;;  %v7306_v26 = vmul.f32 0.7978846, %v7178_v48  ;;  %v6797_v41 = vmul.f32 0.044715, %v16306_v49 }
0x15ea   :  { %v16328_v62 = vmul.f32 %v7554_v59, %v16211_v34  ;;  %v7052_v31 = vmul.f32 %v6924_v9, %v6339_v45  ;;  %v6926_v7 = vmul.f32 %v6798_v38, %v6532_v63  ;;  %v6923_v36 = vmul.f32 %v6795_v2, %v16282_v61  ;;  %v18208_v6 = vld [vmem:[#allocation31_spill] sm:$0xff] }
0x15eb   :  { %18206 = vst [vmem:[#allocation10_spill] sm:$0xff] %v16325_v58  ;;  %10776 = vtanh.f32 %v7304_v54  ;;  %v10773_v35 = vpop.eup %10772  ;;  %v6799_v34 = vmul.f32 0.044715, %v16322_v44  ;;  %v6925_v33 = vmul.f32 %v6797_v41, %v16306_v49  ;;  %v6343_v21 = vadd.f32 %v18208_v6, %v15201_v37 }
0x15ec   :  { %18207 = vst [vmem:[#allocation64_spill] sm:$0xff] %v16328_v62  ;;  %10778 = vtanh.f32 %v7306_v26  ;;  %v10775_v48 = vpop.eup %10774  ;;  %v7180_v59 = vadd.f32 %v7052_v31, %v6339_v45  ;;  %v7054_v12 = vmul.f32 %v6926_v7, %v6532_v63  ;;  %v7556_v54 = vadd.f32 1.0, %v10773_v35  ;;  %v18209_v26 = vld [vmem:[#allocation15_spill] sm:$0xff] }
0x15ed   :  { %v16342_v9 = vmul.f32 %v6919_v10, %v16236_v50  ;;  %v16344_v38 = vmul.f32 0.5, %v6339_v45  ;;  %v6536_v60 = vadd.f32 %v18209_v26, %v15205_v46  ;;  %v7558_v2 = vadd.f32 1.0, %v10775_v48  ;;  %v18210_v48 = vld [vmem:[#allocation27_spill] sm:$0xff] }
0x15ee   :  { %v7308_v15 = vmul.f32 0.7978846, %v7180_v59  ;;  %v16348_v62 = vmul.f32 0.5, %v6532_v63  ;;  %v7182_v31 = vadd.f32 %v7054_v12, %v6532_v63  ;;  %v16351_v7 = vmul.f32 %v6921_v1, %v16274_v13  ;;  %v16380_v58 = vpop.f32.mrb[248].mxu0 }
0x15ef   :  { %v16354_v41 = vmul.f32 %v6923_v36, %v16282_v61  ;;  %v6927_v35 = vmul.f32 %v6799_v34, %v16322_v44  ;;  %v6800_v10 = vmul.f32 0.044715, %v6343_v21  ;;  %v16358_v45 = vmul.f32 %v6925_v33, %v16306_v49  ;;  %v18211_v36 = vld [vmem:[#allocation102_spill] sm:$0xff]  ;;  %18213 = vst [vmem:[#allocation103_spill] sm:$0xff] %v16380_v58 }
0x15f0   :  { %v7310_v6 = vmul.f32 0.7978846, %v7182_v31  ;;  %v6802_v4 = vmul.f32 0.044715, %v6536_v60  ;;  %v16362_v59 = vadd.f32 %v18210_v48, %v15213_v56  ;;  %v16365_v63 = vmul.f32 %v7556_v54, %v16251_v5  ;;  %v16378_v48 = vpop.f32.mrb[248].mxu1 }
0x15f1   :  { %v16367_v1 = vmul.f32 0.5, %v6343_v21  ;;  %v6928_v12 = vmul.f32 %v6800_v10, %v6343_v21  ;;  %v16371_v26 = vadd.f32 %v18211_v36, %v15215_v27  ;;  %v16374_v34 = vmul.f32 %v7558_v2, %v16267_v32  ;;  %18212 = vst [vmem:[#allocation105_spill] sm:$0xff] %v16378_v48  ;;  %v16388_v32 = vpop.f32.mrb[249].mxu1 }
0x15f2   :  { %10780 = vtanh.f32 %v7308_v15  ;;  %v6930_v33 = vmul.f32 %v6802_v4, %v6536_v60  ;;  %v7157_v31 = vadd.f32 %v16155_v28, %v16095_v17  ;;  %v16383_v5 = vmul.f32 %v6927_v35, %v16322_v44  ;;  %18214 = vst [vmem:[#allocation106_spill] sm:$0xff] %v16388_v32  ;;  %v16390_v15 = vpop.f32.mrb[249].mxu0  ;;  %v16393_v58 = vpop.f32.mrb[250].mxu1 }
0x15f3   :  { %v7056_v54 = vmul.f32 %v6928_v12, %v6343_v21  ;;  %v6801_v10 = vmul.f32 0.044715, %v16362_v59  ;;  %v7161_v36 = vadd.f32 %v16180_v30, %v16126_v42  ;;  %18215 = vst [vmem:[#allocation104_spill] sm:$0xff] %v16390_v15  ;;  %10782 = vtanh.f32 %v7310_v6  ;;  %18216 = vst [vmem:[#allocation109_spill] sm:$0xff] %v16393_v58  ;;  %v16395_v35 = vpop.f32.mrb[250].mxu0  ;;  %v16399_v18 = vpop.f32.mrb[251].mxu1 }
0x15f4   :  { %v7058_v28 = vmul.f32 %v6930_v33, %v6536_v60  ;;  %v6803_v2 = vmul.f32 0.044715, %v16371_v26  ;;  %v7285_v48 = vmul.f32 0.7978846, %v7157_v31  ;;  %18217 = vst [vmem:[#allocation107_spill] sm:$0xff] %v16395_v35  ;;  %v16397_v56 = vmul.f32 0.5, %v6536_v60 }
0x15f5   :  { %v10777_v4 = vpop.eup %10776  ;;  %v7184_v53 = vadd.f32 %v7056_v54, %v6343_v21  ;;  %v7289_v30 = vmul.f32 0.7978846, %v7161_v36  ;;  %v16401_v32 = vpop.f32.mrb[251].mxu0  ;;  %v6645_v33 = vmul.f32 0.5, %v16095_v17  ;;  %v6929_v35 = vmul.f32 %v6801_v10, %v16362_v59 }
0x15f6   :  { %v10779_v12 = vpop.eup %10778  ;;  %v7560_v27 = vadd.f32 1.0, %v10777_v4  ;;  %v7186_v6 = vadd.f32 %v7058_v28, %v6536_v60  ;;  %10784 = vtanh.f32 %v7285_v48  ;;  %v7159_v36 = vadd.f32 %v16173_v19, %v16099_v22 }
0x15f7   :  { %v7562_v15 = vadd.f32 1.0, %v10779_v12  ;;  %v7312_v58 = vmul.f32 0.7978846, %v7184_v53  ;;  %10786 = vtanh.f32 %v7289_v30  ;;  %v7163_v60 = vadd.f32 %v16183_v14, %v16130_v20 }
0x15f8   :  { %v16405_v31 = vmul.f32 %v7560_v27, %v16293_v24  ;;  %v7314_v54 = vmul.f32 0.7978846, %v7186_v6  ;;  %v6931_v27 = vmul.f32 %v6803_v2, %v16371_v26  ;;  %v6649_v53 = vmul.f32 0.5, %v16126_v42 }
0x15f9   :  { %v16409_v21 = vmul.f32 %v7562_v15, %v16301_v55  ;;  %10788 = vtanh.f32 %v7312_v58  ;;  %v7287_v55 = vmul.f32 0.7978846, %v7159_v36  ;;  %v7291_v48 = vmul.f32 0.7978846, %v7163_v60 }
0x15fa   :  { %v7772_v17 = vpack.c.bf16 %v16405_v31, %v16365_v63  ;;  %10790 = vtanh.f32 %v7314_v54  ;;  %v16422_v10 = vmul.f32 0.5, %v16099_v22  ;;  %v16425_v19 = vmul.f32 0.5, %v16130_v20 }
0x15fb   :  { %v7774_v24 = vpack.c.bf16 %v16409_v21, %v16374_v34  ;;  %v7165_v14 = vadd.f32 %v16193_v11, %v16142_v40  ;;  %v7169_v58 = vadd.f32 %v16265_v39, %v16197_v43  ;;  %v7057_v42 = vmul.f32 %v6929_v35, %v16362_v59 }
0x15fc   :  { %v10781_v15 = vpop.eup %10780  ;;  %10792 = vtanh.f32 %v7287_v55  ;;  %v7167_v4 = vadd.f32 %v16261_v16, %v16163_v23  ;;  %v7171_v22 = vadd.f32 %v16270_v25, %v16203_v47  ;;  %v16437_v28 = vmul.f32 %v6931_v27, %v16371_v26 }
0x15fd   :  { %10794 = vtanh.f32 %v7291_v48  ;;  %v16440_v20 = vmul.f32 0.5, %v16142_v40  ;;  %v7293_v11 = vmul.f32 0.7978846, %v7165_v14  ;;  %v10783_v2 = vpop.eup %10782  ;;  %v7297_v39 = vmul.f32 0.7978846, %v7169_v58 }
0x15fe   :  { %v7295_v12 = vmul.f32 0.7978846, %v7167_v4  ;;  %v7299_v30 = vmul.f32 0.7978846, %v7171_v22  ;;  %v7173_v35 = vadd.f32 %v16277_v52, %v16218_v29  ;;  %v7564_v6 = vadd.f32 1.0, %v10781_v15 }
0x15ff   :  { %v16445_v16 = vmul.f32 0.5, %v16197_v43  ;;  %10796 = vtanh.f32 %v7293_v11  ;;  %v16448_v25 = vmul.f32 0.5, %v16163_v23  ;;  %v16451_v40 = vmul.f32 0.5, %v16203_v47 }
0x1600   :  { %v10785_v54 = vpop.eup %10784  ;;  %10798 = vtanh.f32 %v7297_v39  ;;  %v7177_v36 = vadd.f32 %v16351_v7, %v16274_v13  ;;  %v7301_v60 = vmul.f32 0.7978846, %v7173_v35  ;;  %v7566_v55 = vadd.f32 1.0, %v10783_v2 }
0x1601   :  { %v10787_v27 = vpop.eup %10786  ;;  %v7541_v52 = vadd.f32 1.0, %v10785_v54  ;;  %10800 = vtanh.f32 %v7295_v12  ;;  %v7175_v43 = vadd.f32 %v16342_v9, %v16236_v50  ;;  %v7179_v14 = vadd.f32 %v16354_v41, %v16282_v61 }
0x1602   :  { %v7545_v48 = vadd.f32 1.0, %v10787_v27  ;;  %10802 = vtanh.f32 %v7299_v30  ;;  %v7305_v23 = vmul.f32 0.7978846, %v7177_v36  ;;  %v16460_v47 = vmul.f32 %v7564_v6, %v16344_v38 }
0x1603   :  { %v10789_v58 = vpop.eup %10788  ;;  %v7669_v15 = vmul.f32 %v7541_v52, %v6645_v33  ;;  %10804 = vtanh.f32 %v7301_v60  ;;  %v7303_v7 = vmul.f32 0.7978846, %v7175_v43  ;;  %v7307_v2 = vmul.f32 0.7978846, %v7179_v14 }
0x1604   :  { %v10791_v4 = vpop.eup %10790  ;;  %v7568_v22 = vadd.f32 1.0, %v10789_v58  ;;  %v7673_v11 = vmul.f32 %v7545_v48, %v6649_v53  ;;  %10806 = vtanh.f32 %v7305_v23  ;;  %v16463_v9 = vmul.f32 %v7566_v55, %v16348_v62  ;;  %v16471_v35 = vpop.f32.mrb[252].mxu1 }
0x1605   :  { %v7570_v39 = vadd.f32 1.0, %v10791_v4  ;;  %10808 = vtanh.f32 %v7303_v7  ;;  %v7181_v41 = vadd.f32 %v16358_v45, %v16306_v49  ;;  %v7185_v30 = vadd.f32 %v7057_v42, %v16362_v59  ;;  %v16473_v53 = vpop.f32.mrb[252].mxu0  ;;  %v16479_v60 = vpop.f32.mrb[253].mxu1 }
0x1606   :  { %v10793_v12 = vpop.eup %10792  ;;  %v16468_v38 = vmul.f32 %v7568_v22, %v16367_v1  ;;  %v7765_v33 = vpack.c.bf16 %v7673_v11, %v7669_v15  ;;  %10810 = vtanh.f32 %v7307_v2  ;;  %v6661_v36 = vmul.f32 0.5, %v16218_v29  ;;  %v16481_v1 = vpop.f32.mrb[253].mxu0 }
0x1607   :  { %v10795_v6 = vpop.eup %10794  ;;  %v16476_v62 = vmul.f32 %v7570_v39, %v16397_v56  ;;  %v7543_v54 = vadd.f32 1.0, %v10793_v12  ;;  %v7309_v45 = vmul.f32 0.7978846, %v7181_v41  ;;  %v6665_v55 = vmul.f32 0.5, %v16274_v13  ;;  %v16486_v43 = vpop.f32.mrb[254].mxu1 }
0x1608   :  { %v7776_v27 = vpack.c.bf16 %v16468_v38, %v16460_v47  ;;  %8155 = vmatprep.mubr.bf16.mxu1 %v7765_v33  ;;  %v7547_v42 = vadd.f32 1.0, %v10795_v6  ;;  %v7313_v52 = vmul.f32 0.7978846, %v7185_v30  ;;  %v16488_v56 = vpop.f32.mrb[254].mxu0  ;;  %v18218_v14 = vpack.c.bf16 %v16221_v51, %v16189_v8  ;;  %v16498_v13 = vpop.f32.mrb[255].mxu1 }
0x1609   :  { %v10797_v48 = vpop.eup %10796  ;;  %v7778_v29 = vpack.c.bf16 %v16476_v62, %v16463_v9  ;;  %v7671_v23 = vmul.f32 %v7543_v54, %v16422_v10  ;;  %10812 = vtanh.f32 %v7309_v45  ;;  %v7183_v58 = vadd.f32 %v16383_v5, %v16322_v44  ;;  %v16500_v15 = vpop.f32.mrb[255].mxu0  ;;  %v18243_v9 = vld [vmem:[#allocation67_spill] sm:$0xff] }
0x160a   :  { %8156 = vmatmul.mubr.bf16.gmra.mrb[32].mxu1 %v18218_v14  ;;  %v10799_v7 = vpop.eup %10798  ;;  %v7675_v4 = vmul.f32 %v7547_v42, %v16425_v19  ;;  %v7549_v22 = vadd.f32 1.0, %v10797_v48  ;;  %10814 = vtanh.f32 %v7313_v52  ;;  %v7187_v10 = vadd.f32 %v16437_v28, %v16371_v26  ;;  %v18219_v48 = vld [vmem:[#allocation53_spill] sm:$0xff] }
0x160b   :  { %v10801_v11 = vpop.eup %10800  ;;  %v7553_v2 = vadd.f32 1.0, %v10799_v7  ;;  %v6663_v8 = vmul.f32 0.5, %v16236_v50  ;;  %v7311_v51 = vmul.f32 0.7978846, %v7183_v58  ;;  %v6349_v5 = vadd.f32 %v16225_v3, %v15201_v37 }
0x160c   :  { %v10803_v39 = vpop.eup %10802  ;;  %v7767_v41 = vpack.c.bf16 %v7675_v4, %v7671_v23  ;;  %v7551_v12 = vadd.f32 1.0, %v10801_v11  ;;  %v7315_v33 = vmul.f32 0.7978846, %v7187_v10  ;;  %v16510_v19 = vadd.f32 %v16227_v0, %v15205_v46 }
0x160d   :  { %v10805_v30 = vpop.eup %10804  ;;  %v7677_v6 = vmul.f32 %v7549_v22, %v16440_v20  ;;  %v7681_v28 = vmul.f32 %v7553_v2, %v16445_v16  ;;  %v7555_v54 = vadd.f32 1.0, %v10803_v39  ;;  %10816 = vtanh.f32 %v7311_v51  ;;  %v18221_v51 = vld [vmem:[#allocation76_spill] sm:$0xff]  ;;  %v18222_v39 = vld [vmem:[#allocation101_spill] sm:$0xff] }
0x160e   :  { %v10807_v50 = vpop.eup %10806  ;;  %8316 = vmatprep.mubr.bf16.mxu0 %v7767_v41  ;;  %v7557_v45 = vadd.f32 1.0, %v10805_v30  ;;  %v6667_v3 = vmul.f32 0.5, %v16282_v61  ;;  %10818 = vtanh.f32 %v7315_v33  ;;  %v6804_v42 = vmul.f32 0.044715, %v6349_v5  ;;  %v18223_v41 = vld [vmem:[#allocation10_spill] sm:$0xff]  ;;  %v18224_v33 = vld [vmem:[#allocation60_spill] sm:$0xff] }
0x160f   :  { %v10809_v52 = vpop.eup %10808  ;;  %v18220_v23 = vpack.c.bf16 %v16232_v57, %v18219_v48  ;;  %v7769_v0 = vpack.c.bf16 %v7681_v28, %v7677_v6  ;;  %v7679_v14 = vmul.f32 %v7551_v12, %v16448_v25  ;;  %v7683_v20 = vmul.f32 %v7555_v54, %v16451_v40 }
0x1610   :  { %v7561_v16 = vadd.f32 1.0, %v10807_v50  ;;  %v10811_v58 = vpop.eup %10810  ;;  %v7685_v7 = vmul.f32 %v7557_v45, %v6661_v36  ;;  %v7559_v4 = vadd.f32 1.0, %v10809_v52  ;;  %v6932_v22 = vmul.f32 %v6804_v42, %v6349_v5  ;;  %v18227_v50 = vld [vmem:[#allocation47_spill] sm:$0xff]  ;;  %v18228_v42 = vld [vmem:[#allocation81_spill] sm:$0xff] }
0x1611   :  { %8317 = vmatmul.mubr.bf16.gmra.mrb[32].mxu0 %v18220_v23  ;;  %v6806_v10 = vmul.f32 0.044715, %v16510_v19  ;;  %8163 = vmatprep.mubr.bf16.mxu1 %v7769_v0  ;;  %v7771_v61 = vpack.c.bf16 %v7683_v20, %v7679_v14  ;;  %v7563_v2 = vadd.f32 1.0, %v10811_v58  ;;  %v16523_v57 = vadd.f32 %v18222_v39, %v18221_v51 }
0x1612   :  { %v7689_v11 = vmul.f32 %v7561_v16, %v6665_v55  ;;  %v18225_v25 = vpack.c.bf16 %v18223_v41, %v18224_v33  ;;  %v7687_v40 = vmul.f32 %v7559_v4, %v6663_v8  ;;  %v6669_v12 = vmul.f32 0.5, %v16306_v49  ;;  %v18226_v55 = vld [vmem:[#allocation34_spill] sm:$0xff] }
0x1613   :  { %v7060_v36 = vmul.f32 %v6932_v22, %v6349_v5  ;;  %v6934_v30 = vmul.f32 %v6806_v10, %v16510_v19  ;;  %v10813_v6 = vpop.eup %10812  ;;  %8324 = vmatprep.mubr.bf16.mxu0 %v7771_v61  ;;  %v7691_v54 = vmul.f32 %v7563_v2, %v6667_v3  ;;  %v16532_v45 = vadd.f32 %v18227_v50, %v18226_v55  ;;  %v18229_v61 = vld [vmem:[#allocation64_spill] sm:$0xff] }
0x1614   :  { %8164 = vmatmul.mubr.bf16.gmra.mrb[36].mxu1 %v18225_v25  ;;  %v7773_v28 = vpack.c.bf16 %v7689_v11, %v7685_v7  ;;  %v6353_v52 = vadd.f32 %v18228_v42, %v15201_v37  ;;  %v10815_v48 = vpop.eup %10814  ;;  %v7565_v23 = vadd.f32 1.0, %v10813_v6  ;;  %v6805_v49 = vmul.f32 0.044715, %v16523_v57  ;;  %v18230_v11 = vld [vmem:[#allocation82_spill] sm:$0xff]  ;;  %v18233_v50 = vld [vmem:[#allocation80_spill] sm:$0xff] }
0x1615   :  { %v7188_v0 = vadd.f32 %v7060_v36, %v6349_v5  ;;  %v7062_v8 = vmul.f32 %v6934_v30, %v16510_v19  ;;  %v7775_v14 = vpack.c.bf16 %v7691_v54, %v7687_v40  ;;  %v6673_v20 = vmul.f32 0.5, %v16362_v59  ;;  %v18232_v59 = vld [vmem:[#allocation61_spill] sm:$0xff] }
0x1616   :  { %8171 = vmatprep.mubr.bf16.mxu1 %v7773_v28  ;;  %v7569_v16 = vadd.f32 1.0, %v10815_v48  ;;  %v6671_v3 = vmul.f32 0.5, %v16322_v44  ;;  %v6675_v58 = vmul.f32 0.5, %v16371_v26  ;;  %v16541_v7 = vmul.f32 0.5, %v6349_v5 }
0x1617   :  { %v7316_v4 = vmul.f32 0.7978846, %v7188_v0  ;;  %v7190_v22 = vadd.f32 %v7062_v8, %v16510_v19  ;;  %v10817_v10 = vpop.eup %10816  ;;  %v18231_v2 = vpack.c.bf16 %v18229_v61, %v18230_v11  ;;  %v7693_v39 = vmul.f32 %v7565_v23, %v6669_v12  ;;  %v18234_v0 = vld [vmem:[#allocation59_spill] sm:$0xff] }
0x1618   :  { %v7697_v41 = vmul.f32 %v7569_v16, %v6673_v20  ;;  %v6808_v33 = vmul.f32 0.044715, %v6353_v52  ;;  %v6546_v25 = vadd.f32 %v18232_v59, %v15205_v46  ;;  %v10819_v40 = vpop.eup %10818  ;;  %v7567_v44 = vadd.f32 1.0, %v10817_v10  ;;  %v18237_v16 = vld [vmem:[#allocation79_spill] sm:$0xff] }
0x1619   :  { %8325 = vmatmul.mubr.bf16.gmra.mrb[36].mxu0 %v18231_v2  ;;  %v7318_v26 = vmul.f32 0.7978846, %v7190_v22  ;;  %v6933_v5 = vmul.f32 %v6805_v49, %v16523_v57  ;;  %v6807_v36 = vmul.f32 0.044715, %v16532_v45  ;;  %v7571_v6 = vadd.f32 1.0, %v10819_v40  ;;  %v18235_v49 = vld [vmem:[#allocation83_spill] sm:$0xff] }
0x161a   :  { %8332 = vmatprep.mubr.bf16.mxu0 %v7775_v14  ;;  %v7777_v30 = vpack.c.bf16 %v7697_v41, %v7693_v39  ;;  %10820 = vtanh.f32 %v7316_v4  ;;  %v6936_v28 = vmul.f32 %v6808_v33, %v6353_v52  ;;  %v7695_v12 = vmul.f32 %v7567_v44, %v6671_v3 }
0x161b   :  { %10822 = vtanh.f32 %v7318_v26  ;;  %v6810_v54 = vmul.f32 0.044715, %v6546_v25  ;;  %v16556_v42 = vadd.f32 %v18233_v50, %v18221_v51  ;;  %v7699_v48 = vmul.f32 %v7571_v6, %v6675_v58  ;;  %v18238_v26 = vld [vmem:[#allocation77_spill] sm:$0xff] }
0x161c   :  { %8172 = vmatmul.mubr.bf16.gmra.mrb[40].mxu1 %v7772_v17  ;;  %v7064_v23 = vmul.f32 %v6936_v28, %v6353_v52  ;;  %v16560_v8 = vadd.f32 %v18234_v0, %v18226_v55  ;;  %v6359_v14 = vadd.f32 %v18235_v49, %v15201_v37  ;;  %v6935_v63 = vmul.f32 %v6807_v36, %v16532_v45  ;;  %v18236_v17 = vld [vmem:[#allocation63_spill] sm:$0xff]  ;;  %v18239_v28 = vld [vmem:[#allocation65_spill] sm:$0xff]  ;;  %v18240_v0 = vld [vmem:[#allocation62_spill] sm:$0xff] }
0x161d   :  { %8179 = vmatprep.mubr.bf16.mxu1 %v7777_v30  ;;  %v6938_v31 = vmul.f32 %v6810_v54, %v6546_v25  ;;  %v6552_v20 = vadd.f32 %v18236_v17, %v15205_v46  ;;  %v16569_v3 = vadd.f32 %v18237_v16, %v18221_v51  ;;  %v7779_v4 = vpack.c.bf16 %v7699_v48, %v7695_v12 }
0x161e   :  { %v7192_v58 = vadd.f32 %v7064_v23, %v6353_v52  ;;  %v6809_v22 = vmul.f32 0.044715, %v16556_v42  ;;  %v6811_v10 = vmul.f32 0.044715, %v16560_v8  ;;  %v16574_v61 = vmul.f32 0.5, %v16510_v19 }
0x161f   :  { %v16576_v11 = vmul.f32 0.5, %v6353_v52  ;;  %v7066_v2 = vmul.f32 %v6938_v31, %v6546_v25  ;;  %v6812_v39 = vmul.f32 0.044715, %v6359_v14  ;;  %v16582_v41 = vmul.f32 %v6933_v5, %v16523_v57 }
0x1620   :  { %v7320_v33 = vmul.f32 0.7978846, %v7192_v58  ;;  %v6814_v59 = vmul.f32 0.044715, %v6552_v20  ;;  %v6813_v40 = vmul.f32 0.044715, %v16569_v3  ;;  %v16586_v44 = vmul.f32 %v6935_v63, %v16532_v45 }
0x1621   :  { %8333 = vmatmul.mubr.bf16.gmra.mrb[40].mxu0 %v7774_v24  ;;  %v7194_v19 = vadd.f32 %v7066_v2, %v6546_v25  ;;  %v6940_v52 = vmul.f32 %v6812_v39, %v6359_v14  ;;  %v16590_v36 = vadd.f32 %v18238_v26, %v18226_v55  ;;  %v6937_v34 = vmul.f32 %v6809_v22, %v16556_v42 }
0x1622   :  { %8340 = vmatprep.mubr.bf16.mxu0 %v7779_v4  ;;  %10824 = vtanh.f32 %v7320_v33  ;;  %v6939_v21 = vmul.f32 %v6811_v10, %v16560_v8  ;;  %v6942_v24 = vmul.f32 %v6814_v59, %v6552_v20  ;;  %v6941_v6 = vmul.f32 %v6813_v40, %v16569_v3  ;;  %v18241_v33 = vld [vmem:[#allocation8_spill] sm:$0xff] }
0x1623   :  { %v7322_v5 = vmul.f32 0.7978846, %v7194_v19  ;;  %v7068_v30 = vmul.f32 %v6940_v52, %v6359_v14  ;;  %v6363_v12 = vadd.f32 %v18239_v28, %v15201_v37  ;;  %v16600_v50 = vmul.f32 0.5, %v6546_v25  ;;  %v18242_v19 = vld [vmem:[#allocation105_spill] sm:$0xff] }
0x1624   :  { %8180 = vmatmul.mubr.bf16.gmra.mrb[44].mxu1 %v7776_v27  ;;  %v10821_v54 = vpop.eup %10820  ;;  %v7070_v48 = vmul.f32 %v6942_v24, %v6552_v20  ;;  %v6815_v23 = vmul.f32 0.044715, %v16590_v36  ;;  %v16605_v49 = vadd.f32 %v18240_v0, %v15205_v46  ;;  %v16607_v47 = vmul.f32 0.5, %v6359_v14 }
0x1625   :  { %v10823_v63 = vpop.eup %10822  ;;  %10826 = vtanh.f32 %v7322_v5  ;;  %v7196_v38 = vadd.f32 %v7068_v30, %v6359_v14  ;;  %v16609_v27 = vmul.f32 0.5, %v6552_v20  ;;  %v16612_v31 = vmul.f32 %v6937_v34, %v16556_v42 }
0x1626   :  { %v16615_v25 = vmul.f32 %v6939_v21, %v16560_v8  ;;  %v7198_v17 = vadd.f32 %v7070_v48, %v6552_v20  ;;  %v6816_v16 = vmul.f32 0.044715, %v6363_v12  ;;  %v7572_v4 = vadd.f32 1.0, %v10821_v54 }
0x1627   :  { %v7324_v58 = vmul.f32 0.7978846, %v7196_v38  ;;  %v16618_v22 = vmul.f32 %v6941_v6, %v16569_v3  ;;  %v6818_v10 = vmul.f32 0.044715, %v16605_v49  ;;  %v6943_v2 = vmul.f32 %v6815_v23, %v16590_v36 }
0x1628   :  { %v7326_v14 = vmul.f32 0.7978846, %v7198_v17  ;;  %v6944_v39 = vmul.f32 %v6816_v16, %v6363_v12  ;;  %v16627_v59 = vadd.f32 %v18241_v33, %v18221_v51  ;;  %v7574_v20 = vadd.f32 1.0, %v10823_v63  ;;  %v18248_v33 = vld [vmem:[#allocation106_spill] sm:$0xff] }
0x1629   :  { %8341 = vmatmul.mubr.bf16.gmra.mrb[44].mxu0 %v7778_v29  ;;  %10828 = vtanh.f32 %v7324_v58  ;;  %v6946_v40 = vmul.f32 %v6818_v10, %v16605_v49  ;;  %v6369_v52 = vadd.f32 %v18242_v19, %v15201_v37  ;;  %v16634_v62 = vadd.f32 %v18243_v9, %v18226_v55  ;;  %v18244_v29 = vld [vmem:[#allocation103_spill] sm:$0xff]  ;;  %v16638_v21 = vpop.f32.mrb[0].mxu1 }
0x162a   :  { %10830 = vtanh.f32 %v7326_v14  ;;  %v7072_v26 = vmul.f32 %v6944_v39, %v6363_v12  ;;  %v6562_v34 = vadd.f32 %v18244_v29, %v15205_v46  ;;  %v16640_v24 = vmul.f32 0.5, %v6363_v12  ;;  %v16644_v28 = vpop.f32.mrb[1].mxu1 }
0x162b   :  { %v7074_v5 = vmul.f32 %v6946_v40, %v16605_v49  ;;  %v6817_v30 = vmul.f32 0.044715, %v16627_v59  ;;  %v6820_v6 = vmul.f32 0.044715, %v6369_v52  ;;  %v16647_v48 = vmul.f32 %v7572_v4, %v16541_v7  ;;  %v16652_v38 = vpop.f32.mrb[0].mxu0  ;;  %v16654_v17 = vpop.f32.mrb[2].mxu1 }
0x162c   :  { %v10825_v54 = vpop.eup %10824  ;;  %v16650_v23 = vmul.f32 %v6943_v2, %v16590_v36  ;;  %v7200_v0 = vadd.f32 %v7072_v26, %v6363_v12  ;;  %v6822_v63 = vmul.f32 0.044715, %v6562_v34  ;;  %v16657_v16 = vmul.f32 %v7574_v20, %v16574_v61  ;;  %v16660_v39 = vpop.f32.mrb[1].mxu0 }
0x162d   :  { %18245 = vst [vmem:[#allocation110_spill] sm:$0xff] %v16647_v48  ;;  %v7576_v58 = vadd.f32 1.0, %v10825_v54  ;;  %v7202_v10 = vadd.f32 %v7074_v5, %v16605_v49  ;;  %v6948_v14 = vmul.f32 %v6820_v6, %v6369_v52  ;;  %v16662_v7 = vpop.f32.mrb[3].mxu1  ;;  %v6819_v2 = vmul.f32 0.044715, %v16634_v62  ;;  %v16669_v19 = vpop.f32.mrb[2].mxu0 }
0x162e   :  { %18246 = vst [vmem:[#allocation108_spill] sm:$0xff] %v16657_v16  ;;  %18247 = vst [vmem:[#allocation113_spill] sm:$0xff] %v16662_v7  ;;  %v7328_v4 = vmul.f32 0.7978846, %v7200_v0  ;;  %v6950_v12 = vmul.f32 %v6822_v63, %v6562_v34  ;;  %v16667_v40 = vadd.f32 %v18248_v33, %v18221_v51  ;;  %v6945_v9 = vmul.f32 %v6817_v30, %v16627_v59  ;;  %v16675_v5 = vpop.f32.mrb[3].mxu0 }
0x162f   :  { %18250 = vst [vmem:[#allocation114_spill] sm:$0xff] %v16669_v19  ;;  %v10827_v61 = vpop.eup %10826  ;;  %v16672_v20 = vmul.f32 %v7576_v58, %v16576_v11  ;;  %v7330_v26 = vmul.f32 0.7978846, %v7202_v10  ;;  %v7076_v29 = vmul.f32 %v6948_v14, %v6369_v52  ;;  %18252 = vst [vmem:[#allocation88_spill] sm:$0xff] %v16675_v5  ;;  %v18253_v19 = vld [vmem:[#allocation104_spill] sm:$0xff]  ;;  %v6947_v30 = vmul.f32 %v6819_v2, %v16634_v62  ;;  %v18256_v14 = vld [vmem:[#allocation109_spill] sm:$0xff] }
0x1630   :  { %18249 = vst [vmem:[#allocation111_spill] sm:$0xff] %v16667_v40  ;;  %v7578_v6 = vadd.f32 1.0, %v10827_v61  ;;  %10832 = vtanh.f32 %v7328_v4  ;;  %v7078_v54 = vmul.f32 %v6950_v12, %v6562_v34  ;;  %v6821_v0 = vmul.f32 0.044715, %v16667_v40 }
0x1631   :  { %18251 = vst [vmem:[#allocation112_spill] sm:$0xff] %v16672_v20  ;;  %10834 = vtanh.f32 %v7330_v26  ;;  %v7204_v33 = vadd.f32 %v7076_v29, %v6369_v52  ;;  %v16682_v11 = vadd.f32 %v18253_v19, %v18226_v55  ;;  %v6373_v4 = vadd.f32 %v18256_v14, %v15201_v37  ;;  %v16690_v12 = vpop.f32.mrb[4].mxu1  ;;  %v18258_v19 = vld [vmem:[#allocation107_spill] sm:$0xff] }
0x1632   :  { %v16685_v58 = vmul.f32 %v7578_v6, %v16600_v50  ;;  %v7206_v10 = vadd.f32 %v7078_v54, %v6562_v34  ;;  %18257 = vst [vmem:[#allocation20_spill] sm:$0xff] %v16690_v12  ;;  %v6949_v26 = vmul.f32 %v6821_v0, %v16667_v40  ;;  %v6566_v63 = vadd.f32 %v18258_v19, %v15205_v46  ;;  %v16696_v48 = vpop.f32.mrb[5].mxu1 }
0x1633   :  { %18254 = vst [vmem:[#allocation24_spill] sm:$0xff] %v16682_v11  ;;  %v10829_v61 = vpop.eup %10828  ;;  %v7332_v5 = vmul.f32 0.7978846, %v7204_v33  ;;  %v6823_v29 = vmul.f32 0.044715, %v16682_v11  ;;  %18259 = vst [vmem:[#allocation92_spill] sm:$0xff] %v16696_v48  ;;  %v16708_v12 = vmul.f32 %v6945_v9, %v16627_v59 }
0x1634   :  { %18255 = vst [vmem:[#allocation87_spill] sm:$0xff] %v16685_v58  ;;  %v10831_v50 = vpop.eup %10830  ;;  %v6690_v6 = vmul.f32 0.5, %v16605_v49  ;;  %v16701_v54 = vmul.f32 0.5, %v6369_v52  ;;  %v7334_v14 = vmul.f32 0.7978846, %v7206_v10  ;;  %v16703_v20 = vpop.f32.mrb[4].mxu0  ;;  %v16717_v49 = vmul.f32 %v6947_v30, %v16634_v62 }
0x1635   :  { %18260 = vst [vmem:[#allocation90_spill] sm:$0xff] %v16703_v20  ;;  %v16705_v33 = vpop.f32.mrb[6].mxu1  ;;  %v7580_v0 = vadd.f32 1.0, %v10829_v61  ;;  %10836 = vtanh.f32 %v7332_v5  ;;  %v16710_v19 = vmul.f32 0.5, %v6562_v34  ;;  %v16712_v48 = vpop.f32.mrb[5].mxu0  ;;  %v7582_v2 = vadd.f32 1.0, %v10831_v50 }
0x1636   :  { %18261 = vst [vmem:[#allocation91_spill] sm:$0xff] %v16705_v33  ;;  %18262 = vst [vmem:[#allocation89_spill] sm:$0xff] %v16712_v48  ;;  %v16714_v7 = vpop.f32.mrb[7].mxu1  ;;  %10838 = vtanh.f32 %v7334_v14  ;;  %v6824_v52 = vmul.f32 0.044715, %v6373_v4  ;;  %v16719_v10 = vpop.f32.mrb[6].mxu0  ;;  %v16722_v61 = vmul.f32 %v6949_v26, %v16667_v40  ;;  %v6951_v9 = vmul.f32 %v6823_v29, %v16682_v11 }
0x1637   :  { %18263 = vst [vmem:[#allocation96_spill] sm:$0xff] %v16714_v7  ;;  %18264 = vst [vmem:[#allocation94_spill] sm:$0xff] %v16719_v10  ;;  %v6826_v5 = vmul.f32 0.044715, %v6566_v63  ;;  %v16727_v34 = vadd.f32 %v16399_v18, %v18221_v51  ;;  %v16729_v16 = vpop.f32.mrb[7].mxu0  ;;  %v16731_v50 = vmul.f32 0.5, %v6373_v4  ;;  %v16735_v14 = vadd.f32 %v16401_v32, %v18226_v55 }
0x1638   :  { %18265 = vst [vmem:[#allocation95_spill] sm:$0xff] %v16722_v61  ;;  %18266 = vst [vmem:[#allocation93_spill] sm:$0xff] %v16729_v16  ;;  %v6952_v30 = vmul.f32 %v6824_v52, %v6373_v4  ;;  %v6379_v26 = vadd.f32 %v16471_v35, %v15201_v37  ;;  %v16740_v58 = vmul.f32 %v7580_v0, %v16607_v47  ;;  %v16751_v7 = vmul.f32 0.5, %v6566_v63 }
0x1639   :  { %v6954_v29 = vmul.f32 %v6826_v5, %v6566_v63  ;;  %v6572_v18 = vadd.f32 %v16473_v53, %v15205_v46  ;;  %v16746_v16 = vadd.f32 %v16479_v60, %v18221_v51  ;;  %v16749_v52 = vmul.f32 %v7582_v2, %v16609_v27  ;;  %v16753_v35 = vpop.f32.mrb[8].mxu1 }
0x163a   :  { %v10833_v10 = vpop.eup %10832  ;;  %v7080_v32 = vmul.f32 %v6952_v30, %v6373_v4  ;;  %v6828_v33 = vmul.f32 0.044715, %v6379_v26  ;;  %18267 = vst [vmem:[#allocation100_spill] sm:$0xff] %v16753_v35  ;;  %v16756_v5 = vmul.f32 %v6951_v9, %v16682_v11  ;;  %v6825_v48 = vmul.f32 0.044715, %v16727_v34  ;;  %v16759_v60 = vpop.f32.mrb[9].mxu1 }
0x163b   :  { %v10835_v47 = vpop.eup %10834  ;;  %v7584_v0 = vadd.f32 1.0, %v10833_v10  ;;  %v7082_v53 = vmul.f32 %v6954_v29, %v6566_v63  ;;  %18269 = vst [vmem:[#allocation99_spill] sm:$0xff] %v16759_v60  ;;  %v6827_v27 = vmul.f32 0.044715, %v16735_v14  ;;  %v16762_v30 = vpop.f32.mrb[8].mxu0 }
0x163c   :  { %18268 = vst [vmem:[#allocation98_spill] sm:$0xff] %v16756_v5  ;;  %v7586_v20 = vadd.f32 1.0, %v10835_v47  ;;  %v7208_v61 = vadd.f32 %v7080_v32, %v6373_v4  ;;  %v6956_v2 = vmul.f32 %v6828_v33, %v6379_v26  ;;  %18270 = vst [vmem:[#allocation97_spill] sm:$0xff] %v16762_v30  ;;  %v16764_v40 = vpop.f32.mrb[10].mxu1  ;;  %v6830_v9 = vmul.f32 0.044715, %v6572_v18 }
0x163d   :  { %18271 = vst [vmem:[#allocation2_spill] sm:$0xff] %v16764_v40  ;;  %v16767_v35 = vmul.f32 %v7584_v0, %v16640_v24  ;;  %v7210_v10 = vadd.f32 %v7082_v53, %v6566_v63  ;;  %v6829_v29 = vmul.f32 0.044715, %v16746_v16  ;;  %v16770_v5 = vpop.f32.mrb[9].mxu0  ;;  %v16772_v11 = vpop.f32.mrb[11].mxu1  ;;  %v16778_v33 = vadd.f32 %v16481_v1, %v18226_v55 }
0x163e   :  { %18272 = vst [vmem:[#allocation37_spill] sm:$0xff] %v16770_v5  ;;  %18273 = vst [vmem:[#allocation38_spill] sm:$0xff] %v16772_v11  ;;  %v16774_v47 = vmul.f32 %v7586_v20, %v6690_v6  ;;  %v7336_v4 = vmul.f32 0.7978846, %v7208_v61  ;;  %v7084_v32 = vmul.f32 %v6956_v2, %v6379_v26  ;;  %v16780_v40 = vpop.f32.mrb[10].mxu0  ;;  %v6953_v53 = vmul.f32 %v6825_v48, %v16727_v34 }
0x163f   :  { %18274 = vst [vmem:[#allocation3_spill] sm:$0xff] %v16780_v40  ;;  %v10837_v24 = vpop.eup %10836  ;;  %v7338_v0 = vmul.f32 0.7978846, %v7210_v10  ;;  %v6958_v5 = vmul.f32 %v6830_v9, %v6572_v18  ;;  %v16785_v30 = vpop.f32.mrb[11].mxu0  ;;  %v6955_v1 = vmul.f32 %v6827_v27, %v16735_v14  ;;  %v16790_v2 = vmul.f32 0.5, %v6379_v26 }
0x1640   :  { %18275 = vst [vmem:[#allocation73_spill] sm:$0xff] %v16785_v30  ;;  %v10839_v20 = vpop.eup %10838  ;;  %v7786_v6 = vpack.c.bf16 %v16774_v47, %v16749_v52  ;;  %10840 = vtanh.f32 %v7336_v4  ;;  %v7212_v61 = vadd.f32 %v7084_v32, %v6379_v26  ;;  %v6957_v63 = vmul.f32 %v6829_v29, %v16746_v16  ;;  %v18311_v52 = vld [vmem:[#allocation57_spill] sm:$0xff] }
0x1641   :  { %10842 = vtanh.f32 %v7338_v0  ;;  %v7086_v40 = vmul.f32 %v6958_v5, %v6572_v18  ;;  %v7588_v10 = vadd.f32 1.0, %v10837_v24  ;;  %v6831_v48 = vmul.f32 0.044715, %v16778_v33 }
0x1642   :  { %v7340_v11 = vmul.f32 0.7978846, %v7212_v61  ;;  %v6383_v9 = vadd.f32 %v16486_v43, %v15201_v37  ;;  %v7590_v30 = vadd.f32 1.0, %v10839_v20  ;;  %v6576_v4 = vadd.f32 %v16488_v56, %v15205_v46 }
0x1643   :  { %v7214_v60 = vadd.f32 %v7086_v40, %v6572_v18  ;;  %v16800_v27 = vadd.f32 %v16498_v13, %v18221_v51  ;;  %v16803_v26 = vmul.f32 %v6953_v53, %v16727_v34  ;;  %v16806_v5 = vmul.f32 %v6955_v1, %v16735_v14 }
0x1644   :  { %v16808_v29 = vmul.f32 0.5, %v6572_v18  ;;  %v6832_v32 = vmul.f32 0.044715, %v6383_v9  ;;  %10844 = vtanh.f32 %v7340_v11  ;;  %v6959_v43 = vmul.f32 %v6831_v48, %v16778_v33 }
0x1645   :  { %v7342_v37 = vmul.f32 0.7978846, %v7214_v60  ;;  %v6834_v40 = vmul.f32 0.044715, %v6576_v4  ;;  %v16812_v46 = vmul.f32 %v7588_v10, %v16701_v54  ;;  %v16815_v56 = vmul.f32 %v6957_v63, %v16746_v16 }
0x1646   :  { %v6960_v13 = vmul.f32 %v6832_v32, %v6383_v9  ;;  %v16819_v51 = vadd.f32 %v16500_v15, %v18226_v55  ;;  %v16822_v18 = vmul.f32 %v7590_v30, %v16710_v19  ;;  %v16824_v24 = vmul.f32 0.5, %v6383_v9 }
0x1647   :  { %v6962_v11 = vmul.f32 %v6834_v40, %v6576_v4  ;;  %v6833_v60 = vmul.f32 0.044715, %v16800_v27  ;;  %v16827_v53 = vmul.f32 0.5, %v6576_v4  ;;  %v7189_v54 = vadd.f32 %v16582_v41, %v16523_v57 }
0x1648   :  { %v7088_v0 = vmul.f32 %v6960_v13, %v6383_v9  ;;  %v7193_v63 = vadd.f32 %v16612_v31, %v16556_v42  ;;  %10846 = vtanh.f32 %v7342_v37  ;;  %v16834_v15 = vmul.f32 %v6959_v43, %v16778_v33 }
0x1649   :  { %v7090_v55 = vmul.f32 %v6962_v11, %v6576_v4  ;;  %v16837_v19 = vmul.f32 0.5, %v16523_v57  ;;  %v6835_v1 = vmul.f32 0.044715, %v16819_v51  ;;  %v7317_v61 = vmul.f32 0.7978846, %v7189_v54 }
0x164a   :  { %v10841_v30 = vpop.eup %10840  ;;  %v7216_v20 = vadd.f32 %v7088_v0, %v6383_v9  ;;  %v7321_v10 = vmul.f32 0.7978846, %v7193_v63  ;;  %v6961_v40 = vmul.f32 %v6833_v60, %v16800_v27  ;;  %v7191_v31 = vadd.f32 %v16586_v44, %v16532_v45 }
0x164b   :  { %v10843_v48 = vpop.eup %10842  ;;  %v7592_v32 = vadd.f32 1.0, %v10841_v30  ;;  %v7218_v41 = vadd.f32 %v7090_v55, %v6576_v4  ;;  %10848 = vtanh.f32 %v7317_v61  ;;  %v7195_v57 = vadd.f32 %v16615_v25, %v16560_v8 }
0x164c   :  { %v7594_v37 = vadd.f32 1.0, %v10843_v48  ;;  %v7344_v43 = vmul.f32 0.7978846, %v7216_v20  ;;  %10850 = vtanh.f32 %v7321_v10  ;;  %v7319_v11 = vmul.f32 0.7978846, %v7191_v31 }
0x164d   :  { %v16846_v9 = vmul.f32 %v7592_v32, %v16731_v50  ;;  %v7346_v13 = vmul.f32 0.7978846, %v7218_v41  ;;  %v6681_v4 = vmul.f32 0.5, %v16556_v42  ;;  %v7323_v60 = vmul.f32 0.7978846, %v7195_v57  ;;  %v18276_v32 = vld [vmem:[#allocation113_spill] sm:$0xff] }
0x164e   :  { %v16849_v0 = vmul.f32 %v7594_v37, %v16751_v7  ;;  %10852 = vtanh.f32 %v7344_v43  ;;  %v10845_v44 = vpop.eup %10844  ;;  %v16855_v25 = vmul.f32 %v6835_v1, %v16819_v51  ;;  %v16858_v50 = vmul.f32 0.5, %v16532_v45  ;;  %v16878_v20 = vld [vmem:[%s17155_s12] ss:$0 sm:$0xff] }
0x164f   :  { %v7788_v54 = vpack.c.bf16 %v16846_v9, %v16812_v46  ;;  %10854 = vtanh.f32 %v7346_v13  ;;  %v7197_v7 = vadd.f32 %v16618_v22, %v16569_v3  ;;  %v7201_v42 = vadd.f32 %v16708_v12, %v16627_v59  ;;  %v18277_v37 = vld [vmem:[#allocation114_spill] sm:$0xff] }
0x1650   :  { %v7790_v63 = vpack.c.bf16 %v16849_v0, %v16822_v18  ;;  %10856 = vtanh.f32 %v7319_v11  ;;  %v16867_v55 = vmul.f32 %v6961_v40, %v16800_v27  ;;  %v16870_v30 = vmul.f32 0.5, %v16560_v8 }
0x1651   :  { %10858 = vtanh.f32 %v7323_v60  ;;  %v16873_v45 = vmul.f32 0.5, %v16569_v3  ;;  %v7596_v1 = vadd.f32 1.0, %v10845_v44  ;;  %v7325_v22 = vmul.f32 0.7978846, %v7197_v7 }
0x1652   :  { %v7329_v61 = vmul.f32 0.7978846, %v7201_v42  ;;  %v7199_v12 = vadd.f32 %v16650_v23, %v16590_v36  ;;  %v10847_v10 = vpop.eup %10846  ;;  %v7203_v8 = vadd.f32 %v16717_v49, %v16634_v62  ;;  %v8970_v48 = vadd.f32 %v16644_v28, %v16638_v21  ;;  %v18278_v23 = vld [vmem:[#allocation88_spill] sm:$0xff] }
0x1653   :  { %v9082_v3 = vadd.f32 %v16660_v39, %v16652_v38  ;;  %v8973_v41 = vadd.f32 %v18276_v32, %v16654_v17  ;;  %v16891_v40 = vmul.f32 0.5, %v16627_v59  ;;  %10860 = vtanh.f32 %v7325_v22  ;;  %v18279_v17 = vld [vmem:[#allocation111_spill] sm:$0xff] }
0x1654   :  { %v7327_v31 = vmul.f32 0.7978846, %v7199_v12  ;;  %v9085_v43 = vadd.f32 %v18278_v23, %v18277_v37  ;;  %10862 = vtanh.f32 %v7329_v61  ;;  %v7331_v57 = vmul.f32 0.7978846, %v7203_v8  ;;  %v18280_v59 = vld [vmem:[#allocation95_spill] sm:$0xff] }
0x1655   :  { %v8094_v49 = vadd.f32 %v8970_v48, %v16878_v20  ;;  %v8097_v21 = vadd.f32 %v8973_v41, %v16878_v20  ;;  %v10849_v28 = vpop.eup %10848  ;;  %v16898_v38 = vmul.f32 %v7596_v1, %v16790_v2  ;;  %v7598_v39 = vadd.f32 1.0, %v10847_v10  ;;  %v18281_v48 = vld [vmem:[#allocation49_spill] sm:$0xff]  ;;  %v18282_v41 = vld [vmem:[#allocation51_spill] sm:$0xff] }
0x1656   :  { %10864 = vtanh.f32 %v7327_v31  ;;  %v7205_v13 = vadd.f32 %v18280_v59, %v18279_v17  ;;  %v10851_v11 = vpop.eup %10850  ;;  %v7573_v60 = vadd.f32 1.0, %v10849_v28  ;;  %v6687_v61 = vmul.f32 0.5, %v16590_v36 }
0x1657   :  { %10866 = vtanh.f32 %v7331_v57  ;;  %v8255_v44 = vadd.f32 %v9082_v3, %v8094_v49  ;;  %v8258_v7 = vadd.f32 %v9085_v43, %v8097_v21  ;;  %v7577_v22 = vadd.f32 1.0, %v10851_v11 }
0x1658   :  { %v10853_v42 = vpop.eup %10852  ;;  %v7209_v12 = vadd.f32 %v16803_v26, %v16727_v34  ;;  %v7333_v8 = vmul.f32 0.7978846, %v7205_v13  ;;  %v7701_v10 = vmul.f32 %v7573_v60, %v16837_v19  ;;  %v16909_v36 = vmul.f32 %v7598_v39, %v16808_v29  ;;  %v18283_v19 = vld [vmem:[#allocation24_spill] sm:$0xff] }
0x1659   :  { %v10855_v2 = vpop.eup %10854  ;;  %v7600_v1 = vadd.f32 1.0, %v10853_v42  ;;  %v8381_v32 = vadd.f32 %v8255_v44, %v18281_v48  ;;  %v8382_v31 = vadd.f32 %v8258_v7, %v18282_v41  ;;  %v7705_v3 = vmul.f32 %v7577_v22, %v6681_v4  ;;  %v18284_v4 = vld [vmem:[#allocation98_spill] sm:$0xff]  ;;  %v18285_v7 = vld [vmem:[#allocation20_spill] sm:$0xff]  ;;  %v18292_v41 = vld [vmem:[#allocation91_spill] sm:$0xff] }
0x165a   :  { %v10857_v37 = vpop.eup %10856  ;;  %v7602_v23 = vadd.f32 1.0, %v10855_v2  ;;  %v7337_v43 = vmul.f32 0.7978846, %v7209_v12  ;;  %10868 = vtanh.f32 %v7333_v8  ;;  %v7207_v21 = vadd.f32 %v18284_v4, %v18283_v19  ;;  %v18286_v42 = vld [vmem:[#allocation92_spill] sm:$0xff]  ;;  %v18287_v12 = vld [vmem:[#allocation90_spill] sm:$0xff]  ;;  %v18288_v8 = vld [vmem:[#allocation89_spill] sm:$0xff] }
0x165b   :  { %v10859_v57 = vpop.eup %10858  ;;  %v16912_v26 = vmul.f32 %v7600_v1, %v16824_v24  ;;  %v7575_v49 = vadd.f32 1.0, %v10857_v37  ;;  %8413 = vst [vmem:[%s17156_s13] sm:$0xff] %v8381_v32  ;;  %8414 = vst [vmem:[%s17156_s13 + $0x8] sm:$0xff] %v8382_v31  ;;  %v7781_v29 = vpack.c.bf16 %v7705_v3, %v7701_v10  ;;  %v7211_v13 = vadd.f32 %v16806_v5, %v16735_v14  ;;  %v18289_v10 = vld [vmem:[#allocation112_spill] sm:$0xff] }
0x165c   :  { %v16923_v28 = vmul.f32 %v7602_v23, %v16827_v53  ;;  %v7579_v39 = vadd.f32 1.0, %v10859_v57  ;;  %10870 = vtanh.f32 %v7337_v43  ;;  %v7335_v11 = vmul.f32 0.7978846, %v7207_v21  ;;  %v18293_v31 = vld [vmem:[#allocation96_spill] sm:$0xff]  ;;  %v18294_v57 = vld [vmem:[#allocation94_spill] sm:$0xff] }
0x165d   :  { %v7792_v24 = vpack.c.bf16 %v16912_v26, %v16898_v38  ;;  %v7703_v59 = vmul.f32 %v7575_v49, %v16858_v50  ;;  %v10861_v60 = vpop.eup %10860  ;;  %8187 = vmatprep.mubr.bf16.mxu1 %v7781_v29  ;;  %v8976_v22 = vadd.f32 %v18286_v42, %v18285_v7  ;;  %v9088_v2 = vadd.f32 %v18288_v8, %v18287_v12  ;;  %v18290_v50 = vld [vmem:[#allocation110_spill] sm:$0xff]  ;;  %v18295_v49 = vld [vmem:[#allocation93_spill] sm:$0xff]  ;;  %v18296_v42 = vld [vmem:[#allocation87_spill] sm:$0xff] }
0x165e   :  { %v7794_v44 = vpack.c.bf16 %v16923_v28, %v16909_v36  ;;  %v7707_v53 = vmul.f32 %v7579_v39, %v16870_v30  ;;  %v10863_v1 = vpop.eup %10862  ;;  %v18291_v48 = vpack.c.bf16 %v18289_v10, %v18290_v50  ;;  %v7581_v5 = vadd.f32 1.0, %v10861_v60 }
0x165f   :  { %v7339_v32 = vmul.f32 0.7978846, %v7211_v13  ;;  %10872 = vtanh.f32 %v7335_v11  ;;  %v8979_v37 = vadd.f32 %v18293_v31, %v18292_v41  ;;  %v7585_v30 = vadd.f32 1.0, %v10863_v1 }
0x1660   :  { %8188 = vmatmul.mubr.bf16.gmra.mrb[48].mxu1 %v18291_v48  ;;  %v10865_v23 = vpop.eup %10864  ;;  %v7783_v3 = vpack.c.bf16 %v7707_v53, %v7703_v59  ;;  %v8102_v43 = vadd.f32 %v8976_v22, %v16878_v20  ;;  %v9091_v4 = vadd.f32 %v18295_v49, %v18294_v57  ;;  %v6691_v29 = vmul.f32 0.5, %v16634_v62  ;;  %v18297_v22 = vld [vmem:[#allocation108_spill] sm:$0xff]  ;;  %v18303_v49 = vld [vmem:[#allocation99_spill] sm:$0xff] }
0x1661   :  { %v10867_v21 = vpop.eup %10866  ;;  %v7583_v39 = vadd.f32 1.0, %v10865_v23  ;;  %10874 = vtanh.f32 %v7339_v32  ;;  %v8105_v60 = vadd.f32 %v8979_v37, %v16878_v20  ;;  %v7709_v13 = vmul.f32 %v7581_v5, %v16873_v45  ;;  %v18299_v45 = vld [vmem:[#allocation55_spill] sm:$0xff]  ;;  %v18300_v32 = vld [vmem:[#allocation56_spill] sm:$0xff] }
0x1662   :  { %8348 = vmatprep.mubr.bf16.mxu0 %v7783_v3  ;;  %v7713_v11 = vmul.f32 %v7585_v30, %v16891_v40  ;;  %v7587_v7 = vadd.f32 1.0, %v10867_v21  ;;  %v8263_v59 = vadd.f32 %v9088_v2, %v8102_v43  ;;  %v7091_v53 = vmul.f32 %v16855_v25, %v16819_v51  ;;  %v18302_v57 = vld [vmem:[#allocation100_spill] sm:$0xff]  ;;  %v18305_v21 = vld [vmem:[#allocation37_spill] sm:$0xff] }
0x1663   :  { %v18298_v12 = vpack.c.bf16 %v18296_v42, %v18297_v22  ;;  %v7711_v8 = vmul.f32 %v7583_v39, %v6687_v61  ;;  %v8266_v62 = vadd.f32 %v9091_v4, %v8105_v60  ;;  %v7213_v1 = vadd.f32 %v16815_v56, %v16746_v16  ;;  %v18306_v60 = vld [vmem:[#allocation2_spill] sm:$0xff] }
0x1664   :  { %v10869_v10 = vpop.eup %10868  ;;  %v7785_v50 = vpack.c.bf16 %v7713_v11, %v7709_v13  ;;  %v7715_v48 = vmul.f32 %v7587_v7, %v6691_v29  ;;  %v8383_v5 = vadd.f32 %v8263_v59, %v18299_v45  ;;  %v7217_v40 = vadd.f32 %v16867_v55, %v16800_v27  ;;  %v18307_v13 = vld [vmem:[#allocation38_spill] sm:$0xff]  ;;  %v18308_v7 = vld [vmem:[#allocation3_spill] sm:$0xff]  ;;  %v18309_v59 = vld [vmem:[#allocation73_spill] sm:$0xff] }
0x1665   :  { %8349 = vmatmul.mubr.bf16.gmra.mrb[48].mxu0 %v18298_v12  ;;  %v6693_v2 = vmul.f32 0.5, %v18279_v17  ;;  %v7589_v25 = vadd.f32 1.0, %v10869_v10  ;;  %v8384_v41 = vadd.f32 %v8266_v62, %v18300_v32  ;;  %v7341_v31 = vmul.f32 0.7978846, %v7213_v1 }
0x1666   :  { %v10871_v37 = vpop.eup %10870  ;;  %8195 = vmatprep.mubr.bf16.mxu1 %v7785_v50  ;;  %v7787_v61 = vpack.c.bf16 %v7715_v48, %v7711_v8  ;;  %v6697_v23 = vmul.f32 0.5, %v16727_v34  ;;  %8415 = vst [vmem:[%s17156_s13 + $0x10] sm:$0xff] %v8383_v5  ;;  %v7345_v56 = vmul.f32 0.7978846, %v7217_v40  ;;  %v7215_v3 = vadd.f32 %v16834_v15, %v16778_v33  ;;  %v18304_v15 = vld [vmem:[#allocation97_spill] sm:$0xff] }
0x1667   :  { %v18301_v55 = vpack.c.bf16 %v16767_v35, %v16740_v58  ;;  %v7593_v17 = vadd.f32 1.0, %v10871_v37  ;;  %v7717_v30 = vmul.f32 %v7589_v25, %v6693_v2  ;;  %8416 = vst [vmem:[%s17156_s13 + $0x18] sm:$0xff] %v8384_v41  ;;  %10876 = vtanh.f32 %v7341_v31  ;;  %v18310_v2 = vld [vmem:[#allocation58_spill] sm:$0xff] }
0x1668   :  { %v7219_v34 = vadd.f32 %v7091_v53, %v16819_v51  ;;  %8356 = vmatprep.mubr.bf16.mxu0 %v7787_v61  ;;  %10878 = vtanh.f32 %v7345_v56  ;;  %v7343_v43 = vmul.f32 0.7978846, %v7215_v3  ;;  %v8982_v4 = vadd.f32 %v18303_v49, %v18302_v57 }
0x1669   :  { %8196 = vmatmul.mubr.bf16.gmra.mrb[52].mxu1 %v18301_v55  ;;  %v9094_v29 = vadd.f32 %v18305_v21, %v18304_v15  ;;  %v10873_v58 = vpop.eup %10872  ;;  %v7721_v35 = vmul.f32 %v7593_v17, %v6697_v23  ;;  %v8985_v11 = vadd.f32 %v18307_v13, %v18306_v60  ;;  %v9097_v42 = vadd.f32 %v18309_v59, %v18308_v7 }
0x166a   :  { %v7347_v39 = vmul.f32 0.7978846, %v7219_v34  ;;  %v7591_v22 = vadd.f32 1.0, %v10873_v58  ;;  %10880 = vtanh.f32 %v7343_v43  ;;  %v8110_v53 = vadd.f32 %v8982_v4, %v16878_v20 }
0x166b   :  { %v10875_v12 = vpop.eup %10874  ;;  %v7789_v8 = vpack.c.bf16 %v7721_v35, %v7717_v30  ;;  %v8113_v62 = vadd.f32 %v8985_v11, %v16878_v20  ;;  %v6695_v1 = vmul.f32 0.5, %v18283_v19  ;;  %v6699_v10 = vmul.f32 0.5, %v16735_v14 }
0x166c   :  { %10882 = vtanh.f32 %v7347_v39  ;;  %v7595_v50 = vadd.f32 1.0, %v10875_v12  ;;  %v8271_v48 = vadd.f32 %v9094_v29, %v8110_v53  ;;  %v6701_v46 = vmul.f32 0.5, %v16746_v16  ;;  %v18312_v29 = vld [vmem:[#allocation29_spill] sm:$0xff] }
0x166d   :  { %8357 = vmatmul.mubr.bf16.gmra.mrb[52].mxu0 %v7786_v6  ;;  %8203 = vmatprep.mubr.bf16.mxu1 %v7789_v8  ;;  %v8274_v45 = vadd.f32 %v9097_v42, %v8113_v62  ;;  %v7719_v5 = vmul.f32 %v7591_v22, %v6695_v1  ;;  %v6705_v9 = vmul.f32 0.5, %v16800_v27  ;;  %v6703_v56 = vmul.f32 0.5, %v16778_v33 }
0x166e   :  { %v7723_v40 = vmul.f32 %v7595_v50, %v6699_v10  ;;  %v8385_v25 = vadd.f32 %v8271_v48, %v18310_v2  ;;  %v6707_v3 = vmul.f32 0.5, %v16819_v51  ;;  %v18314_v50 = vld [vmem:[#allocation18_spill] sm:$0xff]  ;;  %v18315_v2 = vld [vmem:[#allocation16_spill] sm:$0xff] }
0x166f   :  { %v8386_v47 = vadd.f32 %v8274_v45, %v18311_v52 }
0x1670   :  { %v7791_v6 = vpack.c.bf16 %v7723_v40, %v7719_v5  ;;  %8417 = vst [vmem:[%s17156_s13 + $0x20] sm:$0xff] %v8385_v25 }
0x1671   :  { %8204 = vmatmul.mubr.bf16.gmra.mrb[56].mxu1 %v7788_v54  ;;  %v10877_v14 = vpop.eup %10876  ;;  %8418 = vst [vmem:[%s17156_s13 + $0x28] sm:$0xff] %v8386_v47 }
0x1672   :  { %v10879_v19 = vpop.eup %10878  ;;  %8364 = vmatprep.mubr.bf16.mxu0 %v7791_v6  ;;  %v7597_v32 = vadd.f32 1.0, %v10877_v14 }
0x1673   :  { %v7601_v54 = vadd.f32 1.0, %v10879_v19 }
0x1674   :  { %v10881_v41 = vpop.eup %10880  ;;  %v7725_v37 = vmul.f32 %v7597_v32, %v6701_v46 }
0x1675   :  { %8365 = vmatmul.mubr.bf16.gmra.mrb[56].mxu0 %v7790_v63  ;;  %v7729_v61 = vmul.f32 %v7601_v54, %v6705_v9  ;;  %v7599_v23 = vadd.f32 1.0, %v10881_v41 }
0x1676   :  { %v10883_v31 = vpop.eup %10882 }
0x1677   :  { %v7603_v55 = vadd.f32 1.0, %v10883_v31  ;;  %v7793_v17 = vpack.c.bf16 %v7729_v61, %v7725_v37  ;;  %v7727_v30 = vmul.f32 %v7599_v23, %v6703_v56  ;;  %v18316_v23 = vld [vmem:[#allocation44_spill] sm:$0xff] }
0x1679   :  { %v7731_v34 = vmul.f32 %v7603_v55, %v6707_v3  ;;  %8211 = vmatprep.mubr.bf16.mxu1 %v7793_v17 }
0x167a   :  { %8212 = vmatmul.mubr.bf16.gmra.mrb[60].mxu1 %v7792_v24 }
0x167b   :  { %v7795_v18 = vpack.c.bf16 %v7731_v34, %v7727_v30  ;;  %v18317_v30 = vld [vmem:[#allocation43_spill] sm:$0xff] }
0x167d   :  { %8372 = vmatprep.mubr.bf16.mxu0 %v7795_v18  ;;  %v8986_v16 = vpop.f32.mrb[12].mxu1 }
0x167e   :  { %8373 = vmatmul.mubr.bf16.gmra.mrb[60].mxu0 %v7794_v44  ;;  %v8987_v27 = vpop.f32.mrb[13].mxu1  ;;  %v18313_v44 = vld [vmem:[#allocation33_spill] sm:$0xff] }
0x167f   :  { %v8988_v0 = vadd.f32 %v8987_v27, %v8986_v16  ;;  %v8989_v51 = vpop.f32.mrb[14].mxu1 }
0x1680   :  { %v9098_v33 = vpop.f32.mrb[12].mxu0  ;;  %v8990_v43 = vpop.f32.mrb[15].mxu1 }
0x1681   :  { %v9099_v63 = vpop.f32.mrb[13].mxu0  ;;  %v8118_v57 = vadd.f32 %v8988_v0, %v16878_v20  ;;  %v8991_v15 = vadd.f32 %v8990_v43, %v8989_v51 }
0x1682   :  { %v9100_v49 = vadd.f32 %v9099_v63, %v9098_v33  ;;  %v9101_v4 = vpop.f32.mrb[14].mxu0 }
0x1683   :  { %v9102_v21 = vpop.f32.mrb[15].mxu0  ;;  %v8121_v26 = vadd.f32 %v8991_v15, %v16878_v20 }
0x1684   :  { %v8279_v38 = vadd.f32 %v9100_v49, %v8118_v57  ;;  %v9103_v24 = vadd.f32 %v9102_v21, %v9101_v4 }
0x1686   :  { %v8387_v36 = vadd.f32 %v8279_v38, %v18312_v29  ;;  %v8282_v28 = vadd.f32 %v9103_v24, %v8121_v26  ;;  %v18318_v38 = vld [vmem:[#allocation54_spill] sm:$0xff] }
0x1688   :  { %8419 = vst [vmem:[%s17156_s13 + $0x30] sm:$0xff] %v8387_v36  ;;  %v8388_v58 = vadd.f32 %v8282_v28, %v18313_v44  ;;  %v18319_v28 = vld [vmem:[#allocation52_spill] sm:$0xff] }
0x168a   :  { %8420 = vst [vmem:[%s17156_s13 + $0x38] sm:$0xff] %v8388_v58  ;;  %v8992_v35 = vpop.f32.mrb[16].mxu1 }
0x168b   :  { %v8993_v39 = vpop.f32.mrb[17].mxu1 }
0x168c   :  { %v8994_v13 = vadd.f32 %v8993_v39, %v8992_v35  ;;  %v8995_v11 = vpop.f32.mrb[18].mxu1 }
0x168d   :  { %v9104_v60 = vpop.f32.mrb[16].mxu0  ;;  %v8996_v59 = vpop.f32.mrb[19].mxu1 }
0x168e   :  { %v9105_v7 = vpop.f32.mrb[17].mxu0  ;;  %v8126_v42 = vadd.f32 %v8994_v13, %v16878_v20  ;;  %v8997_v12 = vadd.f32 %v8996_v59, %v8995_v11 }
0x168f   :  { %v9106_v22 = vadd.f32 %v9105_v7, %v9104_v60  ;;  %v9107_v53 = vpop.f32.mrb[18].mxu0 }
0x1690   :  { %v9108_v8 = vpop.f32.mrb[19].mxu0  ;;  %v8129_v1 = vadd.f32 %v8997_v12, %v16878_v20 }
0x1691   :  { %v8287_v62 = vadd.f32 %v9106_v22, %v8126_v42  ;;  %v9109_v10 = vadd.f32 %v9108_v8, %v9107_v53 }
0x1693   :  { %v8389_v48 = vadd.f32 %v8287_v62, %v18314_v50  ;;  %v8290_v45 = vadd.f32 %v9109_v10, %v8129_v1  ;;  %v18320_v62 = vld [vmem:[#allocation46_spill] sm:$0xff]  ;;  %v18321_v50 = vld [vmem:[#allocation45_spill] sm:$0xff] }
0x1695   :  { %v8998_v5 = vpop.f32.mrb[20].mxu1  ;;  %8421 = vst [vmem:[%s17156_s13 + $0x40] sm:$0xff] %v8389_v48  ;;  %v8390_v25 = vadd.f32 %v8290_v45, %v18315_v2 }
0x1696   :  { %v8999_v40 = vpop.f32.mrb[21].mxu1  ;;  %v9110_v52 = vpop.f32.mrb[20].mxu0 }
0x1697   :  { %v9000_v47 = vadd.f32 %v8999_v40, %v8998_v5  ;;  %v9001_v6 = vpop.f32.mrb[22].mxu1  ;;  %v9111_v14 = vpop.f32.mrb[21].mxu0  ;;  %8422 = vst [vmem:[%s17156_s13 + $0x48] sm:$0xff] %v8390_v25 }
0x1698   :  { %v9002_v19 = vpop.f32.mrb[23].mxu1  ;;  %v9112_v46 = vadd.f32 %v9111_v14, %v9110_v52  ;;  %v9113_v9 = vpop.f32.mrb[22].mxu0 }
0x1699   :  { %v8134_v32 = vadd.f32 %v9000_v47, %v16878_v20  ;;  %v9003_v54 = vadd.f32 %v9002_v19, %v9001_v6  ;;  %v9114_v41 = vpop.f32.mrb[23].mxu0 }
0x169a   :  { %v9115_v61 = vadd.f32 %v9114_v41, %v9113_v9 }
0x169b   :  { %v8295_v31 = vadd.f32 %v9112_v46, %v8134_v32  ;;  %v8137_v37 = vadd.f32 %v9003_v54, %v16878_v20 }
0x169d   :  { %v8391_v56 = vadd.f32 %v8295_v31, %v18316_v23  ;;  %v8298_v3 = vadd.f32 %v9115_v61, %v8137_v37  ;;  %v9004_v55 = vpop.f32.mrb[24].mxu1 }
0x169e   :  { %v9005_v17 = vpop.f32.mrb[25].mxu1  ;;  %v9116_v18 = vpop.f32.mrb[24].mxu0 }
0x169f   :  { %8423 = vst [vmem:[%s17156_s13 + $0x50] sm:$0xff] %v8391_v56  ;;  %v8392_v34 = vadd.f32 %v8298_v3, %v18317_v30  ;;  %v9006_v16 = vadd.f32 %v9005_v17, %v9004_v55  ;;  %v9007_v27 = vpop.f32.mrb[26].mxu1  ;;  %v9117_v33 = vpop.f32.mrb[25].mxu0  ;;  %v18322_v56 = vld [vmem:[#allocation14_spill] sm:$0xff] }
0x16a0   :  { %v9008_v0 = vpop.f32.mrb[27].mxu1  ;;  %v9118_v63 = vadd.f32 %v9117_v33, %v9116_v18  ;;  %v9119_v43 = vpop.f32.mrb[26].mxu0 }
0x16a1   :  { %8424 = vst [vmem:[%s17156_s13 + $0x58] sm:$0xff] %v8392_v34  ;;  %v8142_v51 = vadd.f32 %v9006_v16, %v16878_v20  ;;  %v9009_v57 = vadd.f32 %v9008_v0, %v9007_v27  ;;  %v9120_v49 = vpop.f32.mrb[27].mxu0  ;;  %v18323_v34 = vld [vmem:[#allocation66_spill] sm:$0xff] }
0x16a2   :  { %v9121_v21 = vadd.f32 %v9120_v49, %v9119_v43 }
0x16a3   :  { %v8303_v4 = vadd.f32 %v9118_v63, %v8142_v51  ;;  %v8145_v15 = vadd.f32 %v9009_v57, %v16878_v20 }
0x16a5   :  { %v8393_v26 = vadd.f32 %v8303_v4, %v18318_v38  ;;  %v8306_v24 = vadd.f32 %v9121_v21, %v8145_v15  ;;  %v9010_v29 = vpop.f32.mrb[28].mxu1 }
0x16a6   :  { %v9011_v36 = vpop.f32.mrb[29].mxu1 }
0x16a7   :  { %8425 = vst [vmem:[%s17156_s13 + $0x60] sm:$0xff] %v8393_v26  ;;  %v8394_v44 = vadd.f32 %v8306_v24, %v18319_v28  ;;  %v9122_v58 = vpop.f32.mrb[28].mxu0  ;;  %v9012_v35 = vadd.f32 %v9011_v36, %v9010_v29  ;;  %v9013_v39 = vpop.f32.mrb[30].mxu1  ;;  %v18324_v26 = vld [vmem:[#allocation11_spill] sm:$0xff] }
0x16a8   :  { %v9123_v60 = vpop.f32.mrb[29].mxu0  ;;  %v9014_v13 = vpop.f32.mrb[31].mxu1 }
0x16a9   :  { %8426 = vst [vmem:[%s17156_s13 + $0x68] sm:$0xff] %v8394_v44  ;;  %v8150_v11 = vadd.f32 %v9012_v35, %v16878_v20  ;;  %v9124_v7 = vadd.f32 %v9123_v60, %v9122_v58  ;;  %v9125_v59 = vpop.f32.mrb[30].mxu0  ;;  %v9015_v42 = vadd.f32 %v9014_v13, %v9013_v39  ;;  %v18325_v44 = vld [vmem:[#allocation7_spill] sm:$0xff] }
0x16aa   :  { %v9126_v22 = vpop.f32.mrb[31].mxu0 }
0x16ab   :  { %v8311_v53 = vadd.f32 %v9124_v7, %v8150_v11  ;;  %v8153_v12 = vadd.f32 %v9015_v42, %v16878_v20  ;;  %v9127_v8 = vadd.f32 %v9126_v22, %v9125_v59 }
0x16ad   :  { %v8395_v1 = vadd.f32 %v8311_v53, %v18320_v62  ;;  %v8314_v10 = vadd.f32 %v9127_v8, %v8153_v12 }
0x16af   :  { %8427 = vst [vmem:[%s17156_s13 + $0x70] sm:$0xff] %v8395_v1  ;;  %v8396_v48 = vadd.f32 %v8314_v10, %v18321_v50  ;;  %v18326_v1 = vld [vmem:[#allocation68_spill] sm:$0xff] }
0x16b1   :  { %8428 = vst [vmem:[%s17156_s13 + $0x78] sm:$0xff] %v8396_v48 }
0x16dd   :  { %v9016_v45 = vpop.f32.mrb[32].mxu1 }
0x16de   :  { %v9017_v5 = vpop.f32.mrb[33].mxu1 }
0x16df   :  { %v9018_v40 = vadd.f32 %v9017_v5, %v9016_v45  ;;  %v9019_v2 = vpop.f32.mrb[34].mxu1  ;;  %v18327_v5 = vld [vmem:[#allocation69_spill] sm:$0xff] }
0x16e0   :  { %v9020_v25 = vpop.f32.mrb[35].mxu1 }
0x16e1   :  { %v9021_v52 = vadd.f32 %v9020_v25, %v9019_v2  ;;  %v8158_v6 = vadd.f32 %v9018_v40, %v16878_v20 }
0x16e3   :  { %v8161_v46 = vadd.f32 %v9021_v52, %v16878_v20 }
0x16e4   :  { %v9128_v47 = vpop.f32.mrb[32].mxu0 }
0x16e5   :  { %v9129_v14 = vpop.f32.mrb[33].mxu0 }
0x16e6   :  { %v9130_v19 = vadd.f32 %v9129_v14, %v9128_v47  ;;  %v9131_v32 = vpop.f32.mrb[34].mxu0 }
0x16e7   :  { %v9132_v9 = vpop.f32.mrb[35].mxu0  ;;  %v9022_v54 = vpop.f32.mrb[36].mxu1 }
0x16e8   :  { %v8319_v41 = vadd.f32 %v9130_v19, %v8158_v6  ;;  %v9133_v31 = vadd.f32 %v9132_v9, %v9131_v32  ;;  %v9023_v37 = vpop.f32.mrb[37].mxu1  ;;  %v18328_v9 = vld [vmem:[#allocation32_spill] sm:$0xff] }
0x16e9   :  { %v9024_v61 = vadd.f32 %v9023_v37, %v9022_v54  ;;  %v9025_v23 = vpop.f32.mrb[38].mxu1 }
0x16ea   :  { %v8397_v3 = vadd.f32 %v8319_v41, %v18322_v56  ;;  %v8322_v55 = vadd.f32 %v9133_v31, %v8161_v46  ;;  %v9026_v17 = vpop.f32.mrb[39].mxu1  ;;  %v18329_v31 = vld [vmem:[#allocation74_spill] sm:$0xff] }
0x16eb   :  { %v9027_v30 = vadd.f32 %v9026_v17, %v9025_v23  ;;  %v8166_v27 = vadd.f32 %v9024_v61, %v16878_v20 }
0x16ec   :  { %8632 = vst [vmem:[%s17156_s13 + $0x80] sm:$0xff] %v8397_v3  ;;  %v8398_v18 = vadd.f32 %v8322_v55, %v18323_v34  ;;  %v9134_v16 = vpop.f32.mrb[36].mxu0 }
0x16ed   :  { %v9135_v33 = vpop.f32.mrb[37].mxu0  ;;  %v8169_v63 = vadd.f32 %v9027_v30, %v16878_v20 }
0x16ee   :  { %8633 = vst [vmem:[%s17156_s13 + $0x88] sm:$0xff] %v8398_v18  ;;  %v9136_v0 = vadd.f32 %v9135_v33, %v9134_v16  ;;  %v9137_v51 = vpop.f32.mrb[38].mxu0 }
0x16ef   :  { %v9138_v43 = vpop.f32.mrb[39].mxu0  ;;  %v9028_v57 = vpop.f32.mrb[40].mxu1 }
0x16f0   :  { %v8327_v49 = vadd.f32 %v9136_v0, %v8166_v27  ;;  %v9139_v4 = vadd.f32 %v9138_v43, %v9137_v51  ;;  %v9029_v15 = vpop.f32.mrb[41].mxu1 }
0x16f1   :  { %v9030_v21 = vadd.f32 %v9029_v15, %v9028_v57  ;;  %v9031_v38 = vpop.f32.mrb[42].mxu1 }
0x16f2   :  { %v8399_v24 = vadd.f32 %v8327_v49, %v18324_v26  ;;  %v8330_v29 = vadd.f32 %v9139_v4, %v8169_v63  ;;  %v9032_v36 = vpop.f32.mrb[43].mxu1  ;;  %v18330_v49 = vld [vmem:[#allocation36_spill] sm:$0xff] }
0x16f3   :  { %v9033_v28 = vadd.f32 %v9032_v36, %v9031_v38  ;;  %v8174_v39 = vadd.f32 %v9030_v21, %v16878_v20 }
0x16f4   :  { %8634 = vst [vmem:[%s17156_s13 + $0x90] sm:$0xff] %v8399_v24  ;;  %v8400_v58 = vadd.f32 %v8330_v29, %v18325_v44  ;;  %v9140_v35 = vpop.f32.mrb[40].mxu0  ;;  %v18331_v24 = vld [vmem:[#allocation50_spill] sm:$0xff] }
0x16f5   :  { %v9141_v60 = vpop.f32.mrb[41].mxu0  ;;  %v8177_v7 = vadd.f32 %v9033_v28, %v16878_v20 }
0x16f6   :  { %8635 = vst [vmem:[%s17156_s13 + $0x98] sm:$0xff] %v8400_v58  ;;  %v9142_v13 = vadd.f32 %v9141_v60, %v9140_v35  ;;  %v9143_v11 = vpop.f32.mrb[42].mxu0 }
0x16f7   :  { %v9144_v59 = vpop.f32.mrb[43].mxu0  ;;  %v9034_v42 = vpop.f32.mrb[44].mxu1 }
0x16f8   :  { %v8335_v22 = vadd.f32 %v9142_v13, %v8174_v39  ;;  %v9145_v53 = vadd.f32 %v9144_v59, %v9143_v11  ;;  %v9035_v12 = vpop.f32.mrb[45].mxu1 }
0x16f9   :  { %v9036_v8 = vadd.f32 %v9035_v12, %v9034_v42  ;;  %v9037_v62 = vpop.f32.mrb[46].mxu1 }
0x16fa   :  { %v8401_v10 = vadd.f32 %v8335_v22, %v18326_v1  ;;  %v8338_v50 = vadd.f32 %v9145_v53, %v8177_v7  ;;  %v9038_v48 = vpop.f32.mrb[47].mxu1  ;;  %v18332_v22 = vld [vmem:[#allocation35_spill] sm:$0xff] }
0x16fb   :  { %v9039_v45 = vadd.f32 %v9038_v48, %v9037_v62  ;;  %v8182_v25 = vadd.f32 %v9036_v8, %v16878_v20 }
0x16fc   :  { %8636 = vst [vmem:[%s17156_s13 + $0xa0] sm:$0xff] %v8401_v10  ;;  %v8402_v40 = vadd.f32 %v8338_v50, %v18327_v5  ;;  %v9146_v2 = vpop.f32.mrb[44].mxu0  ;;  %v18333_v10 = vld [vmem:[#allocation48_spill] sm:$0xff] }
0x16fd   :  { %v9147_v52 = vpop.f32.mrb[45].mxu0  ;;  %v8185_v14 = vadd.f32 %v9039_v45, %v16878_v20 }
0x16fe   :  { %8637 = vst [vmem:[%s17156_s13 + $0xa8] sm:$0xff] %v8402_v40  ;;  %v9148_v47 = vadd.f32 %v9147_v52, %v9146_v2  ;;  %v9149_v6 = vpop.f32.mrb[46].mxu0 }
0x16ff   :  { %v9150_v19 = vpop.f32.mrb[47].mxu0 }
0x1700   :  { %v8343_v32 = vadd.f32 %v9148_v47, %v8182_v25  ;;  %v9151_v46 = vadd.f32 %v9150_v19, %v9149_v6  ;;  %v18334_v19 = vld [vmem:[#allocation70_spill] sm:$0xff] }
0x1702   :  { %v8403_v54 = vadd.f32 %v8343_v32, %v18328_v9  ;;  %v8346_v41 = vadd.f32 %v9151_v46, %v8185_v14 }
0x1704   :  { %8638 = vst [vmem:[%s17156_s13 + $0xb0] sm:$0xff] %v8403_v54  ;;  %v8404_v37 = vadd.f32 %v8346_v41, %v18329_v31  ;;  %v18335_v54 = vld [vmem:[#allocation71_spill] sm:$0xff] }
0x1706   :  { %8639 = vst [vmem:[%s17156_s13 + $0xb8] sm:$0xff] %v8404_v37 }
0x1733   :  { %v9040_v61 = vpop.f32.mrb[48].mxu1 }
0x1734   :  { %v9041_v23 = vpop.f32.mrb[49].mxu1 }
0x1735   :  { %v9042_v56 = vadd.f32 %v9041_v23, %v9040_v61  ;;  %v9043_v3 = vpop.f32.mrb[50].mxu1 }
0x1736   :  { %v9044_v55 = vpop.f32.mrb[51].mxu1 }
0x1737   :  { %v8190_v30 = vadd.f32 %v9042_v56, %v16878_v20  ;;  %v9045_v34 = vadd.f32 %v9044_v55, %v9043_v3 }
0x1738   :  { %v9152_v17 = vpop.f32.mrb[48].mxu0 }
0x1739   :  { %v9153_v18 = vpop.f32.mrb[49].mxu0  ;;  %v8193_v33 = vadd.f32 %v9045_v34, %v16878_v20 }
0x173a   :  { %v9154_v16 = vadd.f32 %v9153_v18, %v9152_v17  ;;  %v9155_v27 = vpop.f32.mrb[50].mxu0 }
0x173b   :  { %v9156_v0 = vpop.f32.mrb[51].mxu0 }
0x173c   :  { %v8351_v51 = vadd.f32 %v9154_v16, %v8190_v30  ;;  %v9157_v63 = vadd.f32 %v9156_v0, %v9155_v27  ;;  %v9046_v43 = vpop.f32.mrb[52].mxu1  ;;  %v18336_v0 = vld [vmem:[#allocation6_spill] sm:$0xff] }
0x173d   :  { %v9047_v57 = vpop.f32.mrb[53].mxu1 }
0x173e   :  { %v8405_v4 = vadd.f32 %v8351_v51, %v18330_v49  ;;  %v8354_v15 = vadd.f32 %v9157_v63, %v8193_v33  ;;  %v9048_v21 = vadd.f32 %v9047_v57, %v9046_v43  ;;  %v9049_v38 = vpop.f32.mrb[54].mxu1  ;;  %v18337_v43 = vld [vmem:[#allocation4_spill] sm:$0xff] }
0x173f   :  { %v9050_v26 = vpop.f32.mrb[55].mxu1 }
0x1740   :  { %8640 = vst [vmem:[%s17156_s13 + $0xc0] sm:$0xff] %v8405_v4  ;;  %v8406_v29 = vadd.f32 %v8354_v15, %v18331_v24  ;;  %v9158_v36 = vpop.f32.mrb[52].mxu0  ;;  %v8198_v28 = vadd.f32 %v9048_v21, %v16878_v20  ;;  %v9051_v44 = vadd.f32 %v9050_v26, %v9049_v38 }
0x1741   :  { %v9159_v58 = vpop.f32.mrb[53].mxu0 }
0x1742   :  { %8641 = vst [vmem:[%s17156_s13 + $0xc8] sm:$0xff] %v8406_v29  ;;  %v9160_v35 = vadd.f32 %v9159_v58, %v9158_v36  ;;  %v9161_v39 = vpop.f32.mrb[54].mxu0  ;;  %v8201_v60 = vadd.f32 %v9051_v44, %v16878_v20 }
0x1743   :  { %v9162_v13 = vpop.f32.mrb[55].mxu0 }
0x1744   :  { %v8359_v11 = vadd.f32 %v9160_v35, %v8198_v28  ;;  %v9163_v7 = vadd.f32 %v9162_v13, %v9161_v39  ;;  %v9052_v59 = vpop.f32.mrb[56].mxu1 }
0x1745   :  { %v9053_v42 = vpop.f32.mrb[57].mxu1 }
0x1746   :  { %v8407_v53 = vadd.f32 %v8359_v11, %v18332_v22  ;;  %v8362_v12 = vadd.f32 %v9163_v7, %v8201_v60  ;;  %v9054_v8 = vadd.f32 %v9053_v42, %v9052_v59  ;;  %v9055_v62 = vpop.f32.mrb[58].mxu1 }
0x1747   :  { %v9056_v1 = vpop.f32.mrb[59].mxu1 }
0x1748   :  { %8642 = vst [vmem:[%s17156_s13 + $0xd0] sm:$0xff] %v8407_v53  ;;  %v8408_v50 = vadd.f32 %v8362_v12, %v18333_v10  ;;  %v9164_v48 = vpop.f32.mrb[56].mxu0  ;;  %v8206_v45 = vadd.f32 %v9054_v8, %v16878_v20  ;;  %v9057_v5 = vadd.f32 %v9056_v1, %v9055_v62 }
0x1749   :  { %v9165_v40 = vpop.f32.mrb[57].mxu0 }
0x174a   :  { %8643 = vst [vmem:[%s17156_s13 + $0xd8] sm:$0xff] %v8408_v50  ;;  %v9166_v2 = vadd.f32 %v9165_v40, %v9164_v48  ;;  %v9167_v25 = vpop.f32.mrb[58].mxu0  ;;  %v8209_v52 = vadd.f32 %v9057_v5, %v16878_v20 }
0x174b   :  { %v9168_v47 = vpop.f32.mrb[59].mxu0 }
0x174c   :  { %v8367_v6 = vadd.f32 %v9166_v2, %v8206_v45  ;;  %v9169_v14 = vadd.f32 %v9168_v47, %v9167_v25 }
0x174d   :  { %v9058_v9 = vpop.f32.mrb[60].mxu1 }
0x174e   :  { %v8409_v32 = vadd.f32 %v8367_v6, %v18334_v19  ;;  %v8370_v46 = vadd.f32 %v9169_v14, %v8209_v52  ;;  %v9059_v31 = vpop.f32.mrb[61].mxu1 }
0x174f   :  { %v9060_v37 = vadd.f32 %v9059_v31, %v9058_v9  ;;  %v9061_v61 = vpop.f32.mrb[62].mxu1 }
0x1750   :  { %8644 = vst [vmem:[%s17156_s13 + $0xe0] sm:$0xff] %v8409_v32  ;;  %v8410_v41 = vadd.f32 %v8370_v46, %v18335_v54  ;;  %v9062_v56 = vpop.f32.mrb[63].mxu1 }
0x1751   :  { %v9170_v23 = vpop.f32.mrb[60].mxu0  ;;  %v8214_v3 = vadd.f32 %v9060_v37, %v16878_v20  ;;  %v9063_v17 = vadd.f32 %v9062_v56, %v9061_v61 }
0x1752   :  { %8645 = vst [vmem:[%s17156_s13 + $0xe8] sm:$0xff] %v8410_v41  ;;  %v9171_v55 = vpop.f32.mrb[61].mxu0 }
0x1753   :  { %v9172_v30 = vadd.f32 %v9171_v55, %v9170_v23  ;;  %v9173_v34 = vpop.f32.mrb[62].mxu0  ;;  %v8217_v18 = vadd.f32 %v9063_v17, %v16878_v20 }
0x1754   :  { %v9174_v16 = vpop.f32.mrb[63].mxu0 }
0x1755   :  { %v8375_v27 = vadd.f32 %v9172_v30, %v8214_v3  ;;  %v9175_v33 = vadd.f32 %v9174_v16, %v9173_v34 }
0x1757   :  { %v8411_v51 = vadd.f32 %v8375_v27, %v18336_v0  ;;  %v8378_v63 = vadd.f32 %v9175_v33, %v8217_v18 }
0x1759   :  { %8646 = vst [vmem:[%s17156_s13 + $0xf0] sm:$0xff] %v8411_v51  ;;  %v8412_v57 = vadd.f32 %v8378_v63, %v18337_v43 }
0x175b   :  { %8647 = vst [vmem:[%s17156_s13 + $0xf8] sm:$0xff] %v8412_v57 }

</bundles_post_ra>
